<compile_context>
chip_gen: v5e
topology: v5e:2x2
jax: 0.10.0
libtpu: 0.0.40
codegen_flags: <defaults>
</compile_context>

<pallas_src>
import jax
import jax.numpy as jnp
import numpy as np
from jax.experimental import pallas as pl
from jax.experimental.pallas import tpu as pltpu

EPS = 1e-5
# F.rrelu defaults: lower=1/8, upper=1/3, training=False -> deterministic slope.
RRELU_SLOPE = (1.0 / 8.0 + 1.0 / 3.0) / 2.0
LANE = 128
VMEM_LIMIT = 32 * 1024 * 1024   # explicit scoped-VMEM budget, safe on v5e/v6e/v7x


def _round_up(v, m):
    return (v + m - 1) // m * m


def _cparams():
    return pltpu.CompilerParams(dimension_semantics=("parallel",),
                                vmem_limit_bytes=VMEM_LIMIT)


# ------------------------------ in-kernel helpers ------------------------------
def _avg_pool_2x2(v):
    """(H, W, C) f32 value -> (H//2, W//2, C).

    Full-width loads + pairwise adds; no strided Ref reads (strided pl.ds both
    breaks the interpreter's state discharge and costs masked vlds on v5e).
    """
    H, W, C = v.shape
    v = v.reshape(H // 2, 2, W, C)        # leading-dim split: free
    v = v[:, 0] + v[:, 1]
    v = v.reshape(H // 2, W // 2, 2, C)   # sublane split
    return (v[:, :, 0, :] + v[:, :, 1, :]) * 0.25


def _conv3x3_taps(pad_ref, w_ref, Ho, Wo, C, Cout):
    """'SAME' 3x3 conv as 9 shifted-tap MXU matmuls accumulated in f32.

    pad_ref: (Ho+2, Wo+2, C) bf16 zero-halo padded activations (VMEM scratch)
    w_ref  : (9*C, Cout)     bf16 packed weights, row = (3*dy+dx)*C + cin
    Returns (Ho*Wo, Cout) f32.  No im2col buffer is materialized.
    """
    acc = None
    for dy in range(3):
        for dx in range(3):
            k = dy * 3 + dx
            # (Ho, Wo, C) -> (Ho*Wo, C): free view when Wo % 8 == 0.
            tap = pad_ref[dy:dy + Ho, dx:dx + Wo, :].reshape(Ho * Wo, C)
            part = jnp.dot(tap, w_ref[k * C:(k + 1) * C, :],
                           preferred_element_type=jnp.float32)
            acc = part if acc is None else acc + part
    return acc


# -------------- fused conv1 + (AvgPool + conv3 skip) + BN1 stats --------------
def _conv1_conv3_kernel(x_ref, w1_ref, w3_ref, b3_ref,
                        c1_ref, s1_ref, q1_ref, skip_ref,
                        xpad_ref, ppad_ref):
    """One batch element per grid step; both branches share one HBM read of x.

    x_ref    : (1, H, W, C)     bf16 activations, C padded to 128
    w1_ref   : (9*C, C1)        bf16 packed conv1 weights
    w3_ref   : (9*C, C3)        bf16 packed conv3 weights
    b3_ref   : (1, C3)          f32 conv3 bias (kept: no BN on the skip branch)
    c1_ref   : (1, H, W, C1)    bf16 conv1 output
    s1_ref   : (1, 1, C1)       f32 per-batch-element channel sum     (BN1)
    q1_ref   : (1, 1, C1)       f32 per-batch-element channel sum-sq  (BN1)
    skip_ref : (1, H/2, W/2, C3) f32 skip-branch output
    xpad_ref : (H+2, W+2, C)    bf16 zero-halo scratch for conv1 taps
    ppad_ref : (H/2+2, W/2+2, C) bf16 zero-halo scratch for conv3 taps
    """
    H, W, C = x_ref.shape[1], x_ref.shape[2], x_ref.shape[3]
    Hp, Wp, C3 = skip_ref.shape[1], skip_ref.shape[2], skip_ref.shape[3]
    C1 = c1_ref.shape[3]

    x = x_ref[0]                                            # (H, W, C) bf16

    # ---- conv1 ('SAME', stride 1) + fused BN1 batch-stat partials ----
    # conv1 bias is dropped: a per-channel constant before a train-mode
    # BatchNorm cancels exactly (it shifts the batch mean by the same amount).
    xpad_ref[...] = jnp.zeros(xpad_ref.shape, xpad_ref.dtype)
    xpad_ref[1:H + 1, 1:W + 1, :] = x
    y1 = _conv3x3_taps(xpad_ref, w1_ref, H, W, C, C1)       # (H*W, C1) f32
    c1_ref[0] = y1.reshape(H, W, C1).astype(c1_ref.dtype)   # bf16 writeback
    s1_ref[0] = jnp.sum(y1, axis=0, keepdims=True)
    q1_ref[0] = jnp.sum(y1 * y1, axis=0, keepdims=True)

    # ---- skip branch: AvgPool2d(2,2) folded into conv3's input stage ----
    xpool = _avg_pool_2x2(x.astype(jnp.float32))            # (Hp, Wp, C) f32
    ppad_ref[...] = jnp.zeros(ppad_ref.shape, ppad_ref.dtype)
    ppad_ref[1:Hp + 1, 1:Wp + 1, :] = xpool.astype(ppad_ref.dtype)
    y3 = _conv3x3_taps(ppad_ref, w3_ref, Hp, Wp, C, C3) + b3_ref[...]
    skip_ref[0] = y3.reshape(Hp, Wp, C3).astype(skip_ref.dtype)


def conv1_conv3(x, w1, w3, b3):
    N, H, W, C = x.shape
    Hp, Wp = H // 2, W // 2
    C1, C3 = w1.shape[1], w3.shape[1]
    return pl.pallas_call(
        _conv1_conv3_kernel,
        out_shape=(jax.ShapeDtypeStruct((N, H, W, C1), jnp.bfloat16),
                   jax.ShapeDtypeStruct((N, 1, C1), jnp.float32),
                   jax.ShapeDtypeStruct((N, 1, C1), jnp.float32),
                   jax.ShapeDtypeStruct((N, Hp, Wp, C3), jnp.float32)),
        grid=(N,),
        in_specs=[
            pl.BlockSpec((1, H, W, C), lambda n: (n, 0, 0, 0)),
            pl.BlockSpec((9 * C, C1), lambda n: (0, 0)),
            pl.BlockSpec((9 * C, C3), lambda n: (0, 0)),
            pl.BlockSpec((1, C3), lambda n: (0, 0)),
        ],
        out_specs=(pl.BlockSpec((1, H, W, C1), lambda n: (n, 0, 0, 0)),
                   pl.BlockSpec((1, 1, C1), lambda n: (n, 0, 0)),
                   pl.BlockSpec((1, 1, C1), lambda n: (n, 0, 0)),
                   pl.BlockSpec((1, Hp, Wp, C3), lambda n: (n, 0, 0, 0))),
        scratch_shapes=[pltpu.VMEM((H + 2, W + 2, C), jnp.bfloat16),
                        pltpu.VMEM((Hp + 2, Wp + 2, C), jnp.bfloat16)],
        compiler_params=_cparams(),
    )(x, w1, w3, b3)


# ------------------------- conv2 (+ fused BN2 stats) --------------------------
def _conv2_kernel(h_ref, w2_ref, c2_ref, s2_ref, q2_ref, hpad_ref):
    Hp, Wp, C1 = h_ref.shape[1], h_ref.shape[2], h_ref.shape[3]
    C2 = c2_ref.shape[3]
    # conv2 bias dropped: cancelled exactly by the following train-mode BN2.
    hpad_ref[...] = jnp.zeros(hpad_ref.shape, hpad_ref.dtype)
    hpad_ref[1:Hp + 1, 1:Wp + 1, :] = h_ref[0]
    y = _conv3x3_taps(hpad_ref, w2_ref, Hp, Wp, C1, C2)     # (Hp*Wp, C2) f32
    c2_ref[0] = y.reshape(Hp, Wp, C2).astype(c2_ref.dtype)
    s2_ref[0] = jnp.sum(y, axis=0, keepdims=True)
    q2_ref[0] = jnp.sum(y * y, axis=0, keepdims=True)


def conv2_stats(h, w2):
    N, Hp, Wp, C1 = h.shape
    C2 = w2.shape[1]
    return pl.pallas_call(
        _conv2_kernel,
        out_shape=(jax.ShapeDtypeStruct((N, Hp, Wp, C2), jnp.float32),
                   jax.ShapeDtypeStruct((N, 1, C2), jnp.float32),
                   jax.ShapeDtypeStruct((N, 1, C2), jnp.float32)),
        grid=(N,),
        in_specs=[
            pl.BlockSpec((1, Hp, Wp, C1), lambda n: (n, 0, 0, 0)),
            pl.BlockSpec((9 * C1, C2), lambda n: (0, 0)),
        ],
        out_specs=(pl.BlockSpec((1, Hp, Wp, C2), lambda n: (n, 0, 0, 0)),
                   pl.BlockSpec((1, 1, C2), lambda n: (n, 0, 0)),
                   pl.BlockSpec((1, 1, C2), lambda n: (n, 0, 0))),
        scratch_shapes=[pltpu.VMEM((Hp + 2, Wp + 2, C1), jnp.bfloat16)],
        compiler_params=_cparams(),
    )(h, w2)


# ------------------- fused BN-apply + rrelu + 2x2 avg-pool --------------------
def _bn_pool_act_kernel(x_ref, scale_ref, shift_ref, o_ref):
    # x_ref: (1, H, W, C) bf16 conv1 output; o_ref: (1, H//2, W//2, C) bf16.
    s = scale_ref[...].reshape(1, 1, -1)
    t = shift_ref[...].reshape(1, 1, -1)
    y = x_ref[0].astype(jnp.float32) * s + t
    y = jnp.where(y >= 0, y, RRELU_SLOPE * y)
    o_ref[0] = _avg_pool_2x2(y).astype(o_ref.dtype)


def bn_pool_act(x, scale, shift):
    N, H, W, C = x.shape
    Hp, Wp = H // 2, W // 2
    return pl.pallas_call(
        _bn_pool_act_kernel,
        out_shape=jax.ShapeDtypeStruct((N, Hp, Wp, C), jnp.bfloat16),
        grid=(N,),
        in_specs=[
            pl.BlockSpec((1, H, W, C), lambda n: (n, 0, 0, 0)),
            pl.BlockSpec((1, C), lambda n: (0, 0)),
            pl.BlockSpec((1, C), lambda n: (0, 0)),
        ],
        out_specs=pl.BlockSpec((1, Hp, Wp, C), lambda n: (n, 0, 0, 0)),
        compiler_params=_cparams(),
    )(x, scale, shift)


# -------------------- fused BN-apply + skip-add + rrelu -----------------------
def _bn_add_act_kernel(x_ref, skip_ref, scale_ref, shift_ref, o_ref):
    s = scale_ref[...].reshape(1, 1, -1)
    t = shift_ref[...].reshape(1, 1, -1)
    y = x_ref[0] * s + t + skip_ref[0]
    o_ref[0] = jnp.where(y >= 0, y, RRELU_SLOPE * y)


def bn_add_act(x, skip, scale, shift):
    N, H, W, C = x.shape
    return pl.pallas_call(
        _bn_add_act_kernel,
        out_shape=jax.ShapeDtypeStruct((N, H, W, C), jnp.float32),
        grid=(N,),
        in_specs=[
            pl.BlockSpec((1, H, W, C), lambda n: (n, 0, 0, 0)),
            pl.BlockSpec((1, H, W, C), lambda n: (n, 0, 0, 0)),
            pl.BlockSpec((1, C), lambda n: (0, 0)),
            pl.BlockSpec((1, C), lambda n: (0, 0)),
        ],
        out_specs=pl.BlockSpec((1, H, W, C), lambda n: (n, 0, 0, 0)),
        input_output_aliases={1: 0},  # write the result in place over `skip`
        compiler_params=_cparams(),
    )(x, skip, scale, shift)


# ------------------------------ host-side glue --------------------------------
def _pad_channels(x):
    c = x.shape[-1]
    cp = _round_up(c, LANE)
    if cp == c:
        return x
    return jnp.pad(x, ((0, 0), (0, 0), (0, 0), (0, cp - c)))


def _pad_lanes(a):
    c = a.shape[-1]
    cp = _round_up(c, LANE)
    a = a.astype(jnp.float32)
    if cp == c:
        return a
    return jnp.pad(a, ((0, 0), (0, cp - c)))


def _pack_conv(w, b):
    """(3,3,Cin,Cout) HWIO f32 -> ((9*Cin_p, Cout_p) bf16, (1, Cout_p) f32)."""
    kh, kw, cin, cout = w.shape
    cin_p, cout_p = _round_up(cin, LANE), _round_up(cout, LANE)
    w_p = jnp.pad(w.astype(jnp.float32),
                  ((0, 0), (0, 0), (0, cin_p - cin), (0, cout_p - cout)))
    w_packed = w_p.reshape(kh * kw * cin_p, cout_p).astype(jnp.bfloat16)
    b_p = jnp.pad(b.astype(jnp.float32), ((0, 0), (0, cout_p - cout)))
    return w_packed, b_p


def _bn_scale_shift(sums, sqs, count, gamma, beta):
    # sums/sqs: (N, 1, Cp) per-batch-element partials emitted by the conv kernels.
    s = jnp.sum(sums, axis=0)   # (1, Cp)
    q = jnp.sum(sqs, axis=0)    # (1, Cp)
    mean = s / count
    var = jnp.maximum(q / count - mean * mean, 0.0)
    scale = gamma / jnp.sqrt(var + EPS)
    shift = beta - mean * scale
    return scale, shift


def init_params(key, channel_in, channel_out):
    c_half = channel_out // 2
    ks = jax.random.split(key, 6)

    def w(k, cin, cout):
        return jax.random.normal(k, (3, 3, cin, cout), jnp.float32) * 0.1

    def b(k, cout):
        return jax.random.normal(k, (1, cout), jnp.float32) * 0.05

    return dict(
        w1=w(ks[0], channel_in, c_half), b1=b(ks[1], c_half),
        w2=w(ks[2], c_half, channel_out), b2=b(ks[3], channel_out),
        w3=w(ks[4], channel_in, channel_out), b3=b(ks[5], channel_out),
        g1=jnp.ones((1, c_half), jnp.float32),
        bt1=jnp.zeros((1, c_half), jnp.float32),
        g2=jnp.ones((1, channel_out), jnp.float32),
        bt2=jnp.zeros((1, channel_out), jnp.float32),
    )


def res_down_forward(x_nchw, p, scale=2):
    """ResDown forward.  NCHW in/out; NHWC (channels padded to 128 lanes) inside."""
    assert scale == 2  # TODO(synk): kernels implement the default 2x2 AvgPool only.
    x = jnp.transpose(x_nchw, (0, 2, 3, 1)).astype(jnp.float32)
    N, H, W, _ = x.shape
    assert H % 2 == 0 and W % 2 == 0
    cout = p["w2"].shape[-1]

    # bf16 activations: matmul operands anyway, halves HBM traffic on the
    # largest tensors.  Keep W and W//2 multiples of 8 for free reshapes.
    xp = _pad_channels(x).astype(jnp.bfloat16)              # (N, H, W, 128)
    w1, _ = _pack_conv(p["w1"], p["b1"])   # conv1 bias dropped (cancelled by BN1)
    w2, _ = _pack_conv(p["w2"], p["b2"])   # conv2 bias dropped (cancelled by BN2)
    w3, b3 = _pack_conv(p["w3"], p["b3"])  # conv3 bias kept (no BN on skip)
    g1, t1 = _pad_lanes(p["g1"]), _pad_lanes(p["bt1"])
    g2, t2 = _pad_lanes(p["g2"]), _pad_lanes(p["bt2"])

    # fused: conv1 (+ BN1 batch stats) and skip branch (AvgPool folded + conv3);
    # one HBM read of xp serves both.
    c1, s1, q1, skip = conv1_conv3(xp, w1, w3, b3)
    sc1, sh1 = _bn_scale_shift(s1, q1, float(N * H * W), g1, t1)

    # fused BN1-apply + rrelu + 2x2 avg-pool; bf16 output feeds conv2
    h = bn_pool_act(c1, sc1, sh1)                            # (N, H/2, W/2, 128)

    # conv2 (+ fused BN2 batch stats)
    c2, s2, q2 = conv2_stats(h, w2)
    sc2, sh2 = _bn_scale_shift(s2, q2, float(N * (H // 2) * (W // 2)), g2, t2)

    # fused BN2-apply + skip-add + rrelu (in place over `skip`)
    out = bn_add_act(c2, skip, sc2, sh2)                     # (N, H/2, W/2, 128)
    out = out[..., :cout]
    return jnp.transpose(out, (0, 3, 1, 2))


# ---------------------------- pure-JAX reference ------------------------------
def ref_forward(x_nchw, p, scale=2):
    """Reference; mirrors the kernels' bf16 MXU-operand rounding (f32 accumulate)."""
    f32 = jnp.float32
    x = jnp.transpose(x_nchw, (0, 2, 3, 1)).astype(f32)

    def q(v):  # bf16 operand rounding, carried in f32
        return v.astype(jnp.bfloat16).astype(f32)

    def conv(v, w, b):
        y = jax.lax.conv_general_dilated(
            q(v), q(w), (1, 1), "SAME",
            dimension_numbers=("NHWC", "HWIO", "NHWC"))
        return y + b.reshape(1, 1, 1, -1)

    def bn(v, g, bt):
        m = v.mean(axis=(0, 1, 2))
        va = v.var(axis=(0, 1, 2))
        return (v - m) / jnp.sqrt(va + EPS) * g.reshape(-1) + bt.reshape(-1)

    def act(v):
        return jnp.where(v >= 0, v, RRELU_SLOPE * v)

    def pool(v):
        n, hh, ww, c = v.shape
        return v.reshape(n, hh // 2, 2, ww // 2, 2, c).mean(axis=(2, 4))

    skip = conv(pool(x), p["w3"], p["b3"])
    h = act(bn(conv(x, p["w1"], p["b1"]), p["g1"], p["bt1"]))
    h = pool(h)
    h = bn(conv(h, p["w2"], p["b2"]), p["g2"], p["bt2"])
    return jnp.transpose(act(h + skip), (0, 3, 1, 2))


if __name__ == "__main__":
    key = jax.random.PRNGKey(0)
    kx, kp = jax.random.split(key)

    N, Cin, H, W = 2, 4, 16, 16
    Cout = 8  # channel_out (channel_out // 2 == 4), scale = 2

    x = jax.random.normal(kx, (N, Cin, H, W), jnp.float32)
    params = init_params(kp, Cin, Cout)

    out = jax.jit(res_down_forward)(x, params)
    out = jax.block_until_ready(out)

    assert out.shape == (N, Cout, H // 2, W // 2), out.shape

    ref = ref_forward(x, params)
    # bf16 matmul operands + bf16-carried intermediate activations (the reference
    # only rounds matmul operands) -> compare at a correspondingly loose precision.
    np.testing.assert_allclose(np.asarray(out), np.asarray(ref),
                               rtol=1e-2, atol=1e-2)
    print("KERNEL_OK")
</pallas_src>

<mosaic_0001>
module attributes {stable_mosaic.version = 11 : i64} {
  func.func @_conv1_conv3_kernel(%arg0: i32, %arg1: memref<1x16x16x128xbf16, #tpu.memory_space<vmem>>, %arg2: memref<1152x128xbf16, #tpu.memory_space<vmem>>, %arg3: memref<1152x128xbf16, #tpu.memory_space<vmem>>, %arg4: memref<1x128xf32, #tpu.memory_space<vmem>>, %arg5: memref<1x16x16x128xbf16, #tpu.memory_space<vmem>>, %arg6: memref<1x1x128xf32, #tpu.memory_space<vmem>>, %arg7: memref<1x1x128xf32, #tpu.memory_space<vmem>>, %arg8: memref<1x8x8x128xf32, #tpu.memory_space<vmem>>, %arg9: memref<18x18x128xbf16, #tpu.memory_space<vmem>>, %arg10: memref<10x10x128xbf16, #tpu.memory_space<vmem>>) attributes {dimension_semantics = [#tpu.dimension_semantics<parallel>], iteration_bounds = array<i64: 2>, scalar_prefetch = 0 : i64, scratch_operands = 2 : i64, tpu.core_type = #tpu.core_type<tc>, window_params = [{transform_indices = @transform_0, window_bounds = array<i64: 1, 16, 16, 128>}, {pipeline_mode = #tpu.pipeline_mode<synchronous>, transform_indices = @transform_1, window_bounds = array<i64: 1152, 128>}, {pipeline_mode = #tpu.pipeline_mode<synchronous>, transform_indices = @transform_2, window_bounds = array<i64: 1152, 128>}, {pipeline_mode = #tpu.pipeline_mode<synchronous>, transform_indices = @transform_3, window_bounds = array<i64: 1, 128>}, {transform_indices = @transform_4, window_bounds = array<i64: 1, 16, 16, 128>}, {transform_indices = @transform_5, window_bounds = array<i64: 1, 1, 128>}, {transform_indices = @transform_6, window_bounds = array<i64: 1, 1, 128>}, {transform_indices = @transform_7, window_bounds = array<i64: 1, 8, 8, 128>}]} {
    %c0 = arith.constant 0 : index
    %c0_0 = arith.constant 0 : index
    %c0_1 = arith.constant 0 : index
    %c0_2 = arith.constant 0 : index
    %0 = vector.load %arg1[%c0, %c0_0, %c0_1, %c0_2] : memref<1x16x16x128xbf16, #tpu.memory_space<vmem>>, vector<1x16x16x128xbf16>
    %1 = vector.shape_cast %0 : vector<1x16x16x128xbf16> to vector<16x16x128xbf16>
    %cst = arith.constant 0.000000e+00 : bf16
    %2 = vector.broadcast %cst : bf16 to vector<18x18x128xbf16>
    %c0_3 = arith.constant 0 : index
    %c0_4 = arith.constant 0 : index
    %c0_5 = arith.constant 0 : index
    %3 = vector.load %arg9[%c0_3, %c0_4, %c0_5] : memref<18x18x128xbf16, #tpu.memory_space<vmem>>, vector<18x18x128xbf16>
    tpu.vector_store %arg9[%c0_3, %c0_4, %c0_5], %2 {strides = array<i32>} : memref<18x18x128xbf16, #tpu.memory_space<vmem>>, vector<18x18x128xbf16>,
    %c1 = arith.constant 1 : index
    %c1_6 = arith.constant 1 : index
    %c0_7 = arith.constant 0 : index
    %4 = vector.load %arg9[%c1, %c1_6, %c0_7] : memref<18x18x128xbf16, #tpu.memory_space<vmem>>, vector<16x16x128xbf16>
    tpu.vector_store %arg9[%c1, %c1_6, %c0_7], %1 {strides = array<i32>} : memref<18x18x128xbf16, #tpu.memory_space<vmem>>, vector<16x16x128xbf16>,
    %c0_8 = arith.constant 0 : index
    %c0_9 = arith.constant 0 : index
    %c0_10 = arith.constant 0 : index
    %5 = vector.load %arg9[%c0_8, %c0_9, %c0_10] : memref<18x18x128xbf16, #tpu.memory_space<vmem>>, vector<16x16x128xbf16>
    %6 = vector.shape_cast %5 : vector<16x16x128xbf16> to vector<256x128xbf16>
    %c0_11 = arith.constant 0 : index
    %c0_12 = arith.constant 0 : index
    %7 = vector.load %arg2[%c0_11, %c0_12] : memref<1152x128xbf16, #tpu.memory_space<vmem>>, vector<128x128xbf16>
    %cst_13 = arith.constant dense<0.000000e+00> : vector<256x128xf32>
    %8 = tpu.matmul %6, %7, %cst_13 {dimension_numbers = #tpu.dot_dimension_numbers<[1], [0], [0], [1], [0, 0, 1, 1], [], []>} : vector<256x128xbf16>, vector<128x128xbf16>, vector<256x128xf32> -> vector<256x128xf32>
    %c0_14 = arith.constant 0 : index
    %c1_15 = arith.constant 1 : index
    %c0_16 = arith.constant 0 : index
    %9 = vector.load %arg9[%c0_14, %c1_15, %c0_16] : memref<18x18x128xbf16, #tpu.memory_space<vmem>>, vector<16x16x128xbf16>
    %10 = vector.shape_cast %9 : vector<16x16x128xbf16> to vector<256x128xbf16>
    %c128 = arith.constant 128 : index
    %c0_17 = arith.constant 0 : index
    %11 = vector.load %arg2[%c128, %c0_17] : memref<1152x128xbf16, #tpu.memory_space<vmem>>, vector<128x128xbf16>
    %cst_18 = arith.constant dense<0.000000e+00> : vector<256x128xf32>
    %12 = tpu.matmul %10, %11, %cst_18 {dimension_numbers = #tpu.dot_dimension_numbers<[1], [0], [0], [1], [0, 0, 1, 1], [], []>} : vector<256x128xbf16>, vector<128x128xbf16>, vector<256x128xf32> -> vector<256x128xf32>
    %13 = arith.addf %8, %12 : vector<256x128xf32>
    %c0_19 = arith.constant 0 : index
    %c2 = arith.constant 2 : index
    %c0_20 = arith.constant 0 : index
    %14 = vector.load %arg9[%c0_19, %c2, %c0_20] : memref<18x18x128xbf16, #tpu.memory_space<vmem>>, vector<16x16x128xbf16>
    %15 = vector.shape_cast %14 : vector<16x16x128xbf16> to vector<256x128xbf16>
    %c256 = arith.constant 256 : index
    %c0_21 = arith.constant 0 : index
    %16 = vector.load %arg2[%c256, %c0_21] : memref<1152x128xbf16, #tpu.memory_space<vmem>>, vector<128x128xbf16>
    %cst_22 = arith.constant dense<0.000000e+00> : vector<256x128xf32>
    %17 = tpu.matmul %15, %16, %cst_22 {dimension_numbers = #tpu.dot_dimension_numbers<[1], [0], [0], [1], [0, 0, 1, 1], [], []>} : vector<256x128xbf16>, vector<128x128xbf16>, vector<256x128xf32> -> vector<256x128xf32>
    %18 = arith.addf %13, %17 : vector<256x128xf32>
    %c1_23 = arith.constant 1 : index
    %c0_24 = arith.constant 0 : index
    %c0_25 = arith.constant 0 : index
    %19 = vector.load %arg9[%c1_23, %c0_24, %c0_25] : memref<18x18x128xbf16, #tpu.memory_space<vmem>>, vector<16x16x128xbf16>
    %20 = vector.shape_cast %19 : vector<16x16x128xbf16> to vector<256x128xbf16>
    %c384 = arith.constant 384 : index
    %c0_26 = arith.constant 0 : index
    %21 = vector.load %arg2[%c384, %c0_26] : memref<1152x128xbf16, #tpu.memory_space<vmem>>, vector<128x128xbf16>
    %cst_27 = arith.constant dense<0.000000e+00> : vector<256x128xf32>
    %22 = tpu.matmul %20, %21, %cst_27 {dimension_numbers = #tpu.dot_dimension_numbers<[1], [0], [0], [1], [0, 0, 1, 1], [], []>} : vector<256x128xbf16>, vector<128x128xbf16>, vector<256x128xf32> -> vector<256x128xf32>
    %23 = arith.addf %18, %22 : vector<256x128xf32>
    %c1_28 = arith.constant 1 : index
    %c1_29 = arith.constant 1 : index
    %c0_30 = arith.constant 0 : index
    %24 = vector.load %arg9[%c1_28, %c1_29, %c0_30] : memref<18x18x128xbf16, #tpu.memory_space<vmem>>, vector<16x16x128xbf16>
    %25 = vector.shape_cast %24 : vector<16x16x128xbf16> to vector<256x128xbf16>
    %c512 = arith.constant 512 : index
    %c0_31 = arith.constant 0 : index
    %26 = vector.load %arg2[%c512, %c0_31] : memref<1152x128xbf16, #tpu.memory_space<vmem>>, vector<128x128xbf16>
    %cst_32 = arith.constant dense<0.000000e+00> : vector<256x128xf32>
    %27 = tpu.matmul %25, %26, %cst_32 {dimension_numbers = #tpu.dot_dimension_numbers<[1], [0], [0], [1], [0, 0, 1, 1], [], []>} : vector<256x128xbf16>, vector<128x128xbf16>, vector<256x128xf32> -> vector<256x128xf32>
    %28 = arith.addf %23, %27 : vector<256x128xf32>
    %c1_33 = arith.constant 1 : index
    %c2_34 = arith.constant 2 : index
    %c0_35 = arith.constant 0 : index
    %29 = vector.load %arg9[%c1_33, %c2_34, %c0_35] : memref<18x18x128xbf16, #tpu.memory_space<vmem>>, vector<16x16x128xbf16>
    %30 = vector.shape_cast %29 : vector<16x16x128xbf16> to vector<256x128xbf16>
    %c640 = arith.constant 640 : index
    %c0_36 = arith.constant 0 : index
    %31 = vector.load %arg2[%c640, %c0_36] : memref<1152x128xbf16, #tpu.memory_space<vmem>>, vector<128x128xbf16>
    %cst_37 = arith.constant dense<0.000000e+00> : vector<256x128xf32>
    %32 = tpu.matmul %30, %31, %cst_37 {dimension_numbers = #tpu.dot_dimension_numbers<[1], [0], [0], [1], [0, 0, 1, 1], [], []>} : vector<256x128xbf16>, vector<128x128xbf16>, vector<256x128xf32> -> vector<256x128xf32>
    %33 = arith.addf %28, %32 : vector<256x128xf32>
    %c2_38 = arith.constant 2 : index
    %c0_39 = arith.constant 0 : index
    %c0_40 = arith.constant 0 : index
    %34 = vector.load %arg9[%c2_38, %c0_39, %c0_40] : memref<18x18x128xbf16, #tpu.memory_space<vmem>>, vector<16x16x128xbf16>
    %35 = vector.shape_cast %34 : vector<16x16x128xbf16> to vector<256x128xbf16>
    %c768 = arith.constant 768 : index
    %c0_41 = arith.constant 0 : index
    %36 = vector.load %arg2[%c768, %c0_41] : memref<1152x128xbf16, #tpu.memory_space<vmem>>, vector<128x128xbf16>
    %cst_42 = arith.constant dense<0.000000e+00> : vector<256x128xf32>
    %37 = tpu.matmul %35, %36, %cst_42 {dimension_numbers = #tpu.dot_dimension_numbers<[1], [0], [0], [1], [0, 0, 1, 1], [], []>} : vector<256x128xbf16>, vector<128x128xbf16>, vector<256x128xf32> -> vector<256x128xf32>
    %38 = arith.addf %33, %37 : vector<256x128xf32>
    %c2_43 = arith.constant 2 : index
    %c1_44 = arith.constant 1 : index
    %c0_45 = arith.constant 0 : index
    %39 = vector.load %arg9[%c2_43, %c1_44, %c0_45] : memref<18x18x128xbf16, #tpu.memory_space<vmem>>, vector<16x16x128xbf16>
    %40 = vector.shape_cast %39 : vector<16x16x128xbf16> to vector<256x128xbf16>
    %c896 = arith.constant 896 : index
    %c0_46 = arith.constant 0 : index
    %41 = vector.load %arg2[%c896, %c0_46] : memref<1152x128xbf16, #tpu.memory_space<vmem>>, vector<128x128xbf16>
    %cst_47 = arith.constant dense<0.000000e+00> : vector<256x128xf32>
    %42 = tpu.matmul %40, %41, %cst_47 {dimension_numbers = #tpu.dot_dimension_numbers<[1], [0], [0], [1], [0, 0, 1, 1], [], []>} : vector<256x128xbf16>, vector<128x128xbf16>, vector<256x128xf32> -> vector<256x128xf32>
    %43 = arith.addf %38, %42 : vector<256x128xf32>
    %c2_48 = arith.constant 2 : index
    %c2_49 = arith.constant 2 : index
    %c0_50 = arith.constant 0 : index
    %44 = vector.load %arg9[%c2_48, %c2_49, %c0_50] : memref<18x18x128xbf16, #tpu.memory_space<vmem>>, vector<16x16x128xbf16>
    %45 = vector.shape_cast %44 : vector<16x16x128xbf16> to vector<256x128xbf16>
    %c1024 = arith.constant 1024 : index
    %c0_51 = arith.constant 0 : index
    %46 = vector.load %arg2[%c1024, %c0_51] : memref<1152x128xbf16, #tpu.memory_space<vmem>>, vector<128x128xbf16>
    %cst_52 = arith.constant dense<0.000000e+00> : vector<256x128xf32>
    %47 = tpu.matmul %45, %46, %cst_52 {dimension_numbers = #tpu.dot_dimension_numbers<[1], [0], [0], [1], [0, 0, 1, 1], [], []>} : vector<256x128xbf16>, vector<128x128xbf16>, vector<256x128xf32> -> vector<256x128xf32>
    %48 = arith.addf %43, %47 : vector<256x128xf32>
    %49 = vector.shape_cast %48 : vector<256x128xf32> to vector<16x16x128xf32>
    %50 = arith.truncf %49 : vector<16x16x128xf32> to vector<16x16x128xbf16>
    %c0_53 = arith.constant 0 : index
    %c0_54 = arith.constant 0 : index
    %c0_55 = arith.constant 0 : index
    %c0_56 = arith.constant 0 : index
    %51 = vector.load %arg5[%c0_53, %c0_54, %c0_55, %c0_56] : memref<1x16x16x128xbf16, #tpu.memory_space<vmem>>, vector<1x16x16x128xbf16>
    %52 = vector.shape_cast %51 : vector<1x16x16x128xbf16> to vector<16x16x128xbf16>
    %53 = vector.shape_cast %50 : vector<16x16x128xbf16> to vector<1x16x16x128xbf16>
    tpu.vector_store %arg5[%c0_53, %c0_54, %c0_55, %c0_56], %53 {strides = array<i32>} : memref<1x16x16x128xbf16, #tpu.memory_space<vmem>>, vector<1x16x16x128xbf16>,
    %cst_57 = arith.constant dense<0.000000e+00> : vector<128xf32>
    %54 = vector.multi_reduction <add>, %48, %cst_57 [0] : vector<256x128xf32> to vector<128xf32>
    %55 = vector.shape_cast %54 : vector<128xf32> to vector<1x128xf32>
    %c0_58 = arith.constant 0 : index
    %c0_59 = arith.constant 0 : index
    %c0_60 = arith.constant 0 : index
    %56 = vector.load %arg6[%c0_58, %c0_59, %c0_60] : memref<1x1x128xf32, #tpu.memory_space<vmem>>, vector<1x1x128xf32>
    %57 = vector.shape_cast %56 : vector<1x1x128xf32> to vector<1x128xf32>
    %58 = vector.shape_cast %55 : vector<1x128xf32> to vector<1x1x128xf32>
    tpu.vector_store %arg6[%c0_58, %c0_59, %c0_60], %58 {strides = array<i32>} : memref<1x1x128xf32, #tpu.memory_space<vmem>>, vector<1x1x128xf32>,
    %59 = arith.mulf %48, %48 : vector<256x128xf32>
    %cst_61 = arith.constant dense<0.000000e+00> : vector<128xf32>
    %60 = vector.multi_reduction <add>, %59, %cst_61 [0] : vector<256x128xf32> to vector<128xf32>
    %61 = vector.shape_cast %60 : vector<128xf32> to vector<1x128xf32>
    %c0_62 = arith.constant 0 : index
    %c0_63 = arith.constant 0 : index
    %c0_64 = arith.constant 0 : index
    %62 = vector.load %arg7[%c0_62, %c0_63, %c0_64] : memref<1x1x128xf32, #tpu.memory_space<vmem>>, vector<1x1x128xf32>
    %63 = vector.shape_cast %62 : vector<1x1x128xf32> to vector<1x128xf32>
    %64 = vector.shape_cast %61 : vector<1x128xf32> to vector<1x1x128xf32>
    tpu.vector_store %arg7[%c0_62, %c0_63, %c0_64], %64 {strides = array<i32>} : memref<1x1x128xf32, #tpu.memory_space<vmem>>, vector<1x1x128xf32>,
    %65 = arith.extf %1 : vector<16x16x128xbf16> to vector<16x16x128xf32>
    %66 = vector.shape_cast %65 : vector<16x16x128xf32> to vector<8x2x16x128xf32>
    %67 = vector.extract_strided_slice %66 {offsets = [0, 0, 0, 0], sizes = [8, 1, 16, 128], strides = [1, 1, 1, 1]} : vector<8x2x16x128xf32> to vector<8x1x16x128xf32>
    %68 = vector.shape_cast %67 : vector<8x1x16x128xf32> to vector<8x16x128xf32>
    %69 = vector.extract_strided_slice %66 {offsets = [0, 1, 0, 0], sizes = [8, 1, 16, 128], strides = [1, 1, 1, 1]} : vector<8x2x16x128xf32> to vector<8x1x16x128xf32>
    %70 = vector.shape_cast %69 : vector<8x1x16x128xf32> to vector<8x16x128xf32>
    %71 = arith.addf %68, %70 : vector<8x16x128xf32>
    %72 = vector.shape_cast %71 : vector<8x16x128xf32> to vector<8x8x2x128xf32>
    %73 = vector.extract_strided_slice %72 {offsets = [0, 0, 0, 0], sizes = [8, 8, 1, 128], strides = [1, 1, 1, 1]} : vector<8x8x2x128xf32> to vector<8x8x1x128xf32>
    %74 = vector.shape_cast %73 : vector<8x8x1x128xf32> to vector<8x8x128xf32>
    %75 = vector.extract_strided_slice %72 {offsets = [0, 0, 1, 0], sizes = [8, 8, 1, 128], strides = [1, 1, 1, 1]} : vector<8x8x2x128xf32> to vector<8x8x1x128xf32>
    %76 = vector.shape_cast %75 : vector<8x8x1x128xf32> to vector<8x8x128xf32>
    %77 = arith.addf %74, %76 : vector<8x8x128xf32>
    %cst_65 = arith.constant 2.500000e-01 : f32
    %78 = vector.broadcast %cst_65 : f32 to vector<8x8x128xf32>
    %79 = arith.mulf %77, %78 : vector<8x8x128xf32>
    %cst_66 = arith.constant 0.000000e+00 : bf16
    %80 = vector.broadcast %cst_66 : bf16 to vector<10x10x128xbf16>
    %c0_67 = arith.constant 0 : index
    %c0_68 = arith.constant 0 : index
    %c0_69 = arith.constant 0 : index
    %81 = vector.load %arg10[%c0_67, %c0_68, %c0_69] : memref<10x10x128xbf16, #tpu.memory_space<vmem>>, vector<10x10x128xbf16>
    tpu.vector_store %arg10[%c0_67, %c0_68, %c0_69], %80 {strides = array<i32>} : memref<10x10x128xbf16, #tpu.memory_space<vmem>>, vector<10x10x128xbf16>,
    %82 = arith.truncf %79 : vector<8x8x128xf32> to vector<8x8x128xbf16>
    %c1_70 = arith.constant 1 : index
    %c1_71 = arith.constant 1 : index
    %c0_72 = arith.constant 0 : index
    %83 = vector.load %arg10[%c1_70, %c1_71, %c0_72] : memref<10x10x128xbf16, #tpu.memory_space<vmem>>, vector<8x8x128xbf16>
    tpu.vector_store %arg10[%c1_70, %c1_71, %c0_72], %82 {strides = array<i32>} : memref<10x10x128xbf16, #tpu.memory_space<vmem>>, vector<8x8x128xbf16>,
    %c0_73 = arith.constant 0 : index
    %c0_74 = arith.constant 0 : index
    %c0_75 = arith.constant 0 : index
    %84 = vector.load %arg10[%c0_73, %c0_74, %c0_75] : memref<10x10x128xbf16, #tpu.memory_space<vmem>>, vector<8x8x128xbf16>
    %85 = vector.shape_cast %84 : vector<8x8x128xbf16> to vector<64x128xbf16>
    %c0_76 = arith.constant 0 : index
    %c0_77 = arith.constant 0 : index
    %86 = vector.load %arg3[%c0_76, %c0_77] : memref<1152x128xbf16, #tpu.memory_space<vmem>>, vector<128x128xbf16>
    %cst_78 = arith.constant dense<0.000000e+00> : vector<64x128xf32>
    %87 = tpu.matmul %85, %86, %cst_78 {dimension_numbers = #tpu.dot_dimension_numbers<[1], [0], [0], [1], [0, 0, 1, 1], [], []>} : vector<64x128xbf16>, vector<128x128xbf16>, vector<64x128xf32> -> vector<64x128xf32>
    %c0_79 = arith.constant 0 : index
    %c1_80 = arith.constant 1 : index
    %c0_81 = arith.constant 0 : index
    %88 = vector.load %arg10[%c0_79, %c1_80, %c0_81] : memref<10x10x128xbf16, #tpu.memory_space<vmem>>, vector<8x8x128xbf16>
    %89 = vector.shape_cast %88 : vector<8x8x128xbf16> to vector<64x128xbf16>
    %c128_82 = arith.constant 128 : index
    %c0_83 = arith.constant 0 : index
    %90 = vector.load %arg3[%c128_82, %c0_83] : memref<1152x128xbf16, #tpu.memory_space<vmem>>, vector<128x128xbf16>
    %cst_84 = arith.constant dense<0.000000e+00> : vector<64x128xf32>
    %91 = tpu.matmul %89, %90, %cst_84 {dimension_numbers = #tpu.dot_dimension_numbers<[1], [0], [0], [1], [0, 0, 1, 1], [], []>} : vector<64x128xbf16>, vector<128x128xbf16>, vector<64x128xf32> -> vector<64x128xf32>
    %92 = arith.addf %87, %91 : vector<64x128xf32>
    %c0_85 = arith.constant 0 : index
    %c2_86 = arith.constant 2 : index
    %c0_87 = arith.constant 0 : index
    %93 = vector.load %arg10[%c0_85, %c2_86, %c0_87] : memref<10x10x128xbf16, #tpu.memory_space<vmem>>, vector<8x8x128xbf16>
    %94 = vector.shape_cast %93 : vector<8x8x128xbf16> to vector<64x128xbf16>
    %c256_88 = arith.constant 256 : index
    %c0_89 = arith.constant 0 : index
    %95 = vector.load %arg3[%c256_88, %c0_89] : memref<1152x128xbf16, #tpu.memory_space<vmem>>, vector<128x128xbf16>
    %cst_90 = arith.constant dense<0.000000e+00> : vector<64x128xf32>
    %96 = tpu.matmul %94, %95, %cst_90 {dimension_numbers = #tpu.dot_dimension_numbers<[1], [0], [0], [1], [0, 0, 1, 1], [], []>} : vector<64x128xbf16>, vector<128x128xbf16>, vector<64x128xf32> -> vector<64x128xf32>
    %97 = arith.addf %92, %96 : vector<64x128xf32>
    %c1_91 = arith.constant 1 : index
    %c0_92 = arith.constant 0 : index
    %c0_93 = arith.constant 0 : index
    %98 = vector.load %arg10[%c1_91, %c0_92, %c0_93] : memref<10x10x128xbf16, #tpu.memory_space<vmem>>, vector<8x8x128xbf16>
    %99 = vector.shape_cast %98 : vector<8x8x128xbf16> to vector<64x128xbf16>
    %c384_94 = arith.constant 384 : index
    %c0_95 = arith.constant 0 : index
    %100 = vector.load %arg3[%c384_94, %c0_95] : memref<1152x128xbf16, #tpu.memory_space<vmem>>, vector<128x128xbf16>
    %cst_96 = arith.constant dense<0.000000e+00> : vector<64x128xf32>
    %101 = tpu.matmul %99, %100, %cst_96 {dimension_numbers = #tpu.dot_dimension_numbers<[1], [0], [0], [1], [0, 0, 1, 1], [], []>} : vector<64x128xbf16>, vector<128x128xbf16>, vector<64x128xf32> -> vector<64x128xf32>
    %102 = arith.addf %97, %101 : vector<64x128xf32>
    %c1_97 = arith.constant 1 : index
    %c1_98 = arith.constant 1 : index
    %c0_99 = arith.constant 0 : index
    %103 = vector.load %arg10[%c1_97, %c1_98, %c0_99] : memref<10x10x128xbf16, #tpu.memory_space<vmem>>, vector<8x8x128xbf16>
    %104 = vector.shape_cast %103 : vector<8x8x128xbf16> to vector<64x128xbf16>
    %c512_100 = arith.constant 512 : index
    %c0_101 = arith.constant 0 : index
    %105 = vector.load %arg3[%c512_100, %c0_101] : memref<1152x128xbf16, #tpu.memory_space<vmem>>, vector<128x128xbf16>
    %cst_102 = arith.constant dense<0.000000e+00> : vector<64x128xf32>
    %106 = tpu.matmul %104, %105, %cst_102 {dimension_numbers = #tpu.dot_dimension_numbers<[1], [0], [0], [1], [0, 0, 1, 1], [], []>} : vector<64x128xbf16>, vector<128x128xbf16>, vector<64x128xf32> -> vector<64x128xf32>
    %107 = arith.addf %102, %106 : vector<64x128xf32>
    %c1_103 = arith.constant 1 : index
    %c2_104 = arith.constant 2 : index
    %c0_105 = arith.constant 0 : index
    %108 = vector.load %arg10[%c1_103, %c2_104, %c0_105] : memref<10x10x128xbf16, #tpu.memory_space<vmem>>, vector<8x8x128xbf16>
    %109 = vector.shape_cast %108 : vector<8x8x128xbf16> to vector<64x128xbf16>
    %c640_106 = arith.constant 640 : index
    %c0_107 = arith.constant 0 : index
    %110 = vector.load %arg3[%c640_106, %c0_107] : memref<1152x128xbf16, #tpu.memory_space<vmem>>, vector<128x128xbf16>
    %cst_108 = arith.constant dense<0.000000e+00> : vector<64x128xf32>
    %111 = tpu.matmul %109, %110, %cst_108 {dimension_numbers = #tpu.dot_dimension_numbers<[1], [0], [0], [1], [0, 0, 1, 1], [], []>} : vector<64x128xbf16>, vector<128x128xbf16>, vector<64x128xf32> -> vector<64x128xf32>
    %112 = arith.addf %107, %111 : vector<64x128xf32>
    %c2_109 = arith.constant 2 : index
    %c0_110 = arith.constant 0 : index
    %c0_111 = arith.constant 0 : index
    %113 = vector.load %arg10[%c2_109, %c0_110, %c0_111] : memref<10x10x128xbf16, #tpu.memory_space<vmem>>, vector<8x8x128xbf16>
    %114 = vector.shape_cast %113 : vector<8x8x128xbf16> to vector<64x128xbf16>
    %c768_112 = arith.constant 768 : index
    %c0_113 = arith.constant 0 : index
    %115 = vector.load %arg3[%c768_112, %c0_113] : memref<1152x128xbf16, #tpu.memory_space<vmem>>, vector<128x128xbf16>
    %cst_114 = arith.constant dense<0.000000e+00> : vector<64x128xf32>
    %116 = tpu.matmul %114, %115, %cst_114 {dimension_numbers = #tpu.dot_dimension_numbers<[1], [0], [0], [1], [0, 0, 1, 1], [], []>} : vector<64x128xbf16>, vector<128x128xbf16>, vector<64x128xf32> -> vector<64x128xf32>
    %117 = arith.addf %112, %116 : vector<64x128xf32>
    %c2_115 = arith.constant 2 : index
    %c1_116 = arith.constant 1 : index
    %c0_117 = arith.constant 0 : index
    %118 = vector.load %arg10[%c2_115, %c1_116, %c0_117] : memref<10x10x128xbf16, #tpu.memory_space<vmem>>, vector<8x8x128xbf16>
    %119 = vector.shape_cast %118 : vector<8x8x128xbf16> to vector<64x128xbf16>
    %c896_118 = arith.constant 896 : index
    %c0_119 = arith.constant 0 : index
    %120 = vector.load %arg3[%c896_118, %c0_119] : memref<1152x128xbf16, #tpu.memory_space<vmem>>, vector<128x128xbf16>
    %cst_120 = arith.constant dense<0.000000e+00> : vector<64x128xf32>
    %121 = tpu.matmul %119, %120, %cst_120 {dimension_numbers = #tpu.dot_dimension_numbers<[1], [0], [0], [1], [0, 0, 1, 1], [], []>} : vector<64x128xbf16>, vector<128x128xbf16>, vector<64x128xf32> -> vector<64x128xf32>
    %122 = arith.addf %117, %121 : vector<64x128xf32>
    %c2_121 = arith.constant 2 : index
    %c2_122 = arith.constant 2 : index
    %c0_123 = arith.constant 0 : index
    %123 = vector.load %arg10[%c2_121, %c2_122, %c0_123] : memref<10x10x128xbf16, #tpu.memory_space<vmem>>, vector<8x8x128xbf16>
    %124 = vector.shape_cast %123 : vector<8x8x128xbf16> to vector<64x128xbf16>
    %c1024_124 = arith.constant 1024 : index
    %c0_125 = arith.constant 0 : index
    %125 = vector.load %arg3[%c1024_124, %c0_125] : memref<1152x128xbf16, #tpu.memory_space<vmem>>, vector<128x128xbf16>
    %cst_126 = arith.constant dense<0.000000e+00> : vector<64x128xf32>
    %126 = tpu.matmul %124, %125, %cst_126 {dimension_numbers = #tpu.dot_dimension_numbers<[1], [0], [0], [1], [0, 0, 1, 1], [], []>} : vector<64x128xbf16>, vector<128x128xbf16>, vector<64x128xf32> -> vector<64x128xf32>
    %127 = arith.addf %122, %126 : vector<64x128xf32>
    %c0_127 = arith.constant 0 : index
    %c0_128 = arith.constant 0 : index
    %128 = vector.load %arg4[%c0_127, %c0_128] : memref<1x128xf32, #tpu.memory_space<vmem>>, vector<1x128xf32>
    %129 = vector.broadcast %128 : vector<1x128xf32> to vector<64x128xf32>
    %130 = arith.addf %127, %129 : vector<64x128xf32>
    %131 = vector.shape_cast %130 : vector<64x128xf32> to vector<8x8x128xf32>
    %c0_129 = arith.constant 0 : index
    %c0_130 = arith.constant 0 : index
    %c0_131 = arith.constant 0 : index
    %c0_132 = arith.constant 0 : index
    %132 = vector.load %arg8[%c0_129, %c0_130, %c0_131, %c0_132] : memref<1x8x8x128xf32, #tpu.memory_space<vmem>>, vector<1x8x8x128xf32>
    %133 = vector.shape_cast %132 : vector<1x8x8x128xf32> to vector<8x8x128xf32>
    %134 = vector.shape_cast %131 : vector<8x8x128xf32> to vector<1x8x8x128xf32>
    tpu.vector_store %arg8[%c0_129, %c0_130, %c0_131, %c0_132], %134 {strides = array<i32>} : memref<1x8x8x128xf32, #tpu.memory_space<vmem>>, vector<1x8x8x128xf32>,
    return
  }
  func.func @transform_0(%arg0: i32) -> (i32, i32, i32, i32) {
    %c0_i32 = arith.constant 0 : i32
    %c0_i32_0 = arith.constant 0 : i32
    %c0_i32_1 = arith.constant 0 : i32
    %c0_i32_2 = arith.constant 0 : i32
    return %arg0, %c0_i32, %c0_i32_0, %c0_i32_1 : i32, i32, i32, i32
  }
  func.func @transform_1(%arg0: i32) -> (i32, i32) {
    %c0_i32 = arith.constant 0 : i32
    %c0_i32_0 = arith.constant 0 : i32
    %c0_i32_1 = arith.constant 0 : i32
    return %c0_i32, %c0_i32_0 : i32, i32
  }
  func.func @transform_2(%arg0: i32) -> (i32, i32) {
    %c0_i32 = arith.constant 0 : i32
    %c0_i32_0 = arith.constant 0 : i32
    %c0_i32_1 = arith.constant 0 : i32
    return %c0_i32, %c0_i32_0 : i32, i32
  }
  func.func @transform_3(%arg0: i32) -> (i32, i32) {
    %c0_i32 = arith.constant 0 : i32
    %c0_i32_0 = arith.constant 0 : i32
    %c0_i32_1 = arith.constant 0 : i32
    return %c0_i32, %c0_i32_0 : i32, i32
  }
  func.func @transform_4(%arg0: i32) -> (i32, i32, i32, i32) {
    %c0_i32 = arith.constant 0 : i32
    %c0_i32_0 = arith.constant 0 : i32
    %c0_i32_1 = arith.constant 0 : i32
    %c0_i32_2 = arith.constant 0 : i32
    return %arg0, %c0_i32, %c0_i32_0, %c0_i32_1 : i32, i32, i32, i32
  }
  func.func @transform_5(%arg0: i32) -> (i32, i32, i32) {
    %c0_i32 = arith.constant 0 : i32
    %c0_i32_0 = arith.constant 0 : i32
    %c0_i32_1 = arith.constant 0 : i32
    return %arg0, %c0_i32, %c0_i32_0 : i32, i32, i32
  }
  func.func @transform_6(%arg0: i32) -> (i32, i32, i32) {
    %c0_i32 = arith.constant 0 : i32
    %c0_i32_0 = arith.constant 0 : i32
    %c0_i32_1 = arith.constant 0 : i32
    return %arg0, %c0_i32, %c0_i32_0 : i32, i32, i32
  }
  func.func @transform_7(%arg0: i32) -> (i32, i32, i32, i32) {
    %c0_i32 = arith.constant 0 : i32
    %c0_i32_0 = arith.constant 0 : i32
    %c0_i32_1 = arith.constant 0 : i32
    %c0_i32_2 = arith.constant 0 : i32
    return %arg0, %c0_i32, %c0_i32_0, %c0_i32_1 : i32, i32, i32, i32
  }
}

module attributes {stable_mosaic.version = 11 : i64} {
  func.func @_conv2_kernel(%arg0: i32, %arg1: memref<1x8x8x128xbf16, #tpu.memory_space<vmem>>, %arg2: memref<1152x128xbf16, #tpu.memory_space<vmem>>, %arg3: memref<1x8x8x128xf32, #tpu.memory_space<vmem>>, %arg4: memref<1x1x128xf32, #tpu.memory_space<vmem>>, %arg5: memref<1x1x128xf32, #tpu.memory_space<vmem>>, %arg6: memref<10x10x128xbf16, #tpu.memory_space<vmem>>) attributes {dimension_semantics = [#tpu.dimension_semantics<parallel>], iteration_bounds = array<i64: 2>, scalar_prefetch = 0 : i64, scratch_operands = 1 : i64, tpu.core_type = #tpu.core_type<tc>, window_params = [{transform_indices = @transform_0, window_bounds = array<i64: 1, 8, 8, 128>}, {pipeline_mode = #tpu.pipeline_mode<synchronous>, transform_indices = @transform_1, window_bounds = array<i64: 1152, 128>}, {transform_indices = @transform_2, window_bounds = array<i64: 1, 8, 8, 128>}, {transform_indices = @transform_3, window_bounds = array<i64: 1, 1, 128>}, {transform_indices = @transform_4, window_bounds = array<i64: 1, 1, 128>}]} {
    %cst = arith.constant 0.000000e+00 : bf16
    %0 = vector.broadcast %cst : bf16 to vector<10x10x128xbf16>
    %c0 = arith.constant 0 : index
    %c0_0 = arith.constant 0 : index
    %c0_1 = arith.constant 0 : index
    %1 = vector.load %arg6[%c0, %c0_0, %c0_1] : memref<10x10x128xbf16, #tpu.memory_space<vmem>>, vector<10x10x128xbf16>
    tpu.vector_store %arg6[%c0, %c0_0, %c0_1], %0 {strides = array<i32>} : memref<10x10x128xbf16, #tpu.memory_space<vmem>>, vector<10x10x128xbf16>,
    %c0_2 = arith.constant 0 : index
    %c0_3 = arith.constant 0 : index
    %c0_4 = arith.constant 0 : index
    %c0_5 = arith.constant 0 : index
    %2 = vector.load %arg1[%c0_2, %c0_3, %c0_4, %c0_5] : memref<1x8x8x128xbf16, #tpu.memory_space<vmem>>, vector<1x8x8x128xbf16>
    %3 = vector.shape_cast %2 : vector<1x8x8x128xbf16> to vector<8x8x128xbf16>
    %c1 = arith.constant 1 : index
    %c1_6 = arith.constant 1 : index
    %c0_7 = arith.constant 0 : index
    %4 = vector.load %arg6[%c1, %c1_6, %c0_7] : memref<10x10x128xbf16, #tpu.memory_space<vmem>>, vector<8x8x128xbf16>
    tpu.vector_store %arg6[%c1, %c1_6, %c0_7], %3 {strides = array<i32>} : memref<10x10x128xbf16, #tpu.memory_space<vmem>>, vector<8x8x128xbf16>,
    %c0_8 = arith.constant 0 : index
    %c0_9 = arith.constant 0 : index
    %c0_10 = arith.constant 0 : index
    %5 = vector.load %arg6[%c0_8, %c0_9, %c0_10] : memref<10x10x128xbf16, #tpu.memory_space<vmem>>, vector<8x8x128xbf16>
    %6 = vector.shape_cast %5 : vector<8x8x128xbf16> to vector<64x128xbf16>
    %c0_11 = arith.constant 0 : index
    %c0_12 = arith.constant 0 : index
    %7 = vector.load %arg2[%c0_11, %c0_12] : memref<1152x128xbf16, #tpu.memory_space<vmem>>, vector<128x128xbf16>
    %cst_13 = arith.constant dense<0.000000e+00> : vector<64x128xf32>
    %8 = tpu.matmul %6, %7, %cst_13 {dimension_numbers = #tpu.dot_dimension_numbers<[1], [0], [0], [1], [0, 0, 1, 1], [], []>} : vector<64x128xbf16>, vector<128x128xbf16>, vector<64x128xf32> -> vector<64x128xf32>
    %c0_14 = arith.constant 0 : index
    %c1_15 = arith.constant 1 : index
    %c0_16 = arith.constant 0 : index
    %9 = vector.load %arg6[%c0_14, %c1_15, %c0_16] : memref<10x10x128xbf16, #tpu.memory_space<vmem>>, vector<8x8x128xbf16>
    %10 = vector.shape_cast %9 : vector<8x8x128xbf16> to vector<64x128xbf16>
    %c128 = arith.constant 128 : index
    %c0_17 = arith.constant 0 : index
    %11 = vector.load %arg2[%c128, %c0_17] : memref<1152x128xbf16, #tpu.memory_space<vmem>>, vector<128x128xbf16>
    %cst_18 = arith.constant dense<0.000000e+00> : vector<64x128xf32>
    %12 = tpu.matmul %10, %11, %cst_18 {dimension_numbers = #tpu.dot_dimension_numbers<[1], [0], [0], [1], [0, 0, 1, 1], [], []>} : vector<64x128xbf16>, vector<128x128xbf16>, vector<64x128xf32> -> vector<64x128xf32>
    %13 = arith.addf %8, %12 : vector<64x128xf32>
    %c0_19 = arith.constant 0 : index
    %c2 = arith.constant 2 : index
    %c0_20 = arith.constant 0 : index
    %14 = vector.load %arg6[%c0_19, %c2, %c0_20] : memref<10x10x128xbf16, #tpu.memory_space<vmem>>, vector<8x8x128xbf16>
    %15 = vector.shape_cast %14 : vector<8x8x128xbf16> to vector<64x128xbf16>
    %c256 = arith.constant 256 : index
    %c0_21 = arith.constant 0 : index
    %16 = vector.load %arg2[%c256, %c0_21] : memref<1152x128xbf16, #tpu.memory_space<vmem>>, vector<128x128xbf16>
    %cst_22 = arith.constant dense<0.000000e+00> : vector<64x128xf32>
    %17 = tpu.matmul %15, %16, %cst_22 {dimension_numbers = #tpu.dot_dimension_numbers<[1], [0], [0], [1], [0, 0, 1, 1], [], []>} : vector<64x128xbf16>, vector<128x128xbf16>, vector<64x128xf32> -> vector<64x128xf32>
    %18 = arith.addf %13, %17 : vector<64x128xf32>
    %c1_23 = arith.constant 1 : index
    %c0_24 = arith.constant 0 : index
    %c0_25 = arith.constant 0 : index
    %19 = vector.load %arg6[%c1_23, %c0_24, %c0_25] : memref<10x10x128xbf16, #tpu.memory_space<vmem>>, vector<8x8x128xbf16>
    %20 = vector.shape_cast %19 : vector<8x8x128xbf16> to vector<64x128xbf16>
    %c384 = arith.constant 384 : index
    %c0_26 = arith.constant 0 : index
    %21 = vector.load %arg2[%c384, %c0_26] : memref<1152x128xbf16, #tpu.memory_space<vmem>>, vector<128x128xbf16>
    %cst_27 = arith.constant dense<0.000000e+00> : vector<64x128xf32>
    %22 = tpu.matmul %20, %21, %cst_27 {dimension_numbers = #tpu.dot_dimension_numbers<[1], [0], [0], [1], [0, 0, 1, 1], [], []>} : vector<64x128xbf16>, vector<128x128xbf16>, vector<64x128xf32> -> vector<64x128xf32>
    %23 = arith.addf %18, %22 : vector<64x128xf32>
    %c1_28 = arith.constant 1 : index
    %c1_29 = arith.constant 1 : index
    %c0_30 = arith.constant 0 : index
    %24 = vector.load %arg6[%c1_28, %c1_29, %c0_30] : memref<10x10x128xbf16, #tpu.memory_space<vmem>>, vector<8x8x128xbf16>
    %25 = vector.shape_cast %24 : vector<8x8x128xbf16> to vector<64x128xbf16>
    %c512 = arith.constant 512 : index
    %c0_31 = arith.constant 0 : index
    %26 = vector.load %arg2[%c512, %c0_31] : memref<1152x128xbf16, #tpu.memory_space<vmem>>, vector<128x128xbf16>
    %cst_32 = arith.constant dense<0.000000e+00> : vector<64x128xf32>
    %27 = tpu.matmul %25, %26, %cst_32 {dimension_numbers = #tpu.dot_dimension_numbers<[1], [0], [0], [1], [0, 0, 1, 1], [], []>} : vector<64x128xbf16>, vector<128x128xbf16>, vector<64x128xf32> -> vector<64x128xf32>
    %28 = arith.addf %23, %27 : vector<64x128xf32>
    %c1_33 = arith.constant 1 : index
    %c2_34 = arith.constant 2 : index
    %c0_35 = arith.constant 0 : index
    %29 = vector.load %arg6[%c1_33, %c2_34, %c0_35] : memref<10x10x128xbf16, #tpu.memory_space<vmem>>, vector<8x8x128xbf16>
    %30 = vector.shape_cast %29 : vector<8x8x128xbf16> to vector<64x128xbf16>
    %c640 = arith.constant 640 : index
    %c0_36 = arith.constant 0 : index
    %31 = vector.load %arg2[%c640, %c0_36] : memref<1152x128xbf16, #tpu.memory_space<vmem>>, vector<128x128xbf16>
    %cst_37 = arith.constant dense<0.000000e+00> : vector<64x128xf32>
    %32 = tpu.matmul %30, %31, %cst_37 {dimension_numbers = #tpu.dot_dimension_numbers<[1], [0], [0], [1], [0, 0, 1, 1], [], []>} : vector<64x128xbf16>, vector<128x128xbf16>, vector<64x128xf32> -> vector<64x128xf32>
    %33 = arith.addf %28, %32 : vector<64x128xf32>
    %c2_38 = arith.constant 2 : index
    %c0_39 = arith.constant 0 : index
    %c0_40 = arith.constant 0 : index
    %34 = vector.load %arg6[%c2_38, %c0_39, %c0_40] : memref<10x10x128xbf16, #tpu.memory_space<vmem>>, vector<8x8x128xbf16>
    %35 = vector.shape_cast %34 : vector<8x8x128xbf16> to vector<64x128xbf16>
    %c768 = arith.constant 768 : index
    %c0_41 = arith.constant 0 : index
    %36 = vector.load %arg2[%c768, %c0_41] : memref<1152x128xbf16, #tpu.memory_space<vmem>>, vector<128x128xbf16>
    %cst_42 = arith.constant dense<0.000000e+00> : vector<64x128xf32>
    %37 = tpu.matmul %35, %36, %cst_42 {dimension_numbers = #tpu.dot_dimension_numbers<[1], [0], [0], [1], [0, 0, 1, 1], [], []>} : vector<64x128xbf16>, vector<128x128xbf16>, vector<64x128xf32> -> vector<64x128xf32>
    %38 = arith.addf %33, %37 : vector<64x128xf32>
    %c2_43 = arith.constant 2 : index
    %c1_44 = arith.constant 1 : index
    %c0_45 = arith.constant 0 : index
    %39 = vector.load %arg6[%c2_43, %c1_44, %c0_45] : memref<10x10x128xbf16, #tpu.memory_space<vmem>>, vector<8x8x128xbf16>
    %40 = vector.shape_cast %39 : vector<8x8x128xbf16> to vector<64x128xbf16>
    %c896 = arith.constant 896 : index
    %c0_46 = arith.constant 0 : index
    %41 = vector.load %arg2[%c896, %c0_46] : memref<1152x128xbf16, #tpu.memory_space<vmem>>, vector<128x128xbf16>
    %cst_47 = arith.constant dense<0.000000e+00> : vector<64x128xf32>
    %42 = tpu.matmul %40, %41, %cst_47 {dimension_numbers = #tpu.dot_dimension_numbers<[1], [0], [0], [1], [0, 0, 1, 1], [], []>} : vector<64x128xbf16>, vector<128x128xbf16>, vector<64x128xf32> -> vector<64x128xf32>
    %43 = arith.addf %38, %42 : vector<64x128xf32>
    %c2_48 = arith.constant 2 : index
    %c2_49 = arith.constant 2 : index
    %c0_50 = arith.constant 0 : index
    %44 = vector.load %arg6[%c2_48, %c2_49, %c0_50] : memref<10x10x128xbf16, #tpu.memory_space<vmem>>, vector<8x8x128xbf16>
    %45 = vector.shape_cast %44 : vector<8x8x128xbf16> to vector<64x128xbf16>
    %c1024 = arith.constant 1024 : index
    %c0_51 = arith.constant 0 : index
    %46 = vector.load %arg2[%c1024, %c0_51] : memref<1152x128xbf16, #tpu.memory_space<vmem>>, vector<128x128xbf16>
    %cst_52 = arith.constant dense<0.000000e+00> : vector<64x128xf32>
    %47 = tpu.matmul %45, %46, %cst_52 {dimension_numbers = #tpu.dot_dimension_numbers<[1], [0], [0], [1], [0, 0, 1, 1], [], []>} : vector<64x128xbf16>, vector<128x128xbf16>, vector<64x128xf32> -> vector<64x128xf32>
    %48 = arith.addf %43, %47 : vector<64x128xf32>
    %49 = vector.shape_cast %48 : vector<64x128xf32> to vector<8x8x128xf32>
    %c0_53 = arith.constant 0 : index
    %c0_54 = arith.constant 0 : index
    %c0_55 = arith.constant 0 : index
    %c0_56 = arith.constant 0 : index
    %50 = vector.load %arg3[%c0_53, %c0_54, %c0_55, %c0_56] : memref<1x8x8x128xf32, #tpu.memory_space<vmem>>, vector<1x8x8x128xf32>
    %51 = vector.shape_cast %50 : vector<1x8x8x128xf32> to vector<8x8x128xf32>
    %52 = vector.shape_cast %49 : vector<8x8x128xf32> to vector<1x8x8x128xf32>
    tpu.vector_store %arg3[%c0_53, %c0_54, %c0_55, %c0_56], %52 {strides = array<i32>} : memref<1x8x8x128xf32, #tpu.memory_space<vmem>>, vector<1x8x8x128xf32>,
    %cst_57 = arith.constant dense<0.000000e+00> : vector<128xf32>
    %53 = vector.multi_reduction <add>, %48, %cst_57 [0] : vector<64x128xf32> to vector<128xf32>
    %54 = vector.shape_cast %53 : vector<128xf32> to vector<1x128xf32>
    %c0_58 = arith.constant 0 : index
    %c0_59 = arith.constant 0 : index
    %c0_60 = arith.constant 0 : index
    %55 = vector.load %arg4[%c0_58, %c0_59, %c0_60] : memref<1x1x128xf32, #tpu.memory_space<vmem>>, vector<1x1x128xf32>
    %56 = vector.shape_cast %55 : vector<1x1x128xf32> to vector<1x128xf32>
    %57 = vector.shape_cast %54 : vector<1x128xf32> to vector<1x1x128xf32>
    tpu.vector_store %arg4[%c0_58, %c0_59, %c0_60], %57 {strides = array<i32>} : memref<1x1x128xf32, #tpu.memory_space<vmem>>, vector<1x1x128xf32>,
    %58 = arith.mulf %48, %48 : vector<64x128xf32>
    %cst_61 = arith.constant dense<0.000000e+00> : vector<128xf32>
    %59 = vector.multi_reduction <add>, %58, %cst_61 [0] : vector<64x128xf32> to vector<128xf32>
    %60 = vector.shape_cast %59 : vector<128xf32> to vector<1x128xf32>
    %c0_62 = arith.constant 0 : index
    %c0_63 = arith.constant 0 : index
    %c0_64 = arith.constant 0 : index
    %61 = vector.load %arg5[%c0_62, %c0_63, %c0_64] : memref<1x1x128xf32, #tpu.memory_space<vmem>>, vector<1x1x128xf32>
    %62 = vector.shape_cast %61 : vector<1x1x128xf32> to vector<1x128xf32>
    %63 = vector.shape_cast %60 : vector<1x128xf32> to vector<1x1x128xf32>
    tpu.vector_store %arg5[%c0_62, %c0_63, %c0_64], %63 {strides = array<i32>} : memref<1x1x128xf32, #tpu.memory_space<vmem>>, vector<1x1x128xf32>,
    return
  }
  func.func @transform_0(%arg0: i32) -> (i32, i32, i32, i32) {
    %c0_i32 = arith.constant 0 : i32
    %c0_i32_0 = arith.constant 0 : i32
    %c0_i32_1 = arith.constant 0 : i32
    %c0_i32_2 = arith.constant 0 : i32
    return %arg0, %c0_i32, %c0_i32_0, %c0_i32_1 : i32, i32, i32, i32
  }
  func.func @transform_1(%arg0: i32) -> (i32, i32) {
    %c0_i32 = arith.constant 0 : i32
    %c0_i32_0 = arith.constant 0 : i32
    %c0_i32_1 = arith.constant 0 : i32
    return %c0_i32, %c0_i32_0 : i32, i32
  }
  func.func @transform_2(%arg0: i32) -> (i32, i32, i32, i32) {
    %c0_i32 = arith.constant 0 : i32
    %c0_i32_0 = arith.constant 0 : i32
    %c0_i32_1 = arith.constant 0 : i32
    %c0_i32_2 = arith.constant 0 : i32
    return %arg0, %c0_i32, %c0_i32_0, %c0_i32_1 : i32, i32, i32, i32
  }
  func.func @transform_3(%arg0: i32) -> (i32, i32, i32) {
    %c0_i32 = arith.constant 0 : i32
    %c0_i32_0 = arith.constant 0 : i32
    %c0_i32_1 = arith.constant 0 : i32
    return %arg0, %c0_i32, %c0_i32_0 : i32, i32, i32
  }
  func.func @transform_4(%arg0: i32) -> (i32, i32, i32) {
    %c0_i32 = arith.constant 0 : i32
    %c0_i32_0 = arith.constant 0 : i32
    %c0_i32_1 = arith.constant 0 : i32
    return %arg0, %c0_i32, %c0_i32_0 : i32, i32, i32
  }
}

module attributes {stable_mosaic.version = 11 : i64} {
  func.func @_bn_pool_act_kernel(%arg0: i32, %arg1: memref<1x16x16x128xbf16, #tpu.memory_space<vmem>>, %arg2: memref<1x128xf32, #tpu.memory_space<vmem>>, %arg3: memref<1x128xf32, #tpu.memory_space<vmem>>, %arg4: memref<1x8x8x128xbf16, #tpu.memory_space<vmem>>) attributes {dimension_semantics = [#tpu.dimension_semantics<parallel>], iteration_bounds = array<i64: 2>, scalar_prefetch = 0 : i64, scratch_operands = 0 : i64, tpu.core_type = #tpu.core_type<tc>, window_params = [{transform_indices = @transform_0, window_bounds = array<i64: 1, 16, 16, 128>}, {pipeline_mode = #tpu.pipeline_mode<synchronous>, transform_indices = @transform_1, window_bounds = array<i64: 1, 128>}, {pipeline_mode = #tpu.pipeline_mode<synchronous>, transform_indices = @transform_2, window_bounds = array<i64: 1, 128>}, {transform_indices = @transform_3, window_bounds = array<i64: 1, 8, 8, 128>}]} {
    %c0 = arith.constant 0 : index
    %c0_0 = arith.constant 0 : index
    %0 = vector.load %arg2[%c0, %c0_0] : memref<1x128xf32, #tpu.memory_space<vmem>>, vector<1x128xf32>
    %1 = vector.shape_cast %0 : vector<1x128xf32> to vector<1x1x128xf32>
    %c0_1 = arith.constant 0 : index
    %c0_2 = arith.constant 0 : index
    %2 = vector.load %arg3[%c0_1, %c0_2] : memref<1x128xf32, #tpu.memory_space<vmem>>, vector<1x128xf32>
    %3 = vector.shape_cast %2 : vector<1x128xf32> to vector<1x1x128xf32>
    %c0_3 = arith.constant 0 : index
    %c0_4 = arith.constant 0 : index
    %c0_5 = arith.constant 0 : index
    %c0_6 = arith.constant 0 : index
    %4 = vector.load %arg1[%c0_3, %c0_4, %c0_5, %c0_6] : memref<1x16x16x128xbf16, #tpu.memory_space<vmem>>, vector<1x16x16x128xbf16>
    %5 = vector.shape_cast %4 : vector<1x16x16x128xbf16> to vector<16x16x128xbf16>
    %6 = arith.extf %5 : vector<16x16x128xbf16> to vector<16x16x128xf32>
    %7 = vector.broadcast %1 : vector<1x1x128xf32> to vector<16x16x128xf32>
    %8 = arith.mulf %6, %7 : vector<16x16x128xf32>
    %9 = vector.broadcast %3 : vector<1x1x128xf32> to vector<16x16x128xf32>
    %10 = arith.addf %8, %9 : vector<16x16x128xf32>
    %cst = arith.constant 0.000000e+00 : f32
    %11 = vector.broadcast %cst : f32 to vector<16x16x128xf32>
    %12 = arith.cmpf oge, %10, %11 : vector<16x16x128xf32>
    %cst_7 = arith.constant 0.229166672 : f32
    %13 = vector.broadcast %cst_7 : f32 to vector<16x16x128xf32>
    %14 = arith.mulf %13, %10 : vector<16x16x128xf32>
    %15 = arith.select %12, %10, %14 : vector<16x16x128xi1>, vector<16x16x128xf32>
    %16 = vector.shape_cast %15 : vector<16x16x128xf32> to vector<8x2x16x128xf32>
    %17 = vector.extract_strided_slice %16 {offsets = [0, 0, 0, 0], sizes = [8, 1, 16, 128], strides = [1, 1, 1, 1]} : vector<8x2x16x128xf32> to vector<8x1x16x128xf32>
    %18 = vector.shape_cast %17 : vector<8x1x16x128xf32> to vector<8x16x128xf32>
    %19 = vector.extract_strided_slice %16 {offsets = [0, 1, 0, 0], sizes = [8, 1, 16, 128], strides = [1, 1, 1, 1]} : vector<8x2x16x128xf32> to vector<8x1x16x128xf32>
    %20 = vector.shape_cast %19 : vector<8x1x16x128xf32> to vector<8x16x128xf32>
    %21 = arith.addf %18, %20 : vector<8x16x128xf32>
    %22 = vector.shape_cast %21 : vector<8x16x128xf32> to vector<8x8x2x128xf32>
    %23 = vector.extract_strided_slice %22 {offsets = [0, 0, 0, 0], sizes = [8, 8, 1, 128], strides = [1, 1, 1, 1]} : vector<8x8x2x128xf32> to vector<8x8x1x128xf32>
    %24 = vector.shape_cast %23 : vector<8x8x1x128xf32> to vector<8x8x128xf32>
    %25 = vector.extract_strided_slice %22 {offsets = [0, 0, 1, 0], sizes = [8, 8, 1, 128], strides = [1, 1, 1, 1]} : vector<8x8x2x128xf32> to vector<8x8x1x128xf32>
    %26 = vector.shape_cast %25 : vector<8x8x1x128xf32> to vector<8x8x128xf32>
    %27 = arith.addf %24, %26 : vector<8x8x128xf32>
    %cst_8 = arith.constant 2.500000e-01 : f32
    %28 = vector.broadcast %cst_8 : f32 to vector<8x8x128xf32>
    %29 = arith.mulf %27, %28 : vector<8x8x128xf32>
    %30 = arith.truncf %29 : vector<8x8x128xf32> to vector<8x8x128xbf16>
    %c0_9 = arith.constant 0 : index
    %c0_10 = arith.constant 0 : index
    %c0_11 = arith.constant 0 : index
    %c0_12 = arith.constant 0 : index
    %31 = vector.load %arg4[%c0_9, %c0_10, %c0_11, %c0_12] : memref<1x8x8x128xbf16, #tpu.memory_space<vmem>>, vector<1x8x8x128xbf16>
    %32 = vector.shape_cast %31 : vector<1x8x8x128xbf16> to vector<8x8x128xbf16>
    %33 = vector.shape_cast %30 : vector<8x8x128xbf16> to vector<1x8x8x128xbf16>
    tpu.vector_store %arg4[%c0_9, %c0_10, %c0_11, %c0_12], %33 {strides = array<i32>} : memref<1x8x8x128xbf16, #tpu.memory_space<vmem>>, vector<1x8x8x128xbf16>,
    return
  }
  func.func @transform_0(%arg0: i32) -> (i32, i32, i32, i32) {
    %c0_i32 = arith.constant 0 : i32
    %c0_i32_0 = arith.constant 0 : i32
    %c0_i32_1 = arith.constant 0 : i32
    %c0_i32_2 = arith.constant 0 : i32
    return %arg0, %c0_i32, %c0_i32_0, %c0_i32_1 : i32, i32, i32, i32
  }
  func.func @transform_1(%arg0: i32) -> (i32, i32) {
    %c0_i32 = arith.constant 0 : i32
    %c0_i32_0 = arith.constant 0 : i32
    %c0_i32_1 = arith.constant 0 : i32
    return %c0_i32, %c0_i32_0 : i32, i32
  }
  func.func @transform_2(%arg0: i32) -> (i32, i32) {
    %c0_i32 = arith.constant 0 : i32
    %c0_i32_0 = arith.constant 0 : i32
    %c0_i32_1 = arith.constant 0 : i32
    return %c0_i32, %c0_i32_0 : i32, i32
  }
  func.func @transform_3(%arg0: i32) -> (i32, i32, i32, i32) {
    %c0_i32 = arith.constant 0 : i32
    %c0_i32_0 = arith.constant 0 : i32
    %c0_i32_1 = arith.constant 0 : i32
    %c0_i32_2 = arith.constant 0 : i32
    return %arg0, %c0_i32, %c0_i32_0, %c0_i32_1 : i32, i32, i32, i32
  }
}

module attributes {stable_mosaic.version = 11 : i64} {
  func.func @_bn_add_act_kernel(%arg0: i32, %arg1: memref<1x8x8x128xf32, #tpu.memory_space<vmem>>, %arg2: memref<1x8x8x128xf32, #tpu.memory_space<vmem>>, %arg3: memref<1x128xf32, #tpu.memory_space<vmem>>, %arg4: memref<1x128xf32, #tpu.memory_space<vmem>>, %arg5: memref<1x8x8x128xf32, #tpu.memory_space<vmem>>) attributes {dimension_semantics = [#tpu.dimension_semantics<parallel>], iteration_bounds = array<i64: 2>, scalar_prefetch = 0 : i64, scratch_operands = 0 : i64, tpu.core_type = #tpu.core_type<tc>, window_params = [{transform_indices = @transform_0, window_bounds = array<i64: 1, 8, 8, 128>}, {transform_indices = @transform_1, window_bounds = array<i64: 1, 8, 8, 128>}, {pipeline_mode = #tpu.pipeline_mode<synchronous>, transform_indices = @transform_2, window_bounds = array<i64: 1, 128>}, {pipeline_mode = #tpu.pipeline_mode<synchronous>, transform_indices = @transform_3, window_bounds = array<i64: 1, 128>}, {transform_indices = @transform_4, window_bounds = array<i64: 1, 8, 8, 128>}]} {
    %c0 = arith.constant 0 : index
    %c0_0 = arith.constant 0 : index
    %0 = vector.load %arg3[%c0, %c0_0] : memref<1x128xf32, #tpu.memory_space<vmem>>, vector<1x128xf32>
    %1 = vector.shape_cast %0 : vector<1x128xf32> to vector<1x1x128xf32>
    %c0_1 = arith.constant 0 : index
    %c0_2 = arith.constant 0 : index
    %2 = vector.load %arg4[%c0_1, %c0_2] : memref<1x128xf32, #tpu.memory_space<vmem>>, vector<1x128xf32>
    %3 = vector.shape_cast %2 : vector<1x128xf32> to vector<1x1x128xf32>
    %c0_3 = arith.constant 0 : index
    %c0_4 = arith.constant 0 : index
    %c0_5 = arith.constant 0 : index
    %c0_6 = arith.constant 0 : index
    %4 = vector.load %arg1[%c0_3, %c0_4, %c0_5, %c0_6] : memref<1x8x8x128xf32, #tpu.memory_space<vmem>>, vector<1x8x8x128xf32>
    %5 = vector.shape_cast %4 : vector<1x8x8x128xf32> to vector<8x8x128xf32>
    %6 = vector.broadcast %1 : vector<1x1x128xf32> to vector<8x8x128xf32>
    %7 = arith.mulf %5, %6 : vector<8x8x128xf32>
    %8 = vector.broadcast %3 : vector<1x1x128xf32> to vector<8x8x128xf32>
    %9 = arith.addf %7, %8 : vector<8x8x128xf32>
    %c0_7 = arith.constant 0 : index
    %c0_8 = arith.constant 0 : index
    %c0_9 = arith.constant 0 : index
    %c0_10 = arith.constant 0 : index
    %10 = vector.load %arg2[%c0_7, %c0_8, %c0_9, %c0_10] : memref<1x8x8x128xf32, #tpu.memory_space<vmem>>, vector<1x8x8x128xf32>
    %11 = vector.shape_cast %10 : vector<1x8x8x128xf32> to vector<8x8x128xf32>
    %12 = arith.addf %9, %11 : vector<8x8x128xf32>
    %cst = arith.constant 0.000000e+00 : f32
    %13 = vector.broadcast %cst : f32 to vector<8x8x128xf32>
    %14 = arith.cmpf oge, %12, %13 : vector<8x8x128xf32>
    %cst_11 = arith.constant 0.229166672 : f32
    %15 = vector.broadcast %cst_11 : f32 to vector<8x8x128xf32>
    %16 = arith.mulf %15, %12 : vector<8x8x128xf32>
    %17 = arith.select %14, %12, %16 : vector<8x8x128xi1>, vector<8x8x128xf32>
    %c0_12 = arith.constant 0 : index
    %c0_13 = arith.constant 0 : index
    %c0_14 = arith.constant 0 : index
    %c0_15 = arith.constant 0 : index
    %18 = vector.load %arg5[%c0_12, %c0_13, %c0_14, %c0_15] : memref<1x8x8x128xf32, #tpu.memory_space<vmem>>, vector<1x8x8x128xf32>
    %19 = vector.shape_cast %18 : vector<1x8x8x128xf32> to vector<8x8x128xf32>
    %20 = vector.shape_cast %17 : vector<8x8x128xf32> to vector<1x8x8x128xf32>
    tpu.vector_store %arg5[%c0_12, %c0_13, %c0_14, %c0_15], %20 {strides = array<i32>} : memref<1x8x8x128xf32, #tpu.memory_space<vmem>>, vector<1x8x8x128xf32>,
    return
  }
  func.func @transform_0(%arg0: i32) -> (i32, i32, i32, i32) {
    %c0_i32 = arith.constant 0 : i32
    %c0_i32_0 = arith.constant 0 : i32
    %c0_i32_1 = arith.constant 0 : i32
    %c0_i32_2 = arith.constant 0 : i32
    return %arg0, %c0_i32, %c0_i32_0, %c0_i32_1 : i32, i32, i32, i32
  }
  func.func @transform_1(%arg0: i32) -> (i32, i32, i32, i32) {
    %c0_i32 = arith.constant 0 : i32
    %c0_i32_0 = arith.constant 0 : i32
    %c0_i32_1 = arith.constant 0 : i32
    %c0_i32_2 = arith.constant 0 : i32
    return %arg0, %c0_i32, %c0_i32_0, %c0_i32_1 : i32, i32, i32, i32
  }
  func.func @transform_2(%arg0: i32) -> (i32, i32) {
    %c0_i32 = arith.constant 0 : i32
    %c0_i32_0 = arith.constant 0 : i32
    %c0_i32_1 = arith.constant 0 : i32
    return %c0_i32, %c0_i32_0 : i32, i32
  }
  func.func @transform_3(%arg0: i32) -> (i32, i32) {
    %c0_i32 = arith.constant 0 : i32
    %c0_i32_0 = arith.constant 0 : i32
    %c0_i32_1 = arith.constant 0 : i32
    return %c0_i32, %c0_i32_0 : i32, i32
  }
  func.func @transform_4(%arg0: i32) -> (i32, i32, i32, i32) {
    %c0_i32 = arith.constant 0 : i32
    %c0_i32_0 = arith.constant 0 : i32
    %c0_i32_1 = arith.constant 0 : i32
    %c0_i32_2 = arith.constant 0 : i32
    return %arg0, %c0_i32, %c0_i32_0, %c0_i32_1 : i32, i32, i32, i32
  }
}

</mosaic_0001>

<bundles_post_ra>
// kernel: res_down_forward.7
= control target key start
LH: loop header
LB: loop body
LE: loop exit
PB: predicated region body
PF: predicated region fallthrough
CT: control target
= control target key end

     0   :  { %s424_s15 = smov 0   ;;  %s475_s0 = inlined_call_operand.vmem [shape: f32[2,8,8,128], index: 0, kind: input, shape index: {}]   ;;  %s476_s1 = inlined_call_operand.vmem [shape: f32[2,8,8,128], index: 1, kind: input, shape index: {}, may-alias: {1,4}]   ;;  %s477_s2 = inlined_call_operand.vmem [shape: f32[1,128], index: 2, kind: input, shape index: {}]   ;;  %s478_s3 = inlined_call_operand.vmem [shape: f32[1,128], index: 3, kind: input, shape index: {}]   ;;  %s479_s4 = inlined_call_operand.vmem [shape: f32[2,8,8,128], index: 4, kind: output, shape index: {}, may-alias: {1,4}]  }
   0x1 LB: > { %s365_s16 = sadd.s32 4294967295, %s397_s15   ;;  %p369_p0 = scmp.ge.s32.totalorder %s397_s15, 1  ;;  %s397_s15 = sphi %s424_s15, %s14_s15  }
   0x2   : > { %p172_p1 = scmp.lt.s32.totalorder %s397_s15, 3 }
   0x4   : > { %p173_p2 = pnand %p369_p0, %p172_p1 }
   0x5   : > { %p203_p3 = scmp.lt.s32.totalorder (!%p173_p2), %s365_s16, 1 }
   0x6   : > { %176 = sbr.rel (%p173_p2) target bundleno = 32 (0x20), region = 36 }
   0xb   : > { %s481_s16 = smov (!%p203_p3, %s365_s16), 1  ;;  %v389_v0 = vld [vmem:[%s477_s2] ss:$0 sm:$0xff] }
   0xc   : > { %s435_s19 = sshll.u32 %s481_s16, 6  ;;  %v390_v1 = vld [vmem:[%s478_s3] ss:$0 sm:$0xff] }
   0xd   : > { %s207_s22 = scalar_lea.vmem %s475_s0, %s435_s19  ;;  %s445_s25 = scalar_lea.vmem %s476_s1, %s435_s19 }
   0xe   : > { %v220_v2 = vld [vmem:[%s207_s22] sm:$0xff]  ;;  %v251_v6 = vld [vmem:[%s445_s25 + $0x8] sm:$0xff]  ;;  %v222_v8 = vld [vmem:[%s207_s22 + $0x10] sm:$0xff]  ;;  %s460_s30 = scalar_lea.vmem %s479_s4, %s435_s19 }
   0xf   : > { %v231_v3 = vmul.f32 %v389_v0, %v220_v2  ;;  %v250_v4 = vld [vmem:[%s445_s25] sm:$0xff]  ;;  %v221_v7 = vld [vmem:[%s207_s22 + $0x8] sm:$0xff]  ;;  %v223_v9 = vld [vmem:[%s207_s22 + $0x18] sm:$0xff]  ;;  %v233_v11 = vmul.f32 %v389_v0, %v222_v8 }
  0x10   : > { %v232_v10 = vmul.f32 %v389_v0, %v221_v7  ;;  %v234_v12 = vmul.f32 %v389_v0, %v223_v9  ;;  %v224_v13 = vld [vmem:[%s207_s22 + $0x20] sm:$0xff]  ;;  %v225_v14 = vld [vmem:[%s207_s22 + $0x28] sm:$0xff]  ;;  %v226_v15 = vld [vmem:[%s207_s22 + $0x30] sm:$0xff] }
  0x11   : > { %v242_v5 = vadd.f32 %v390_v1, %v231_v3  ;;  %v252_v16 = vld [vmem:[%s445_s25 + $0x10] sm:$0xff]  ;;  %v253_v17 = vld [vmem:[%s445_s25 + $0x18] sm:$0xff]  ;;  %v235_v19 = vmul.f32 %v389_v0, %v224_v13  ;;  %v236_v20 = vmul.f32 %v389_v0, %v225_v14  ;;  %v237_v21 = vmul.f32 %v389_v0, %v226_v15  ;;  %v254_v23 = vld [vmem:[%s445_s25 + $0x20] sm:$0xff] }
  0x12   : > { %v227_v22 = vld [vmem:[%s207_s22 + $0x38] sm:$0xff]  ;;  %v255_v24 = vld [vmem:[%s445_s25 + $0x28] sm:$0xff]  ;;  %v243_v25 = vadd.f32 %v390_v1, %v232_v10  ;;  %v244_v26 = vadd.f32 %v390_v1, %v233_v11  ;;  %v245_v27 = vadd.f32 %v390_v1, %v234_v12  ;;  %v256_v36 = vld [vmem:[%s445_s25 + $0x30] sm:$0xff] }
  0x13   : > { %v258_v18 = vadd.f32 %v250_v4, %v242_v5  ;;  %v238_v28 = vmul.f32 %v389_v0, %v227_v22  ;;  %v246_v30 = vadd.f32 %v390_v1, %v235_v19  ;;  %v247_v31 = vadd.f32 %v390_v1, %v236_v20  ;;  %v257_v37 = vld [vmem:[%s445_s25 + $0x38] sm:$0xff] }
  0x14   : > { %v259_v32 = vadd.f32 %v251_v6, %v243_v25  ;;  %v260_v33 = vadd.f32 %v252_v16, %v244_v26  ;;  %v261_v34 = vadd.f32 %v253_v17, %v245_v27  ;;  %v248_v35 = vadd.f32 %v390_v1, %v237_v21 }
  0x15   : > { %vm266_vm0 = vcmp.ge.f32.partialorder %v258_v18, 0.0  ;;  %v274_v29 = vmul.f32 0.22916667, %v258_v18  ;;  %v262_v39 = vadd.f32 %v254_v23, %v246_v30  ;;  %v263_v40 = vadd.f32 %v255_v24, %v247_v31 }
  0x16   : > { %v249_v41 = vadd.f32 %v390_v1, %v238_v28  ;;  %vm267_vm1 = vcmp.ge.f32.partialorder %v259_v32, 0.0  ;;  %v275_v42 = vmul.f32 0.22916667, %v259_v32  ;;  %vm268_vm2 = vcmp.ge.f32.partialorder %v260_v33, 0.0 }
  0x17   : > { %v282_v38 = vsel %vm266_vm0, %v258_v18, %v274_v29  ;;  %v276_v43 = vmul.f32 0.22916667, %v260_v33  ;;  %vm269_vm3 = vcmp.ge.f32.partialorder %v261_v34, 0.0  ;;  %v277_v44 = vmul.f32 0.22916667, %v261_v34 }
  0x18   : > { %290 = vst [vmem:[%s460_s30] sm:$0xff] %v282_v38  ;;  %vm270_vm4 = vcmp.ge.f32.partialorder %v262_v39, 0.0  ;;  %v278_v45 = vmul.f32 0.22916667, %v262_v39  ;;  %v283_v46 = vsel %vm267_vm1, %v259_v32, %v275_v42  ;;  %vm271_vm5 = vcmp.ge.f32.partialorder %v263_v40, 0.0 }
  0x19   : > { %v284_v47 = vsel %vm268_vm2, %v260_v33, %v276_v43  ;;  %v279_v48 = vmul.f32 0.22916667, %v263_v40  ;;  %291 = vst [vmem:[%s460_s30 + $0x8] sm:$0xff] %v283_v46  ;;  %v285_v49 = vsel %vm269_vm3, %v261_v34, %v277_v44  ;;  %v264_v51 = vadd.f32 %v256_v36, %v248_v35 }
  0x1a   : > { %v286_v50 = vsel %vm270_vm4, %v262_v39, %v278_v45  ;;  %v265_v52 = vadd.f32 %v257_v37, %v249_v41  ;;  %292 = vst [vmem:[%s460_s30 + $0x10] sm:$0xff] %v284_v47 }
  0x1b   : > { %v287_v53 = vsel %vm271_vm5, %v263_v40, %v279_v48  ;;  %293 = vst [vmem:[%s460_s30 + $0x18] sm:$0xff] %v285_v49  ;;  %vm272_vm6 = vcmp.ge.f32.partialorder %v264_v51, 0.0  ;;  %v280_v54 = vmul.f32 0.22916667, %v264_v51 }
  0x1c   : > { %vm273_vm7 = vcmp.ge.f32.partialorder %v265_v52, 0.0  ;;  %294 = vst [vmem:[%s460_s30 + $0x20] sm:$0xff] %v286_v50  ;;  %v281_v55 = vmul.f32 0.22916667, %v265_v52 }
  0x1d   : > { %295 = vst [vmem:[%s460_s30 + $0x28] sm:$0xff] %v287_v53  ;;  %v288_v56 = vsel %vm272_vm6, %v264_v51, %v280_v54 }
  0x1e   : > { %296 = vst [vmem:[%s460_s30 + $0x30] sm:$0xff] %v288_v56  ;;  %v289_v57 = vsel %vm273_vm7, %v265_v52, %v281_v55 }
  0x1f   : > { %297 = vst [vmem:[%s460_s30 + $0x38] sm:$0xff] %v289_v57 }
  0x20 PF: > { %s14_s15 = sadd.s32 1, %s397_s15  }
  0x21   : > { %p11_p4 = scmp.ge.s32.totalorder %s14_s15, 4  }
  0x23   :  { %13 = sbr.rel (!%p11_p4) target bundleno = 1 (0x1), region = 69 }

// kernel: res_down_forward.5
= control target key start
LH: loop header
LB: loop body
LE: loop exit
PB: predicated region body
PF: predicated region fallthrough
CT: control target
= control target key end

     0   :  { %s1435_s12 = smov 0   ;;  %s3087_s0 = inlined_call_operand.vmem [shape: bf16[2,16,16,128], index: 0, kind: input, shape index: {}]   ;;  %s3088_s1 = inlined_call_operand.vmem [shape: f32[1,128], index: 1, kind: input, shape index: {}]   ;;  %s3089_s2 = inlined_call_operand.vmem [shape: f32[1,128], index: 2, kind: input, shape index: {}]   ;;  %s3090_s3 = inlined_call_operand.vmem [shape: bf16[2,8,8,128], index: 3, kind: output, shape index: {}]  }
   0x1 LB: > { %s1241_s13 = sadd.s32 4294967295, %s1413_s12   ;;  %p1245_p0 = scmp.ge.s32.totalorder %s1413_s12, 1  ;;  %s1413_s12 = sphi %s1435_s12, %s13_s12  }
   0x2   : > { %p137_p1 = scmp.lt.s32.totalorder %s1413_s12, 3 }
   0x4   : > { %p138_p2 = pnand %p1245_p0, %p137_p1 }
   0x6   : > { %141 = sbr.rel (%p138_p2) target bundleno = 213 (0xd5), region = 32 }
   0xb   : > { %p161_p3 = scmp.lt.s32.totalorder %s1241_s13, 1  ;;  %v1405_v36 = vld [vmem:[%s3088_s1] ss:$0 sm:$0xff] }
   0xd   : > { %s3391_s13 = smov (!%p161_p3, %s1241_s13), 1 }
   0xe   : > { %s1316_s14 = sshll.u32 %s3391_s13, 7  ;;  %s1317_s22 = sshll.u32 %s3391_s13, 5 }
   0xf   : > { %s1449_s17 = scalar_lea.vmem %s3087_s0, %s1316_s14  ;;  %s170_s25 = scalar_lea.vmem %s3090_s3, %s1317_s22 }
  0x10   : > { %v1319_v0 = vld [vmem:[%s1449_s17] sm:$0xff]   ;;  %v1382_v1 = vld [vmem:[%s1449_s17 + $0x8] sm:$0xff]   ;;  %v1383_v2 = vld [vmem:[%s1449_s17 + $0x10] sm:$0xff]  }
  0x11   : > { %v1384_v3 = vld [vmem:[%s1449_s17 + $0x18] sm:$0xff]   ;;  %v1385_v4 = vld [vmem:[%s1449_s17 + $0x20] sm:$0xff]   ;;  %v1386_v5 = vld [vmem:[%s1449_s17 + $0x28] sm:$0xff]   ;;  %v1320_v6 = vunpack.c.l.bf16 %v1319_v0  ;;  %v1321_v7 = vunpack.c.h.bf16 %v1319_v0  ;;  %v1324_v8 = vunpack.c.l.bf16 %v1382_v1  ;;  %v1325_v9 = vunpack.c.h.bf16 %v1382_v1 }
  0x12   : > { %v1387_v10 = vld [vmem:[%s1449_s17 + $0x30] sm:$0xff]   ;;  %v1388_v11 = vld [vmem:[%s1449_s17 + $0x38] sm:$0xff]   ;;  %v1328_v12 = vunpack.c.l.bf16 %v1383_v2  ;;  %v1329_v13 = vunpack.c.h.bf16 %v1383_v2  ;;  %v1332_v14 = vunpack.c.l.bf16 %v1384_v3  ;;  %v1333_v15 = vunpack.c.h.bf16 %v1384_v3  ;;  %v1389_v16 = vld [vmem:[%s1449_s17 + $0x40] sm:$0xff]  }
  0x13   : > { %v1390_v17 = vld [vmem:[%s1449_s17 + $0x48] sm:$0xff]   ;;  %v1336_v18 = vunpack.c.l.bf16 %v1385_v4  ;;  %v1337_v19 = vunpack.c.h.bf16 %v1385_v4  ;;  %v1340_v20 = vunpack.c.l.bf16 %v1386_v5  ;;  %v1341_v21 = vunpack.c.h.bf16 %v1386_v5  ;;  %v1391_v22 = vld [vmem:[%s1449_s17 + $0x50] sm:$0xff]   ;;  %v1392_v23 = vld [vmem:[%s1449_s17 + $0x58] sm:$0xff]  }
  0x14   : > { %v1344_v24 = vunpack.c.l.bf16 %v1387_v10  ;;  %v1345_v25 = vunpack.c.h.bf16 %v1387_v10  ;;  %v1348_v26 = vunpack.c.l.bf16 %v1388_v11  ;;  %v1349_v27 = vunpack.c.h.bf16 %v1388_v11  ;;  %v1393_v28 = vld [vmem:[%s1449_s17 + $0x60] sm:$0xff]   ;;  %v1394_v29 = vld [vmem:[%s1449_s17 + $0x68] sm:$0xff]   ;;  %v1395_v34 = vld [vmem:[%s1449_s17 + $0x70] sm:$0xff]  }
  0x15   : > { %v1352_v30 = vunpack.c.l.bf16 %v1389_v16  ;;  %v1353_v31 = vunpack.c.h.bf16 %v1389_v16  ;;  %v1356_v32 = vunpack.c.l.bf16 %v1390_v17  ;;  %v1357_v33 = vunpack.c.h.bf16 %v1390_v17  ;;  %v1396_v35 = vld [vmem:[%s1449_s17 + $0x78] sm:$0xff]   ;;  %v1406_v5 = vld [vmem:[%s3089_s2] ss:$0 sm:$0xff] }
  0x16   : > { %v1360_v37 = vunpack.c.l.bf16 %v1391_v22  ;;  %v1361_v38 = vunpack.c.h.bf16 %v1391_v22  ;;  %v1364_v39 = vunpack.c.l.bf16 %v1392_v23  ;;  %v1365_v40 = vunpack.c.h.bf16 %v1392_v23 }
  0x17   : > { %v1368_v41 = vunpack.c.l.bf16 %v1393_v28  ;;  %v1369_v42 = vunpack.c.h.bf16 %v1393_v28  ;;  %v1372_v43 = vunpack.c.l.bf16 %v1394_v29  ;;  %v1373_v44 = vunpack.c.h.bf16 %v1394_v29 }
  0x18   : > { %v1376_v45 = vunpack.c.l.bf16 %v1395_v34  ;;  %v1377_v46 = vunpack.c.h.bf16 %v1395_v34  ;;  %v1380_v47 = vunpack.c.l.bf16 %v1396_v35  ;;  %v1381_v48 = vunpack.c.h.bf16 %v1396_v35 }
  0x19   : > { %v240_v49 = vmul.f32 %v1405_v36, %v1320_v6  ;;  %v241_v50 = vmul.f32 %v1405_v36, %v1321_v7  ;;  %v242_v51 = vmul.f32 %v1405_v36, %v1324_v8  ;;  %v243_v52 = vmul.f32 %v1405_v36, %v1325_v9 }
  0x1a   : > { %v244_v53 = vmul.f32 %v1405_v36, %v1328_v12  ;;  %v245_v54 = vmul.f32 %v1405_v36, %v1329_v13  ;;  %v246_v55 = vmul.f32 %v1405_v36, %v1332_v14  ;;  %v247_v56 = vmul.f32 %v1405_v36, %v1333_v15 }
  0x1b   : > { %v248_v57 = vmul.f32 %v1405_v36, %v1336_v18  ;;  %v249_v58 = vmul.f32 %v1405_v36, %v1337_v19  ;;  %v250_v59 = vmul.f32 %v1405_v36, %v1340_v20  ;;  %v251_v60 = vmul.f32 %v1405_v36, %v1341_v21 }
  0x1c   : > { %v252_v61 = vmul.f32 %v1405_v36, %v1344_v24  ;;  %v253_v62 = vmul.f32 %v1405_v36, %v1345_v25  ;;  %v254_v63 = vmul.f32 %v1405_v36, %v1348_v26  ;;  %v255_v0 = vmul.f32 %v1405_v36, %v1349_v27 }
  0x1d   : > { %v256_v1 = vmul.f32 %v1405_v36, %v1352_v30  ;;  %v257_v2 = vmul.f32 %v1405_v36, %v1353_v31  ;;  %v258_v3 = vmul.f32 %v1405_v36, %v1356_v32  ;;  %v259_v4 = vmul.f32 %v1405_v36, %v1357_v33 }
  0x1e   : > { %v260_v6 = vmul.f32 %v1405_v36, %v1360_v37  ;;  %v261_v7 = vmul.f32 %v1405_v36, %v1361_v38  ;;  %v262_v8 = vmul.f32 %v1405_v36, %v1364_v39  ;;  %v263_v9 = vmul.f32 %v1405_v36, %v1365_v40 }
  0x1f   : > { %v264_v10 = vmul.f32 %v1405_v36, %v1368_v41  ;;  %v265_v11 = vmul.f32 %v1405_v36, %v1369_v42  ;;  %v266_v12 = vmul.f32 %v1405_v36, %v1372_v43  ;;  %v267_v13 = vmul.f32 %v1405_v36, %v1373_v44 }
  0x20   : > { %v268_v14 = vmul.f32 %v1405_v36, %v1376_v45  ;;  %v269_v15 = vmul.f32 %v1405_v36, %v1377_v46  ;;  %v270_v16 = vmul.f32 %v1405_v36, %v1380_v47  ;;  %v271_v17 = vmul.f32 %v1405_v36, %v1381_v48 }
  0x21   : > { %v1473_v18 = vadd.f32 %v1406_v5, %v240_v49  ;;  %v1475_v19 = vadd.f32 %v1406_v5, %v241_v50  ;;  %v1477_v20 = vadd.f32 %v1406_v5, %v242_v51  ;;  %v1479_v21 = vadd.f32 %v1406_v5, %v243_v52 }
  0x22   : > { %v1481_v22 = vadd.f32 %v1406_v5, %v244_v53  ;;  %v1483_v23 = vadd.f32 %v1406_v5, %v245_v54  ;;  %v1485_v24 = vadd.f32 %v1406_v5, %v246_v55  ;;  %v1487_v25 = vadd.f32 %v1406_v5, %v247_v56 }
  0x23   : > { %v1489_v26 = vadd.f32 %v1406_v5, %v248_v57  ;;  %v1491_v27 = vadd.f32 %v1406_v5, %v249_v58  ;;  %v1493_v28 = vadd.f32 %v1406_v5, %v250_v59  ;;  %v1495_v29 = vadd.f32 %v1406_v5, %v251_v60 }
  0x24   : > { %v1497_v30 = vadd.f32 %v1406_v5, %v252_v61  ;;  %v1499_v31 = vadd.f32 %v1406_v5, %v253_v62  ;;  %v1501_v32 = vadd.f32 %v1406_v5, %v254_v63  ;;  %v1503_v33 = vadd.f32 %v1406_v5, %v255_v0 }
  0x25   : > { %v1505_v34 = vadd.f32 %v1406_v5, %v256_v1  ;;  %v1507_v35 = vadd.f32 %v1406_v5, %v257_v2  ;;  %v1509_v36 = vadd.f32 %v1406_v5, %v258_v3  ;;  %v1511_v37 = vadd.f32 %v1406_v5, %v259_v4 }
  0x26   : > { %v1513_v38 = vadd.f32 %v1406_v5, %v260_v6  ;;  %v1515_v39 = vadd.f32 %v1406_v5, %v261_v7  ;;  %v1517_v40 = vadd.f32 %v1406_v5, %v262_v8  ;;  %v1519_v41 = vadd.f32 %v1406_v5, %v263_v9 }
  0x27   : > { %v1521_v42 = vadd.f32 %v1406_v5, %v264_v10  ;;  %v1523_v43 = vadd.f32 %v1406_v5, %v265_v11  ;;  %v1525_v44 = vadd.f32 %v1406_v5, %v266_v12  ;;  %v1527_v45 = vadd.f32 %v1406_v5, %v267_v13 }
  0x28   : > { %v1529_v46 = vadd.f32 %v1406_v5, %v268_v14  ;;  %v1531_v47 = vadd.f32 %v1406_v5, %v269_v15  ;;  %vm307_vm0 = vcmp.ge.f32.partialorder %v1473_v18, 0.0  ;;  %vm308_vm1 = vcmp.ge.f32.partialorder %v1475_v19, 0.0 }
  0x29   : > { %vm309_vm2 = vcmp.ge.f32.partialorder %v1477_v20, 0.0  ;;  %vm310_vm3 = vcmp.ge.f32.partialorder %v1479_v21, 0.0  ;;  %vm311_vm4 = vcmp.ge.f32.partialorder %v1481_v22, 0.0  ;;  %vm312_vm5 = vcmp.ge.f32.partialorder %v1483_v23, 0.0 }
  0x2a   : > { %vm313_vm6 = vcmp.ge.f32.partialorder %v1485_v24, 0.0  ;;  %vm314_vm7 = vcmp.ge.f32.partialorder %v1487_v25, 0.0  ;;  %vm315_vm8 = vcmp.ge.f32.partialorder %v1489_v26, 0.0  ;;  %v1543_v48 = vadd.f32 %v1406_v5, %v270_v16 }
  0x2b   : > { %v339_v49 = vmul.f32 0.22916667, %v1473_v18  ;;  %v340_v50 = vmul.f32 0.22916667, %v1475_v19  ;;  %v341_v51 = vmul.f32 0.22916667, %v1477_v20  ;;  %v1552_v52 = vadd.f32 %v1406_v5, %v271_v17 }
  0x2c   : > { %vm322_vm15 = vcmp.ge.f32.partialorder %v1503_v33, 0.0  ;;  %vm323_vm10 = vcmp.ge.f32.partialorder %v1505_v34, 0.0  ;;  %v342_v53 = vmul.f32 0.22916667, %v1479_v21  ;;  %v343_v54 = vmul.f32 0.22916667, %v1481_v22 }
  0x2d   : > { %v344_v55 = vmul.f32 0.22916667, %v1483_v23  ;;  %vm328_vm14 = vcmp.ge.f32.partialorder %v1515_v39, 0.0  ;;  %v345_v56 = vmul.f32 0.22916667, %v1485_v24  ;;  %v1571_v59 = vsel %vm307_vm0, %v1473_v18, %v339_v49 }
  0x2e   : > { %v346_v57 = vmul.f32 0.22916667, %v1487_v25  ;;  %v347_v58 = vmul.f32 0.22916667, %v1489_v26  ;;  %vm332_vm9 = vcmp.ge.f32.partialorder %v1523_v43, 0.0  ;;  %v372_v63 = vsel %vm308_vm1, %v1475_v19, %v340_v50 }
  0x2f   : > { %v348_v60 = vmul.f32 0.22916667, %v1491_v27  ;;  %v349_v61 = vmul.f32 0.22916667, %v1493_v28  ;;  %v350_v62 = vmul.f32 0.22916667, %v1495_v29  ;;  %v373_v3 = vsel %vm309_vm2, %v1477_v20, %v341_v51 }
  0x30   : > { %vm334_vm11 = vcmp.ge.f32.partialorder %v1527_v45, 0.0  ;;  %vm335_vm13 = vcmp.ge.f32.partialorder %v1529_v46, 0.0  ;;  %vm336_vm12 = vcmp.ge.f32.partialorder %v1531_v47, 0.0  ;;  %v351_v0 = vmul.f32 0.22916667, %v1497_v30 }
  0x31   : > { %v352_v1 = vmul.f32 0.22916667, %v1499_v31  ;;  %v353_v2 = vmul.f32 0.22916667, %v1501_v32  ;;  %vm337_vm1 = vcmp.ge.f32.partialorder %v1543_v48, 0.0  ;;  %vm338_vm0 = vcmp.ge.f32.partialorder %v1552_v52, 0.0 }
  0x32   : > { %v354_v4 = vmul.f32 0.22916667, %v1503_v33  ;;  %v355_v5 = vmul.f32 0.22916667, %v1505_v34  ;;  %v356_v6 = vmul.f32 0.22916667, %v1507_v35  ;;  %v374_v7 = vsel %vm310_vm3, %v1479_v21, %v342_v53 }
  0x33   : > { %v357_v8 = vmul.f32 0.22916667, %v1509_v36  ;;  %v358_v9 = vmul.f32 0.22916667, %v1511_v37  ;;  %v359_v10 = vmul.f32 0.22916667, %v1513_v38  ;;  %v375_v11 = vsel %vm311_vm4, %v1481_v22, %v343_v54 }
  0x34   : > { %v360_v12 = vmul.f32 0.22916667, %v1515_v39  ;;  %v361_v13 = vmul.f32 0.22916667, %v1517_v40  ;;  %v362_v14 = vmul.f32 0.22916667, %v1519_v41  ;;  %v376_v15 = vsel %vm312_vm5, %v1483_v23, %v344_v55 }
  0x35   : > { %v363_v16 = vmul.f32 0.22916667, %v1521_v42  ;;  %v364_v17 = vmul.f32 0.22916667, %v1523_v43  ;;  %v365_v18 = vmul.f32 0.22916667, %v1525_v44  ;;  %v377_v19 = vsel %vm313_vm6, %v1485_v24, %v345_v56 }
  0x36   : > { %v366_v20 = vmul.f32 0.22916667, %v1527_v45  ;;  %v367_v21 = vmul.f32 0.22916667, %v1529_v46  ;;  %v368_v22 = vmul.f32 0.22916667, %v1531_v47  ;;  %v378_v23 = vsel %vm314_vm7, %v1487_v25, %v346_v57 }
  0x37   : > { %v369_v49 = vmul.f32 0.22916667, %v1543_v48  ;;  %v370_v50 = vmul.f32 0.22916667, %v1552_v52  ;;  %v379_v51 = vsel %vm315_vm8, %v1489_v26, %v347_v58  ;;  %vm3151_vm2 = vcmp.ge.f32.partialorder %v1491_v27, 0.0 }
  0x38   : > { %v380_v24 = vsel %vm3151_vm2, %v1491_v27, %v348_v60  ;;  %vm3152_vm3 = vcmp.ge.f32.partialorder %v1493_v28, 0.0  ;;  %vm3153_vm4 = vcmp.ge.f32.partialorder %v1495_v29, 0.0  ;;  %vm3154_vm5 = vcmp.ge.f32.partialorder %v1497_v30, 0.0 }
  0x39   : > { %v381_v53 = vsel %vm3152_vm3, %v1493_v28, %v349_v61  ;;  %v382_v25 = vsel %vm3153_vm4, %v1495_v29, %v350_v62  ;;  %v383_v54 = vsel %vm3154_vm5, %v1497_v30, %v351_v0  ;;  %vm3155_vm6 = vcmp.ge.f32.partialorder %v1499_v31, 0.0 }
  0x3a   : > { %v384_v26 = vsel %vm3155_vm6, %v1499_v31, %v352_v1  ;;  %vm3156_vm7 = vcmp.ge.f32.partialorder %v1501_v32, 0.0  ;;  %v386_v28 = vsel %vm322_vm15, %v1503_v33, %v354_v4  ;;  %v387_v29 = vsel %vm323_vm10, %v1505_v34, %v355_v5 }
  0x3b   : > { %v385_v27 = vsel %vm3156_vm7, %v1501_v32, %v353_v2  ;;  %vm3157_vm8 = vcmp.ge.f32.partialorder %v1507_v35, 0.0  ;;  %vm3158_vm2 = vcmp.ge.f32.partialorder %v1509_v36, 0.0  ;;  %vm3159_vm3 = vcmp.ge.f32.partialorder %v1511_v37, 0.0 }
  0x3c   : > { %v388_v30 = vsel %vm3157_vm8, %v1507_v35, %v356_v6  ;;  %v389_v31 = vsel %vm3158_vm2, %v1509_v36, %v357_v8  ;;  %v390_v32 = vsel %vm3159_vm3, %v1511_v37, %v358_v9  ;;  %vm3160_vm4 = vcmp.ge.f32.partialorder %v1513_v38, 0.0 }
  0x3d   : > { %v391_v33 = vsel %vm3160_vm4, %v1513_v38, %v359_v10  ;;  %v392_v34 = vsel %vm328_vm14, %v1515_v39, %v360_v12  ;;  %vm3161_vm10 = vcmp.ge.f32.partialorder %v1517_v40, 0.0  ;;  %vm3162_vm15 = vcmp.ge.f32.partialorder %v1519_v41, 0.0 }
  0x3e   : > { %v393_v35 = vsel %vm3161_vm10, %v1517_v40, %v361_v13  ;;  %v394_v36 = vsel %vm3162_vm15, %v1519_v41, %v362_v14  ;;  %vm3163_vm5 = vcmp.ge.f32.partialorder %v1521_v42, 0.0  ;;  %v396_v38 = vsel %vm332_vm9, %v1523_v43, %v364_v17 }
  0x3f   : > { %v395_v37 = vsel %vm3163_vm5, %v1521_v42, %v363_v16  ;;  %vm3164_vm6 = vcmp.ge.f32.partialorder %v1525_v44, 0.0  ;;  %v398_v40 = vsel %vm334_vm11, %v1527_v45, %v366_v20  ;;  %v399_v41 = vsel %vm335_vm13, %v1529_v46, %v367_v21 }
  0x40   : > { %v397_v39 = vsel %vm3164_vm6, %v1525_v44, %v365_v18  ;;  %v400_v42 = vsel %vm336_vm12, %v1531_v47, %v368_v22  ;;  %v401_v43 = vsel %vm337_vm1, %v1543_v48, %v369_v49  ;;  %v402_v44 = vsel %vm338_vm0, %v1552_v52, %v370_v50 }
  0x41   : > { %v1700_v55 = vadd.f32 %v373_v3, %v1571_v59  ;;  %v1702_v45 = vadd.f32 %v374_v7, %v372_v63  ;;  %v1704_v56 = vadd.f32 %v377_v19, %v375_v11  ;;  %v1706_v46 = vadd.f32 %v378_v23, %v376_v15 }
  0x42   : > { %v1708_v57 = vadd.f32 %v381_v53, %v379_v51  ;;  %v1710_v47 = vadd.f32 %v382_v25, %v380_v24  ;;  %v1712_v58 = vadd.f32 %v385_v27, %v383_v54  ;;  %v1714_v48 = vadd.f32 %v386_v28, %v384_v26 }
  0x43   : > { %v1716_v60 = vadd.f32 %v389_v31, %v387_v29  ;;  %v1718_v52 = vadd.f32 %v390_v32, %v388_v30  ;;  %v1720_v59 = vadd.f32 %v393_v35, %v391_v33  ;;  %v1722_v61 = vadd.f32 %v394_v36, %v392_v34 }
  0x44   : > { %v1724_v62 = vadd.f32 %v397_v39, %v395_v37  ;;  %v1726_v63 = vadd.f32 %v398_v40, %v396_v38  ;;  %v1728_v0 = vadd.f32 %v401_v43, %v399_v41  ;;  %v1730_v1 = vadd.f32 %v402_v44, %v400_v42 }
  0x45   : > { %v3091_v2 = vrot.slane %v1700_v55, 2  ;;  %v3092_v3 = vrot.slane %v1700_v55, 4  ;;  %v3093_v4 = vrot.slane %v1700_v55, 6  ;;  %v3094_v5 = vrot.slane %v1702_v45, 2 }
  0x46   : > { %v3095_v6 = vrot.slane %v1702_v45, 4  ;;  %v3096_v7 = vrot.slane %v1702_v45, 6  ;;  %v3097_v8 = vrot.slane %v1704_v56, 2  ;;  %v3098_v9 = vrot.slane %v1704_v56, 4 }
  0x47   : > { %v3099_v10 = vrot.slane %v1704_v56, 6  ;;  %v3100_v11 = vrot.slane %v1706_v46, 2  ;;  %v3101_v12 = vrot.slane %v1706_v46, 4  ;;  %v3102_v13 = vrot.slane %v1706_v46, 6 }
  0x48   : > { %v3103_v14 = vrot.slane %v1708_v57, 2  ;;  %v3104_v15 = vrot.slane %v1708_v57, 4  ;;  %v3105_v16 = vrot.slane %v1708_v57, 6  ;;  %v3106_v17 = vrot.slane %v1710_v47, 2 }
  0x49   : > { %v3107_v18 = vrot.slane %v1710_v47, 4  ;;  %v3108_v19 = vrot.slane %v1710_v47, 6  ;;  %v3109_v20 = vrot.slane %v1712_v58, 2  ;;  %v3110_v21 = vrot.slane %v1712_v58, 4 }
  0x4a   : > { %v3111_v22 = vrot.slane %v1712_v58, 6  ;;  %v3112_v23 = vrot.slane %v1714_v48, 2  ;;  %v3113_v49 = vrot.slane %v1714_v48, 4  ;;  %v3114_v50 = vrot.slane %v1714_v48, 6 }
  0x4b   : > { %v3115_v51 = vrot.slane %v1716_v60, 2  ;;  %v3116_v24 = vrot.slane %v1716_v60, 4  ;;  %v3117_v53 = vrot.slane %v1716_v60, 6  ;;  %v3118_v25 = vrot.slane %v1718_v52, 2 }
  0x4c   : > { %v3119_v54 = vrot.slane %v1718_v52, 4  ;;  %v3120_v26 = vrot.slane %v1718_v52, 6  ;;  %v3121_v27 = vrot.slane %v1720_v59, 2  ;;  %v3122_v28 = vrot.slane %v1720_v59, 4 }
  0x4d   : > { %v3123_v29 = vrot.slane %v1720_v59, 6  ;;  %v3124_v30 = vrot.slane %v1722_v61, 2  ;;  %v3125_v31 = vrot.slane %v1722_v61, 4  ;;  %v3126_v32 = vrot.slane %v1722_v61, 6 }
  0x4e   : > { %v3127_v33 = vrot.slane %v1724_v62, 2  ;;  %v3128_v34 = vrot.slane %v1724_v62, 4  ;;  %v3129_v37 = vrot.slane %v1726_v63, 4  ;;  %v1783_v36 = vrot.slane %v3091_v2, 9 }
  0x4f   : > { %v1787_v38 = vrot.slane %v3092_v3, 9  ;;  %v1791_v40 = vrot.slane %v3093_v4, 9  ;;  %v1796_v43 = vrot.slane %v3094_v5, 9  ;;  %v1800_v35 = vrot.slane %v3095_v6, 9 }
  0x50   : > { %v1804_v2 = vrot.slane %v3096_v7, 9  ;;  %v1809_v4 = vrot.slane %v3097_v8, 9  ;;  %v1813_v42 = vrot.slane %v3098_v9, 9  ;;  %v1817_v5 = vrot.slane %v3099_v10, 9 }
  0x51   : > { %v1822_v7 = vrot.slane %v3100_v11, 9  ;;  %v1826_v3 = vrot.slane %v3101_v12, 9  ;;  %v1830_v8 = vrot.slane %v3102_v13, 9  ;;  %v1835_v10 = vrot.slane %v3103_v14, 9 }
  0x52   : > { %v1839_v6 = vrot.slane %v3104_v15, 9  ;;  %v1843_v11 = vrot.slane %v3105_v16, 9  ;;  %v1848_v13 = vrot.slane %v3106_v17, 9  ;;  %v1852_v9 = vrot.slane %v3107_v18, 9 }
  0x53   : > { %v1856_v14 = vrot.slane %v3108_v19, 9  ;;  %v1861_v16 = vrot.slane %v3109_v20, 9  ;;  %v1865_v12 = vrot.slane %v3110_v21, 9  ;;  %v1869_v17 = vrot.slane %v3111_v22, 9 }
  0x54   : > { %v1874_v19 = vrot.slane %v3112_v23, 9  ;;  %v1878_v15 = vrot.slane %v3113_v49, 9  ;;  %v1882_v20 = vrot.slane %v3114_v50, 9  ;;  %v1887_v22 = vrot.slane %v3115_v51, 9 }
  0x55   : > { %v1891_v18 = vrot.slane %v3116_v24, 9  ;;  %v1895_v23 = vrot.slane %v3117_v53, 9  ;;  %v1900_v50 = vrot.slane %v3118_v25, 9  ;;  %v1904_v21 = vrot.slane %v3119_v54, 9 }
  0x56   : > { %v1908_v51 = vrot.slane %v3120_v26, 9  ;;  %v1913_v53 = vrot.slane %v3121_v27, 9  ;;  %v1917_v49 = vrot.slane %v3122_v28, 9  ;;  %v1921_v25 = vrot.slane %v3123_v29, 9 }
  0x57   : > { %v1926_v26 = vrot.slane %v3124_v30, 9  ;;  %v1930_v24 = vrot.slane %v3125_v31, 9  ;;  %v1934_v27 = vrot.slane %v3126_v32, 9  ;;  %v1939_v29 = vrot.slane %v3127_v33, 9 }
  0x58   : > { %v1943_v54 = vrot.slane %v3128_v34, 9  ;;  %v3166_v30 = vrot.slane %v1724_v62, 6  ;;  %v3168_v41 = vrot.slane %v1726_v63, 2  ;;  %v1956_v28 = vrot.slane %v3129_v37, 9 }
  0x59   : > { %v3171_v33 = vrot.slane %v1726_v63, 6  ;;  %v3175_v31 = vrot.slane %v1728_v0, 4  ;;  %v3180_v34 = vrot.slane %v1730_v1, 4  ;;  %vm1044_vm9 = vcmask 1041409  }
  0x5a   : > { %3165 = vst [vmem:[#allocation2_spill] sm:$0xff] %v1943_v54  ;;  %v1947_v44 = vrot.slane %v3166_v30, 9  ;;  %v1952_v32 = vrot.slane %v3168_v41, 9  ;;  %v3173_v54 = vrot.slane %v1728_v0, 2  ;;  %v3177_v41 = vrot.slane %v1728_v0, 6 }
  0x5b   : > { %3170 = vst [vmem:[#allocation5_spill] sm:$0xff] %v1956_v28  ;;  %v1960_v39 = vrot.slane %v3171_v33, 9  ;;  %v3178_v28 = vrot.slane %v1730_v1, 2  ;;  %vm1047_vm11 = vcmask 1042434   ;;  %vm1050_vm12 = vcmask 1043459  }
  0x5c   : > { %3167 = vst [vmem:[#allocation3_spill] sm:$0xff] %v1947_v44  ;;  %v1965_v30 = vrot.slane %v3173_v54, 9  ;;  %v1969_v44 = vrot.slane %v3175_v31, 9  ;;  %v3181_v54 = vrot.slane %v1730_v1, 6  ;;  %v3183_v31 = vrot.slane %v1700_v55, 9 }
  0x5d   : > { %3169 = vst [vmem:[#allocation4_spill] sm:$0xff] %v1952_v32  ;;  %v1973_v32 = vrot.slane %v3177_v41, 9  ;;  %v1978_v33 = vrot.slane %v3178_v28, 9  ;;  %v3185_v41 = vrot.slane %v1700_v55, 2  ;;  %v3186_v28 = vrot.slane %v1700_v55, 4 }
  0x5e   : > { %3172 = vst [vmem:[#allocation6_spill] sm:$0xff] %v1960_v39  ;;  %v1982_v39 = vrot.slane %v3180_v34, 9  ;;  %v3187_v34 = vrot.slane %v1700_v55, 6  ;;  %vm1053_vm13 = vcmask 1044484   ;;  %vm1056_vm14 = vcmask 1045509  }
  0x5f   : > { %3174 = vst [vmem:[#allocation7_spill] sm:$0xff] %v1965_v30  ;;  %v1986_v30 = vrot.slane %v3181_v54, 9  ;;  %v1996_v37 = vadd.f32 %v1783_v36, %v3185_v41  ;;  %v3190_v41 = vrot.slane %v1702_v45, 4  ;;  %vm1059_vm0 = vcmask 1046534  }
  0x60   : > { %3176 = vst [vmem:[#allocation8_spill] sm:$0xff] %v1969_v44  ;;  %v1991_v44 = vadd.f32 %v3183_v31, %v1700_v55  ;;  %v2006_v54 = vadd.f32 %v1791_v40, %v3187_v34  ;;  %v3191_v55 = vrot.slane %v1702_v45, 6  ;;  %v3193_v34 = vrot.slane %v1704_v56, 2 }
  0x61   : > { %3179 = vst [vmem:[#allocation9_spill] sm:$0xff] %v1978_v33  ;;  %v2001_v33 = vadd.f32 %v1787_v38, %v3186_v28  ;;  %v2021_v38 = vadd.f32 %v1800_v35, %v3190_v41  ;;  %v3192_v28 = vrot.slane %v1704_v56, 9  ;;  %v3196_v41 = vrot.slane %v1706_v46, 9 }
  0x62   : > { %3182 = vst [vmem:[#allocation10_spill] sm:$0xff] %v1986_v30  ;;  %v3188_v30 = vrot.slane %v1702_v45, 9  ;;  %v2026_v40 = vadd.f32 %v1804_v2, %v3191_v55  ;;  %vm1062_vm1 = vcmask 1047559  }
  0x63   : > { %3184 = vst [vmem:[#allocation11_spill] sm:$0xff] %v1991_v44  ;;  %v3189_v44 = vrot.slane %v1702_v45, 2  ;;  %v2051_v55 = vadd.f32 %v3196_v41, %v1706_v46  ;;  %v3201_v41 = vrot.slane %v1708_v57, 2 }
  0x64   : > { %v2011_v31 = vadd.f32 %v3188_v30, %v1702_v45  ;;  %v2031_v30 = vadd.f32 %v3192_v28, %v1704_v56  ;;  %v3195_v45 = vrot.slane %v1704_v56, 6  ;;  %v3197_v28 = vrot.slane %v1706_v46, 2 }
  0x65   : > { %v2016_v36 = vadd.f32 %v1796_v43, %v3189_v44  ;;  %v2036_v43 = vadd.f32 %v1809_v4, %v3193_v34  ;;  %v3194_v44 = vrot.slane %v1704_v56, 4  ;;  %v3198_v34 = vrot.slane %v1706_v46, 4 }
  0x66   : > { %v2046_v2 = vadd.f32 %v1817_v5, %v3195_v45  ;;  %v2056_v4 = vadd.f32 %v1822_v7, %v3197_v28  ;;  %v3199_v56 = vrot.slane %v1706_v46, 6  ;;  %v2076_v7 = vadd.f32 %v1835_v10, %v3201_v41 }
  0x67   : > { %v2041_v35 = vadd.f32 %v1813_v42, %v3194_v44  ;;  %v2061_v42 = vadd.f32 %v1826_v3, %v3198_v34  ;;  %v3200_v44 = vrot.slane %v1708_v57, 9  ;;  %v3202_v28 = vrot.slane %v1708_v57, 4 }
  0x68   : > { %v2066_v5 = vadd.f32 %v1830_v8, %v3199_v56  ;;  %v3203_v46 = vrot.slane %v1708_v57, 6  ;;  %v3204_v34 = vrot.slane %v1710_v47, 9  ;;  %v3206_v41 = vrot.slane %v1710_v47, 4 }
  0x69   : > { %v2071_v45 = vadd.f32 %v3200_v44, %v1708_v57  ;;  %v2081_v3 = vadd.f32 %v1839_v6, %v3202_v28  ;;  %v3205_v44 = vrot.slane %v1710_v47, 2  ;;  %v3207_v57 = vrot.slane %v1710_v47, 6 }
  0x6a   : > { %v2086_v8 = vadd.f32 %v1843_v11, %v3203_v46  ;;  %v2091_v56 = vadd.f32 %v3204_v34, %v1710_v47  ;;  %v2101_v6 = vadd.f32 %v1852_v9, %v3206_v41  ;;  %v3208_v28 = vrot.slane %v1712_v58, 9 }
  0x6b   : > { %v2096_v10 = vadd.f32 %v1848_v13, %v3205_v44  ;;  %v2106_v11 = vadd.f32 %v1856_v14, %v3207_v57  ;;  %v3209_v34 = vrot.slane %v1712_v58, 2  ;;  %v3210_v44 = vrot.slane %v1712_v58, 4 }
  0x6c   : > { %v2111_v46 = vadd.f32 %v3208_v28, %v1712_v58  ;;  %v3211_v47 = vrot.slane %v1712_v58, 6  ;;  %v3212_v41 = vrot.slane %v1714_v48, 9  ;;  %v3213_v28 = vrot.slane %v1714_v48, 2 }
  0x6d   : > { %v2116_v13 = vadd.f32 %v1861_v16, %v3209_v34  ;;  %v2121_v9 = vadd.f32 %v1865_v12, %v3210_v44  ;;  %v3214_v34 = vrot.slane %v1714_v48, 4  ;;  %v3215_v58 = vrot.slane %v1714_v48, 6 }
  0x6e   : > { %v2126_v14 = vadd.f32 %v1869_v17, %v3211_v47  ;;  %v2131_v57 = vadd.f32 %v3212_v41, %v1714_v48  ;;  %v2136_v16 = vadd.f32 %v1874_v19, %v3213_v28  ;;  %v3216_v44 = vrot.slane %v1716_v60, 9 }
  0x6f   : > { %v2141_v12 = vadd.f32 %v1878_v15, %v3214_v34  ;;  %v2146_v17 = vadd.f32 %v1882_v20, %v3215_v58  ;;  %v3217_v41 = vrot.slane %v1716_v60, 2  ;;  %v3218_v28 = vrot.slane %v1716_v60, 4 }
  0x70   : > { %v2151_v47 = vadd.f32 %v3216_v44, %v1716_v60  ;;  %v3219_v48 = vrot.slane %v1716_v60, 6  ;;  %v3220_v34 = vrot.slane %v1718_v52, 9  ;;  %v3221_v44 = vrot.slane %v1718_v52, 2 }
  0x71   : > { %v2156_v19 = vadd.f32 %v1887_v22, %v3217_v41  ;;  %v2161_v15 = vadd.f32 %v1891_v18, %v3218_v28  ;;  %v3222_v41 = vrot.slane %v1718_v52, 4  ;;  %v3223_v60 = vrot.slane %v1718_v52, 6 }
  0x72   : > { %v2166_v20 = vadd.f32 %v1895_v23, %v3219_v48  ;;  %v2171_v58 = vadd.f32 %v3220_v34, %v1718_v52  ;;  %v2176_v22 = vadd.f32 %v1900_v50, %v3221_v44  ;;  %v3224_v28 = vrot.slane %v1720_v59, 9 }
  0x73   : > { %v2181_v18 = vadd.f32 %v1904_v21, %v3222_v41  ;;  %v2186_v23 = vadd.f32 %v1908_v51, %v3223_v60  ;;  %v3225_v34 = vrot.slane %v1720_v59, 2  ;;  %v3226_v44 = vrot.slane %v1720_v59, 4 }
  0x74   : > { %v2191_v48 = vadd.f32 %v3224_v28, %v1720_v59  ;;  %v3227_v52 = vrot.slane %v1720_v59, 6  ;;  %v3228_v41 = vrot.slane %v1722_v61, 9  ;;  %v3229_v28 = vrot.slane %v1722_v61, 2 }
  0x75   : > { %v2196_v50 = vadd.f32 %v1913_v53, %v3225_v34  ;;  %v2201_v21 = vadd.f32 %v1917_v49, %v3226_v44  ;;  %v3231_v34 = vrot.slane %v1722_v61, 4  ;;  %v3232_v59 = vrot.slane %v1722_v61, 6 }
  0x76   : > { %v2206_v51 = vadd.f32 %v1921_v25, %v3227_v52  ;;  %v2211_v60 = vadd.f32 %v3228_v41, %v1722_v61  ;;  %v2216_v53 = vadd.f32 %v1926_v26, %v3229_v28  ;;  %v3234_v44 = vrot.slane %v1724_v62, 9 }
  0x77   : > { %v2221_v49 = vadd.f32 %v1930_v24, %v3231_v34  ;;  %v2226_v25 = vadd.f32 %v1934_v27, %v3232_v59  ;;  %v3236_v41 = vrot.slane %v1724_v62, 2  ;;  %v3238_v28 = vrot.slane %v1724_v62, 4  ;;  %v3241_v34 = vld [vmem:[#allocation3_spill] sm:$0xff] }
  0x78   : > { %3230 = vst [vmem:[#allocation12_spill] sm:$0xff] %v2216_v53  ;;  %v2231_v52 = vadd.f32 %v3234_v44, %v1724_v62  ;;  %v3239_v53 = vld [vmem:[#allocation2_spill] sm:$0xff]  ;;  %v3240_v61 = vrot.slane %v1724_v62, 6  ;;  %v3243_v59 = vrot.slane %v1726_v63, 9  ;;  %v3250_v62 = vrot.slane %v1726_v63, 6 }
  0x79   : > { %3233 = vst [vmem:[#allocation13_spill] sm:$0xff] %v2226_v25  ;;  %v2236_v26 = vadd.f32 %v1939_v29, %v3236_v41  ;;  %v2241_v24 = vadd.f32 %v3239_v53, %v3238_v28  ;;  %v3246_v25 = vld [vmem:[#allocation4_spill] sm:$0xff]  ;;  %v3248_v41 = vrot.slane %v1726_v63, 4  ;;  %v3251_v28 = vld [vmem:[#allocation6_spill] sm:$0xff] }
  0x7a   : > { %3235 = vst [vmem:[#allocation14_spill] sm:$0xff] %v2231_v52  ;;  %v2246_v27 = vadd.f32 %v3241_v34, %v3240_v61  ;;  %v2251_v44 = vadd.f32 %v3243_v59, %v1726_v63  ;;  %v3245_v52 = vrot.slane %v1726_v63, 2  ;;  %v2266_v61 = vadd.f32 %v3251_v28, %v3250_v62 }
  0x7b   : > { %3237 = vst [vmem:[#allocation15_spill] sm:$0xff] %v2236_v26  ;;  %v3249_v26 = vld [vmem:[#allocation5_spill] sm:$0xff]  ;;  %v3252_v34 = vrot.slane %v1728_v0, 9  ;;  %v3258_v63 = vrot.slane %v1728_v0, 6  ;;  %v3260_v62 = vrot.slane %v1730_v1, 9 }
  0x7c   : > { %3242 = vst [vmem:[#allocation2_spill] sm:$0xff] %v2246_v27  ;;  %v2256_v29 = vadd.f32 %v3246_v25, %v3245_v52  ;;  %v2261_v53 = vadd.f32 %v3249_v26, %v3248_v41  ;;  %v3255_v27 = vld [vmem:[#allocation7_spill] sm:$0xff]  ;;  %v3256_v52 = vrot.slane %v1728_v0, 4 }
  0x7d   : > { %3244 = vst [vmem:[#allocation3_spill] sm:$0xff] %v2251_v44  ;;  %v2271_v59 = vadd.f32 %v3252_v34, %v1728_v0  ;;  %v3254_v44 = vrot.slane %v1728_v0, 2  ;;  %v2286_v41 = vadd.f32 %v1973_v32, %v3258_v63  ;;  %v2291_v28 = vadd.f32 %v3260_v62, %v1730_v1  ;;  %v3267_v63 = vld [vmem:[#allocation11_spill] sm:$0xff] }
  0x7e   : > { %3247 = vst [vmem:[#allocation4_spill] sm:$0xff] %v2256_v29  ;;  %v3257_v29 = vld [vmem:[#allocation8_spill] sm:$0xff]  ;;  %v3262_v34 = vrot.slane %v1730_v1, 2  ;;  %v3265_v0 = vrot.slane %v1730_v1, 6  ;;  %v2312_v62 = vmul.f32 0.25, %v1996_v37  ;;  %v2333_v37 = vmul.f32 0.25, %v2031_v30 }
  0x7f   : > { %3253 = vst [vmem:[#allocation5_spill] sm:$0xff] %v2271_v59  ;;  %v2276_v25 = vadd.f32 %v3255_v27, %v3254_v44  ;;  %v2281_v26 = vadd.f32 %v3257_v29, %v3256_v52  ;;  %v3263_v59 = vld [vmem:[#allocation9_spill] sm:$0xff]  ;;  %v3264_v44 = vrot.slane %v1730_v1, 4  ;;  %v3266_v52 = vld [vmem:[#allocation10_spill] sm:$0xff]  ;;  %v2324_v1 = vmul.f32 0.25, %v2016_v36 }
  0x80   : > { %3259 = vst [vmem:[#allocation6_spill] sm:$0xff] %v2286_v41  ;;  %v2296_v27 = vadd.f32 %v3263_v59, %v3262_v34  ;;  %v2306_v32 = vadd.f32 %v3266_v52, %v3265_v0  ;;  %v2309_v41 = vmul.f32 0.25, %v3267_v63  ;;  %v2318_v59 = vmul.f32 0.25, %v2006_v54 }
  0x81   : > { %3261 = vst [vmem:[#allocation7_spill] sm:$0xff] %v2291_v28  ;;  %v2301_v29 = vadd.f32 %v1982_v39, %v3264_v44  ;;  %v2315_v28 = vmul.f32 0.25, %v2001_v33  ;;  %v2321_v39 = vmul.f32 0.25, %v2011_v31  ;;  %v2327_v34 = vmul.f32 0.25, %v2021_v38 }
  0x82   : > { %v2330_v44 = vmul.f32 0.25, %v2026_v40  ;;  %v2336_v33 = vmul.f32 0.25, %v2036_v43  ;;  %v2339_v54 = vmul.f32 0.25, %v2041_v35  ;;  %v2342_v31 = vmul.f32 0.25, %v2046_v2 }
  0x83   : > { %v2345_v36 = vmul.f32 0.25, %v2051_v55  ;;  %v2348_v38 = vmul.f32 0.25, %v2056_v4  ;;  %v2351_v40 = vmul.f32 0.25, %v2061_v42  ;;  %v2354_v30 = vmul.f32 0.25, %v2066_v5 }
  0x84   : > { %v2357_v43 = vmul.f32 0.25, %v2071_v45  ;;  %v2360_v35 = vmul.f32 0.25, %v2076_v7  ;;  %v2363_v2 = vmul.f32 0.25, %v2081_v3  ;;  %v2366_v55 = vmul.f32 0.25, %v2086_v8 }
  0x85   : > { %v2369_v4 = vmul.f32 0.25, %v2091_v56  ;;  %v2372_v42 = vmul.f32 0.25, %v2096_v10  ;;  %v2375_v5 = vmul.f32 0.25, %v2101_v6  ;;  %v2378_v45 = vmul.f32 0.25, %v2106_v11 }
  0x86   : > { %v2381_v7 = vmul.f32 0.25, %v2111_v46  ;;  %v2384_v3 = vmul.f32 0.25, %v2116_v13  ;;  %v2387_v8 = vmul.f32 0.25, %v2121_v9  ;;  %v2390_v56 = vmul.f32 0.25, %v2126_v14 }
  0x87   : > { %v2393_v10 = vmul.f32 0.25, %v2131_v57  ;;  %v2396_v6 = vmul.f32 0.25, %v2136_v16  ;;  %v2399_v11 = vmul.f32 0.25, %v2141_v12  ;;  %v2402_v46 = vmul.f32 0.25, %v2146_v17 }
  0x88   : > { %v2405_v13 = vmul.f32 0.25, %v2151_v47  ;;  %v2408_v9 = vmul.f32 0.25, %v2156_v19  ;;  %v2411_v14 = vmul.f32 0.25, %v2161_v15  ;;  %v2414_v57 = vmul.f32 0.25, %v2166_v20 }
  0x89   : > { %v2417_v16 = vmul.f32 0.25, %v2171_v58  ;;  %v2420_v12 = vmul.f32 0.25, %v2176_v22  ;;  %v2423_v17 = vmul.f32 0.25, %v2181_v18  ;;  %v2426_v47 = vmul.f32 0.25, %v2186_v23  ;;  %v3275_v18 = vld [vmem:[#allocation12_spill] sm:$0xff] }
  0x8a   : > { %3268 = vst [vmem:[#allocation8_spill] sm:$0xff] %v2411_v14  ;;  %v2429_v19 = vmul.f32 0.25, %v2191_v48  ;;  %v2432_v15 = vmul.f32 0.25, %v2196_v50  ;;  %v2435_v20 = vmul.f32 0.25, %v2201_v21  ;;  %v2438_v58 = vmul.f32 0.25, %v2206_v51  ;;  %v3278_v48 = vld [vmem:[#allocation13_spill] sm:$0xff] }
  0x8b   : > { %3269 = vst [vmem:[#allocation9_spill] sm:$0xff] %v2417_v16  ;;  %v2441_v22 = vmul.f32 0.25, %v2211_v60  ;;  %v2444_v0 = vmul.f32 0.25, %v3275_v18  ;;  %v2447_v23 = vmul.f32 0.25, %v2221_v49  ;;  %v2450_v52 = vmul.f32 0.25, %v3278_v48  ;;  %v3279_v50 = vld [vmem:[#allocation14_spill] sm:$0xff] }
  0x8c   : > { %3270 = vst [vmem:[#allocation10_spill] sm:$0xff] %v2420_v12  ;;  %v2453_v63 = vmul.f32 0.25, %v3279_v50  ;;  %v3280_v21 = vld [vmem:[#allocation15_spill] sm:$0xff]  ;;  %v2459_v51 = vmul.f32 0.25, %v2241_v24  ;;  %v3282_v60 = vld [vmem:[#allocation2_spill] sm:$0xff]  ;;  %v3285_v49 = vld [vmem:[#allocation4_spill] sm:$0xff] }
  0x8d   : > { %3271 = vst [vmem:[#allocation11_spill] sm:$0xff] %v2423_v17  ;;  %v3283_v18 = vld [vmem:[#allocation3_spill] sm:$0xff]  ;;  %v2471_v48 = vmul.f32 0.25, %v2261_v53  ;;  %v2474_v50 = vmul.f32 0.25, %v2266_v61  ;;  %v2480_v24 = vmul.f32 0.25, %v2276_v25  ;;  %v2492_v53 = vmul.f32 0.25, %v2296_v27 }
  0x8e   : > { %3272 = vst [vmem:[#allocation16_spill] sm:$0xff] %v2432_v15  ;;  %v2495_v61 = vmul.f32 0.25, %v2301_v29  ;;  %v3301_v27 = vpack.c.bf16 %v2315_v28, %v2315_v28  ;;  %v3305_v28 = vpack.c.bf16 %v2327_v34, %v2327_v34  ;;  %v3309_v34 = vpack.c.bf16 %v2339_v54, %v2339_v54 }
  0x8f   : > { %3273 = vst [vmem:[#allocation17_spill] sm:$0xff] %v2435_v20  ;;  %v2456_v20 = vmul.f32 0.25, %v3280_v21  ;;  %v3287_v21 = vld [vmem:[#allocation5_spill] sm:$0xff]  ;;  %v3313_v54 = vpack.c.bf16 %v2351_v40, %v2351_v40  ;;  %v3317_v40 = vpack.c.bf16 %v2363_v2, %v2363_v2  ;;  %v3321_v2 = vpack.c.bf16 %v2375_v5, %v2375_v5 }
  0x90   : > { %3274 = vst [vmem:[#allocation18_spill] sm:$0xff] %v2441_v22  ;;  %v2462_v22 = vmul.f32 0.25, %v3282_v60  ;;  %v2483_v60 = vmul.f32 0.25, %v2281_v26  ;;  %v3299_v26 = vpack.c.bf16 %v2309_v41, %v2309_v41  ;;  %v2641_v29 = vunpack.c.l.b16 %v3301_v27 }
  0x91   : > { %3276 = vst [vmem:[#allocation12_spill] sm:$0xff] %v2444_v0  ;;  %v2465_v0 = vmul.f32 0.25, %v3283_v18  ;;  %v3289_v18 = vld [vmem:[#allocation6_spill] sm:$0xff]  ;;  %v3303_v41 = vpack.c.bf16 %v2321_v39, %v2321_v39  ;;  %v2661_v27 = vunpack.c.l.b16 %v3305_v28  ;;  %v3307_v39 = vpack.c.bf16 %v2333_v37, %v2333_v37  ;;  %v3336_v25 = vld [vmem:[#allocation8_spill] sm:$0xff] }
  0x92   : > { %3277 = vst [vmem:[#allocation19_spill] sm:$0xff] %v2447_v23  ;;  %v2468_v23 = vmul.f32 0.25, %v3285_v49  ;;  %v3290_v49 = vld [vmem:[#allocation7_spill] sm:$0xff]  ;;  %v2681_v28 = vunpack.c.l.b16 %v3309_v34  ;;  %v3311_v37 = vpack.c.bf16 %v2345_v36, %v2345_v36  ;;  %v2701_v34 = vunpack.c.l.b16 %v3313_v54 }
  0x93   : > { %3281 = vst [vmem:[#allocation13_spill] sm:$0xff] %v2456_v20  ;;  %v2477_v20 = vmul.f32 0.25, %v3287_v21  ;;  %v2498_v21 = vmul.f32 0.25, %v2306_v32  ;;  %v3302_v32 = vpack.c.bf16 %v2318_v59, %v2318_v59  ;;  %v3306_v59 = vpack.c.bf16 %v2330_v44, %v2330_v44 }
  0x94   : > { %3284 = vst [vmem:[#allocation14_spill] sm:$0xff] %v2465_v0  ;;  %v2486_v0 = vmul.f32 0.25, %v3289_v18  ;;  %v3310_v44 = vpack.c.bf16 %v2342_v31, %v2342_v31  ;;  %v3314_v31 = vpack.c.bf16 %v2354_v30, %v2354_v30  ;;  %v3315_v36 = vpack.c.bf16 %v2357_v43, %v2357_v43 }
  0x95   : > { %3286 = vst [vmem:[#allocation15_spill] sm:$0xff] %v2468_v23  ;;  %v2489_v23 = vmul.f32 0.25, %v3290_v49  ;;  %v3300_v49 = vpack.c.bf16 %v2312_v62, %v2312_v62  ;;  %v3304_v62 = vpack.c.bf16 %v2324_v1, %v2324_v1  ;;  %v3308_v1 = vpack.c.bf16 %v2336_v33, %v2336_v33 }
  0x96   : > { %3288 = vst [vmem:[#allocation2_spill] sm:$0xff] %v2480_v24  ;;  %v3292_v14 = vld [vmem:[#allocation17_spill] sm:$0xff]  ;;  %v2631_v24 = vunpack.c.l.b16 %v3299_v26  ;;  %v2651_v26 = vunpack.c.l.b16 %v3303_v41  ;;  %v2671_v41 = vunpack.c.l.b16 %v3307_v39  ;;  %v2691_v39 = vunpack.c.l.b16 %v3311_v37 }
  0x97   : > { %3291 = vst [vmem:[#allocation3_spill] sm:$0xff] %v2495_v61  ;;  %v2636_v18 = vunpack.c.l.b16 %v3300_v49  ;;  %v2646_v61 = vunpack.c.l.b16 %v3302_v32  ;;  %v2656_v49 = vunpack.c.l.b16 %v3304_v62  ;;  %v2666_v32 = vunpack.c.l.b16 %v3306_v59 }
  0x98   : > { %v2676_v62 = vunpack.c.l.b16 %v3308_v1  ;;  %v2686_v59 = vunpack.c.l.b16 %v3310_v44  ;;  %v3312_v33 = vpack.c.bf16 %v2348_v38, %v2348_v38  ;;  %v2706_v44 = vunpack.c.l.b16 %v3314_v31 }
  0x99   : > { %v3295_v17 = vld [vmem:[#allocation19_spill] sm:$0xff]  ;;  %v2711_v37 = vunpack.c.l.b16 %v3315_v36  ;;  %v3316_v38 = vpack.c.bf16 %v2360_v35, %v2360_v35  ;;  %v2721_v54 = vunpack.c.l.b16 %v3317_v40  ;;  %v3318_v30 = vpack.c.bf16 %v2366_v55, %v2366_v55 }
  0x9a   : > { %v3296_v15 = vld [vmem:[#allocation13_spill] sm:$0xff]  ;;  %v2696_v1 = vunpack.c.l.b16 %v3312_v33  ;;  %v3319_v43 = vpack.c.bf16 %v2369_v4, %v2369_v4  ;;  %v3320_v35 = vpack.c.bf16 %v2372_v42, %v2372_v42  ;;  %v2741_v40 = vunpack.c.l.b16 %v3321_v2 }
  0x9b   : > { %v3297_v16 = vld [vmem:[#allocation14_spill] sm:$0xff]  ;;  %v2716_v33 = vunpack.c.l.b16 %v3316_v38  ;;  %v2726_v31 = vunpack.c.l.b16 %v3318_v30  ;;  %v3322_v55 = vpack.c.bf16 %v2378_v45, %v2378_v45  ;;  %v3323_v4 = vpack.c.bf16 %v2381_v7, %v2381_v7 }
  0x9c   : > { %v3298_v12 = vld [vmem:[#allocation15_spill] sm:$0xff]  ;;  %v2731_v36 = vunpack.c.l.b16 %v3319_v43  ;;  %v2736_v38 = vunpack.c.l.b16 %v3320_v35  ;;  %v3324_v42 = vpack.c.bf16 %v2384_v3, %v2384_v3  ;;  %v3325_v5 = vpack.c.bf16 %v2387_v8, %v2387_v8 }
  0x9d   : > { %v2746_v30 = vunpack.c.l.b16 %v3322_v55  ;;  %v2751_v43 = vunpack.c.l.b16 %v3323_v4  ;;  %v3326_v45 = vpack.c.bf16 %v2390_v56, %v2390_v56  ;;  %v3327_v7 = vpack.c.bf16 %v2393_v10, %v2393_v10 }
  0x9e   : > { %v2756_v35 = vunpack.c.l.b16 %v3324_v42  ;;  %v2761_v2 = vunpack.c.l.b16 %v3325_v5  ;;  %v3328_v3 = vpack.c.bf16 %v2396_v6, %v2396_v6  ;;  %v3329_v8 = vpack.c.bf16 %v2399_v11, %v2399_v11 }
  0x9f   : > { %v2766_v55 = vunpack.c.l.b16 %v3326_v45  ;;  %v2771_v4 = vunpack.c.l.b16 %v3327_v7  ;;  %v3330_v56 = vpack.c.bf16 %v2402_v46, %v2402_v46  ;;  %v3332_v10 = vpack.c.bf16 %v2405_v13, %v2405_v13 }
  0xa0   : > { %v2776_v42 = vunpack.c.l.b16 %v3328_v3  ;;  %v2781_v5 = vunpack.c.l.b16 %v3329_v8  ;;  %v3334_v6 = vpack.c.bf16 %v2408_v9, %v2408_v9  ;;  %v3337_v11 = vpack.c.bf16 %v3336_v25, %v3336_v25 }
  0xa1   : > { %v2786_v45 = vunpack.c.l.b16 %v3330_v56  ;;  %v2791_v7 = vunpack.c.l.b16 %v3332_v10  ;;  %v3338_v46 = vpack.c.bf16 %v2414_v57, %v2414_v57  ;;  %v3346_v57 = vpack.c.bf16 %v2426_v47, %v2426_v47 }
  0xa2   : > { %v2796_v3 = vunpack.c.l.b16 %v3334_v6  ;;  %v2801_v8 = vunpack.c.l.b16 %v3337_v11  ;;  %v3353_v47 = vpack.c.bf16 %v2438_v58, %v2438_v58  ;;  %v3359_v58 = vpack.c.bf16 %v2450_v52, %v2450_v52 }
  0xa3   : > { %3331 = vst [vmem:[#allocation4_spill] sm:$0xff] %v2786_v45  ;;  %v2806_v56 = vunpack.c.l.b16 %v3338_v46  ;;  %v3339_v45 = vld [vmem:[#allocation9_spill] sm:$0xff]  ;;  %v2826_v46 = vunpack.c.l.b16 %v3346_v57  ;;  %v3363_v52 = vpack.c.bf16 %v2462_v22, %v2462_v22  ;;  %v3368_v22 = vpack.c.bf16 %v2474_v50, %v2474_v50 }
  0xa4   : > { %3333 = vst [vmem:[#allocation5_spill] sm:$0xff] %v2791_v7  ;;  %v3340_v13 = vpack.c.bf16 %v3339_v45, %v3339_v45  ;;  %v3342_v7 = vld [vmem:[#allocation10_spill] sm:$0xff]  ;;  %v3348_v45 = vpack.c.bf16 %v2429_v19, %v2429_v19  ;;  %v2846_v57 = vunpack.c.l.b16 %v3353_v47  ;;  %v2866_v47 = vunpack.c.l.b16 %v3359_v58 }
  0xa5   : > { %3335 = vst [vmem:[#allocation6_spill] sm:$0xff] %v2796_v3  ;;  %v3343_v9 = vpack.c.bf16 %v3342_v7, %v3342_v7  ;;  %v3344_v3 = vld [vmem:[#allocation11_spill] sm:$0xff]  ;;  %v2886_v58 = vunpack.c.l.b16 %v3363_v52  ;;  %v2906_v52 = vunpack.c.l.b16 %v3368_v22  ;;  %v3374_v50 = vpack.c.bf16 %v2486_v0, %v2486_v0 }
  0xa6   : > { %v2811_v10 = vunpack.c.l.b16 %v3340_v13  ;;  %v3345_v25 = vpack.c.bf16 %v3344_v3, %v3344_v3  ;;  %3347 = vst [vmem:[#allocation17_spill] sm:$0xff] %v2826_v46  ;;  %v2831_v13 = vunpack.c.l.b16 %v3348_v45  ;;  %v3352_v3 = vpack.c.bf16 %v3292_v14, %v3292_v14  ;;  %v3354_v46 = vld [vmem:[#allocation18_spill] sm:$0xff] }
  0xa7   : > { %v2816_v6 = vunpack.c.l.b16 %v3343_v9  ;;  %v3355_v19 = vpack.c.bf16 %v3354_v46, %v3354_v46  ;;  %v3358_v14 = vpack.c.bf16 %v3295_v17, %v3295_v17  ;;  %v3360_v46 = vpack.c.bf16 %v2453_v63, %v2453_v63 }
  0xa8   : > { %3341 = vst [vmem:[#allocation7_spill] sm:$0xff] %v2811_v10  ;;  %v2821_v11 = vunpack.c.l.b16 %v3345_v25  ;;  %v3350_v10 = vld [vmem:[#allocation16_spill] sm:$0xff]  ;;  %v2841_v25 = vunpack.c.l.b16 %v3352_v3  ;;  %v3362_v17 = vpack.c.bf16 %v2459_v51, %v2459_v51  ;;  %v3364_v63 = vpack.c.bf16 %v3297_v16, %v3297_v16 }
  0xa9   : > { %3349 = vst [vmem:[#allocation19_spill] sm:$0xff] %v2831_v13  ;;  %v3351_v7 = vpack.c.bf16 %v3350_v10, %v3350_v10  ;;  %v2851_v45 = vunpack.c.l.b16 %v3355_v19  ;;  %v3356_v13 = vld [vmem:[#allocation12_spill] sm:$0xff]  ;;  %v2861_v3 = vunpack.c.l.b16 %v3358_v14  ;;  %v2871_v19 = vunpack.c.l.b16 %v3360_v46 }
  0xaa   : > { %v3357_v10 = vpack.c.bf16 %v3356_v13, %v3356_v13  ;;  %v3361_v13 = vpack.c.bf16 %v3296_v15, %v3296_v15  ;;  %v2881_v14 = vunpack.c.l.b16 %v3362_v17  ;;  %v2891_v46 = vunpack.c.l.b16 %v3364_v63 }
  0xab   : > { %v2836_v9 = vunpack.c.l.b16 %v3351_v7  ;;  %v3366_v15 = vpack.c.bf16 %v3298_v12, %v3298_v12  ;;  %v3367_v51 = vpack.c.bf16 %v2471_v48, %v2471_v48  ;;  %v3369_v16 = vpack.c.bf16 %v2477_v20, %v2477_v20 }
  0xac   : > { %v2856_v7 = vunpack.c.l.b16 %v3357_v10  ;;  %v2876_v10 = vunpack.c.l.b16 %v3361_v13  ;;  %3365 = vst [vmem:[#allocation13_spill] sm:$0xff] %v2891_v46  ;;  %v3371_v46 = vld [vmem:[#allocation2_spill] sm:$0xff]  ;;  %v3373_v48 = vpack.c.bf16 %v2483_v60, %v2483_v60  ;;  %v2926_v22 = vunpack.c.l.b16 %v3374_v50 }
  0xad   : > { %v2896_v13 = vunpack.c.l.b16 %v3366_v15  ;;  %v2901_v17 = vunpack.c.l.b16 %v3367_v51  ;;  %v2911_v63 = vunpack.c.l.b16 %v3369_v16  ;;  %v3372_v12 = vpack.c.bf16 %v3371_v46, %v3371_v46 }
  0xae   : > { %v2921_v51 = vunpack.c.l.b16 %v3373_v48  ;;  %3375 = vst [vmem:[#allocation15_spill] sm:$0xff] %v2926_v22  ;;  %v3376_v20 = vpack.c.bf16 %v2489_v23, %v2489_v23  ;;  %v3377_v46 = vpack.c.bf16 %v2492_v53, %v2492_v53  ;;  %v3380_v0 = vpack.c.bf16 %v2498_v21, %v2498_v21 }
  0xaf   : > { %3370 = vst [vmem:[#allocation14_spill] sm:$0xff] %v2911_v63  ;;  %v2916_v15 = vunpack.c.l.b16 %v3372_v12  ;;  %v3378_v63 = vld [vmem:[#allocation3_spill] sm:$0xff]  ;;  %v1043_v22 = vrot.slane %v2636_v18, 7  ;;  %v1046_v23 = vrot.slane %v2641_v29, 6  ;;  %v1049_v53 = vrot.slane %v2646_v61, 5 }
  0xb0   : > { %v2931_v16 = vunpack.c.l.b16 %v3376_v20  ;;  %v2936_v12 = vunpack.c.l.b16 %v3377_v46  ;;  %v3379_v60 = vpack.c.bf16 %v3378_v63, %v3378_v63  ;;  %v2946_v50 = vunpack.c.l.b16 %v3380_v0 }
  0xb1   : > { %v1045_v20 = vsel %vm1044_vm9, %v1043_v22, %v2631_v24  ;;  %v1052_v63 = vrot.slane %v2651_v26, 4  ;;  %v1055_v46 = vrot.slane %v2656_v49, 3  ;;  %v1058_v18 = vrot.slane %v2661_v27, 2 }
  0xb2   : > { %v2941_v48 = vunpack.c.l.b16 %v3379_v60  ;;  %v1048_v21 = vsel %vm1047_vm11, %v1046_v23, %v1045_v20  ;;  %v1061_v60 = vrot.slane %v2666_v32, 1  ;;  %v1064_v61 = vrot.slane %v2676_v62, 7 }
  0xb3   : > { %v1051_v29 = vsel %vm1050_vm12, %v1049_v53, %v1048_v21  ;;  %v1066_v26 = vrot.slane %v2681_v28, 6  ;;  %v1068_v22 = vrot.slane %v2686_v59, 5  ;;  %v1070_v49 = vrot.slane %v2691_v39, 4 }
  0xb4   : > { %v1054_v24 = vsel %vm1053_vm13, %v1052_v63, %v1051_v29  ;;  %v1065_v27 = vsel %vm1044_vm9, %v1064_v61, %v2671_v41  ;;  %v1072_v23 = vrot.slane %v2696_v1, 3  ;;  %v1074_v32 = vrot.slane %v2701_v34, 2 }
  0xb5   : > { %v1057_v0 = vsel %vm1056_vm14, %v1055_v46, %v1054_v24  ;;  %v1067_v62 = vsel %vm1047_vm11, %v1066_v26, %v1065_v27  ;;  %v1076_v20 = vrot.slane %v2706_v44, 1  ;;  %v1078_v28 = vrot.slane %v2716_v33, 7  ;;  %v3382_v27 = vld [vmem:[#allocation6_spill] sm:$0xff] }
  0xb6   : > { %v1060_v53 = vsel %vm1059_vm0, %v1058_v18, %v1057_v0  ;;  %v1069_v39 = vsel %vm1050_vm12, %v1068_v22, %v1067_v62  ;;  %v1080_v63 = vrot.slane %v2721_v54, 6  ;;  %v1082_v41 = vrot.slane %v2726_v31, 5  ;;  %v3384_v62 = vld [vmem:[#allocation7_spill] sm:$0xff] }
  0xb7   : > { %v2974_v59 = vsel %vm1062_vm1, %v1061_v60, %v1060_v53  ;;  %v1071_v1 = vsel %vm1053_vm13, %v1070_v49, %v1069_v39  ;;  %v1079_v34 = vsel %vm1044_vm9, %v1078_v28, %v2711_v37  ;;  %v1084_v46 = vrot.slane %v2731_v36, 4  ;;  %v3381_v49 = vld [vmem:[#allocation4_spill] sm:$0xff] }
  0xb8   : > { %v1086_v44 = vrot.slane %v2736_v38, 3  ;;  %v1073_v33 = vsel %vm1056_vm14, %v1072_v23, %v1071_v1  ;;  %v1081_v21 = vsel %vm1047_vm11, %v1080_v63, %v1079_v34  ;;  %v1088_v18 = vrot.slane %v2741_v40, 2  ;;  %v3385_v1 = vld [vmem:[#allocation17_spill] sm:$0xff] }
  0xb9   : > { %v1090_v29 = vrot.slane %v2746_v30, 1  ;;  %v1075_v54 = vsel %vm1059_vm0, %v1074_v32, %v1073_v33  ;;  %v1083_v31 = vsel %vm1050_vm12, %v1082_v41, %v1081_v21  ;;  %v1092_v60 = vrot.slane %v2756_v35, 7 }
  0xba   : > { %v1094_v37 = vrot.slane %v2761_v2, 6  ;;  %v2993_v36 = vsel %vm1062_vm1, %v1076_v20, %v1075_v54  ;;  %v1085_v38 = vsel %vm1053_vm13, %v1084_v46, %v1083_v31  ;;  %v1096_v61 = vrot.slane %v2766_v55, 5 }
  0xbb   : > { %v1098_v24 = vrot.slane %v2771_v4, 4  ;;  %v1087_v40 = vsel %vm1056_vm14, %v1086_v44, %v1085_v38  ;;  %v1093_v30 = vsel %vm1044_vm9, %v1092_v60, %v2751_v43  ;;  %v1100_v26 = vrot.slane %v2776_v42, 3 }
  0xbc   : > { %v1102_v35 = vrot.slane %v2781_v5, 2  ;;  %v1089_v2 = vsel %vm1059_vm0, %v1088_v18, %v1087_v40  ;;  %v1095_v22 = vsel %vm1047_vm11, %v1094_v37, %v1093_v30  ;;  %v1104_v0 = vrot.slane %v3381_v49, 1  ;;  %v3383_v5 = vld [vmem:[#allocation5_spill] sm:$0xff] }
  0xbd   : > { %v1106_v23 = vrot.slane %v3382_v27, 7  ;;  %v3008_v55 = vsel %vm1062_vm1, %v1090_v29, %v1089_v2  ;;  %v1097_v4 = vsel %vm1050_vm12, %v1096_v61, %v1095_v22  ;;  %v1108_v32 = vrot.slane %v2801_v8, 6  ;;  %v3386_v29 = vld [vmem:[#allocation19_spill] sm:$0xff]  ;;  %v3387_v40 = vld [vmem:[#allocation13_spill] sm:$0xff] }
  0xbe   : > { %v1110_v43 = vrot.slane %v2806_v56, 5  ;;  %v1099_v42 = vsel %vm1053_vm13, %v1098_v24, %v1097_v4  ;;  %v1112_v20 = vrot.slane %v3384_v62, 4  ;;  %v1114_v28 = vrot.slane %v2816_v6, 3 }
  0xbf   : > { %v1107_v53 = vsel %vm1044_vm9, %v1106_v23, %v3383_v5  ;;  %v1101_v39 = vsel %vm1056_vm14, %v1100_v26, %v1099_v42  ;;  %v1116_v41 = vrot.slane %v2821_v11, 2  ;;  %v1118_v34 = vrot.slane %v3385_v1, 1 }
  0xc0   : > { %v1109_v63 = vsel %vm1047_vm11, %v1108_v32, %v1107_v53  ;;  %v1103_v8 = vsel %vm1059_vm0, %v1102_v35, %v1101_v39  ;;  %v1120_v46 = vrot.slane %v2836_v9, 7  ;;  %v1122_v44 = vrot.slane %v2841_v25, 6 }
  0xc1   : > { %v1111_v56 = vsel %vm1050_vm12, %v1110_v43, %v1109_v63  ;;  %v1105_v33 = vsel %vm1062_vm1, %v1104_v0, %v1103_v8  ;;  %v1124_v21 = vrot.slane %v2846_v57, 5  ;;  %v1126_v18 = vrot.slane %v2851_v45, 4  ;;  %v3388_v0 = vld [vmem:[#allocation15_spill] sm:$0xff] }
  0xc2   : > { %v1113_v6 = vsel %vm1053_vm13, %v1112_v20, %v1111_v56  ;;  %v1121_v54 = vsel %vm1044_vm9, %v1120_v46, %v3386_v29  ;;  %v1128_v31 = vrot.slane %v2856_v7, 3  ;;  %v1130_v9 = vrot.slane %v2861_v3, 2 }
  0xc3   : > { %v1115_v11 = vsel %vm1056_vm14, %v1114_v28, %v1113_v6  ;;  %v1123_v60 = vsel %vm1047_vm11, %v1122_v44, %v1121_v54  ;;  %v1132_v37 = vrot.slane %v2866_v47, 1  ;;  %v1134_v57 = vrot.slane %v2876_v10, 7 }
  0xc4   : > { %v1117_v25 = vsel %vm1059_vm0, %v1116_v41, %v1115_v11  ;;  %v1125_v38 = vsel %vm1050_vm12, %v1124_v21, %v1123_v60  ;;  %v1136_v61 = vrot.slane %v2881_v14, 6  ;;  %v1138_v24 = vrot.slane %v2886_v58, 5 }
  0xc5   : > { %v1119_v45 = vsel %vm1062_vm1, %v1118_v34, %v1117_v25  ;;  %v1127_v7 = vsel %vm1053_vm13, %v1126_v18, %v1125_v38  ;;  %v1135_v3 = vsel %vm1044_vm9, %v1134_v57, %v2871_v19  ;;  %v1140_v30 = vrot.slane %v3387_v40, 4 }
  0xc6   : > { %v1142_v26 = vrot.slane %v2896_v13, 3  ;;  %v1129_v47 = vsel %vm1056_vm14, %v1128_v31, %v1127_v7  ;;  %v1137_v10 = vsel %vm1047_vm11, %v1136_v61, %v1135_v3  ;;  %v1144_v35 = vrot.slane %v2901_v17, 2 }
  0xc7   : > { %v1146_v14 = vrot.slane %v2906_v52, 1  ;;  %v1131_v58 = vsel %vm1059_vm0, %v1130_v9, %v1129_v47  ;;  %v1139_v2 = vsel %vm1050_vm12, %v1138_v24, %v1137_v10  ;;  %v1148_v22 = vrot.slane %v2916_v15, 7  ;;  %v3389_v52 = vld [vmem:[#allocation14_spill] sm:$0xff] }
  0xc8   : > { %v1150_v19 = vrot.slane %v2921_v51, 6  ;;  %v1133_v49 = vsel %vm1062_vm1, %v1132_v37, %v1131_v58  ;;  %v1141_v13 = vsel %vm1053_vm13, %v1140_v30, %v1139_v2  ;;  %v1152_v27 = vrot.slane %v3388_v0, 5 }
  0xc9   : > { %v1154_v23 = vrot.slane %v2931_v16, 4  ;;  %v1143_v17 = vsel %vm1056_vm14, %v1142_v26, %v1141_v13  ;;  %v1149_v4 = vsel %vm1044_vm9, %v1148_v22, %v3389_v52  ;;  %v1156_v15 = vrot.slane %v2936_v12, 3 }
  0xca   : > { %v1158_v51 = vrot.slane %v2941_v48, 2  ;;  %v1145_v32 = vsel %vm1059_vm0, %v1144_v35, %v1143_v17  ;;  %v1151_v43 = vsel %vm1047_vm11, %v1150_v19, %v1149_v4  ;;  %v1160_v42 = vrot.slane %v2946_v50, 1 }
  0xcb   : > { %v1162_v16 = vpack.c.b16 %v2974_v59, %v2974_v59  ;;  %v1147_v5 = vsel %vm1062_vm1, %v1146_v14, %v1145_v32  ;;  %v1153_v53 = vsel %vm1050_vm12, %v1152_v27, %v1151_v43  ;;  %v1163_v62 = vpack.c.b16 %v2993_v36, %v2993_v36 }
  0xcc   : > { %v1164_v12 = vpack.c.b16 %v3008_v55, %v3008_v55  ;;  %v1155_v48 = vsel %vm1053_vm13, %v1154_v23, %v1153_v53  ;;  %v1165_v20 = vpack.c.b16 %v1105_v33, %v1105_v33  ;;  %v1166_v28 = vpack.c.b16 %v1119_v45, %v1119_v45 }
  0xcd   : > { %1178 = vst [vmem:[%s170_s25] sm:$0xf] %v1162_v16  ;;  %v1157_v50 = vsel %vm1056_vm14, %v1156_v15, %v1155_v48  ;;  %v1167_v39 = vpack.c.b16 %v1133_v49, %v1133_v49  ;;  %v1168_v63 = vpack.c.b16 %v1147_v5, %v1147_v5 }
  0xce   : > { %1179 = vst [vmem:[%s170_s25 + $0x4] sm:$0xf] %v1163_v62  ;;  %v1159_v59 = vsel %vm1059_vm0, %v1158_v51, %v1157_v50 }
  0xcf   : > { %1180 = vst [vmem:[%s170_s25 + $0x8] sm:$0xf] %v1164_v12  ;;  %v1161_v41 = vsel %vm1062_vm1, %v1160_v42, %v1159_v59 }
  0xd0   : > { %1181 = vst [vmem:[%s170_s25 + $0xc] sm:$0xf] %v1165_v20  ;;  %v1169_v36 = vpack.c.b16 %v1161_v41, %v1161_v41 }
  0xd1   : > { %1182 = vst [vmem:[%s170_s25 + $0x10] sm:$0xf] %v1166_v28 }
  0xd2   : > { %1183 = vst [vmem:[%s170_s25 + $0x14] sm:$0xf] %v1167_v39 }
  0xd3   : > { %1184 = vst [vmem:[%s170_s25 + $0x18] sm:$0xf] %v1168_v63 }
  0xd4   : > { %1185 = vst [vmem:[%s170_s25 + $0x1c] sm:$0xf] %v1169_v36 }
  0xd5 PF: > { %s13_s12 = sadd.s32 1, %s1413_s12  }
  0xd6   : > { %p10_p4 = scmp.ge.s32.totalorder %s13_s12, 4  }
  0xd8   :  { %12 = sbr.rel (!%p10_p4) target bundleno = 1 (0x1), region = 62 }

// kernel: res_down_forward.6
= control target key start
LH: loop header
LB: loop body
LE: loop exit
PB: predicated region body
PF: predicated region fallthrough
CT: control target
= control target key end

     0   :  { %s2680_s15 = smov 0   ;;  %s3278_s0 = inlined_call_operand.vmem [shape: bf16[2,8,8,128], index: 0, kind: input, shape index: {}]   ;;  %s3279_s1 = inlined_call_operand.vmem [shape: bf16[1152,128], index: 1, kind: input, shape index: {}]   ;;  %s3280_s2 = inlined_call_operand.vmem [shape: f32[2,8,8,128], index: 2, kind: output, shape index: {0}]   ;;  %s3281_s3 = inlined_call_operand.vmem [shape: f32[2,1,128], index: 3, kind: output, shape index: {1}]   ;;  %s3282_s4 = inlined_call_operand.vmem [shape: f32[2,1,128], index: 4, kind: output, shape index: {2}]  }
   0x1 LB: > { %s2164_s16 = sadd.s32 4294967295, %s2652_s15   ;;  %p2168_p0 = scmp.ge.s32.totalorder %s2652_s15, 1  ;;  %s2652_s15 = sphi %s2680_s15, %s15_s15  }
   0x2   : > { %p167_p1 = scmp.lt.s32.totalorder %s2652_s15, 3 }
   0x4   : > { %p168_p2 = pnand %p2168_p0, %p167_p1 }
   0x5   : > { %p199_p3 = scmp.lt.s32.totalorder (!%p168_p2), %s2164_s16, 1 }
   0x6   : > { %171 = sbr.rel (%p168_p2) target bundleno = 354 (0x162), region = 28 }
   0xb   : > { %v2556_v0 = vld [vmem:[%s3279_s1 + $0x78] sm:$0xff]  ;;  %v2654_v2 = vmov 0   ;;  %v2555_v3 = vld [vmem:[%s3279_s1 + $0x70] sm:$0xff]  ;;  %s3292_s16 = smov (!%p199_p3, %s2164_s16), 1  ;;  %v2554_v6 = vld [vmem:[%s3279_s1 + $0x68] sm:$0xff]  ;;  %vm325_vm0 = vcmask 1043456  }
   0xc   : > { %v2564_v1 = vld [vmem:[%s3279_s1 + $0xb8] sm:$0xff]  ;;  %224 = vst [vmem:[#allocation2 + $0x20] sm:$0xf] %v2654_v2  ;;  %2621 = vmatpush.bf16.msra.mxu1 %v2556_v0  ;;  %606 = vmatpush.bf16.msra.mxu0 %v2556_v0  ;;  %v2563_v4 = vld [vmem:[%s3279_s1 + $0xb0] sm:$0xff]  ;;  %s2535_s29 = sshll.u32 %s3292_s16, 5  ;;  %v2562_v7 = vld [vmem:[%s3279_s1 + $0xa8] sm:$0xff]  ;;  %s211_s30 = scalar_lea.vmem %s3281_s3, %s3292_s16 }
   0xd   : > { %225 = vst [vmem:[#allocation2 + $0x24] sm:$0x1] %v2654_v2  ;;  %875 = vmatpush.bf16.msra.mxu2 %v2564_v1  ;;  %v2576_v5 = vld [vmem:[%s3279_s1 + $0xf8] sm:$0xff]  ;;  %v2575_v8 = vld [vmem:[%s3279_s1 + $0xf0] sm:$0xff]  ;;  %s2722_s10 = scalar_lea.vmem %s3278_s0, %s2535_s29  ;;  %vm326_vm1 = vsmask.f32 7938  ;;  %s214_s7 = scalar_lea.vmem %s3282_s4, %s3292_s16 }
   0xe   : > { %226 = vst [vmem:[#allocation2 + $0x28] sm:$0xf] %v2654_v2  ;;  %1008 = vmatpush.bf16.msra.mxu3 %v2576_v5  ;;  %vm331_vm2 = vcmask 1040384   ;;  %v239_v9 = vld [vmem:[%s2722_s10 + $0xc] sm:$0xf]  ;;  %v2553_v15 = vld [vmem:[%s3279_s1 + $0x60] sm:$0xff]  ;;  %vm2739_vm4 = vmand %vm325_vm0, %vm326_vm1 }
   0xf   : > { %227 = vst [vmem:[#allocation2 + $0x2c] sm:$0x1] %v2654_v2  ;;  %v240_v10 = vld [vmem:[%s2722_s10 + $0x10] sm:$0xf]  ;;  %vm332_vm3 = vsmask.f32 256 }
  0x10   : > { %2622 = vmatpush.bf16.msra.mxu1 %v2555_v3  ;;  %607 = vmatpush.bf16.msra.mxu0 %v2555_v3  ;;  %v269_v11 = vshrl.u32 %v239_v9, 16  ;;  %v272_v12 = vshll.u32 %v239_v9, 16  ;;  %v277_v13 = vshrl.u32 %v240_v10, 16  ;;  %v280_v14 = vshll.u32 %v240_v10, 16  ;;  %216 = vst [vmem:[#allocation2] sm:$0xf] %v2654_v2  ;;  %vm2746_vm5 = vmand %vm331_vm2, %vm332_vm3 }
  0x11   : > { %876 = vmatpush.bf16.msra.mxu2 %v2563_v4  ;;  %v2574_v16 = vld [vmem:[%s3279_s1 + $0xe8] sm:$0xff]  ;;  %217 = vst [vmem:[#allocation2 + $0x4] sm:$0x1] %v2654_v2  ;;  %v2561_v17 = vld [vmem:[%s3279_s1 + $0xa0] sm:$0xff]  ;;  %v2552_v30 = vld [vmem:[%s3279_s1 + $0x58] sm:$0xff]  ;;  %vm760_vm8 = vcmask 1042432  }
  0x12   : > { %1009 = vmatpush.bf16.msra.mxu3 %v2575_v8  ;;  %v271_v18 = vrot.slane %v269_v11, 7  ;;  %v279_v19 = vrot.slane %v277_v13, 7  ;;  %218 = vst [vmem:[#allocation2 + $0x8] sm:$0xf] %v2654_v2  ;;  %v2560_v31 = vld [vmem:[%s3279_s1 + $0x98] sm:$0xff]  ;;  %v2573_v35 = vld [vmem:[%s3279_s1 + $0xe0] sm:$0xff] }
  0x13   : > { %v349_v21 = vld [vmem:[#allocation2 + $0x20] sm:$0xf]  ;;  %219 = vst [vmem:[#allocation2 + $0xc] sm:$0x1] %v2654_v2  ;;  %v2551_v45 = vld [vmem:[%s3279_s1 + $0x50] sm:$0xff]  ;;  %v2572_v48 = vld [vmem:[%s3279_s1 + $0xd8] sm:$0xff] }
  0x14   : > { %2623 = vmatpush.bf16.msra.mxu1 %v2554_v6  ;;  %608 = vmatpush.bf16.msra.mxu0 %v2554_v6  ;;  %v352_v23 = vld [vmem:[#allocation2 + $0x24] sm:$0x1]  ;;  %v274_v25 = vor.u32 %v272_v12, %v271_v18  ;;  %v275_v26 = vrot.slane %v271_v18, 4  ;;  %v282_v27 = vor.u32 %v280_v14, %v279_v19  ;;  %v283_v28 = vrot.slane %v279_v19, 4  ;;  %220 = vst [vmem:[#allocation2 + $0x10] sm:$0xf] %v2654_v2 }
  0x15   : > { %v355_v24 = vld [vmem:[#allocation2 + $0x28] sm:$0xf]  ;;  %877 = vmatpush.bf16.msra.mxu2 %v2562_v7  ;;  %221 = vst [vmem:[#allocation2 + $0x14] sm:$0x1] %v2654_v2  ;;  %v236_v36 = vld [vmem:[%s2722_s10] sm:$0xf] }
  0x16   : > { %v358_v29 = vld [vmem:[#allocation2 + $0x2c] sm:$0x1]  ;;  %1010 = vmatpush.bf16.msra.mxu3 %v2574_v16  ;;  %v350_v32 = vsel %vm2739_vm4, %v274_v25, %v349_v21  ;;  %v353_v33 = vsel %vm2746_vm5, %v275_v26, %v352_v23  ;;  %v356_v34 = vsel %vm2739_vm4, %v282_v27, %v355_v24  ;;  %v245_v38 = vshrl.u32 %v236_v36, 16  ;;  %v2559_v47 = vld [vmem:[%s3279_s1 + $0x90] sm:$0xff]  ;;  %222 = vst [vmem:[#allocation2 + $0x18] sm:$0xf] %v2654_v2 }
  0x17   : > { %351 = vst [vmem:[#allocation2 + $0x20] sm:$0xf] %v350_v32  ;;  %v359_v37 = vsel %vm2746_vm5, %v283_v28, %v358_v29  ;;  %v248_v39 = vshll.u32 %v236_v36, 16  ;;  %v379_v40 = vld [vmem:[#allocation2] sm:$0xf]  ;;  %v2550_v53 = vld [vmem:[%s3279_s1 + $0x48] sm:$0xff] }
  0x18   : > { %2624 = vmatpush.bf16.msra.mxu1 %v2553_v15  ;;  %609 = vmatpush.bf16.msra.mxu0 %v2553_v15  ;;  %354 = vst [vmem:[#allocation2 + $0x24] sm:$0x1] %v353_v33  ;;  %v2771_v41 = vld [vmem:[#allocation2 + $0x4] sm:$0x1]  ;;  %v415_v42 = vshrl.u32 %v379_v40, 16  ;;  %v418_v43 = vshll.u32 %v379_v40, 16 }
  0x19   : > { %878 = vmatpush.bf16.msra.mxu2 %v2561_v17  ;;  %357 = vst [vmem:[#allocation2 + $0x28] sm:$0xf] %v356_v34  ;;  %v247_v44 = vrot.slane %v245_v38, 7  ;;  %vm411_vm6 = vsmask.f32 3328  ;;  %v424_v46 = vshll.u32 %v2771_v41, 16 }
  0x1a   : > { %360 = vst [vmem:[#allocation2 + $0x2c] sm:$0x1] %v359_v37  ;;  %1011 = vmatpush.bf16.msra.mxu3 %v2573_v35  ;;  %vm412_vm7 = vsmask.f32 7440  ;;  %v2787_v50 = vld [vmem:[#allocation2 + $0x8] sm:$0xf] }
  0x1b   : > { %223 = vst [vmem:[#allocation2 + $0x1c] sm:$0x1] %v2654_v2  ;;  %v2785_v49 = vor.u32 %v248_v39, %v247_v44  ;;  %v2789_v51 = vrot.slane %v415_v42, 4  ;;  %v2791_v52 = vrot.slane %v418_v43, 5  ;;  %v251_v54 = vrot.slane %v247_v44, 4  ;;  %v2558_v58 = vld [vmem:[%s3279_s1 + $0x88] sm:$0xff]  ;;  %vm2846_vm10 = vmor %vm411_vm6, %vm412_vm7 }
  0x1c   : > { %2625 = vmatpush.bf16.msra.mxu1 %v2552_v30  ;;  %610 = vmatpush.bf16.msra.mxu0 %v2552_v30  ;;  %228 = vst [vmem:[#allocation2 + $0x30] sm:$0xf] %v2654_v2  ;;  %v334_v55 = vld [vmem:[#allocation2 + $0xc] sm:$0x1]  ;;  %v2797_v56 = vld [vmem:[#allocation2] sm:$0xe] }
  0x1d   : > { %879 = vmatpush.bf16.msra.mxu2 %v2560_v31  ;;  %229 = vst [vmem:[#allocation2 + $0x34] sm:$0x1] %v2654_v2  ;;  %v2803_v59 = vrot.slane %v424_v46, 5  ;;  %v2571_v60 = vld [vmem:[%s3279_s1 + $0xd0] sm:$0xff]  ;;  %v242_v1 = vld [vmem:[%s2722_s10 + $0x18] sm:$0xf]  ;;  %v329_v5 = vsel %vm2739_vm4, %v2785_v49, %v2787_v50  ;;  %v421_v6 = vor.u32 %v2791_v52, %v2789_v51  ;;  %v335_v17 = vsel %vm2746_vm5, %v251_v54, %v334_v55 }
  0x1e   : > { %v383_v57 = vld [vmem:[#allocation2 + $0x20] sm:$0xf]  ;;  %1012 = vmatpush.bf16.msra.mxu3 %v2572_v48  ;;  %v241_v61 = vld [vmem:[%s2722_s10 + $0x14] sm:$0xf]  ;;  %230 = vst [vmem:[#allocation2 + $0x38] sm:$0xf] %v2654_v2 }
  0x1f   : > { %v2809_v62 = vld [vmem:[#allocation2 + $0x24] sm:$0x1]  ;;  %v471_v63 = vshrl.u32 %v383_v57, 16  ;;  %v474_v0 = vshll.u32 %v383_v57, 16  ;;  %231 = vst [vmem:[#allocation2 + $0x3c] sm:$0x1] %v2654_v2 }
  0x20   : > { %2626 = vmatpush.bf16.msra.mxu1 %v2551_v45  ;;  %611 = vmatpush.bf16.msra.mxu0 %v2551_v45  ;;  %v384_v3 = vld [vmem:[#allocation2 + $0x28] sm:$0xf]  ;;  %v480_v4 = vshll.u32 %v2809_v62, 16  ;;  %vm761_vm9 = vcmask 1046532   ;;  %v2549_v7 = vld [vmem:[%s3279_s1 + $0x40] sm:$0xff]  ;;  %v2548_v15 = vld [vmem:[%s3279_s1 + $0x38] sm:$0xff] }
  0x21   : > { %880 = vmatpush.bf16.msra.mxu2 %v2559_v47  ;;  %v2824_v8 = vld [vmem:[#allocation2 + $0x2c] sm:$0x1]  ;;  %v473_v9 = vrot.slane %v471_v63, 4  ;;  %v476_v10 = vrot.slane %v474_v0, 5  ;;  %v485_v11 = vshrl.u32 %v384_v3, 16  ;;  %v488_v12 = vshll.u32 %v384_v3, 16  ;;  %vm2882_vm11 = vmor %vm760_vm8, %vm761_vm9 }
  0x22   : > { %v482_v13 = vrot.slane %v480_v4, 5  ;;  %v494_v14 = vshll.u32 %v2824_v8, 16  ;;  %232 = vst [vmem:[#allocation2 + $0x40] sm:$0xf] %v2654_v2  ;;  %v2557_v16 = vld [vmem:[%s3279_s1 + $0x80] sm:$0xff]  ;;  %v2253_v18 = vrot.slane %v2797_v56, 9  ;;  %1013 = vmatpush.bf16.msra.mxu3 %v2571_v60 }
  0x23   : > { %v2570_v19 = vld [vmem:[%s3279_s1 + $0xc8] sm:$0xff]  ;;  %v477_v21 = vor.u32 %v476_v10, %v473_v9  ;;  %v487_v23 = vrot.slane %v485_v11, 4  ;;  %v490_v24 = vrot.slane %v488_v12, 5  ;;  %233 = vst [vmem:[#allocation2 + $0x44] sm:$0x1] %v2654_v2  ;;  %v2584_v25 = vld [vmem:[%s3279_s1 + $0x138] sm:$0xff] }
  0x24   : > { %2627 = vmatpush.bf16.msra.mxu1 %v2550_v53  ;;  %612 = vmatpush.bf16.msra.mxu0 %v2550_v53  ;;  %v285_v26 = vshrl.u32 %v241_v61, 16  ;;  %v496_v28 = vrot.slane %v494_v14, 5  ;;  %234 = vst [vmem:[#allocation2 + $0x48] sm:$0xf] %v2654_v2  ;;  %v288_v29 = vshll.u32 %v241_v61, 16  ;;  %v293_v30 = vshrl.u32 %v242_v1, 16 }
  0x25   : > { %881 = vmatpush.bf16.msra.mxu2 %v2558_v58  ;;  %v296_v31 = vshll.u32 %v242_v1, 16  ;;  %v478_v32 = vrot.slane %v477_v21, 4  ;;  %v491_v33 = vor.u32 %v490_v24, %v487_v23  ;;  %235 = vst [vmem:[#allocation2 + $0x4c] sm:$0x1] %v2654_v2  ;;  %v361_v35 = vld [vmem:[#allocation2 + $0x30] sm:$0xf] }
  0x26   : > { %v287_v34 = vrot.slane %v285_v26, 7  ;;  %330 = vst [vmem:[#allocation2 + $0x8] sm:$0xf] %v329_v5  ;;  %1014 = vmatpush.bf16.msra.mxu3 %v2570_v19  ;;  %v295_v36 = vrot.slane %v293_v30, 7  ;;  %v364_v37 = vld [vmem:[#allocation2 + $0x34] sm:$0x1] }
  0x27   : > { %v2604_v38 = vld [vmem:[%s3279_s1 + $0x1b8] sm:$0xff]  ;;  %v483_v39 = vsel %vm2846_vm10, %v478_v32, %v482_v13  ;;  %v492_v40 = vrot.slane %v491_v33, 4  ;;  %336 = vst [vmem:[#allocation2 + $0xc] sm:$0x1] %v335_v17  ;;  %v2547_v45 = vld [vmem:[%s3279_s1 + $0x30] sm:$0xff]  ;;  %v2860_v46 = vrot.slane %v421_v6, 4 }
  0x28   : > { %2628 = vmatpush.bf16.msra.mxu1 %v2549_v7  ;;  %613 = vmatpush.bf16.msra.mxu0 %v2549_v7  ;;  %v290_v42 = vor.u32 %v288_v29, %v287_v34  ;;  %v291_v43 = vrot.slane %v287_v34, 4  ;;  %v367_v2 = vld [vmem:[#allocation2 + $0x38] sm:$0xf]  ;;  %v546_v44 = vunpack.c.l.b16 %v483_v39  ;;  %v298_v47 = vor.u32 %v296_v31, %v295_v36  ;;  %v370_v49 = vld [vmem:[#allocation2 + $0x3c] sm:$0x1]  ;;  %v2569_v50 = vld [vmem:[%s3279_s1 + $0xc0] sm:$0xff] }
  0x29   : > { %882 = vmatpush.bf16.msra.mxu2 %v2557_v16  ;;  %v299_v48 = vrot.slane %v295_v36, 4  ;;  %v497_v51 = vsel %vm2846_vm10, %v492_v40, %v496_v28  ;;  %v765_v52 = vrot.slane %v2771_v41, 5  ;;  %v2583_v53 = vld [vmem:[%s3279_s1 + $0x130] sm:$0xff]  ;;  %v237_v57 = vld [vmem:[%s2722_s10 + $0x4] sm:$0xf]  ;;  %v2546_v61 = vld [vmem:[%s3279_s1 + $0x28] sm:$0xff]  ;;  %v427_v13 = vsel %vm2846_vm10, %v2860_v46, %v2803_v59 }
  0x2a   : > { %v362_v54 = vsel %vm2739_vm4, %v290_v42, %v361_v35  ;;  %v365_v55 = vsel %vm2746_vm5, %v291_v43, %v364_v37  ;;  %v238_v58 = vld [vmem:[%s2722_s10 + $0x8] sm:$0xf]  ;;  %v547_v60 = vunpack.c.l.b16 %v497_v51  ;;  %v368_v63 = vsel %vm2739_vm4, %v298_v47, %v367_v2  ;;  %1015 = vmatpush.bf16.msra.mxu3 %v2569_v50  ;;  %v337_v5 = vld [vmem:[#allocation2 + $0x10] sm:$0xf]  ;;  %v2545_v23 = vld [vmem:[%s3279_s1 + $0x20] sm:$0xff]  ;;  %s2536_s24 = sshll.u32 %s3292_s16, 6 }
  0x2b   : > { %363 = vst [vmem:[#allocation2 + $0x30] sm:$0xf] %v362_v54  ;;  %v371_v0 = vsel %vm2746_vm5, %v299_v48, %v370_v49  ;;  %v253_v1 = vshrl.u32 %v237_v57, 16  ;;  %v256_v3 = vshll.u32 %v237_v57, 16  ;;  %v261_v4 = vshrl.u32 %v238_v58, 16  ;;  %v2582_v7 = vld [vmem:[%s3279_s1 + $0x128] sm:$0xff]  ;;  %s3244_s27 = scalar_lea.vmem %s3280_s2, %s2536_s24 }
  0x2c   : > { %707 = vmatpush.bf16.msrb.mxu1 %v2548_v15  ;;  %1253 = vmatpush.bf16.msrb.mxu0 %v2584_v25  ;;  %366 = vst [vmem:[#allocation2 + $0x34] sm:$0x1] %v365_v55  ;;  %v552_v6 = vpack.c.b16 %v547_v60, %v546_v44  ;;  %v264_v10 = vshll.u32 %v238_v58, 16  ;;  %v2603_v11 = vld [vmem:[%s3279_s1 + $0x1b0] sm:$0xff]  ;;  %v766_v15 = vsel %vm2882_vm11, %v2253_v18, %v765_v52  ;;  %v2581_v56 = vld [vmem:[%s3279_s1 + $0x120] sm:$0xff]  ;;  %v2544_v57 = vld [vmem:[%s3279_s1 + $0x18] sm:$0xff]  ;;  %v542_v58 = vunpack.c.l.b16 %v427_v13 }
  0x2d   : > { %1560 = vmatpush.bf16.msrb.mxu2 %v2604_v38  ;;  %369 = vst [vmem:[#allocation2 + $0x38] sm:$0xf] %v368_v63  ;;  %v255_v9 = vrot.slane %v253_v1, 7  ;;  %v380_v12 = vld [vmem:[#allocation2 + $0x8] sm:$0xf]  ;;  %v263_v26 = vrot.slane %v261_v4, 7  ;;  %v811_v31 = vunpack.c.l.b16 %v766_v15 }
  0x2e   : > { %v737_v14 = vld [vmem:[#allocation2 + $0x8] sm:$0xe]  ;;  %372 = vst [vmem:[#allocation2 + $0x3c] sm:$0x1] %v371_v0  ;;  %624 = vmatmul.bf16.vlgmr.msra.gmra.mxu1 %v552_v6  ;;  %v404_v16 = vld [vmem:[#allocation2 + $0xc] sm:$0x1] }
  0x2f   : > { %v429_v17 = vshrl.u32 %v380_v12, 16  ;;  %v432_v19 = vshll.u32 %v380_v12, 16  ;;  %v2254_v21 = vrot.slane %v737_v14, 9  ;;  %v258_v24 = vor.u32 %v256_v3, %v255_v9  ;;  %v340_v28 = vld [vmem:[#allocation2 + $0x14] sm:$0x1]  ;;  %v2580_v0 = vld [vmem:[%s3279_s1 + $0x118] sm:$0xff] }
  0x30   : > { %708 = vmatpush.bf16.msrb.mxu1 %v2547_v45  ;;  %1254 = vmatpush.bf16.msrb.mxu0 %v2583_v53  ;;  %v438_v59 = vshll.u32 %v404_v16, 16  ;;  %v769_v25 = vrot.slane %v404_v16, 5  ;;  %v259_v18 = vrot.slane %v255_v9, 4  ;;  %v343_v33 = vld [vmem:[#allocation2 + $0x18] sm:$0xf]  ;;  %v266_v38 = vor.u32 %v264_v10, %v263_v26  ;;  %v2602_v6 = vld [vmem:[%s3279_s1 + $0x1a8] sm:$0xff] }
  0x31   : > { %1561 = vmatpush.bf16.msrb.mxu2 %v2603_v11  ;;  %v431_v29 = vrot.slane %v429_v17, 4  ;;  %v434_v30 = vrot.slane %v432_v19, 5  ;;  %v338_v32 = vsel %vm2739_vm4, %v258_v24, %v337_v5  ;;  %v346_v34 = vld [vmem:[#allocation2 + $0x1c] sm:$0x1]  ;;  %v267_v39 = vrot.slane %v263_v26, 4  ;;  %v2543_v5 = vld [vmem:[%s3279_s1 + $0x10] sm:$0xff] }
  0x32   : > { %v440_v35 = vrot.slane %v438_v59, 5  ;;  %v770_v36 = vsel %vm2882_vm11, %v2254_v21, %v769_v25  ;;  %v385_v37 = vld [vmem:[#allocation2 + $0x30] sm:$0xf]  ;;  %339 = vst [vmem:[#allocation2 + $0x10] sm:$0xf] %v338_v32  ;;  %v2612_v45 = vld [vmem:[%s3279_s1 + $0x1f8] sm:$0xff]  ;;  %v341_v48 = vsel %vm2746_vm5, %v259_v18, %v340_v28  ;;  %v344_v49 = vsel %vm2739_vm4, %v266_v38, %v343_v33 }
  0x33   : > { %v435_v40 = vor.u32 %v434_v30, %v431_v29  ;;  %v812_v42 = vunpack.c.l.b16 %v770_v36  ;;  %v2914_v43 = vld [vmem:[#allocation2 + $0x34] sm:$0x1]  ;;  %v499_v2 = vshrl.u32 %v385_v37, 16  ;;  %v502_v44 = vshll.u32 %v385_v37, 16  ;;  %1805 = vmatpush.bf16.msrb.mxu3 %v2612_v45  ;;  %342 = vst [vmem:[#allocation2 + $0x14] sm:$0x1] %v341_v48 }
  0x34   : > { %709 = vmatpush.bf16.msrb.mxu1 %v2546_v61  ;;  %1255 = vmatpush.bf16.msrb.mxu0 %v2582_v7  ;;  %v386_v46 = vld [vmem:[#allocation2 + $0x38] sm:$0xf]  ;;  %v508_v47 = vshll.u32 %v2914_v43, 16  ;;  %v347_v50 = vsel %vm2746_vm5, %v267_v39, %v346_v34  ;;  %345 = vst [vmem:[#allocation2 + $0x18] sm:$0xf] %v344_v49  ;;  %v2579_v24 = vld [vmem:[%s3279_s1 + $0x110] sm:$0xff] }
  0x35   : > { %v436_v51 = vrot.slane %v435_v40, 4  ;;  %v819_v52 = vpack.c.b16 %v812_v42, %v811_v31  ;;  %v2926_v53 = vld [vmem:[#allocation2 + $0x3c] sm:$0x1]  ;;  %v501_v54 = vrot.slane %v499_v2, 4  ;;  %v504_v55 = vrot.slane %v502_v44, 5  ;;  %1562 = vmatpush.bf16.msrb.mxu2 %v2602_v6  ;;  %v2611_v30 = vld [vmem:[%s3279_s1 + $0x1f0] sm:$0xff] }
  0x36   : > { %v513_v60 = vshrl.u32 %v386_v46, 16  ;;  %v516_v61 = vshll.u32 %v386_v46, 16  ;;  %v522_v63 = vshll.u32 %v2926_v53, 16  ;;  %v510_v4 = vrot.slane %v508_v47, 5  ;;  %348 = vst [vmem:[#allocation2 + $0x1c] sm:$0x1] %v347_v50 }
  0x37   : > { %v441_v1 = vsel %vm2846_vm10, %v436_v51, %v440_v35  ;;  %883 = vmatmul.bf16.vlgmr.msra.gmra.mxu2 %v819_v52  ;;  %v505_v3 = vor.u32 %v504_v55, %v501_v54  ;;  %v2295_v11 = vld [vmem:[#allocation2 + $0x8] sm:$0xf]  ;;  %1806 = vmatpush.bf16.msrb.mxu3 %v2611_v30  ;;  %v2541_v54 = vld [vmem:[%s3279_s1] sm:$0xff] }
  0x38   : > { %710 = vmatpush.bf16.msrb.mxu1 %v2545_v23  ;;  %1256 = vmatpush.bf16.msrb.mxu0 %v2581_v56  ;;  %v543_v7 = vunpack.c.l.b16 %v441_v1  ;;  %v515_v9 = vrot.slane %v513_v60, 4  ;;  %v518_v10 = vrot.slane %v516_v61, 5  ;;  %v524_v13 = vrot.slane %v522_v63, 5  ;;  %v1045_v56 = vld [vmem:[#allocation2 + $0x8] sm:$0xf]  ;;  %v2601_v55 = vld [vmem:[%s3279_s1 + $0x1a0] sm:$0xff] }
  0x39   : > { %v506_v12 = vrot.slane %v505_v3, 4  ;;  %v381_v14 = vld [vmem:[#allocation2 + $0x10] sm:$0xf]  ;;  %v2542_v33 = vld [vmem:[%s3279_s1 + $0x8] sm:$0xff]  ;;  %v1062_v35 = vshrl.u32 %v1045_v56, 16  ;;  %v1065_v36 = vshll.u32 %v1045_v56, 16  ;;  %1563 = vmatpush.bf16.msrb.mxu2 %v2601_v55 }
  0x3a   : > { %v2565_v15 = vld [vmem:[#allocation2 + $0xc] sm:$0xf0]  ;;  %v550_v16 = vpack.c.b16 %v543_v7, %v542_v58  ;;  %v519_v17 = vor.u32 %v518_v10, %v515_v9  ;;  %v443_v19 = vshrl.u32 %v381_v14, 16  ;;  %v446_v21 = vshll.u32 %v381_v14, 16  ;;  %v405_v32 = vld [vmem:[#allocation2 + $0x14] sm:$0x1] }
  0x3b   : > { %v738_v23 = vld [vmem:[#allocation2 + $0x10] sm:$0xe]  ;;  %v511_v59 = vsel %vm2846_vm10, %v506_v12, %v510_v4  ;;  %v2296_v25 = vor.u32 %v2565_v15, %v2295_v11  ;;  %v2578_v34 = vld [vmem:[%s3279_s1 + $0x108] sm:$0xff]  ;;  %v382_v38 = vld [vmem:[#allocation2 + $0x18] sm:$0xf]  ;;  %v452_v40 = vshll.u32 %v405_v32, 16 }
  0x3c   : > { %711 = vmatpush.bf16.msrb.mxu1 %v2544_v57  ;;  %1257 = vmatpush.bf16.msrb.mxu0 %v2580_v0  ;;  %v520_v18 = vrot.slane %v519_v17, 4  ;;  %v445_v26 = vrot.slane %v443_v19, 4  ;;  %v448_v28 = vrot.slane %v446_v21, 5  ;;  %v2255_v29 = vrot.slane %v738_v23, 9  ;;  %v739_v42 = vld [vmem:[#allocation2 + $0x18] sm:$0xe] }
  0x3d   : > { %614 = vmatmul.bf16.vlgmr.msra.gmra.mxu0 %v550_v16  ;;  %v548_v31 = vunpack.c.l.b16 %v511_v59  ;;  %1016 = vmatmul.bf16.vlgmr.msra.gmra.mxu3 %v2296_v25  ;;  %v773_v2 = vrot.slane %v405_v32, 5  ;;  %v406_v45 = vld [vmem:[#allocation2 + $0x1c] sm:$0x1]  ;;  %v457_v46 = vshrl.u32 %v382_v38, 16  ;;  %v460_v47 = vshll.u32 %v382_v38, 16  ;;  %v2610_v0 = vld [vmem:[%s3279_s1 + $0x1e8] sm:$0xff] }
  0x3e   : > { %v525_v37 = vsel %vm2846_vm10, %v520_v18, %v524_v13  ;;  %v449_v39 = vor.u32 %v448_v28, %v445_v26  ;;  %v2256_v48 = vrot.slane %v739_v42, 9  ;;  %v454_v50 = vrot.slane %v452_v40, 5  ;;  %v1047_v63 = vld [vmem:[#allocation2 + $0x10] sm:$0xf]  ;;  %v2592_v3 = vld [vmem:[%s3279_s1 + $0x178] sm:$0xff]  ;;  %v2577_v4 = vld [vmem:[%s3279_s1 + $0x100] sm:$0xff]  ;;  %1807 = vmatpush.bf16.msrb.mxu3 %v2610_v0 }
  0x3f   : > { %v549_v44 = vunpack.c.l.b16 %v525_v37  ;;  %v466_v51 = vshll.u32 %v406_v45, 16  ;;  %v774_v52 = vsel %vm2882_vm11, %v2255_v29, %v773_v2  ;;  %v459_v58 = vrot.slane %v457_v46, 4  ;;  %v2566_v10 = vld [vmem:[#allocation2 + $0x1c] sm:$0xf0]  ;;  %v2600_v11 = vld [vmem:[%s3279_s1 + $0x198] sm:$0xff]  ;;  %v2591_v28 = vld [vmem:[%s3279_s1 + $0x170] sm:$0xff] }
  0x40   : > { %712 = vmatpush.bf16.msrb.mxu1 %v2543_v5  ;;  %1258 = vmatpush.bf16.msrb.mxu0 %v2579_v24  ;;  %v450_v49 = vrot.slane %v449_v39, 4  ;;  %v462_v60 = vrot.slane %v460_v47, 5  ;;  %v777_v61 = vrot.slane %v406_v45, 5  ;;  %v813_v1 = vunpack.c.l.b16 %v774_v52  ;;  %v2983_v13 = vld [vmem:[#allocation2 + $0xc] sm:$0x1]  ;;  %v2988_v17 = vld [vmem:[%s3279_s1 + $0x238] sm:$0xff] }
  0x41   : > { %v553_v57 = vpack.c.b16 %v549_v44, %v548_v31  ;;  %v468_v7 = vrot.slane %v466_v51, 5  ;;  %v1064_v14 = vrot.slane %v1062_v35, 4  ;;  %v1067_v15 = vrot.slane %v1065_v36, 5  ;;  %v2299_v21 = vld [vmem:[#allocation2 + $0x18] sm:$0xf]  ;;  %1564 = vmatpush.bf16.msrb.mxu2 %v2600_v11  ;;  %v2609_v47 = vld [vmem:[%s3279_s1 + $0x1e0] sm:$0xff] }
  0x42   : > { %v455_v5 = vsel %vm2846_vm10, %v450_v49, %v454_v50  ;;  %v463_v6 = vor.u32 %v462_v60, %v459_v58  ;;  %v778_v9 = vsel %vm2882_vm11, %v2256_v48, %v777_v61  ;;  %v1076_v16 = vshrl.u32 %v1047_v63, 16  ;;  %v2990_v23 = vld [vmem:[#allocation2 + $0x14] sm:$0x1]  ;;  %v740_v18 = vld [vmem:[#allocation2 + $0x20] sm:$0xe]  ;;  %1808 = vmatpush.bf16.msrb.mxu3 %v2609_v47  ;;  %v2608_v58 = vld [vmem:[%s3279_s1 + $0x1d8] sm:$0xff] }
  0x43   : > { %629 = vmatmul.bf16.gmra.mxu1 %v553_v57  ;;  %v814_v12 = vunpack.c.l.b16 %v778_v9  ;;  %v1079_v24 = vshll.u32 %v1047_v63, 16  ;;  %v544_v59 = vunpack.c.l.b16 %v455_v5  ;;  %v741_v26 = vld [vmem:[#allocation2 + $0x28] sm:$0xe]  ;;  %v781_v31 = vrot.slane %v2809_v62, 5  ;;  %v1049_v46 = vld [vmem:[#allocation2 + $0x18] sm:$0xf] }
  0x44   : > { %713 = vmatpush.bf16.msrb.mxu1 %v2542_v33  ;;  %1259 = vmatpush.bf16.msrb.mxu0 %v2578_v34  ;;  %v464_v19 = vrot.slane %v463_v6, 4  ;;  %v1078_v56 = vrot.slane %v1076_v16, 4  ;;  %v785_v32 = vrot.slane %v2824_v8, 5  ;;  %v2300_v34 = vor.u32 %v2566_v10, %v2299_v21  ;;  %v2590_v62 = vld [vmem:[%s3279_s1 + $0x168] sm:$0xff]  ;;  %v2207_v8 = vld [vmem:[#allocation2] sm:$0xf] }
  0x45   : > { %v820_v25 = vpack.c.b16 %v814_v12, %v813_v1  ;;  %v1081_v30 = vrot.slane %v1079_v24, 5  ;;  %v1068_v35 = vor.u32 %v1067_v15, %v1064_v14  ;;  %v1071_v36 = vshll.u32 %v2983_v13, 16  ;;  %v2537_v2 = vld [vmem:[#allocation2 + $0x4] sm:$0xf0]  ;;  %v1051_v52 = vld [vmem:[#allocation2 + $0x20] sm:$0xf] }
  0x46   : > { %v469_v29 = vsel %vm2846_vm10, %v464_v19, %v468_v7  ;;  %v1085_v38 = vshll.u32 %v2990_v23, 16  ;;  %v2257_v39 = vrot.slane %v740_v18, 9  ;;  %v2258_v40 = vrot.slane %v741_v26, 9  ;;  %v3018_v55 = vld [vmem:[%s3279_s1 + $0x230] sm:$0xff]  ;;  %v2589_v57 = vld [vmem:[%s3279_s1 + $0x160] sm:$0xff]  ;;  %1809 = vmatpush.bf16.msrb.mxu3 %v2608_v58  ;;  %v2588_v15 = vld [vmem:[%s3279_s1 + $0x158] sm:$0xff] }
  0x47   : > { %v545_v33 = vunpack.c.l.b16 %v469_v29  ;;  %888 = vmatmul.bf16.gmra.mxu2 %v820_v25  ;;  %v1082_v37 = vor.u32 %v1081_v30, %v1078_v56  ;;  %v1069_v44 = vrot.slane %v1068_v35, 4  ;;  %v1073_v45 = vrot.slane %v1071_v36, 5  ;;  %v243_v60 = vld [vmem:[%s2722_s10 + $0x1c] sm:$0xf]  ;;  %v2303_v10 = vld [vmem:[#allocation2 + $0x28] sm:$0xf] }
  0x48   : > { %714 = vmatpush.bf16.msrb.mxu1 %v2541_v54  ;;  %1260 = vmatpush.bf16.msrb.mxu0 %v2577_v4  ;;  %v1087_v49 = vrot.slane %v1085_v38, 5  ;;  %v782_v50 = vsel %vm2882_vm11, %v2257_v39, %v781_v31  ;;  %v786_v51 = vsel %vm2882_vm11, %v2258_v40, %v785_v32  ;;  %v2599_v54 = vld [vmem:[%s3279_s1 + $0x190] sm:$0xff]  ;;  %v2208_v61 = vor.u32 %v2537_v2, %v2207_v8  ;;  %v3032_v12 = vld [vmem:[#allocation2 + $0x1c] sm:$0x1]  ;;  %v2598_v16 = vld [vmem:[%s3279_s1 + $0x188] sm:$0xff] }
  0x49   : > { %v551_v42 = vpack.c.b16 %v545_v33, %v544_v59  ;;  %v1083_v48 = vrot.slane %v1082_v37, 4  ;;  %v1090_v63 = vshrl.u32 %v1049_v46, 16  ;;  %1565 = vmatpush.bf16.msrb.mxu2 %v2599_v54  ;;  %v1074_v0 = vsel %vm2846_vm10, %v1069_v44, %v1073_v45  ;;  %v2567_v11 = vld [vmem:[#allocation2 + $0x2c] sm:$0xf0]  ;;  %v3043_v19 = vld [vmem:[%s3279_s1 + $0x228] sm:$0xff]  ;;  %v2597_v32 = vld [vmem:[%s3279_s1 + $0x180] sm:$0xff] }
  0x4a   : > { %v815_v1 = vunpack.c.l.b16 %v782_v50  ;;  %v1093_v4 = vshll.u32 %v1049_v46, 16  ;;  %v1104_v6 = vshrl.u32 %v1051_v52, 16  ;;  %v1107_v7 = vshll.u32 %v1051_v52, 16  ;;  %v3045_v56 = vld [vmem:[#allocation2 + $0x24] sm:$0x1]  ;;  %v2607_v52 = vld [vmem:[%s3279_s1 + $0x1d0] sm:$0xff] }
  0x4b   : > { %v1088_v5 = vsel %vm2846_vm10, %v1083_v48, %v1087_v49  ;;  %v301_v9 = vshrl.u32 %v243_v60, 16  ;;  %v304_v14 = vshll.u32 %v243_v60, 16  ;;  %v1189_v24 = vunpack.c.l.b16 %v1074_v0  ;;  %v373_v26 = vld [vmem:[#allocation2 + $0x40] sm:$0xf]  ;;  %v742_v31 = vld [vmem:[#allocation2 + $0x30] sm:$0xe]  ;;  %1810 = vmatpush.bf16.msrb.mxu3 %v2607_v52 }
  0x4c   : > { %1426 = vmatpush.bf16.msra.mxu1 %v2592_v3  ;;  %1978 = vmatpush.bf16.msra.mxu0 %v2988_v17  ;;  %v816_v3 = vunpack.c.l.b16 %v786_v51  ;;  %v1190_v59 = vunpack.c.l.b16 %v1088_v5  ;;  %v1092_v18 = vrot.slane %v1090_v63, 4  ;;  %v1106_v29 = vrot.slane %v1104_v6, 4  ;;  %v376_v46 = vld [vmem:[#allocation2 + $0x44] sm:$0x1]  ;;  %v2211_v47 = vld [vmem:[#allocation2 + $0x10] sm:$0xf] }
  0x4d   : > { %619 = vmatmul.bf16.gmra.mxu0 %v551_v42  ;;  %1021 = vmatmul.bf16.gmra.mxu3 %v2300_v34  ;;  %v303_v21 = vrot.slane %v301_v9, 7  ;;  %v1109_v30 = vrot.slane %v1107_v7, 5  ;;  %v743_v34 = vld [vmem:[#allocation2 + $0x38] sm:$0xe]  ;;  %v2304_v36 = vor.u32 %v2567_v11, %v2303_v10  ;;  %v1099_v37 = vshll.u32 %v3032_v12, 16  ;;  %v2606_v63 = vld [vmem:[%s3279_s1 + $0x1c8] sm:$0xff] }
  0x4e   : > { %v821_v25 = vpack.c.b16 %v816_v3, %v815_v1  ;;  %1566 = vmatpush.bf16.msrb.mxu2 %v2598_v16  ;;  %v1197_v39 = vpack.c.b16 %v1190_v59, %v1189_v24  ;;  %v1113_v40 = vshll.u32 %v3045_v56, 16  ;;  %v2259_v42 = vrot.slane %v742_v31, 9  ;;  %v2538_v48 = vld [vmem:[#allocation2 + $0x14] sm:$0xf0]  ;;  %v1053_v49 = vld [vmem:[#allocation2 + $0x28] sm:$0xf] }
  0x4f   : > { %v306_v33 = vor.u32 %v304_v14, %v303_v21  ;;  %v307_v35 = vrot.slane %v303_v21, 4  ;;  %v1110_v2 = vor.u32 %v1109_v30, %v1106_v29  ;;  %v2260_v44 = vrot.slane %v743_v34, 9  ;;  %v1055_v50 = vld [vmem:[#allocation2 + $0x30] sm:$0xf]  ;;  %v1599_v10 = vld [vmem:[#allocation2 + $0x18] sm:$0xf]  ;;  %1811 = vmatpush.bf16.msrb.mxu3 %v2606_v63 }
  0x50   : > { %1427 = vmatpush.bf16.msra.mxu1 %v2591_v28  ;;  %1979 = vmatpush.bf16.msra.mxu0 %v3018_v55  ;;  %v1095_v28 = vrot.slane %v1093_v4, 5  ;;  %v793_v45 = vrot.slane %v2926_v53, 5  ;;  %v1115_v51 = vrot.slane %v1113_v40, 5  ;;  %v2587_v53 = vld [vmem:[%s3279_s1 + $0x150] sm:$0xff]  ;;  %v1118_v60 = vshrl.u32 %v1053_v49, 16 }
  0x51   : > { %v374_v38 = vsel %vm2739_vm4, %v306_v33, %v373_v26  ;;  %v377_v20 = vsel %vm2746_vm5, %v307_v35, %v376_v46  ;;  %v1111_v54 = vrot.slane %v1110_v2, 4  ;;  %v1597_v0 = vld [vmem:[#allocation2 + $0x10] sm:$0xf]  ;;  %v2212_v1 = vor.u32 %v2538_v48, %v2211_v47  ;;  %v2307_v30 = vld [vmem:[#allocation2 + $0x38] sm:$0xf] }
  0x52   : > { %375 = vst [vmem:[#allocation2 + $0x40] sm:$0xf] %v374_v38  ;;  %v1096_v8 = vor.u32 %v1095_v28, %v1092_v18  ;;  %1567 = vmatpush.bf16.msrb.mxu2 %v2597_v32  ;;  %v794_v58 = vsel %vm2882_vm11, %v2260_v44, %v793_v45  ;;  %v1132_v3 = vshrl.u32 %v1055_v50, 16  ;;  %v1135_v4 = vshll.u32 %v1055_v50, 16  ;;  %v2605_v18 = vld [vmem:[%s3279_s1 + $0x1c0] sm:$0xff] }
  0x53   : > { %715 = vmatmul.bf16.vlgmr.msrb.gmra.mxu1 %v2208_v61  ;;  %378 = vst [vmem:[#allocation2 + $0x44] sm:$0x1] %v377_v20  ;;  %v1121_v61 = vshll.u32 %v1053_v49, 16  ;;  %v818_v6 = vunpack.c.l.b16 %v794_v58  ;;  %v1116_v9 = vsel %vm2846_vm10, %v1111_v54, %v1115_v51  ;;  %v1614_v11 = vshrl.u32 %v1597_v0, 16  ;;  %v3093_v31 = vld [vmem:[#allocation2 + $0x34] sm:$0x1]  ;;  %1812 = vmatpush.bf16.msrb.mxu3 %v2605_v18 }
  0x54   : > { %1428 = vmatpush.bf16.msra.mxu1 %v2590_v62  ;;  %1980 = vmatpush.bf16.msra.mxu0 %v3043_v19  ;;  %v789_v62 = vrot.slane %v2914_v43, 5  ;;  %v1101_v43 = vrot.slane %v1099_v37, 5  ;;  %v1097_v22 = vrot.slane %v1096_v8, 4  ;;  %v1617_v14 = vshll.u32 %v1597_v0, 16  ;;  %v3096_v38 = vld [vmem:[#allocation2 + $0x14] sm:$0x1] }
  0x55   : > { %v1120_v16 = vrot.slane %v1118_v60, 4  ;;  %v1123_v21 = vrot.slane %v1121_v61, 5  ;;  %v1134_v24 = vrot.slane %v1132_v3, 4  ;;  %v1137_v59 = vrot.slane %v1135_v4, 5  ;;  %v1057_v49 = vld [vmem:[#allocation2 + $0x38] sm:$0xf] }
  0x56   : > { %2629 = vmatpush.bf16.msra.mxu2 %v2988_v17  ;;  %v2617_v17 = vld [vmem:[%s3279_s1 + $0x220] sm:$0xff]  ;;  %v1102_v7 = vsel %vm2846_vm10, %v1097_v22, %v1101_v43  ;;  %v1192_v28 = vunpack.c.l.b16 %v1116_v9  ;;  %v1628_v32 = vshrl.u32 %v1599_v10, 16  ;;  %v1616_v35 = vrot.slane %v1614_v11, 4  ;;  %v2539_v51 = vld [vmem:[#allocation2 + $0x24] sm:$0xf0]  ;;  %v2615_v54 = vld [vmem:[%s3279_s1 + $0x210] sm:$0xff] }
  0x57   : > { %893 = vmatmul.bf16.gmra.mxu2 %v821_v25  ;;  %v2616_v25 = vld [vmem:[%s3279_s1 + $0x218] sm:$0xff]  ;;  %v1191_v26 = vunpack.c.l.b16 %v1102_v7  ;;  %v1124_v37 = vor.u32 %v1123_v21, %v1120_v16  ;;  %v1631_v40 = vshll.u32 %v1599_v10, 16  ;;  %v1623_v46 = vshll.u32 %v3096_v38, 16  ;;  %v2215_v43 = vld [vmem:[#allocation2 + $0x20] sm:$0xf]  ;;  %v2614_v3 = vld [vmem:[%s3279_s1 + $0x208] sm:$0xff] }
  0x58   : > { %1429 = vmatpush.bf16.msra.mxu1 %v2589_v57  ;;  %v790_v57 = vsel %vm2882_vm11, %v2259_v42, %v789_v62  ;;  %1981 = vmatpush.bf16.msra.mxu0 %v2617_v17  ;;  %v1138_v42 = vor.u32 %v1137_v59, %v1134_v24  ;;  %v1141_v62 = vshll.u32 %v3093_v31, 16  ;;  %v2585_v22 = vld [vmem:[%s3279_s1 + $0x140] sm:$0xff]  ;;  %v2216_v63 = vor.u32 %v2539_v51, %v2215_v43  ;;  %v2415_v7 = vld [vmem:[#allocation2 + $0x10] sm:$0xf] }
  0x59   : > { %v817_v5 = vunpack.c.l.b16 %v790_v57  ;;  %v2568_v33 = vld [vmem:[#allocation2 + $0x3c] sm:$0xf0]  ;;  %v1198_v8 = vpack.c.b16 %v1192_v28, %v1191_v26  ;;  %v1633_v2 = vrot.slane %v1631_v40, 5  ;;  %v1125_v48 = vrot.slane %v1124_v37, 4 }
  0x5a   : > { %2630 = vmatpush.bf16.msra.mxu2 %v3018_v55  ;;  %v2586_v55 = vld [vmem:[%s3279_s1 + $0x148] sm:$0xff]  ;;  %v2308_v44 = vor.u32 %v2568_v33, %v2307_v30  ;;  %v1139_v52 = vrot.slane %v1138_v42, 4  ;;  %v1146_v57 = vshrl.u32 %v1057_v49, 16  ;;  %v1625_v60 = vrot.slane %v1623_v46, 5  ;;  %v1601_v4 = vld [vmem:[#allocation2 + $0x20] sm:$0xf] }
  0x5b   : > { %v822_v29 = vpack.c.b16 %v818_v6, %v817_v5  ;;  %v1603_v5 = vld [vmem:[#allocation2 + $0x28] sm:$0xf]  ;;  %v1149_v9 = vshll.u32 %v1057_v49, 16  ;;  %v1642_v16 = vshrl.u32 %v1601_v4, 16  ;;  %v1645_v21 = vshll.u32 %v1601_v4, 16 }
  0x5c   : > { %1430 = vmatpush.bf16.msra.mxu1 %v2588_v15  ;;  %v3081_v15 = vld [vmem:[#allocation2 + $0x2c] sm:$0x1]  ;;  %1982 = vmatpush.bf16.msra.mxu0 %v2616_v25  ;;  %v1656_v24 = vshrl.u32 %v1603_v5, 16  ;;  %v1659_v59 = vshll.u32 %v1603_v5, 16  ;;  %v1148_v18 = vrot.slane %v1146_v57, 4 }
  0x5d   : > { %1261 = vmatmul.bf16.vlgmr.msrb.gmra.mxu0 %v1197_v39  ;;  %1026 = vmatmul.bf16.gmra.mxu3 %v2304_v36  ;;  %v1127_v34 = vshll.u32 %v3081_v15, 16  ;;  %v1619_v36 = vrot.slane %v1617_v14, 5  ;;  %v3098_v39 = vld [vmem:[#allocation2 + $0x1c] sm:$0x1]  ;;  %v2593_v14 = vld [vmem:[#allocation2 + $0x14] sm:$0xf0] }
  0x5e   : > { %2631 = vmatpush.bf16.msra.mxu2 %v3043_v19  ;;  %v1630_v19 = vrot.slane %v1628_v32, 4  ;;  %v1637_v47 = vshll.u32 %v3098_v39, 16  ;;  %v3120_v30 = vld [vmem:[#allocation2 + $0x3c] sm:$0x1]  ;;  %v1151_v32 = vrot.slane %v1149_v9, 5  ;;  %v1644_v37 = vrot.slane %v1642_v16, 4 }
  0x5f   : > { %v1620_v45 = vor.u32 %v1619_v36, %v1616_v35  ;;  %v1129_v20 = vrot.slane %v1127_v34, 5  ;;  %v2613_v35 = vld [vmem:[%s3279_s1 + $0x200] sm:$0xff]  ;;  %v1658_v40 = vrot.slane %v1656_v24, 4  ;;  %v1661_v42 = vrot.slane %v1659_v59, 5  ;;  %v2594_v9 = vld [vmem:[#allocation2 + $0x24] sm:$0xf0] }
  0x60   : > { %1431 = vmatpush.bf16.msra.mxu1 %v2587_v53  ;;  %v1634_v50 = vor.u32 %v1633_v2, %v1630_v19  ;;  %v1143_v53 = vrot.slane %v1141_v62, 5  ;;  %v1639_v61 = vrot.slane %v1637_v47, 5  ;;  %1983 = vmatpush.bf16.msra.mxu0 %v2615_v54  ;;  %v3125_v36 = vld [vmem:[#allocation2 + $0x44] sm:$0x1]  ;;  %v1647_v19 = vrot.slane %v1645_v21, 5 }
  0x61   : > { %v1621_v58 = vrot.slane %v1620_v45, 4  ;;  %v1130_v0 = vsel %vm2846_vm10, %v1125_v48, %v1129_v20  ;;  %v3127_v2 = vld [vmem:[#allocation2 + $0x24] sm:$0x1]  ;;  %v1152_v46 = vor.u32 %v1151_v32, %v1148_v18  ;;  %v1155_v47 = vshll.u32 %v3120_v30, 16  ;;  %v1291_v16 = vld [vmem:[#allocation2 + $0x10] sm:$0xe] }
  0x62   : > { %2632 = vmatpush.bf16.msra.mxu2 %v2617_v17  ;;  %v1059_v17 = vld [vmem:[#allocation2 + $0x40] sm:$0xf]  ;;  %v1144_v6 = vsel %vm2846_vm10, %v1139_v52, %v1143_v53  ;;  %v1169_v20 = vshll.u32 %v3125_v36, 16  ;;  %v1648_v49 = vor.u32 %v1647_v19, %v1644_v37  ;;  %v1662_v43 = vor.u32 %v1661_v42, %v1658_v40  ;;  %v2219_v53 = vld [vmem:[#allocation2 + $0x30] sm:$0xf] }
  0x63   : > { %720 = vmatmul.bf16.gmra.mxu1 %v2212_v1  ;;  %v1635_v1 = vrot.slane %v1634_v50, 4  ;;  %v1160_v10 = vshrl.u32 %v1059_v17, 16  ;;  %v1163_v11 = vshll.u32 %v1059_v17, 16  ;;  %v1626_v26 = vsel %vm2846_vm10, %v1621_v58, %v1625_v60  ;;  %v2540_v58 = vld [vmem:[#allocation2 + $0x34] sm:$0xf0] }
  0x64   : > { %1432 = vmatpush.bf16.msra.mxu1 %v2586_v55  ;;  %v1193_v55 = vunpack.c.l.b16 %v1130_v0  ;;  %1984 = vmatpush.bf16.msra.mxu0 %v2614_v3  ;;  %v1741_v62 = vunpack.c.l.b16 %v1626_v26  ;;  %v1651_v50 = vshll.u32 %v3127_v2, 16  ;;  %v1153_v17 = vrot.slane %v1152_v46, 4 }
  0x65   : > { %v1640_v28 = vsel %vm2846_vm10, %v1635_v1, %v1639_v61  ;;  %v1162_v33 = vrot.slane %v1160_v10, 4  ;;  %v1165_v34 = vrot.slane %v1163_v11, 5  ;;  %v1171_v57 = vrot.slane %v1169_v20, 5  ;;  %v1605_v1 = vld [vmem:[#allocation2 + $0x30] sm:$0xf] }
  0x66   : > { %2633 = vmatpush.bf16.msra.mxu2 %v2616_v25  ;;  %v1194_v25 = vunpack.c.l.b16 %v1144_v6  ;;  %v1649_v60 = vrot.slane %v1648_v49, 4  ;;  %v1653_v61 = vrot.slane %v1651_v50, 5  ;;  %v2220_v4 = vor.u32 %v2540_v58, %v2219_v53  ;;  %v1290_v10 = vld [vmem:[#allocation2 + $0x8] sm:$0xe] }
  0x67   : > { %898 = vmatmul.bf16.gmra.mxu2 %v822_v29  ;;  %v2416_v29 = vor.u32 %v2593_v14, %v2415_v7  ;;  %v1166_v48 = vor.u32 %v1165_v34, %v1162_v33  ;;  %v2419_v7 = vld [vmem:[#allocation2 + $0x20] sm:$0xf]  ;;  %v1670_v21 = vshrl.u32 %v1605_v1, 16  ;;  %v1673_v24 = vshll.u32 %v1605_v1, 16 }
  0x68   : > { %1433 = vmatpush.bf16.msra.mxu1 %v2585_v22  ;;  %v1199_v45 = vpack.c.b16 %v1194_v25, %v1193_v55  ;;  %1985 = vmatpush.bf16.msra.mxu0 %v2613_v35  ;;  %v1157_v22 = vrot.slane %v1155_v47, 5  ;;  %v1654_v11 = vsel %vm2846_vm10, %v1649_v60, %v1653_v61  ;;  %v1316_v25 = vrot.slane %v2983_v13, 5  ;;  %v1842_v47 = vld [vmem:[#allocation2 + $0x10] sm:$0xe] }
  0x69   : > { %v1320_v18 = vrot.slane %v2990_v23, 5  ;;  %v2373_v32 = vrot.slane %v1290_v10, 9  ;;  %v2374_v33 = vrot.slane %v1291_v16, 9  ;;  %v1743_v34 = vunpack.c.l.b16 %v1654_v11 }
  0x6a   : > { %2634 = vmatpush.bf16.msra.mxu2 %v2615_v54  ;;  %v1167_v54 = vrot.slane %v1166_v48, 4  ;;  %v1158_v5 = vsel %vm2846_vm10, %v1153_v17, %v1157_v22  ;;  %v1672_v37 = vrot.slane %v1670_v21, 4  ;;  %v1675_v19 = vrot.slane %v1673_v24, 5  ;;  %v1843_v48 = vld [vmem:[#allocation2 + $0x18] sm:$0xe] }
  0x6b   : > { %v1195_v26 = vunpack.c.l.b16 %v1158_v5  ;;  %v1317_v13 = vsel %vm2882_vm11, %v2373_v32, %v1316_v25  ;;  %v1321_v23 = vsel %vm2882_vm11, %v2374_v33, %v1320_v18  ;;  %v1868_v53 = vrot.slane %v3096_v38, 5 }
  0x6c   : > { %v1172_v6 = vsel %vm2846_vm10, %v1167_v54, %v1171_v57  ;;  %v1676_v20 = vor.u32 %v1675_v19, %v1672_v37  ;;  %v1872_v17 = vrot.slane %v3098_v39, 5  ;;  %v2493_v22 = vrot.slane %v1842_v47, 9  ;;  %v3171_v37 = vld [vmem:[#allocation2 + $0x44] sm:$0x1]  ;;  %v3173_v19 = vld [vmem:[#allocation2 + $0x4c] sm:$0x1] }
  0x6d   : > { %1266 = vmatmul.bf16.gmra.mxu0 %v1198_v8  ;;  %1031 = vmatmul.bf16.gmra.mxu3 %v2308_v44  ;;  %v1742_v8 = vunpack.c.l.b16 %v1640_v28  ;;  %v3129_v44 = vld [vmem:[#allocation2 + $0x2c] sm:$0x1]  ;;  %v1196_v28 = vunpack.c.l.b16 %v1172_v6  ;;  %v2494_v54 = vrot.slane %v1843_v48, 9  ;;  %v1324_v39 = vrot.slane %v3032_v12, 5 }
  0x6e   : > { %2635 = vmatpush.bf16.msra.mxu2 %v2614_v3  ;;  %v1665_v51 = vshll.u32 %v3129_v44, 16  ;;  %v1607_v3 = vld [vmem:[#allocation2 + $0x38] sm:$0xf]  ;;  %v1677_v57 = vrot.slane %v1676_v20, 4  ;;  %v1869_v5 = vsel %vm2882_vm11, %v2493_v22, %v1868_v53  ;;  %v1328_v6 = vrot.slane %v3045_v56, 5 }
  0x6f   : > { %v1749_v52 = vpack.c.b16 %v1742_v8, %v1741_v62  ;;  %v1684_v59 = vshrl.u32 %v1607_v3, 16  ;;  %v1687_v55 = vshll.u32 %v1607_v3, 16  ;;  %v3145_v62 = vld [vmem:[#allocation2 + $0x34] sm:$0x1]  ;;  %v3147_v8 = vld [vmem:[#allocation2 + $0x3c] sm:$0x1]  ;;  %v1873_v38 = vsel %vm2882_vm11, %v2494_v54, %v1872_v17 }
  0x70   : > { %v1667_v0 = vrot.slane %v1665_v51, 5  ;;  %v1679_v49 = vshll.u32 %v3145_v62, 16  ;;  %v1362_v51 = vunpack.c.l.b16 %v1317_v13  ;;  %v1609_v3 = vld [vmem:[#allocation2 + $0x40] sm:$0xf]  ;;  %v1914_v25 = vunpack.c.l.b16 %v1869_v5 }
  0x71   : > { %v1686_v40 = vrot.slane %v1684_v59, 4  ;;  %v1689_v42 = vrot.slane %v1687_v55, 5  ;;  %v1698_v21 = vshrl.u32 %v1609_v3, 16  ;;  %v1701_v24 = vshll.u32 %v1609_v3, 16 }
  0x72   : > { %2636 = vmatpush.bf16.msra.mxu2 %v2613_v35  ;;  %v1681_v58 = vrot.slane %v1679_v49, 5  ;;  %v1915_v18 = vunpack.c.l.b16 %v1873_v38  ;;  %v1707_v48 = vshll.u32 %v3171_v37, 16  ;;  %v1721_v49 = vshll.u32 %v3173_v19, 16 }
  0x73   : > { %725 = vmatmul.bf16.gmra.mxu1 %v2216_v63  ;;  %v1663_v63 = vrot.slane %v1662_v43, 4  ;;  %v1690_v50 = vor.u32 %v1689_v42, %v1686_v40  ;;  %v1693_v43 = vshll.u32 %v3147_v8, 16  ;;  %v1700_v32 = vrot.slane %v1698_v21, 4  ;;  %v1844_v42 = vld [vmem:[#allocation2 + $0x20] sm:$0xe] }
  0x74   : > { %v1703_v33 = vrot.slane %v1701_v24, 5  ;;  %v1922_v40 = vpack.c.b16 %v1915_v18, %v1914_v25  ;;  %v1709_v17 = vrot.slane %v1707_v48, 5  ;;  %v1723_v54 = vrot.slane %v1721_v49, 5  ;;  %v1847_v18 = vld [vmem:[#allocation2 + $0x38] sm:$0xe] }
  0x75   : > { %v1668_v14 = vsel %vm2846_vm10, %v1663_v63, %v1667_v0  ;;  %v1691_v60 = vrot.slane %v1690_v50, 4  ;;  %v1695_v61 = vrot.slane %v1693_v43, 5  ;;  %v1292_v63 = vld [vmem:[#allocation2 + $0x18] sm:$0xe]  ;;  %v1293_v0 = vld [vmem:[#allocation2 + $0x20] sm:$0xe] }
  0x76   : > { %v1744_v35 = vunpack.c.l.b16 %v1668_v14  ;;  %v2375_v10 = vrot.slane %v1292_v63, 9  ;;  %v2376_v11 = vrot.slane %v1293_v0, 9  ;;  %v1682_v14 = vsel %vm2846_vm10, %v1677_v57, %v1681_v58  ;;  %v1295_v63 = vld [vmem:[#allocation2 + $0x30] sm:$0xe]  ;;  %v2427_v0 = vld [vmem:[#allocation2 + $0x40] sm:$0xf] }
  0x77   : > { %1568 = vmatmul.bf16.vlgmr.msrb.gmra.mxu2 %v2416_v29  ;;  %v2420_v29 = vor.u32 %v2594_v9, %v2419_v7  ;;  %v2423_v7 = vld [vmem:[#allocation2 + $0x30] sm:$0xf]  ;;  %v2595_v9 = vld [vmem:[#allocation2 + $0x34] sm:$0xf0]  ;;  %v1696_v16 = vsel %vm2846_vm10, %v1691_v60, %v1695_v61  ;;  %v1704_v47 = vor.u32 %v1703_v33, %v1700_v32  ;;  %v2495_v50 = vrot.slane %v1844_v42, 9 }
  0x78   : > { %v1750_v46 = vpack.c.b16 %v1744_v35, %v1743_v34  ;;  %v2424_v12 = vor.u32 %v2595_v9, %v2423_v7  ;;  %v1325_v56 = vsel %vm2882_vm11, %v2375_v10, %v1324_v39  ;;  %v1876_v43 = vrot.slane %v3127_v2, 5  ;;  %v1294_v61 = vld [vmem:[#allocation2 + $0x28] sm:$0xe] }
  0x79   : > { %v1364_v13 = vunpack.c.l.b16 %v1325_v56  ;;  %v1705_v53 = vrot.slane %v1704_v47, 4  ;;  %v2596_v2 = vld [vmem:[#allocation2 + $0x44] sm:$0xf0]  ;;  %v2377_v5 = vrot.slane %v1294_v61, 9  ;;  %v1332_v38 = vrot.slane %v3081_v15, 5 }
  0x7a   : > { %v1877_v58 = vsel %vm2882_vm11, %v2495_v50, %v1876_v43  ;;  %v2378_v39 = vrot.slane %v1295_v63, 9  ;;  %v2428_v7 = vor.u32 %v2596_v2, %v2427_v0  ;;  %v1892_v24 = vrot.slane %v3171_v37, 5 }
  0x7b   : > { %v1333_v21 = vsel %vm2882_vm11, %v2377_v5, %v1332_v38  ;;  %v1896_v15 = vrot.slane %v3173_v19, 5  ;;  %v2498_v32 = vrot.slane %v1847_v18, 9  ;;  %v1888_v33 = vrot.slane %v3147_v8, 5 }
  0x7c   : > { %v1340_v48 = vrot.slane %v3120_v30, 5  ;;  %v1344_v49 = vrot.slane %v3125_v36, 5 }
  0x7d   : > { %1271 = vmatmul.bf16.gmra.mxu0 %v1199_v45  ;;  %1813 = vmatmul.bf16.vlgmr.msrb.gmra.mxu3 %v1749_v52  ;;  %v1200_v45 = vpack.c.b16 %v1196_v28, %v1195_v26  ;;  %v1363_v52 = vunpack.c.l.b16 %v1321_v23  ;;  %v1329_v26 = vsel %vm2882_vm11, %v2376_v11, %v1328_v6  ;;  %v1745_v28 = vunpack.c.l.b16 %v1682_v14  ;;  %v1848_v11 = vld [vmem:[#allocation2 + $0x40] sm:$0xe]  ;;  %v1849_v14 = vld [vmem:[#allocation2 + $0x48] sm:$0xe] }
  0x7e   : > { %v1365_v23 = vunpack.c.l.b16 %v1329_v26  ;;  %v1336_v6 = vrot.slane %v3093_v31, 5  ;;  %v2500_v31 = vrot.slane %v1849_v14, 9 }
  0x7f   : > { %v1370_v1 = vpack.c.b16 %v1363_v52, %v1362_v51  ;;  %v1880_v52 = vrot.slane %v3129_v44, 5  ;;  %v1710_v44 = vsel %vm2846_vm10, %v1705_v53, %v1709_v17 }
  0x80   : > { %v1371_v57 = vpack.c.b16 %v1365_v23, %v1364_v13  ;;  %v1747_v9 = vunpack.c.l.b16 %v1710_v44  ;;  %v1337_v27 = vsel %vm2882_vm11, %v2378_v39, %v1336_v6  ;;  %v1297_v13 = vld [vmem:[#allocation2 + $0x40] sm:$0xe] }
  0x81   : > { %v1367_v56 = vunpack.c.l.b16 %v1337_v27 }
  0x83   : > { %730 = vmatmul.bf16.gmra.mxu1 %v2220_v4  ;;  %v1611_v4 = vld [vmem:[#allocation2 + $0x48] sm:$0xf] }
  0x84   : > { %v1712_v59 = vshrl.u32 %v1611_v4, 16  ;;  %v1715_v55 = vshll.u32 %v1611_v4, 16 }
  0x86   : > { %v1714_v34 = vrot.slane %v1712_v59, 4  ;;  %v1717_v35 = vrot.slane %v1715_v55, 5  ;;  %v1846_v59 = vld [vmem:[#allocation2 + $0x30] sm:$0xe]  ;;  %v2499_v55 = vrot.slane %v1848_v11, 9 }
  0x87   : > { %1573 = vmatmul.bf16.gmra.mxu2 %v2420_v29  ;;  %v1746_v29 = vunpack.c.l.b16 %v1696_v16  ;;  %v2497_v26 = vrot.slane %v1846_v59, 9 }
  0x88   : > { %v1718_v20 = vor.u32 %v1717_v35, %v1714_v34  ;;  %v1893_v34 = vsel %vm2882_vm11, %v2499_v55, %v1892_v24  ;;  %v1897_v35 = vsel %vm2882_vm11, %v2500_v31, %v1896_v15 }
  0x89   : > { %v1920_v19 = vunpack.c.l.b16 %v1893_v34 }
  0x8a   : > { %v1719_v22 = vrot.slane %v1718_v20, 4  ;;  %v2380_v20 = vrot.slane %v1297_v13, 9 }
  0x8c   : > { %v1724_v4 = vsel %vm2846_vm10, %v1719_v22, %v1723_v54 }
  0x8d   : > { %1276 = vmatmul.bf16.gmra.mxu0 %v1200_v45  ;;  %1818 = vmatmul.bf16.gmra.mxu3 %v1750_v46  ;;  %v1845_v45 = vld [vmem:[#allocation2 + $0x28] sm:$0xe]  ;;  %v1751_v46 = vpack.c.b16 %v1746_v29, %v1745_v28  ;;  %v1748_v10 = vunpack.c.l.b16 %v1724_v4  ;;  %v1884_v28 = vrot.slane %v3145_v62, 5  ;;  %v1889_v62 = vsel %vm2882_vm11, %v2498_v32, %v1888_v33 }
  0x8e   : > { %v2496_v51 = vrot.slane %v1845_v45, 9  ;;  %v1296_v45 = vld [vmem:[#allocation2 + $0x38] sm:$0xe]  ;;  %v1919_v23 = vunpack.c.l.b16 %v1889_v62 }
  0x8f   : > { %v1752_v25 = vpack.c.b16 %v1748_v10, %v1747_v9  ;;  %v1885_v42 = vsel %vm2882_vm11, %v2497_v26, %v1884_v28  ;;  %v2379_v47 = vrot.slane %v1296_v45, 9 }
  0x90   : > { %v1881_v60 = vsel %vm2882_vm11, %v2496_v51, %v1880_v52  ;;  %v1918_v8 = vunpack.c.l.b16 %v1885_v42  ;;  %v1345_v52 = vsel %vm2882_vm11, %v2380_v20, %v1344_v49 }
  0x91   : > { %v1917_v3 = vunpack.c.l.b16 %v1881_v60  ;;  %v1341_v51 = vsel %vm2882_vm11, %v2379_v47, %v1340_v48  ;;  %v1369_v54 = vunpack.c.l.b16 %v1345_v52 }
  0x92   : > { %v1924_v43 = vpack.c.b16 %v1919_v23, %v1918_v8  ;;  %v1368_v22 = vunpack.c.l.b16 %v1341_v51 }
  0x93   : > { %1434 = vmatmul.bf16.vlgmr.msra.gmra.mxu1 %v1370_v1  ;;  %v1916_v1 = vunpack.c.l.b16 %v1877_v58 }
  0x95   : > { %v1923_v16 = vpack.c.b16 %v1917_v3, %v1916_v1 }
  0x97   : > { %1578 = vmatmul.bf16.gmra.mxu2 %v2424_v12  ;;  %v1366_v12 = vunpack.c.l.b16 %v1333_v21 }
  0x99   : > { %v1372_v37 = vpack.c.b16 %v1367_v56, %v1366_v12 }
  0x9d   : > { %1986 = vmatmul.bf16.vlgmr.msra.gmra.mxu0 %v1922_v40  ;;  %1823 = vmatmul.bf16.gmra.mxu3 %v1751_v46  ;;  %v1921_v40 = vunpack.c.l.b16 %v1897_v35 }
  0x9f   : > { %v1925_v46 = vpack.c.b16 %v1921_v40, %v1920_v19 }
  0xa3   : > { %1439 = vmatmul.bf16.gmra.mxu1 %v1371_v57  ;;  %v1373_v57 = vpack.c.b16 %v1369_v54, %v1368_v22 }
  0xa7   : > { %1583 = vmatmul.bf16.gmra.mxu2 %v2428_v7 }
  0xab   : > { %v3196_v29 = vpop.f32.mrf.mxu1 }
  0xad   : > { %1991 = vmatmul.bf16.gmra.mxu0 %v1923_v16  ;;  %1828 = vmatmul.bf16.gmra.mxu3 %v1752_v25 }
  0xb3   : > { %1444 = vmatmul.bf16.gmra.mxu1 %v1372_v37  ;;  %v627_v50 = vpop.f32.mrf.mxu1 }
  0xb7   : > { %2001 = vmatmul.bf16.vlgmr.msra.gmra.mxu2 %v1925_v46 }
  0xba   : > { %v615_v53 = vpop.f32.mrf.mxu0  ;;  %v884_v17 = vpop.f32.mrf.mxu2 }
  0xbd   : > { %1996 = vmatmul.bf16.gmra.mxu0 %v1924_v43 }
  0xc0   : > { %v630_v58 = vpop.f32.mrf.mxu1  ;;  %v1017_v30 = vpop.f32.mrf.mxu3 }
  0xc2   : > { %v617_v60 = vpop.f32.mrf.mxu0  ;;  %v886_v61 = vpop.f32.mrf.mxu2 }
  0xc3   : > { %1449 = vmatmul.bf16.gmra.mxu1 %v1373_v57 }
  0xc8   : > { %v632_v36 = vpop.f32.mrf.mxu1  ;;  %v1019_v63 = vpop.f32.mrf.mxu3 }
  0xca   : > { %v620_v0 = vpop.f32.mrf.mxu0  ;;  %v889_v2 = vpop.f32.mrf.mxu2 }
  0xd0   : > { %v716_v1 = vpop.f32.mrf.mxu1  ;;  %v3213_v3 = vpop.f32.mrf.mxu3 }
  0xd1   : > { %v717_v44 = vadd.f32 %v716_v1, %v615_v53 }
  0xd2   : > { %v622_v41 = vpop.f32.mrf.mxu0  ;;  %v891_v5 = vpop.f32.mrf.mxu2 }
  0xd3   : > { %v904_v4 = vadd.f32 %v884_v17, %v717_v44 }
  0xd5   : > { %v1037_v20 = vadd.f32 %v1017_v30, %v904_v4 }
  0xd8   : > { %v718_v38 = vpop.f32.mrf.mxu1  ;;  %v3215_v39 = vpop.f32.mrf.mxu3 }
  0xd9   : > { %v719_v7 = vadd.f32 %v718_v38, %v617_v60 }
  0xda   : > { %v1262_v6 = vpop.f32.mrf.mxu0  ;;  %v894_v10 = vpop.f32.mrf.mxu2 }
  0xdb   : > { %v905_v9 = vadd.f32 %v886_v61, %v719_v7  ;;  %v1282_v43 = vadd.f32 %v1262_v6, %v1037_v20 }
  0xdd   : > { %v1038_v22 = vadd.f32 %v1019_v63, %v905_v9 }
  0xe0   : > { %v721_v11 = vpop.f32.mrf.mxu1  ;;  %v3217_v14 = vpop.f32.mrf.mxu3 }
  0xe1   : > { %v722_v21 = vadd.f32 %v721_v11, %v620_v0 }
  0xe2   : > { %v1264_v16 = vpop.f32.mrf.mxu0  ;;  %v896_v24 = vpop.f32.mrf.mxu2 }
  0xe3   : > { %v906_v27 = vadd.f32 %v889_v2, %v722_v21  ;;  %v1283_v60 = vadd.f32 %v1264_v16, %v1038_v22 }
  0xe5   : > { %v1039_v1 = vadd.f32 %v3213_v3, %v906_v27 }
  0xe8   : > { %v723_v15 = vpop.f32.mrf.mxu1  ;;  %v3219_v59 = vpop.f32.mrf.mxu3 }
  0xe9   : > { %v724_v31 = vadd.f32 %v723_v15, %v622_v41 }
  0xea   : > { %v1267_v55 = vpop.f32.mrf.mxu0  ;;  %v899_v18 = vpop.f32.mrf.mxu2 }
  0xeb   : > { %v907_v25 = vadd.f32 %v891_v5, %v724_v31  ;;  %v1284_v4 = vadd.f32 %v1267_v55, %v1039_v1 }
  0xed   : > { %v1040_v9 = vadd.f32 %v3215_v39, %v907_v25 }
  0xf0   : > { %v726_v12 = vpop.f32.mrf.mxu1  ;;  %v3222_v28 = vpop.f32.mrf.mxu3 }
  0xf1   : > { %v727_v26 = vadd.f32 %v726_v12, %v3196_v29 }
  0xf2   : > { %v1269_v56 = vpop.f32.mrf.mxu0  ;;  %v901_v33 = vpop.f32.mrf.mxu2 }
  0xf3   : > { %v908_v32 = vadd.f32 %v894_v10, %v727_v26  ;;  %v1285_v31 = vadd.f32 %v1269_v56, %v1040_v9 }
  0xf8   : > { %v728_v34 = vpop.f32.mrf.mxu1  ;;  %v3228_v42 = vpop.f32.mrf.mxu3 }
  0xf9   : > { %v729_v37 = vadd.f32 %v728_v34, %v627_v50 }
  0xfa   : > { %v3224_v35 = vpop.f32.mrf.mxu0  ;;  %v1569_v40 = vpop.f32.mrf.mxu2 }
  0xfb   : > { %v3226_v19 = vadd.f32 %v896_v24, %v729_v37 }
  0xfd   : > { %v1042_v20 = vadd.f32 %v3219_v59, %v3226_v19 }
 0x100   : > { %v731_v62 = vpop.f32.mrf.mxu1  ;;  %v1814_v23 = vpop.f32.mrf.mxu3 }
 0x101   : > { %v732_v13 = vadd.f32 %v731_v62, %v630_v58 }
 0x102   : > { %v3230_v45 = vpop.f32.mrf.mxu0  ;;  %v1571_v29 = vpop.f32.mrf.mxu2 }
 0x103   : > { %v3232_v8 = vadd.f32 %v899_v18, %v732_v13 }
 0x108   : > { %v733_v46 = vpop.f32.mrf.mxu1  ;;  %v1816_v52 = vpop.f32.mrf.mxu3 }
 0x109   : > { %v734_v48 = vadd.f32 %v733_v46, %v632_v36 }
 0x10a   : > { %v3234_v47 = vpop.f32.mrf.mxu0  ;;  %v1574_v50 = vpop.f32.mrf.mxu2 }
 0x10b   : > { %v3236_v49 = vadd.f32 %v901_v33, %v734_v48  ;;  %v1041_v33 = vadd.f32 %v3217_v14, %v908_v32 }
 0x10d   : > { %v1286_v13 = vadd.f32 %v3224_v35, %v1041_v33 }
 0x110   : > { %v1435_v51 = vpop.f32.mrf.mxu1  ;;  %v1819_v2 = vpop.f32.mrf.mxu3 }
 0x111   : > { %v1455_v17 = vadd.f32 %v1435_v51, %v1282_v43 }
 0x112   : > { %v3238_v53 = vpop.f32.mrf.mxu0  ;;  %v1576_v57 = vpop.f32.mrf.mxu2 }
 0x113   : > { %v1589_v54 = vadd.f32 %v1569_v40, %v1455_v17 }
 0x115   : > { %v1834_v58 = vadd.f32 %v1814_v23, %v1589_v54 }
 0x118   : > { %v1437_v61 = vpop.f32.mrf.mxu1  ;;  %v1821_v24 = vpop.f32.mrf.mxu3 }
 0x119   : > { %v1456_v36 = vadd.f32 %v1437_v61, %v1283_v60  ;;  %v1043_v60 = vadd.f32 %v3222_v28, %v3232_v8 }
 0x11a   : > { %v1987_v30 = vpop.f32.mrf.mxu0  ;;  %v1579_v41 = vpop.f32.mrf.mxu2 }
 0x11b   : > { %v2007_v0 = vadd.f32 %v1987_v30, %v1834_v58  ;;  %v1590_v63 = vadd.f32 %v1571_v29, %v1456_v36 }
 0x11d   : > { %2015 = vst [vmem:[%s3244_s27] sm:$0xff] %v2007_v0  ;;  %v1835_v44 = vadd.f32 %v1816_v52, %v1590_v63  ;;  %v2037_v11 = vmul.f32 %v2007_v0, %v2007_v0  ;;  %v1287_v52 = vadd.f32 %v3230_v45, %v1042_v20 }
 0x120   : > { %v1440_v5 = vpop.f32.mrf.mxu1  ;;  %v1824_v40 = vpop.f32.mrf.mxu3 }
 0x121   : > { %v1457_v6 = vadd.f32 %v1440_v5, %v1284_v4 }
 0x122   : > { %v1989_v38 = vpop.f32.mrf.mxu0  ;;  %v1581_v3 = vpop.f32.mrf.mxu2 }
 0x123   : > { %v2008_v7 = vadd.f32 %v1989_v38, %v1835_v44  ;;  %v1591_v10 = vadd.f32 %v1574_v50, %v1457_v6  ;;  %v1044_v44 = vadd.f32 %v3228_v42, %v3236_v49 }
 0x125   : > { %2016 = vst [vmem:[%s3244_s27 + $0x8] sm:$0xff] %v2008_v7  ;;  %v2023_v16 = vadd.f32 %v2008_v7, %v2007_v0  ;;  %v2038_v21 = vmul.f32 %v2008_v7, %v2008_v7  ;;  %v1836_v27 = vadd.f32 %v1819_v2, %v1591_v10  ;;  %v1288_v0 = vadd.f32 %v3234_v47, %v1043_v60 }
 0x126   : > { %v1289_v7 = vadd.f32 %v3238_v53, %v1044_v44 }
 0x127   : > { %v2045_v15 = vadd.f32 %v2038_v21, %v2037_v11 }
 0x128   : > { %v1442_v18 = vpop.f32.mrf.mxu1  ;;  %v1826_v17 = vpop.f32.mrf.mxu3 }
 0x129   : > { %v1458_v55 = vadd.f32 %v1442_v18, %v1285_v31 }
 0x12a   : > { %v1992_v12 = vpop.f32.mrf.mxu0  ;;  %v1584_v29 = vpop.f32.mrf.mxu2 }
 0x12b   : > { %v2009_v26 = vadd.f32 %v1992_v12, %v1836_v27  ;;  %v1592_v34 = vadd.f32 %v1576_v57, %v1458_v55 }
 0x12d   : > { %2017 = vst [vmem:[%s3244_s27 + $0x10] sm:$0xff] %v2009_v26  ;;  %v2024_v39 = vadd.f32 %v2023_v16, %v2009_v26  ;;  %v2039_v25 = vmul.f32 %v2009_v26, %v2009_v26  ;;  %v1837_v62 = vadd.f32 %v1821_v24, %v1592_v34 }
 0x12f   : > { %v2046_v37 = vadd.f32 %v2045_v15, %v2039_v25 }
 0x130   : > { %v1445_v23 = vpop.f32.mrf.mxu1  ;;  %v1829_v63 = vpop.f32.mrf.mxu3 }
 0x131   : > { %v1459_v56 = vadd.f32 %v1445_v23, %v1286_v13 }
 0x132   : > { %v1994_v46 = vpop.f32.mrf.mxu0  ;;  %v1586_v57 = vpop.f32.mrf.mxu2 }
 0x133   : > { %v2010_v48 = vadd.f32 %v1994_v46, %v1837_v62  ;;  %v1593_v14 = vadd.f32 %v1579_v41, %v1459_v56 }
 0x135   : > { %2018 = vst [vmem:[%s3244_s27 + $0x18] sm:$0xff] %v2010_v48  ;;  %v2025_v32 = vadd.f32 %v2024_v39, %v2010_v48  ;;  %v2040_v50 = vmul.f32 %v2010_v48, %v2010_v48  ;;  %v1838_v51 = vadd.f32 %v1824_v40, %v1593_v14 }
 0x137   : > { %v2047_v43 = vadd.f32 %v2046_v37, %v2040_v50 }
 0x138   : > { %v1447_v22 = vpop.f32.mrf.mxu1  ;;  %v1831_v15 = vpop.f32.mrf.mxu3 }
 0x139   : > { %v1460_v54 = vadd.f32 %v1447_v22, %v1287_v52 }
 0x13a   : > { %v1997_v35 = vpop.f32.mrf.mxu0  ;;  %v2002_v5 = vpop.f32.mrf.mxu2 }
 0x13b   : > { %v2011_v58 = vadd.f32 %v1997_v35, %v1838_v51  ;;  %v1594_v59 = vadd.f32 %v1581_v3, %v1460_v54 }
 0x13d   : > { %2019 = vst [vmem:[%s3244_s27 + $0x20] sm:$0xff] %v2011_v58  ;;  %v2026_v19 = vadd.f32 %v2025_v32, %v2011_v58  ;;  %v2041_v61 = vmul.f32 %v2011_v58, %v2011_v58  ;;  %v1839_v36 = vadd.f32 %v1826_v17, %v1594_v59 }
 0x13f   : > { %v2048_v30 = vadd.f32 %v2047_v43, %v2041_v61 }
 0x140   : > { %v1450_v2 = vpop.f32.mrf.mxu1 }
 0x141   : > { %v1461_v1 = vadd.f32 %v1450_v2, %v1288_v0 }
 0x142   : > { %v1999_v45 = vpop.f32.mrf.mxu0  ;;  %v2004_v49 = vpop.f32.mrf.mxu2 }
 0x143   : > { %v2012_v41 = vadd.f32 %v1999_v45, %v1839_v36  ;;  %v1595_v4 = vadd.f32 %v1584_v29, %v1461_v1 }
 0x145   : > { %2020 = vst [vmem:[%s3244_s27 + $0x28] sm:$0xff] %v2012_v41  ;;  %v2027_v28 = vadd.f32 %v2026_v19, %v2012_v41  ;;  %v2042_v8 = vmul.f32 %v2012_v41, %v2012_v41  ;;  %v1840_v38 = vadd.f32 %v1829_v63, %v1595_v4 }
 0x147   : > { %v2049_v6 = vadd.f32 %v2048_v30, %v2042_v8  ;;  %v2013_v47 = vadd.f32 %v2002_v5, %v1840_v38 }
 0x148   : > { %v1452_v9 = vpop.f32.mrf.mxu1 }
 0x149   : > { %2021 = vst [vmem:[%s3244_s27 + $0x30] sm:$0xff] %v2013_v47  ;;  %v2028_v10 = vadd.f32 %v2027_v28, %v2013_v47  ;;  %v2043_v11 = vmul.f32 %v2013_v47, %v2013_v47  ;;  %v1462_v16 = vadd.f32 %v1452_v9, %v1289_v7 }
 0x14b   : > { %v2050_v21 = vadd.f32 %v2049_v6, %v2043_v11  ;;  %v1596_v24 = vadd.f32 %v1586_v57, %v1462_v16 }
 0x14d   : > { %v1841_v42 = vadd.f32 %v1831_v15, %v1596_v24 }
 0x14f   : > { %v2014_v3 = vadd.f32 %v2004_v49, %v1841_v42 }
 0x151   : > { %2022 = vst [vmem:[%s3244_s27 + $0x38] sm:$0xff] %v2014_v3  ;;  %v2029_v27 = vadd.f32 %v2028_v10, %v2014_v3  ;;  %v2044_v31 = vmul.f32 %v2014_v3, %v2014_v3 }
 0x153   : > { %v2030_v18 = vrot.slane %v2029_v27, 4  ;;  %v2051_v12 = vadd.f32 %v2050_v21, %v2044_v31 }
 0x155   : > { %v2031_v53 = vadd.f32 %v2030_v18, %v2029_v27  ;;  %v2052_v55 = vrot.slane %v2051_v12, 4 }
 0x157   : > { %v2032_v26 = vrot.slane %v2031_v53, 2  ;;  %v2053_v33 = vadd.f32 %v2052_v55, %v2051_v12 }
 0x159   : > { %v2033_v34 = vadd.f32 %v2032_v26, %v2031_v53  ;;  %v2054_v39 = vrot.slane %v2053_v33, 2 }
 0x15b   : > { %v2034_v25 = vrot.slane %v2033_v34, 1  ;;  %v2055_v37 = vadd.f32 %v2054_v39, %v2053_v33 }
 0x15d   : > { %v2035_v40 = vadd.f32 %v2034_v25, %v2033_v34  ;;  %v2056_v62 = vrot.slane %v2055_v37, 1 }
 0x15f   : > { %2036 = vst [vmem:[%s211_s30] sm:$0x1] %v2035_v40  ;;  %v2057_v13 = vadd.f32 %v2056_v62, %v2055_v37 }
 0x161   : > { %2058 = vst [vmem:[%s214_s7] sm:$0x1] %v2057_v13 }
 0x162 PF: > { %s15_s15 = sadd.s32 1, %s2652_s15  }
 0x163   : > { %p12_p4 = scmp.ge.s32.totalorder %s15_s15, 4  }
 0x165   :  { %14 = sbr.rel (!%p12_p4) target bundleno = 1 (0x1), region = 84 }

// kernel: res_down_forward.4
= control target key start
LH: loop header
LB: loop body
LE: loop exit
PB: predicated region body
PF: predicated region fallthrough
CT: control target
= control target key end

     0   :  { %s9215_s24 = smov 0   ;;  %s12288_s0 = inlined_call_operand.vmem [shape: bf16[2,16,16,128], index: 0, kind: input, shape index: {}]   ;;  %s12289_s1 = inlined_call_operand.vmem [shape: bf16[1152,128], index: 1, kind: input, shape index: {}]   ;;  %s12290_s2 = inlined_call_operand.vmem [shape: bf16[1152,128], index: 2, kind: input, shape index: {}]   ;;  %s12291_s3 = inlined_call_operand.vmem [shape: f32[1,128], index: 3, kind: input, shape index: {}]   ;;  %s12292_s4 = inlined_call_operand.vmem [shape: bf16[2,16,16,128], index: 4, kind: output, shape index: {0}]   ;;  %s12293_s5 = inlined_call_operand.vmem [shape: f32[2,1,128], index: 5, kind: output, shape index: {1}]   ;;  %s12294_s6 = inlined_call_operand.vmem [shape: f32[2,1,128], index: 6, kind: output, shape index: {2}]   ;;  %s12295_s7 = inlined_call_operand.vmem [shape: f32[2,8,8,128], index: 7, kind: output, shape index: {3}]  }
   0x1 LB: > { %s7831_s25 = sadd.s32 4294967295, %s9172_s24   ;;  %p7835_p0 = scmp.ge.s32.totalorder %s9172_s24, 1  ;;  %s9172_s24 = sphi %s9215_s24, %s18_s24  }
   0x2   : > { %p244_p1 = scmp.lt.s32.totalorder %s9172_s24, 3 }
   0x4   : > { %p245_p2 = pnand %p7835_p0, %p244_p1 }
   0x6   : > { %248 = sbr.rel (%p245_p2) target bundleno = 1069 (0x42d), region = 36 }
   0xb   : > { %v8830_v0 = vld [vmem:[%s12289_s1 + $0x78] sm:$0xff]  ;;  %v9174_v1 = vmov 0   ;;  %v8829_v2 = vld [vmem:[%s12289_s1 + $0x70] sm:$0xff]  ;;  %v8828_v5 = vld [vmem:[%s12289_s1 + $0x68] sm:$0xff]  ;;  %vm900_vm0 = vsmask.f32 3328 }
   0xc   : > { %341 = vst [vmem:[#allocation2] sm:$0xf] %v9174_v1  ;;  %1415 = vmatpush.bf16.msra.mxu0 %v8830_v0  ;;  %9099 = vmatpush.bf16.msra.mxu2 %v8830_v0  ;;  %v8862_v3 = vld [vmem:[%s12289_s1 + $0xf8] sm:$0xff]  ;;  %v8861_v4 = vld [vmem:[%s12289_s1 + $0xf0] sm:$0xff]  ;;  %v8827_v10 = vld [vmem:[%s12289_s1 + $0x60] sm:$0xff]  ;;  %p287_p3 = scmp.lt.s32.totalorder %s7831_s25, 1 }
   0xd   : > { %342 = vst [vmem:[#allocation2 + $0x4] sm:$0xf] %v9174_v1  ;;  %9098 = vmatpush.bf16.msra.mxu1 %v8830_v0  ;;  %2341 = vmatpush.bf16.msra.mxu3 %v8862_v3  ;;  %v8826_v18 = vld [vmem:[%s12289_s1 + $0x58] sm:$0xff]  ;;  %vm901_vm1 = vsmask.f32 7440  ;;  %v8825_v22 = vld [vmem:[%s12289_s1 + $0x50] sm:$0xff] }
   0xe   : > { %343 = vst [vmem:[#allocation2 + $0x8] sm:$0x1] %v9174_v1  ;;  %vm9272_vm2 = vmor %vm900_vm0, %vm901_vm1  ;;  %v8824_v27 = vld [vmem:[%s12289_s1 + $0x48] sm:$0xff]  ;;  %v8823_v32 = vld [vmem:[%s12289_s1 + $0x40] sm:$0xff]  ;;  %s12602_s25 = smov (!%p287_p3, %s7831_s25), 1  ;;  %vm719_vm5 = vcmask 1043456  }
   0xf   : > { %344 = vst [vmem:[#allocation2 + $0xc] sm:$0xf] %v9174_v1  ;;  %v8838_v33 = vld [vmem:[%s12289_s1 + $0xb8] sm:$0xff]  ;;  %v8860_v35 = vld [vmem:[%s12289_s1 + $0xe8] sm:$0xff]  ;;  %s8796_s29 = sshll.u32 %s12602_s25, 7  ;;  %vm726_vm7 = vcmask 1040384   ;;  %s299_s13 = scalar_lea.vmem %s12293_s5, %s12602_s25 }
  0x10   : > { %345 = vst [vmem:[#allocation2 + $0x10] sm:$0xf] %v9174_v1  ;;  %1416 = vmatpush.bf16.msra.mxu0 %v8829_v2  ;;  %9101 = vmatpush.bf16.msra.mxu2 %v8829_v2  ;;  %s9333_s9 = scalar_lea.vmem %s12288_s0, %s8796_s29  ;;  %vm395_vm3 = vsmask.f32 256  ;;  %vm396_vm4 = vsmask.f32 4368  ;;  %s11599_s16 = scalar_lea.vmem %s12292_s4, %s8796_s29 }
  0x11   : > { %346 = vst [vmem:[#allocation2 + $0x14] sm:$0x1] %v9174_v1  ;;  %9100 = vmatpush.bf16.msra.mxu1 %v8829_v2  ;;  %2342 = vmatpush.bf16.msra.mxu3 %v8861_v4  ;;  %v9339_v36 = vld [vmem:[%s9333_s9 + $0x60] sm:$0xf]  ;;  %v9347_v38 = vld [vmem:[%s9333_s9 + $0x64] sm:$0xf]  ;;  %vm9409_vm8 = vmor %vm395_vm3, %vm396_vm4  ;;  %s302_s17 = scalar_lea.vmem %s12294_s6, %s12602_s25 }
  0x12   : > { %347 = vst [vmem:[#allocation2 + $0x18] sm:$0xf] %v9174_v1  ;;  %v603_v37 = vshrl.u32 %v9339_v36, 16  ;;  %v9352_v39 = vld [vmem:[%s9333_s9 + $0x70] sm:$0xf]  ;;  %v611_v41 = vshrl.u32 %v9347_v38, 16  ;;  %vm9450_vm10 = vmand %vm726_vm7, %vm395_vm3 }
  0x13   : > { %v836_v6 = vld [vmem:[#allocation2] sm:$0xf]  ;;  %348 = vst [vmem:[#allocation2 + $0x1c] sm:$0xf] %v9174_v1  ;;  %v9360_v42 = vld [vmem:[%s9333_s9 + $0x74] sm:$0xf] }
  0x14   : > { %v9246_v7 = vld [vmem:[#allocation2 + $0x4] sm:$0xf]  ;;  %v904_v8 = vshrl.u32 %v836_v6, 16  ;;  %v907_v9 = vshll.u32 %v836_v6, 16  ;;  %349 = vst [vmem:[#allocation2 + $0x20] sm:$0x1] %v9174_v1  ;;  %1417 = vmatpush.bf16.msra.mxu0 %v8828_v5  ;;  %9103 = vmatpush.bf16.msra.mxu2 %v8828_v5 }
  0x15   : > { %v913_v11 = vshll.u32 %v9246_v7, 16  ;;  %v917_v12 = vshrl.u32 %v9246_v7, 16  ;;  %350 = vst [vmem:[#allocation2 + $0x24] sm:$0xf] %v9174_v1  ;;  %9102 = vmatpush.bf16.msra.mxu1 %v8828_v5  ;;  %v9255_v13 = vld [vmem:[#allocation2 + $0x8] sm:$0x1]  ;;  %2343 = vmatpush.bf16.msra.mxu3 %v8860_v35 }
  0x16   : > { %v906_v14 = vrot.slane %v904_v8, 4  ;;  %v909_v15 = vrot.slane %v907_v9, 5  ;;  %351 = vst [vmem:[#allocation2 + $0x28] sm:$0xf] %v9174_v1  ;;  %v923_v21 = vshll.u32 %v9255_v13, 16  ;;  %v9355_v40 = vrot.slane %v603_v37, 7 }
  0x17   : > { %v915_v16 = vrot.slane %v913_v11, 5  ;;  %v919_v17 = vrot.slane %v917_v12, 4  ;;  %352 = vst [vmem:[#allocation2 + $0x2c] sm:$0x1] %v9174_v1  ;;  %v606_v43 = vshll.u32 %v9339_v36, 16  ;;  %v614_v44 = vshll.u32 %v9347_v38, 16 }
  0x18   : > { %353 = vst [vmem:[#allocation2 + $0x30] sm:$0xf] %v9174_v1  ;;  %1418 = vmatpush.bf16.msra.mxu0 %v8827_v10  ;;  %9105 = vmatpush.bf16.msra.mxu2 %v8827_v10  ;;  %v910_v19 = vor.u32 %v909_v15, %v906_v14  ;;  %v925_v25 = vrot.slane %v923_v21, 5  ;;  %v637_v45 = vshrl.u32 %v9352_v39, 16  ;;  %v609_v46 = vrot.slane %v9355_v40, 4  ;;  %v8837_v51 = vld [vmem:[%s12289_s1 + $0xb0] sm:$0xff] }
  0x19   : > { %v920_v20 = vor.u32 %v919_v17, %v915_v16  ;;  %354 = vst [vmem:[#allocation2 + $0x34] sm:$0xf] %v9174_v1  ;;  %9104 = vmatpush.bf16.msra.mxu1 %v8827_v10  ;;  %v9369_v47 = vrot.slane %v611_v41, 7  ;;  %v645_v48 = vshrl.u32 %v9360_v42, 16  ;;  %vm720_vm6 = vsmask.f32 7938 }
  0x1a   : > { %355 = vst [vmem:[#allocation2 + $0x38] sm:$0x1] %v9174_v1  ;;  %v911_v23 = vrot.slane %v910_v19, 4  ;;  %v9374_v49 = vld [vmem:[%s9333_s9] sm:$0xf]  ;;  %v9381_v52 = vrot.slane %v637_v45, 7  ;;  %v608_v4 = vor.u32 %v606_v43, %v9355_v40  ;;  %vm9436_vm9 = vmand %vm719_vm5, %vm720_vm6 }
  0x1b   : > { %356 = vst [vmem:[#allocation2 + $0x3c] sm:$0xf] %v9174_v1  ;;  %v921_v24 = vrot.slane %v920_v20, 4  ;;  %v618_v50 = vrot.slane %v9369_v47, 4  ;;  %v8822_v53 = vld [vmem:[%s12289_s1 + $0x38] sm:$0xff]  ;;  %v640_v54 = vshll.u32 %v9352_v39, 16  ;;  %v616_v5 = vor.u32 %v614_v44, %v9369_v47 }
  0x1c   : > { %357 = vst [vmem:[#allocation2 + $0x40] sm:$0xf] %v9174_v1  ;;  %1419 = vmatpush.bf16.msra.mxu0 %v8826_v18  ;;  %9107 = vmatpush.bf16.msra.mxu2 %v8826_v18  ;;  %v916_v28 = vsel %vm9272_vm2, %v911_v23, %v915_v16  ;;  %v9389_v55 = vld [vmem:[%s9333_s9 + $0x4] sm:$0xf]  ;;  %v9395_v57 = vrot.slane %v645_v48, 7  ;;  %v648_v58 = vshll.u32 %v9360_v42, 16 }
  0x1d   : > { %358 = vst [vmem:[#allocation2 + $0x44] sm:$0x1] %v9174_v1  ;;  %9106 = vmatpush.bf16.msra.mxu1 %v8826_v18  ;;  %v926_v29 = vsel %vm9272_vm2, %v921_v24, %v925_v25  ;;  %v1303_v30 = vunpack.c.l.b16 %v916_v28  ;;  %v8859_v56 = vld [vmem:[%s12289_s1 + $0xe0] sm:$0xff]  ;;  %v399_v59 = vshrl.u32 %v9374_v49, 16  ;;  %v9401_v60 = vld [vmem:[%s9333_s9 + $0x68] sm:$0xf]  ;;  %v642_v18 = vor.u32 %v640_v54, %v9381_v52 }
  0x1e   : > { %359 = vst [vmem:[#allocation2 + $0x48] sm:$0xf] %v9174_v1  ;;  %v1304_v31 = vunpack.c.l.b16 %v926_v29  ;;  %v9404_v61 = vld [vmem:[%s9333_s9 + $0x6c] sm:$0xf]  ;;  %2344 = vmatpush.bf16.msra.mxu3 %v8859_v56  ;;  %v407_v2 = vshrl.u32 %v9389_v55, 16  ;;  %v643_v8 = vrot.slane %v9381_v52, 4  ;;  %v650_v24 = vor.u32 %v648_v58, %v9395_v57 }
  0x1f   : > { %360 = vst [vmem:[#allocation2 + $0x4c] sm:$0xf] %v9174_v1  ;;  %v8836_v0 = vld [vmem:[%s12289_s1 + $0xa8] sm:$0xff]  ;;  %v8821_v9 = vld [vmem:[%s12289_s1 + $0x30] sm:$0xff]  ;;  %v8870_v10 = vld [vmem:[%s12289_s1 + $0x138] sm:$0xff]  ;;  %v12322_v12 = vmov 0 }
  0x20   : > { %361 = vst [vmem:[#allocation2 + $0x50] sm:$0x1] %v9174_v1  ;;  %1420 = vmatpush.bf16.msra.mxu0 %v8825_v22  ;;  %9109 = vmatpush.bf16.msra.mxu2 %v8825_v22  ;;  %v1335_v34 = vpack.c.b16 %v1304_v31, %v1303_v30  ;;  %v9418_v3 = vld [vmem:[%s9333_s9 + $0x8] sm:$0xf]  ;;  %v8858_v11 = vld [vmem:[%s12289_s1 + $0xd8] sm:$0xff]  ;;  %v12323_v12 = vsel %vm9436_vm9, 4294967295, %v12322_v12  ;;  %v617_v30 = vsel %vm9409_vm8, %v609_v46, %v616_v5 }
  0x21   : > { %362 = vst [vmem:[#allocation2 + $0x54] sm:$0xf] %v9174_v1  ;;  %9108 = vmatpush.bf16.msra.mxu1 %v8825_v22  ;;  %v8835_v14 = vld [vmem:[%s12289_s1 + $0xa0] sm:$0xff]  ;;  %v620_v15 = vshrl.u32 %v9401_v60, 16  ;;  %v9445_v16 = vld [vmem:[%s9333_s9 + $0xc] sm:$0xf]  ;;  %v651_v46 = vsel %vm9409_vm8, %v643_v8, %v650_v24  ;;  %v5185_v8 = vunpack.c.l.bf16 %v9347_v38 }
  0x22   : > { %363 = vst [vmem:[#allocation2 + $0x58] sm:$0xf] %v9174_v1  ;;  %v12325_v17 = vmov 0  ;;  %v8820_v20 = vld [vmem:[%s12289_s1 + $0x28] sm:$0xff]  ;;  %v401_v21 = vrot.slane %v399_v59, 7  ;;  %v402_v22 = vshll.u32 %v9374_v49, 16  ;;  %2345 = vmatpush.bf16.msra.mxu3 %v8858_v11 }
  0x23   : > { %364 = vst [vmem:[#allocation2 + $0x5c] sm:$0x1] %v9174_v1  ;;  %v12326_v17 = vsel %vm9450_vm10, 4294967295, %v12325_v17  ;;  %v628_v23 = vshrl.u32 %v9404_v61, 16  ;;  %v8857_v25 = vld [vmem:[%s12289_s1 + $0xd0] sm:$0xff]  ;;  %v410_v28 = vshll.u32 %v9389_v55, 16 }
  0x24   : > { %365 = vst [vmem:[#allocation2 + $0x60] sm:$0xf] %v9174_v1  ;;  %1421 = vmatpush.bf16.msra.mxu0 %v8824_v27  ;;  %9111 = vmatpush.bf16.msra.mxu2 %v8824_v27  ;;  %v416_v29 = vshrl.u32 %v9418_v3, 16  ;;  %v652_v35 = vrot.slane %v9395_v57, 4  ;;  %v8834_v37 = vld [vmem:[%s12289_s1 + $0x98] sm:$0xff]  ;;  %v622_v39 = vrot.slane %v620_v15, 7  ;;  %v404_v42 = vor.u32 %v402_v22, %v401_v21 }
  0x25   : > { %366 = vst [vmem:[#allocation2 + $0x64] sm:$0xf] %v9174_v1  ;;  %9110 = vmatpush.bf16.msra.mxu1 %v8824_v27  ;;  %v409_v27 = vrot.slane %v407_v2, 7  ;;  %v623_v40 = vshll.u32 %v9401_v60, 16  ;;  %v8819_v41 = vld [vmem:[%s12289_s1 + $0x20] sm:$0xff]  ;;  %v405_v43 = vrot.slane %v401_v21, 4  ;;  %v5186_v22 = vunpack.c.l.bf16 %v9401_v60 }
  0x26   : > { %367 = vst [vmem:[#allocation2 + $0x68] sm:$0x1] %v9174_v1  ;;  %v630_v44 = vrot.slane %v628_v23, 7  ;;  %v631_v45 = vshll.u32 %v9404_v61, 16  ;;  %2346 = vmatpush.bf16.msra.mxu3 %v8857_v25  ;;  %v427_v56 = vshll.u32 %v9445_v16, 16  ;;  %v8833_v11 = vld [vmem:[%s12289_s1 + $0x90] sm:$0xff]  ;;  %v5187_v23 = vunpack.c.l.bf16 %v9404_v61 }
  0x27   : > { %368 = vst [vmem:[#allocation2 + $0x6c] sm:$0xf] %v9174_v1  ;;  %v412_v48 = vor.u32 %v410_v28, %v409_v27  ;;  %v414_v52 = vrot.slane %v409_v27, 4  ;;  %v728_v58 = vld [vmem:[#allocation2 + $0x14] sm:$0x1]  ;;  %v625_v59 = vor.u32 %v623_v40, %v622_v39  ;;  %v8855_v24 = vld [vmem:[%s12289_s1 + $0xc0] sm:$0xff] }
  0x28   : > { %369 = vst [vmem:[#allocation2 + $0x70] sm:$0xf] %v9174_v1  ;;  %1422 = vmatpush.bf16.msra.mxu0 %v8823_v32  ;;  %9113 = vmatpush.bf16.msra.mxu2 %v8823_v32  ;;  %v633_v2 = vor.u32 %v631_v45, %v630_v44  ;;  %v8832_v25 = vld [vmem:[%s12289_s1 + $0x88] sm:$0xff]  ;;  %v735_v27 = vld [vmem:[#allocation2 + $0x20] sm:$0x1]  ;;  %v8817_v61 = vld [vmem:[%s12289_s1 + $0x10] sm:$0xff] }
  0x29   : > { %370 = vst [vmem:[#allocation2 + $0x74] sm:$0x1] %v9174_v1  ;;  %9112 = vmatpush.bf16.msra.mxu1 %v8823_v32  ;;  %v729_v15 = vsel %vm9450_vm10, %v414_v52, %v728_v58  ;;  %v8816_v40 = vld [vmem:[%s12289_s1 + $0x8] sm:$0xff]  ;;  %vm1785_vm11 = vcmask 1042432   ;;  %vm1786_vm12 = vcmask 1046532   ;;  %vm5854_vm14 = vcmask 1042434  }
  0x2a   : > { %371 = vst [vmem:[#allocation2 + $0x78] sm:$0xf] %v9174_v1  ;;  %vm9596_vm13 = vmor %vm1785_vm11, %vm1786_vm12  ;;  %vm5857_vm15 = vcmask 1043459   ;;  %vm5860_vm0 = vcmask 1044484   ;;  %vm5863_vm1 = vcmask 1045509   ;;  %vm5866_vm3 = vcmask 1046534  }
  0x2b   : > { %372 = vst [vmem:[#allocation2 + $0x7c] sm:$0xf] %v9174_v1  ;;  %1423 = vmatmul.bf16.vlgmr.msra.gmra.mxu0 %v1335_v34  ;;  %vm5869_vm4 = vcmask 1047559   ;;  %s8798_s27 = sshll.u32 %s12602_s25, 6 }
  0x2c   : > { %2028 = vmatpush.bf16.msrb.mxu2 %v8838_v33  ;;  %373 = vst [vmem:[#allocation2 + $0x80] sm:$0x1] %v9174_v1  ;;  %3022 = vmatpush.bf16.msrb.mxu0 %v8870_v10  ;;  %v424_v33 = vshrl.u32 %v9445_v16, 16  ;;  %s12228_s11 = scalar_lea.vmem %s12295_s7, %s8798_s27 }
  0x2d   : > { %374 = vst [vmem:[#allocation2 + $0x84] sm:$0xf] %v9174_v1  ;;  %1648 = vmatpush.bf16.msrb.mxu1 %v8822_v53  ;;  %v419_v53 = vshll.u32 %v9418_v3, 16 }
  0x2e   : > { %375 = vst [vmem:[#allocation2 + $0x88] sm:$0xf] %v9174_v1  ;;  %v9498_v54 = vrot.slane %v424_v33, 7 }
  0x2f   : > { %376 = vst [vmem:[#allocation2 + $0x8c] sm:$0x1] %v9174_v1 }
  0x30   : > { %377 = vst [vmem:[#allocation2 + $0x90] sm:$0xf] %v9174_v1  ;;  %2029 = vmatpush.bf16.msrb.mxu2 %v8837_v51  ;;  %v418_v51 = vrot.slane %v416_v29, 7 }
  0x31   : > { %378 = vst [vmem:[#allocation2 + $0x94] sm:$0xf] %v9174_v1  ;;  %1649 = vmatpush.bf16.msrb.mxu1 %v8821_v9  ;;  %v413_v9 = vsel %vm9409_vm8, %v405_v43, %v412_v48 }
  0x32   : > { %379 = vst [vmem:[#allocation2 + $0x98] sm:$0x1] %v9174_v1  ;;  %v9517_v38 = vor.u32 %v419_v53, %v418_v51 }
  0x33   : > { %380 = vst [vmem:[#allocation2 + $0x9c] sm:$0xf] %v9174_v1 }
  0x34   : > { %381 = vst [vmem:[#allocation2 + $0xa0] sm:$0xf] %v9174_v1  ;;  %2030 = vmatpush.bf16.msrb.mxu2 %v8836_v0  ;;  %v626_v0 = vrot.slane %v622_v39, 4 }
  0x35   : > { %382 = vst [vmem:[#allocation2 + $0xa4] sm:$0x1] %v9174_v1  ;;  %1650 = vmatpush.bf16.msrb.mxu1 %v8820_v20  ;;  %v9521_v20 = vld [vmem:[#allocation2 + $0x18] sm:$0xf] }
  0x36   : > { %383 = vst [vmem:[#allocation2 + $0xa8] sm:$0xf] %v9174_v1  ;;  %v634_v29 = vsel %vm9409_vm8, %v626_v0, %v633_v2 }
  0x37   : > { %384 = vst [vmem:[#allocation2 + $0xac] sm:$0xf] %v9174_v1 }
  0x38   : > { %385 = vst [vmem:[#allocation2 + $0xb0] sm:$0x1] %v9174_v1  ;;  %2031 = vmatpush.bf16.msrb.mxu2 %v8835_v14  ;;  %v422_v14 = vrot.slane %v418_v51, 4 }
  0x39   : > { %386 = vst [vmem:[#allocation2 + $0xb4] sm:$0xf] %v9174_v1  ;;  %1651 = vmatpush.bf16.msrb.mxu1 %v8819_v41 }
  0x3a   : > { %387 = vst [vmem:[#allocation2 + $0xb8] sm:$0xf] %v9174_v1  ;;  %v808_v63 = vld [vmem:[#allocation2 + $0x9c] sm:$0xf] }
  0x3b   : > { %388 = vst [vmem:[#allocation2 + $0xbc] sm:$0x1] %v9174_v1  ;;  %v809_v31 = vsel %vm9436_vm9, %v608_v4, %v808_v63  ;;  %v635_v4 = vrot.slane %v630_v44, 4 }
  0x3c   : > { %389 = vst [vmem:[#allocation2 + $0xc0] sm:$0xf] %v9174_v1  ;;  %v812_v6 = vld [vmem:[#allocation2 + $0xa4] sm:$0x1]  ;;  %2032 = vmatpush.bf16.msrb.mxu2 %v8834_v37 }
  0x3d   : > { %390 = vst [vmem:[#allocation2 + $0xc4] sm:$0xf] %v9174_v1  ;;  %v813_v34 = vsel %vm9450_vm10, %v618_v50, %v812_v6  ;;  %v8856_v50 = vld [vmem:[%s12289_s1 + $0xc8] sm:$0xff]  ;;  %v5184_v6 = vunpack.c.l.bf16 %v9339_v36  ;;  %v8818_v36 = vld [vmem:[%s12289_s1 + $0x18] sm:$0xff] }
  0x3e   : > { %391 = vst [vmem:[#allocation2 + $0xc8] sm:$0x1] %v9174_v1  ;;  %v815_v5 = vld [vmem:[#allocation2 + $0xa8] sm:$0xf]  ;;  %2347 = vmatpush.bf16.msra.mxu3 %v8856_v50  ;;  %1652 = vmatpush.bf16.msrb.mxu1 %v8818_v36 }
  0x3f   : > { %392 = vst [vmem:[#allocation2 + $0xcc] sm:$0xf] %v9174_v1  ;;  %v819_v10 = vld [vmem:[#allocation2 + $0xb0] sm:$0x1]  ;;  %v816_v21 = vsel %vm9436_vm9, %v625_v59, %v815_v5  ;;  %v9542_v33 = vadd.f32 %v5186_v22, %v5184_v6  ;;  %v8815_v6 = vld [vmem:[%s12289_s1] sm:$0xff] }
  0x40   : > { %393 = vst [vmem:[#allocation2 + $0xd0] sm:$0xf] %v9174_v1  ;;  %v822_v19 = vld [vmem:[#allocation2 + $0xb4] sm:$0xf]  ;;  %2033 = vmatpush.bf16.msrb.mxu2 %v8833_v11  ;;  %v9537_v60 = vsel %vm9450_vm10, %v635_v4, %v819_v10 }
  0x41   : > { %394 = vst [vmem:[#allocation2 + $0xd4] sm:$0x1] %v9174_v1  ;;  %v823_v47 = vsel %vm9436_vm9, %v642_v18, %v822_v19  ;;  %v429_v18 = vor.u32 %v427_v56, %v9498_v54  ;;  %v431_v19 = vrot.slane %v9498_v54, 4 }
  0x42   : > { %5640 = vst [vmem:[#allocation3] sm:$0xf] %v9174_v1  ;;  %v826_v32 = vld [vmem:[#allocation2 + $0xbc] sm:$0x1]  ;;  %2348 = vmatpush.bf16.msra.mxu3 %v8855_v24  ;;  %1653 = vmatpush.bf16.msrb.mxu1 %v8817_v61 }
  0x43   : > { %5641 = vst [vmem:[#allocation3 + $0x4] sm:$0x1] %v9174_v1  ;;  %v827_v57 = vsel %vm9450_vm10, %v652_v35, %v826_v32  ;;  %v430_v41 = vsel %vm9409_vm8, %v422_v14, %v429_v18  ;;  %v736_v48 = vsel %vm9450_vm10, %v431_v19, %v735_v27 }
  0x44   : > { %5642 = vst [vmem:[#allocation3 + $0x8] sm:$0xf] %v9174_v1  ;;  %2034 = vmatpush.bf16.msrb.mxu2 %v8832_v25 }
  0x45   : > { %5643 = vst [vmem:[#allocation3 + $0xc] sm:$0x1] %v9174_v1 }
  0x46   : > { %5644 = vst [vmem:[#allocation3 + $0x10] sm:$0xf] %v9174_v1  ;;  %1654 = vmatpush.bf16.msrb.mxu1 %v8816_v40 }
  0x47   : > { %5645 = vst [vmem:[#allocation3 + $0x14] sm:$0x1] %v9174_v1 }
  0x48   : > { %5646 = vst [vmem:[#allocation3 + $0x18] sm:$0xf] %v9174_v1 }
  0x49   : > { %5647 = vst [vmem:[#allocation3 + $0x1c] sm:$0x1] %v9174_v1 }
  0x4a   : > { %5648 = vst [vmem:[#allocation3 + $0x20] sm:$0xf] %v9174_v1  ;;  %1655 = vmatpush.bf16.msrb.mxu1 %v8815_v6 }
  0x4b   : > { %5649 = vst [vmem:[#allocation3 + $0x24] sm:$0x1] %v9174_v1 }
  0x4c   : > { %5650 = vst [vmem:[#allocation3 + $0x28] sm:$0xf] %v9174_v1 }
  0x4d   : > { %5651 = vst [vmem:[#allocation3 + $0x2c] sm:$0x1] %v9174_v1 }
  0x4e   : > { %5652 = vst [vmem:[#allocation3 + $0x30] sm:$0xf] %v9174_v1 }
  0x4f   : > { %5653 = vst [vmem:[#allocation3 + $0x34] sm:$0x1] %v9174_v1 }
  0x50   : > { %5654 = vst [vmem:[#allocation3 + $0x38] sm:$0xf] %v9174_v1 }
  0x51   : > { %12324 = vst [vmem:[#allocation4_spill] sm:$0xff] %v12323_v12 }
  0x52   : > { %5655 = vst [vmem:[#allocation3 + $0x3c] sm:$0x1] %v9174_v1 }
  0x53   : > { %12327 = vst [vmem:[#allocation5_spill] sm:$0xff] %v12326_v17 }
  0x54   : > { %5656 = vst [vmem:[#allocation3 + $0x40] sm:$0xf] %v9174_v1 }
  0x55   : > { %5657 = vst [vmem:[#allocation3 + $0x44] sm:$0x1] %v9174_v1 }
  0x56   : > { %5658 = vst [vmem:[#allocation3 + $0x48] sm:$0xf] %v9174_v1 }
  0x57   : > { %5659 = vst [vmem:[#allocation3 + $0x4c] sm:$0x1] %v9174_v1  ;;  %v722_v1 = vld [vmem:[#allocation2 + $0xc] sm:$0xf] }
  0x58   : > { %810 = vst [vmem:[#allocation2 + $0x9c] sm:$0xf] %v809_v31  ;;  %v723_v63 = vsel %vm9436_vm9, %v404_v42, %v722_v1  ;;  %v732_v42 = vsel %vm9436_vm9, %v9517_v38, %v9521_v20 }
  0x59   : > { %811 = vst [vmem:[#allocation2 + $0xa0] sm:$0xf] %v617_v30 }
  0x5a   : > { %814 = vst [vmem:[#allocation2 + $0xa4] sm:$0x1] %v813_v34  ;;  %v9544_v34 = vadd.f32 %v5187_v23, %v5185_v8  ;;  %v8910_v8 = vld [vmem:[%s12289_s1 + $0x1f8] sm:$0xff] }
  0x5b   : > { %824 = vst [vmem:[#allocation2 + $0xb4] sm:$0xf] %v823_v47  ;;  %v8831_v47 = vld [vmem:[%s12289_s1 + $0x80] sm:$0xff]  ;;  %4442 = vmatpush.bf16.msrb.mxu3 %v8910_v8 }
  0x5c   : > { %825 = vst [vmem:[#allocation2 + $0xb8] sm:$0xf] %v651_v46  ;;  %2035 = vmatpush.bf16.msrb.mxu2 %v8831_v47 }
  0x5d   : > { %828 = vst [vmem:[#allocation2 + $0xbc] sm:$0x1] %v827_v57 }
  0x5e   : > { %724 = vst [vmem:[#allocation2 + $0xc] sm:$0xf] %v723_v63 }
  0x5f   : > { %v862_v28 = vld [vmem:[#allocation2 + $0x9c] sm:$0xf]  ;;  %725 = vst [vmem:[#allocation2 + $0x10] sm:$0xf] %v413_v9 }
  0x60   : > { %v863_v30 = vld [vmem:[#allocation2 + $0xa0] sm:$0xf]  ;;  %v1216_v31 = vshrl.u32 %v862_v28, 16  ;;  %v1219_v32 = vshll.u32 %v862_v28, 16  ;;  %730 = vst [vmem:[#allocation2 + $0x14] sm:$0x1] %v729_v15 }
  0x61   : > { %12328 = vst [vmem:[#allocation6_spill] sm:$0xff] %v9542_v33  ;;  %v897_v35 = vld [vmem:[#allocation2 + $0xa4] sm:$0x1]  ;;  %v1225_v37 = vshll.u32 %v863_v30, 16  ;;  %v1229_v39 = vshrl.u32 %v863_v30, 16 }
  0x62   : > { %12329 = vst [vmem:[#allocation7_spill] sm:$0xff] %v9544_v34  ;;  %v1218_v43 = vrot.slane %v1216_v31, 4  ;;  %v1221_v44 = vrot.slane %v1219_v32, 5  ;;  %v1235_v45 = vshll.u32 %v897_v35, 16  ;;  %v866_v46 = vld [vmem:[#allocation2 + $0xb4] sm:$0xf] }
  0x63   : > { %817 = vst [vmem:[#allocation2 + $0xa8] sm:$0xf] %v816_v21  ;;  %v1227_v1 = vrot.slane %v1225_v37, 5  ;;  %v1231_v50 = vrot.slane %v1229_v39, 4  ;;  %v867_v51 = vld [vmem:[#allocation2 + $0xb8] sm:$0xf] }
  0x64   : > { %v1264_v52 = vshrl.u32 %v866_v46, 16  ;;  %v1267_v53 = vshll.u32 %v866_v46, 16  ;;  %v1222_v54 = vor.u32 %v1221_v44, %v1218_v43  ;;  %v1237_v56 = vrot.slane %v1235_v45, 5  ;;  %v899_v57 = vld [vmem:[#allocation2 + $0xbc] sm:$0x1] }
  0x65   : > { %v1273_v58 = vshll.u32 %v867_v51, 16  ;;  %v1277_v59 = vshrl.u32 %v867_v51, 16  ;;  %v1232_v63 = vor.u32 %v1231_v50, %v1227_v1  ;;  %v1283_v4 = vshll.u32 %v899_v57, 16  ;;  %v838_v5 = vld [vmem:[#allocation2 + $0xc] sm:$0xf] }
  0x66   : > { %v1266_v0 = vrot.slane %v1264_v52, 4  ;;  %v1269_v2 = vrot.slane %v1267_v53, 5  ;;  %v1223_v9 = vrot.slane %v1222_v54, 4  ;;  %v9566_v14 = vld [vmem:[#allocation2 + $0x10] sm:$0xf]  ;;  %v928_v15 = vshrl.u32 %v838_v5, 16 }
  0x67   : > { %v1275_v10 = vrot.slane %v1273_v58, 5  ;;  %v1279_v11 = vrot.slane %v1277_v59, 4  ;;  %v1233_v36 = vrot.slane %v1232_v63, 4  ;;  %v1285_v18 = vrot.slane %v1283_v4, 5  ;;  %v9568_v19 = vld [vmem:[#allocation2 + $0x14] sm:$0x1] }
  0x68   : > { %v1270_v38 = vor.u32 %v1269_v2, %v1266_v0  ;;  %v931_v20 = vshll.u32 %v838_v5, 16  ;;  %v8839_v21 = vld [vmem:[#allocation2 + $0xc] sm:$0xff]  ;;  %v1228_v22 = vsel %vm9272_vm2, %v1223_v9, %v1227_v1  ;;  %v930_v24 = vrot.slane %v928_v15, 4  ;;  %818 = vst [vmem:[#allocation2 + $0xac] sm:$0xf] %v634_v29 }
  0x69   : > { %v1280_v23 = vor.u32 %v1279_v11, %v1275_v10  ;;  %v937_v25 = vshll.u32 %v9566_v14, 16  ;;  %v1238_v28 = vsel %vm9272_vm2, %v1233_v36, %v1237_v56  ;;  %v1329_v61 = vunpack.c.l.b16 %v1228_v22  ;;  %821 = vst [vmem:[#allocation2 + $0xb0] sm:$0x1] %v9537_v60  ;;  %2349 = vmatmul.bf16.vlgmr.msra.gmra.mxu3 %v8839_v21  ;;  %v1737_v1 = vld [vmem:[#allocation2] sm:$0xe]  ;;  %v8869_v56 = vld [vmem:[%s12289_s1 + $0x130] sm:$0xff] }
  0x6a   : > { %v864_v27 = vld [vmem:[#allocation2 + $0xa8] sm:$0xf]  ;;  %v1271_v30 = vrot.slane %v1270_v38, 4  ;;  %v933_v31 = vrot.slane %v931_v20, 5  ;;  %v1330_v32 = vunpack.c.l.b16 %v1238_v28  ;;  %v941_v39 = vshrl.u32 %v9566_v14, 16  ;;  %3023 = vmatpush.bf16.msrb.mxu0 %v8869_v56 }
  0x6b   : > { %v1281_v35 = vrot.slane %v1280_v23, 4  ;;  %v939_v37 = vrot.slane %v937_v25, 5  ;;  %733 = vst [vmem:[#allocation2 + $0x18] sm:$0xf] %v732_v42  ;;  %v947_v43 = vshll.u32 %v9568_v19, 16  ;;  %v1240_v44 = vshrl.u32 %v864_v27, 16 }
  0x6c   : > { %v1276_v40 = vsel %vm9272_vm2, %v1271_v30, %v1275_v10  ;;  %v934_v29 = vor.u32 %v933_v31, %v930_v24  ;;  %734 = vst [vmem:[#allocation2 + $0x1c] sm:$0xf] %v430_v41  ;;  %v1348_v45 = vpack.c.b16 %v1330_v32, %v1329_v61  ;;  %v943_v47 = vrot.slane %v941_v39, 4  ;;  %v8902_v41 = vld [vmem:[%s12289_s1 + $0x1b8] sm:$0xff] }
  0x6d   : > { %v1286_v60 = vsel %vm9272_vm2, %v1281_v35, %v1285_v18  ;;  %v1333_v46 = vunpack.c.l.b16 %v1276_v40  ;;  %737 = vst [vmem:[#allocation2 + $0x20] sm:$0x1] %v736_v48  ;;  %v949_v42 = vrot.slane %v947_v43, 5  ;;  %v1242_v53 = vrot.slane %v1240_v44, 4  ;;  %v8878_v48 = vld [vmem:[%s12289_s1 + $0x178] sm:$0xff] }
  0x6e   : > { %v1334_v50 = vunpack.c.l.b16 %v1286_v60  ;;  %v935_v51 = vrot.slane %v934_v29, 4  ;;  %1488 = vmatmul.bf16.vlgmr.msra.gmra.mxu1 %v1348_v45  ;;  %v944_v52 = vor.u32 %v943_v47, %v939_v37  ;;  %v1243_v54 = vshll.u32 %v864_v27, 16 }
  0x6f   : > { %v865_v59 = vld [vmem:[#allocation2 + $0xac] sm:$0xf]  ;;  %v7970_v63 = vrot.slane %v1737_v1, 9  ;;  %v1790_v0 = vrot.slane %v9246_v7, 5  ;;  %v5160_v4 = vunpack.c.l.bf16 %v9374_v49  ;;  %3447 = vmatpush.bf16.msra.mxu1 %v8878_v48  ;;  %v1793_v36 = vrot.slane %v9255_v13, 5 }
  0x70   : > { %v1350_v57 = vpack.c.b16 %v1334_v50, %v1333_v46  ;;  %v940_v58 = vsel %vm9272_vm2, %v935_v51, %v939_v37  ;;  %v945_v2 = vrot.slane %v944_v52, 4  ;;  %v898_v5 = vld [vmem:[#allocation2 + $0xb0] sm:$0x1]  ;;  %v1245_v6 = vrot.slane %v1243_v54, 5 }
  0x71   : > { %v1249_v8 = vshll.u32 %v865_v59, 16  ;;  %v1305_v10 = vunpack.c.l.b16 %v940_v58  ;;  %v1253_v11 = vshrl.u32 %v865_v59, 16  ;;  %v1259_v15 = vshll.u32 %v898_v5, 16 }
  0x72   : > { %1498 = vmatmul.bf16.vlgmr.msra.gmra.mxu2 %v1350_v57  ;;  %v840_v7 = vld [vmem:[#allocation2 + $0x18] sm:$0xf]  ;;  %v950_v49 = vsel %vm9272_vm2, %v945_v2, %v949_v42  ;;  %v1246_v38 = vor.u32 %v1245_v6, %v1242_v53  ;;  %v1792_v20 = vrot.slane %v1790_v0, 4  ;;  %v5161_v23 = vunpack.c.l.bf16 %v9389_v55  ;;  %v9631_v6 = vld [vmem:[%s9333_s9 + $0x10] sm:$0xf] }
  0x73   : > { %v1251_v18 = vrot.slane %v1249_v8, 5  ;;  %3761 = vmatpush.bf16.msra.mxu2 %v8902_v41  ;;  %v9603_v21 = vld [vmem:[#allocation2 + $0x1c] sm:$0xf]  ;;  %v1306_v22 = vunpack.c.l.b16 %v950_v49  ;;  %v1255_v24 = vrot.slane %v1253_v11, 4  ;;  %v1791_v25 = vsel %vm9596_vm13, %v7970_v63, %v1790_v0 }
  0x74   : > { %v1247_v27 = vrot.slane %v1246_v38, 4  ;;  %v1261_v28 = vrot.slane %v1259_v15, 5  ;;  %v952_v13 = vshrl.u32 %v840_v7, 16  ;;  %v955_v61 = vshll.u32 %v840_v7, 16  ;;  %v9608_v32 = vld [vmem:[#allocation2 + $0x20] sm:$0x1] }
  0x75   : > { %v1336_v30 = vpack.c.b16 %v1306_v22, %v1305_v10  ;;  %v1256_v31 = vor.u32 %v1255_v24, %v1251_v18  ;;  %v961_v35 = vshll.u32 %v9603_v21, 16  ;;  %v965_v37 = vshrl.u32 %v9603_v21, 16  ;;  %v8840_v39 = vld [vmem:[#allocation2 + $0x18] sm:$0xff]  ;;  %v8868_v10 = vld [vmem:[%s12289_s1 + $0x128] sm:$0xff] }
  0x76   : > { %v1252_v55 = vsel %vm9272_vm2, %v1247_v27, %v1251_v18  ;;  %v1794_v40 = vsel %vm9596_vm13, %v1792_v20, %v1793_v36  ;;  %v954_v29 = vrot.slane %v952_v13, 4  ;;  %v957_v43 = vrot.slane %v955_v61, 5  ;;  %3024 = vmatpush.bf16.msrb.mxu0 %v8868_v10  ;;  %v8901_v18 = vld [vmem:[%s12289_s1 + $0x1b0] sm:$0xff] }
  0x77   : > { %1428 = vmatmul.bf16.gmra.mxu0 %v1336_v30  ;;  %v1257_v44 = vrot.slane %v1256_v31, 4  ;;  %v1331_v45 = vunpack.c.l.b16 %v1252_v55  ;;  %v963_v60 = vrot.slane %v961_v35, 5  ;;  %v967_v46 = vrot.slane %v965_v37, 4  ;;  %v8909_v20 = vld [vmem:[%s12289_s1 + $0x1f0] sm:$0xff]  ;;  %3762 = vmatpush.bf16.msra.mxu2 %v8901_v18  ;;  %v742_v30 = vld [vmem:[#allocation2 + $0x2c] sm:$0x1] }
  0x78   : > { %v958_v47 = vor.u32 %v957_v43, %v954_v29  ;;  %v971_v1 = vshll.u32 %v9608_v32, 16  ;;  %v5162_v50 = vunpack.c.l.bf16 %v9418_v3  ;;  %v5163_v51 = vunpack.c.l.bf16 %v9445_v16  ;;  %v1738_v3 = vld [vmem:[#allocation2 + $0xc] sm:$0xe]  ;;  %4443 = vmatpush.bf16.msrb.mxu3 %v8909_v20  ;;  %v315_v37 = vld [vmem:[%s9333_s9 + $0x18] sm:$0xf]  ;;  %v8877_v18 = vld [vmem:[%s12289_s1 + $0x170] sm:$0xff] }
  0x79   : > { %v1262_v42 = vsel %vm9272_vm2, %v1257_v44, %v1261_v28  ;;  %v1916_v52 = vunpack.c.l.b16 %v1791_v25  ;;  %v1917_v53 = vunpack.c.l.b16 %v1794_v40  ;;  %v968_v54 = vor.u32 %v967_v46, %v963_v60  ;;  %2354 = vmatmul.bf16.gmra.mxu3 %v8840_v39  ;;  %v738_v28 = vld [vmem:[#allocation2 + $0x24] sm:$0xf]  ;;  %v316_v29 = vld [vmem:[%s9333_s9 + $0x1c] sm:$0xf]  ;;  %v9659_v43 = vld [vmem:[%s9333_s9 + $0x20] sm:$0xf]  ;;  %3448 = vmatpush.bf16.msra.mxu1 %v8877_v18 }
  0x7a   : > { %v1332_v41 = vunpack.c.l.b16 %v1262_v42  ;;  %v959_v56 = vrot.slane %v958_v47, 4  ;;  %v973_v48 = vrot.slane %v971_v1, 5  ;;  %v9621_v57 = vadd.f32 %v5162_v50, %v5160_v4  ;;  %v9634_v4 = vld [vmem:[%s9333_s9 + $0x14] sm:$0xf]  ;;  %v9668_v46 = vld [vmem:[%s9333_s9 + $0x24] sm:$0xf] }
  0x7b   : > { %v969_v58 = vrot.slane %v968_v54, 4  ;;  %v9623_v59 = vadd.f32 %v5163_v51, %v5161_v23  ;;  %v1797_v16 = vrot.slane %v9566_v14, 5  ;;  %v1948_v2 = vpack.c.b16 %v1917_v53, %v1916_v52  ;;  %v8799_v54 = vld [vmem:[#allocation2] sm:$0xff] }
  0x7c   : > { %12332 = vst [vmem:[#allocation8_spill] sm:$0xff] %v9621_v57  ;;  %v1349_v63 = vpack.c.b16 %v1332_v41, %v1331_v45  ;;  %v964_v0 = vsel %vm9272_vm2, %v959_v56, %v963_v60  ;;  %v7971_v8 = vrot.slane %v1738_v3, 9  ;;  %v1800_v36 = vrot.slane %v9568_v19, 5  ;;  %v9665_v60 = vld [vmem:[#allocation2 + $0x18] sm:$0xe] }
  0x7d   : > { %12333 = vst [vmem:[#allocation9_spill] sm:$0xff] %v9623_v59  ;;  %v974_v5 = vsel %vm9272_vm2, %v969_v58, %v973_v48  ;;  %v1307_v11 = vunpack.c.l.b16 %v964_v0  ;;  %v1799_v15 = vrot.slane %v1797_v16, 4  ;;  %v433_v7 = vshrl.u32 %v9631_v6, 16  ;;  %v745_v0 = vld [vmem:[#allocation2 + $0x30] sm:$0xf] }
  0x7e   : > { %1493 = vmatmul.bf16.gmra.mxu1 %v1349_v63  ;;  %v1308_v14 = vunpack.c.l.b16 %v974_v5  ;;  %v436_v49 = vshll.u32 %v9631_v6, 16  ;;  %v441_v38 = vshrl.u32 %v9634_v4, 16  ;;  %v1798_v19 = vsel %vm9596_vm13, %v7971_v8, %v1797_v16  ;;  %v3884_v57 = vld [vmem:[#allocation2 + $0x20] sm:$0x1] }
  0x7f   : > { %v435_v22 = vrot.slane %v433_v7, 7  ;;  %v1801_v24 = vsel %vm9596_vm13, %v1799_v15, %v1800_v36  ;;  %v444_v27 = vshll.u32 %v9634_v4, 16  ;;  %v1918_v39 = vunpack.c.l.b16 %v1798_v19 }
  0x80   : > { %v1337_v23 = vpack.c.b16 %v1308_v14, %v1307_v11  ;;  %v443_v25 = vrot.slane %v441_v38, 7  ;;  %v1919_v55 = vunpack.c.l.b16 %v1801_v24  ;;  %v1804_v47 = vrot.slane %v9603_v21, 5  ;;  %v749_v11 = vld [vmem:[#allocation2 + $0x38] sm:$0x1] }
  0x81   : > { %v438_v13 = vor.u32 %v436_v49, %v435_v22  ;;  %v439_v61 = vrot.slane %v435_v22, 4  ;;  %v450_v1 = vshrl.u32 %v315_v37, 16  ;;  %v453_v50 = vshll.u32 %v315_v37, 16 }
  0x82   : > { %2036 = vmatmul.bf16.vlgmr.msrb.gmra.mxu2 %v1948_v2  ;;  %v446_v31 = vor.u32 %v444_v27, %v443_v25  ;;  %v448_v35 = vrot.slane %v443_v25, 4  ;;  %v5164_v51 = vunpack.c.l.bf16 %v9631_v6  ;;  %v458_v42 = vshrl.u32 %v316_v29, 16 }
  0x83   : > { %v739_v40 = vsel %vm9436_vm9, %v438_v13, %v738_v28  ;;  %v461_v52 = vshll.u32 %v316_v29, 16  ;;  %v467_v53 = vshrl.u32 %v9659_v43, 16  ;;  %v1949_v41 = vpack.c.b16 %v1919_v55, %v1918_v39  ;;  %v752_v28 = vld [vmem:[#allocation2 + $0x3c] sm:$0xf] }
  0x84   : > { %v447_v44 = vsel %vm9409_vm8, %v439_v61, %v446_v31  ;;  %740 = vst [vmem:[#allocation2 + $0x24] sm:$0xf] %v739_v40  ;;  %v743_v45 = vsel %vm9450_vm10, %v448_v35, %v742_v30  ;;  %v452_v56 = vrot.slane %v450_v1, 7  ;;  %v470_v48 = vshll.u32 %v9659_v43, 16 }
  0x85   : > { %741 = vst [vmem:[#allocation2 + $0x28] sm:$0xf] %v447_v44  ;;  %v475_v58 = vshrl.u32 %v9668_v46, 16  ;;  %v5165_v3 = vunpack.c.l.bf16 %v9634_v4  ;;  %v7972_v16 = vrot.slane %v9665_v60, 9  ;;  %v460_v63 = vrot.slane %v458_v42, 7 }
  0x86   : > { %744 = vst [vmem:[#allocation2 + $0x2c] sm:$0x1] %v743_v45  ;;  %v469_v2 = vrot.slane %v467_v53, 7  ;;  %v1806_v5 = vrot.slane %v1804_v47, 4  ;;  %v1807_v6 = vrot.slane %v9608_v32, 5  ;;  %v455_v8 = vor.u32 %v453_v50, %v452_v56 }
  0x87   : > { %1433 = vmatmul.bf16.gmra.mxu0 %v1337_v23  ;;  %v456_v10 = vrot.slane %v452_v56, 4  ;;  %v463_v14 = vor.u32 %v461_v52, %v460_v63  ;;  %v465_v15 = vrot.slane %v460_v63, 4  ;;  %v5166_v36 = vunpack.c.l.bf16 %v315_v37  ;;  %v756_v45 = vld [vmem:[#allocation2 + $0x44] sm:$0x1] }
  0x88   : > { %v478_v7 = vshll.u32 %v9668_v46, 16  ;;  %v746_v49 = vsel %vm9436_vm9, %v455_v8, %v745_v0  ;;  %v5167_v38 = vunpack.c.l.bf16 %v316_v29  ;;  %v472_v20 = vor.u32 %v470_v48, %v469_v2 }
  0x89   : > { %v477_v32 = vrot.slane %v475_v58, 7  ;;  %v464_v25 = vsel %vm9409_vm8, %v456_v10, %v463_v14  ;;  %v750_v27 = vsel %vm9450_vm10, %v465_v15, %v749_v11  ;;  %747 = vst [vmem:[#allocation2 + $0x30] sm:$0xf] %v746_v49  ;;  %v9696_v31 = vadd.f32 %v5166_v36, %v5164_v51  ;;  %v9724_v14 = vld [vmem:[%s9333_s9 + $0x2c] sm:$0xf] }
  0x8a   : > { %v9698_v35 = vadd.f32 %v5167_v38, %v5165_v3  ;;  %748 = vst [vmem:[#allocation2 + $0x34] sm:$0xf] %v464_v25  ;;  %v473_v40 = vrot.slane %v469_v2, 4  ;;  %v1805_v52 = vsel %vm9596_vm13, %v7972_v16, %v1804_v47  ;;  %v753_v53 = vsel %vm9436_vm9, %v472_v20, %v752_v28 }
  0x8b   : > { %v842_v4 = vld [vmem:[#allocation2 + $0x24] sm:$0xf]  ;;  %12334 = vst [vmem:[#allocation10_spill] sm:$0xff] %v9696_v31  ;;  %v480_v1 = vor.u32 %v478_v7, %v477_v32  ;;  %v482_v50 = vrot.slane %v477_v32, 4  ;;  %v1808_v21 = vsel %vm9596_vm13, %v1806_v5, %v1807_v6  ;;  %v1920_v3 = vunpack.c.l.b16 %v1805_v52 }
  0x8c   : > { %v9686_v19 = vld [vmem:[#allocation2 + $0x28] sm:$0xf]  ;;  %v976_v22 = vshrl.u32 %v842_v4, 16  ;;  %v979_v23 = vshll.u32 %v842_v4, 16  ;;  %12335 = vst [vmem:[#allocation11_spill] sm:$0xff] %v9698_v35  ;;  %v1921_v6 = vunpack.c.l.b16 %v1808_v21  ;;  %v8800_v4 = vld [vmem:[#allocation2 + $0xc] sm:$0xff] }
  0x8d   : > { %v8841_v24 = vld [vmem:[#allocation2 + $0x24] sm:$0xff]  ;;  %v9692_v13 = vld [vmem:[#allocation2 + $0x2c] sm:$0x1]  ;;  %v985_v61 = vshll.u32 %v9686_v19, 16  ;;  %v989_v30 = vshrl.u32 %v9686_v19, 16  ;;  %v481_v56 = vsel %vm9409_vm8, %v473_v40, %v480_v1  ;;  %v757_v48 = vsel %vm9450_vm10, %v482_v50, %v756_v45 }
  0x8e   : > { %1656 = vmatmul.bf16.vlgmr.msrb.gmra.mxu1 %v8799_v54  ;;  %v978_v37 = vrot.slane %v976_v22, 4  ;;  %v981_v39 = vrot.slane %v979_v23, 5  ;;  %v995_v55 = vshll.u32 %v9692_v13, 16  ;;  %2359 = vmatmul.bf16.gmra.mxu3 %v8841_v24  ;;  %751 = vst [vmem:[#allocation2 + $0x38] sm:$0x1] %v750_v27  ;;  %v492_v24 = vshrl.u32 %v9724_v14, 16 }
  0x8f   : > { %v987_v29 = vrot.slane %v985_v61, 5  ;;  %v991_v44 = vrot.slane %v989_v30, 4  ;;  %v9708_v54 = vld [vmem:[%s9333_s9 + $0x28] sm:$0xf]  ;;  %754 = vst [vmem:[#allocation2 + $0x3c] sm:$0xf] %v753_v53 }
  0x90   : > { %v982_v60 = vor.u32 %v981_v39, %v978_v37  ;;  %v997_v42 = vrot.slane %v995_v55, 5  ;;  %755 = vst [vmem:[#allocation2 + $0x40] sm:$0xf] %v481_v56  ;;  %v844_v16 = vld [vmem:[#allocation2 + $0x30] sm:$0xf]  ;;  %v484_v63 = vshrl.u32 %v9708_v54, 16  ;;  %v1950_v37 = vpack.c.b16 %v1921_v6, %v1920_v3 }
  0x91   : > { %v992_v51 = vor.u32 %v991_v44, %v987_v29  ;;  %758 = vst [vmem:[#allocation2 + $0x44] sm:$0x1] %v757_v48  ;;  %v9721_v8 = vld [vmem:[#allocation2 + $0x34] sm:$0xf]  ;;  %v1000_v10 = vshrl.u32 %v844_v16, 16  ;;  %v1003_v11 = vshll.u32 %v844_v16, 16 }
  0x92   : > { %2041 = vmatmul.bf16.gmra.mxu2 %v1949_v41  ;;  %v983_v41 = vrot.slane %v982_v60, 4  ;;  %v1009_v36 = vshll.u32 %v9721_v8, 16  ;;  %v1013_v7 = vshrl.u32 %v9721_v8, 16  ;;  %v1740_v23 = vld [vmem:[#allocation2 + $0x24] sm:$0xe]  ;;  %v1811_v27 = vrot.slane %v9686_v19, 5 }
  0x93   : > { %v993_v58 = vrot.slane %v992_v51, 4  ;;  %v1002_v49 = vrot.slane %v1000_v10, 4  ;;  %v1005_v38 = vrot.slane %v1003_v11, 5  ;;  %v486_v61 = vrot.slane %v484_v63, 7  ;;  %v8842_v55 = vld [vmem:[#allocation2 + $0x30] sm:$0xff]  ;;  %v8867_v19 = vld [vmem:[%s12289_s1 + $0x120] sm:$0xff] }
  0x94   : > { %v988_v47 = vsel %vm9272_vm2, %v983_v41, %v987_v29  ;;  %v1011_v32 = vrot.slane %v1009_v36, 5  ;;  %v1015_v22 = vrot.slane %v1013_v7, 4  ;;  %v487_v30 = vshll.u32 %v9708_v54, 16  ;;  %3025 = vmatpush.bf16.msrb.mxu0 %v8867_v19  ;;  %v763_v11 = vld [vmem:[#allocation2 + $0x50] sm:$0x1] }
  0x95   : > { %v998_v0 = vsel %vm9272_vm2, %v993_v58, %v997_v42  ;;  %v1309_v2 = vunpack.c.l.b16 %v988_v47  ;;  %v9726_v15 = vld [vmem:[#allocation2 + $0x38] sm:$0x1]  ;;  %v1006_v25 = vor.u32 %v1005_v38, %v1002_v49  ;;  %v7973_v45 = vrot.slane %v1740_v23, 9  ;;  %v8908_v58 = vld [vmem:[%s12289_s1 + $0x1e8] sm:$0xff]  ;;  %v9765_v49 = vld [vmem:[%s9333_s9 + $0x34] sm:$0xf] }
  0x96   : > { %v1310_v5 = vunpack.c.l.b16 %v998_v0  ;;  %v1019_v18 = vshll.u32 %v9726_v15, 16  ;;  %v846_v28 = vld [vmem:[#allocation2 + $0x3c] sm:$0xf]  ;;  %v1016_v39 = vor.u32 %v1015_v22, %v1011_v32  ;;  %v1814_v60 = vrot.slane %v9692_v13, 5  ;;  %v8900_v13 = vld [vmem:[%s12289_s1 + $0x1a8] sm:$0xff]  ;;  %4444 = vmatpush.bf16.msrb.mxu3 %v8908_v58 }
  0x97   : > { %v9734_v40 = vld [vmem:[#allocation2 + $0x40] sm:$0xf]  ;;  %v1007_v29 = vrot.slane %v1006_v25, 4  ;;  %v1024_v50 = vshrl.u32 %v846_v28, 16  ;;  %v494_v51 = vrot.slane %v492_v24, 7  ;;  %v495_v42 = vshll.u32 %v9724_v14, 16  ;;  %3763 = vmatpush.bf16.msra.mxu2 %v8900_v13 }
  0x98   : > { %v1338_v20 = vpack.c.b16 %v1310_v5, %v1309_v2  ;;  %v1021_v44 = vrot.slane %v1019_v18, 5  ;;  %v1017_v1 = vrot.slane %v1016_v39, 4  ;;  %v1813_v52 = vrot.slane %v1811_v27, 4  ;;  %v759_v47 = vld [vmem:[#allocation2 + $0x48] sm:$0xf] }
  0x99   : > { %v1027_v53 = vshll.u32 %v846_v28, 16  ;;  %v1033_v41 = vshll.u32 %v9734_v40, 16  ;;  %v489_v56 = vor.u32 %v487_v30, %v486_v61  ;;  %v1037_v48 = vshrl.u32 %v9734_v40, 16 }
  0x9a   : > { %1438 = vmatmul.bf16.gmra.mxu0 %v1338_v20  ;;  %v490_v21 = vrot.slane %v486_v61, 4  ;;  %v1012_v3 = vsel %vm9272_vm2, %v1007_v29, %v1011_v32  ;;  %v1022_v16 = vsel %vm9272_vm2, %v1017_v1, %v1021_v44  ;;  %v1812_v63 = vsel %vm9596_vm13, %v7973_v45, %v1811_v27  ;;  %v9767_v20 = vld [vmem:[#allocation2 + $0x44] sm:$0x1] }
  0x9b   : > { %v1026_v0 = vrot.slane %v1024_v50, 4  ;;  %v497_v2 = vor.u32 %v495_v42, %v494_v51  ;;  %v499_v10 = vrot.slane %v494_v51, 4  ;;  %v1815_v5 = vsel %vm9596_vm13, %v1813_v52, %v1814_v60  ;;  %v8801_v60 = vld [vmem:[#allocation2 + $0x18] sm:$0xff]  ;;  %v766_v42 = vld [vmem:[#allocation2 + $0x54] sm:$0xf] }
  0x9c   : > { %v1029_v6 = vrot.slane %v1027_v53, 5  ;;  %v9757_v36 = vrot.slane %v1033_v41, 5  ;;  %v760_v7 = vsel %vm9436_vm9, %v489_v56, %v759_v47  ;;  %v1311_v38 = vunpack.c.l.b16 %v1012_v3  ;;  %v1741_v56 = vld [vmem:[#allocation2 + $0x30] sm:$0xe] }
  0x9d   : > { %v1312_v18 = vunpack.c.l.b16 %v1022_v16  ;;  %v1039_v32 = vrot.slane %v1037_v48, 4  ;;  %v498_v22 = vsel %vm9409_vm8, %v490_v21, %v497_v2  ;;  %761 = vst [vmem:[#allocation2 + $0x48] sm:$0xf] %v760_v7  ;;  %v764_v23 = vsel %vm9450_vm10, %v499_v10, %v763_v11  ;;  %v8843_v21 = vld [vmem:[#allocation2 + $0x3c] sm:$0xff]  ;;  %v8876_v16 = vld [vmem:[%s12289_s1 + $0x168] sm:$0xff] }
  0x9e   : > { %1661 = vmatmul.bf16.gmra.mxu1 %v8800_v4  ;;  %2364 = vmatmul.bf16.gmra.mxu3 %v8842_v55  ;;  %v9762_v4 = vld [vmem:[%s9333_s9 + $0x30] sm:$0xf]  ;;  %762 = vst [vmem:[#allocation2 + $0x4c] sm:$0xf] %v498_v22  ;;  %v1922_v24 = vunpack.c.l.b16 %v1812_v63  ;;  %v509_v28 = vshrl.u32 %v9765_v49, 16  ;;  %v1923_v61 = vunpack.c.l.b16 %v1815_v5  ;;  %v1030_v30 = vor.u32 %v1029_v6, %v1026_v0 }
  0x9f   : > { %765 = vst [vmem:[#allocation2 + $0x50] sm:$0x1] %v764_v23  ;;  %v501_v25 = vshrl.u32 %v9762_v4, 16  ;;  %v504_v27 = vshll.u32 %v9762_v4, 16  ;;  %v512_v39 = vshll.u32 %v9765_v49, 16  ;;  %v1339_v55 = vpack.c.b16 %v1312_v18, %v1311_v38  ;;  %3449 = vmatpush.bf16.msra.mxu1 %v8876_v16 }
  0xa0   : > { %v1040_v29 = vor.u32 %v1039_v32, %v9757_v36  ;;  %v511_v45 = vrot.slane %v509_v28, 7  ;;  %v5168_v19 = vunpack.c.l.bf16 %v9659_v43  ;;  %v1951_v52 = vpack.c.b16 %v1923_v61, %v1922_v24  ;;  %v9811_v24 = vld [vmem:[%s9333_s9 + $0x38] sm:$0xf] }
  0xa1   : > { %v503_v44 = vrot.slane %v501_v25, 7  ;;  %v5169_v41 = vunpack.c.l.bf16 %v9668_v46  ;;  %v1818_v48 = vrot.slane %v9721_v8, 5  ;;  %v1031_v13 = vrot.slane %v1030_v30, 4 }
  0xa2   : > { %2046 = vmatmul.bf16.gmra.mxu2 %v1950_v37  ;;  %v1043_v37 = vshll.u32 %v9767_v20, 16  ;;  %v514_v51 = vor.u32 %v512_v39, %v511_v45  ;;  %v1041_v58 = vrot.slane %v1040_v29, 4  ;;  %v5170_v47 = vunpack.c.l.bf16 %v9708_v54  ;;  %v770_v54 = vld [vmem:[#allocation2 + $0x5c] sm:$0x1] }
  0xa3   : > { %v506_v1 = vor.u32 %v504_v27, %v503_v44  ;;  %v507_v50 = vrot.slane %v503_v44, 4  ;;  %v5171_v3 = vunpack.c.l.bf16 %v9724_v14  ;;  %v516_v63 = vrot.slane %v511_v45, 4 }
  0xa4   : > { %v1045_v53 = vrot.slane %v1043_v37, 5  ;;  %v848_v43 = vld [vmem:[#allocation2 + $0x48] sm:$0xf]  ;;  %v7974_v0 = vrot.slane %v1741_v56, 9  ;;  %v9793_v10 = vadd.f32 %v5170_v47, %v5168_v19  ;;  %v1820_v14 = vrot.slane %v1818_v48, 4 }
  0xa5   : > { %v515_v46 = vsel %vm9409_vm8, %v507_v50, %v514_v51  ;;  %v767_v8 = vsel %vm9436_vm9, %v506_v1, %v766_v42  ;;  %v9791_v2 = vld [vmem:[#allocation2 + $0x4c] sm:$0xf]  ;;  %v1821_v11 = vrot.slane %v9726_v15, 5  ;;  %v9796_v5 = vadd.f32 %v5171_v3, %v5169_v41  ;;  %v8866_v15 = vld [vmem:[%s12289_s1 + $0x118] sm:$0xff] }
  0xa6   : > { %12336 = vst [vmem:[#allocation12_spill] sm:$0xff] %v9793_v10  ;;  %v1036_v6 = vsel %vm9272_vm2, %v1031_v13, %v9757_v36  ;;  %v1046_v7 = vsel %vm9272_vm2, %v1041_v58, %v1045_v53  ;;  %v1048_v38 = vshrl.u32 %v848_v43, 16  ;;  %v1051_v18 = vshll.u32 %v848_v43, 16  ;;  %v9814_v36 = vld [vmem:[%s9333_s9 + $0x3c] sm:$0xf]  ;;  %3026 = vmatpush.bf16.msrb.mxu0 %v8866_v15 }
  0xa7   : > { %12337 = vst [vmem:[#allocation13_spill] sm:$0xff] %v9796_v5  ;;  %v1057_v32 = vshll.u32 %v9791_v2, 16  ;;  %v1061_v22 = vshrl.u32 %v9791_v2, 16  ;;  %v771_v23 = vsel %vm9450_vm10, %v516_v63, %v770_v54  ;;  %v1819_v25 = vsel %vm9596_vm13, %v7974_v0, %v1818_v48  ;;  %v9824_v50 = vld [vmem:[#allocation2 + $0x50] sm:$0x1] }
  0xa8   : > { %768 = vst [vmem:[#allocation2 + $0x54] sm:$0xf] %v767_v8  ;;  %v518_v27 = vshrl.u32 %v9811_v24, 16  ;;  %v1313_v28 = vunpack.c.l.b16 %v1036_v6  ;;  %v1314_v61 = vunpack.c.l.b16 %v1046_v7  ;;  %v521_v30 = vshll.u32 %v9811_v24, 16  ;;  %v8844_v8 = vld [vmem:[#allocation2 + $0x48] sm:$0xff] }
  0xa9   : > { %769 = vst [vmem:[#allocation2 + $0x58] sm:$0xf] %v515_v46  ;;  %v526_v37 = vshrl.u32 %v9814_v36, 16  ;;  %v1050_v39 = vrot.slane %v1048_v38, 4  ;;  %v529_v44 = vshll.u32 %v9814_v36, 16  ;;  %v1822_v45 = vsel %vm9596_vm13, %v1820_v14, %v1821_v11 }
  0xaa   : > { %1443 = vmatmul.bf16.gmra.mxu0 %v1339_v55  ;;  %772 = vst [vmem:[#allocation2 + $0x5c] sm:$0x1] %v771_v23  ;;  %v1053_v55 = vrot.slane %v1051_v18, 5  ;;  %v520_v29 = vrot.slane %v518_v27, 7  ;;  %v1063_v19 = vrot.slane %v1061_v22, 4  ;;  %v1924_v53 = vunpack.c.l.b16 %v1819_v25 }
  0xab   : > { %v528_v1 = vrot.slane %v526_v37, 7  ;;  %v1340_v56 = vpack.c.b16 %v1314_v61, %v1313_v28  ;;  %v1925_v48 = vunpack.c.l.b16 %v1822_v45  ;;  %v1067_v3 = vshll.u32 %v9824_v50, 16  ;;  %v777_v46 = vld [vmem:[#allocation2 + $0x68] sm:$0x1]  ;;  %v1742_v14 = vld [vmem:[#allocation2 + $0x3c] sm:$0xe] }
  0xac   : > { %v523_v51 = vor.u32 %v521_v30, %v520_v29  ;;  %v524_v42 = vrot.slane %v520_v29, 4  ;;  %v1054_v13 = vor.u32 %v1053_v55, %v1050_v39  ;;  %v1825_v11 = vrot.slane %v9734_v40, 5  ;;  %v9838_v22 = vld [vmem:[%s9333_s9 + $0x40] sm:$0xf]  ;;  %v9841_v23 = vld [vmem:[%s9333_s9 + $0x44] sm:$0xf] }
  0xad   : > { %v531_v41 = vor.u32 %v529_v44, %v528_v1  ;;  %v533_v58 = vrot.slane %v528_v1, 4  ;;  %v1952_v0 = vpack.c.b16 %v1925_v48, %v1924_v53  ;;  %v1069_v7 = vrot.slane %v1067_v3, 5  ;;  %v8899_v28 = vld [vmem:[%s12289_s1 + $0x1a0] sm:$0xff] }
  0xae   : > { %1666 = vmatmul.bf16.gmra.mxu1 %v8801_v60  ;;  %2369 = vmatmul.bf16.gmra.mxu3 %v8843_v21  ;;  %v1059_v60 = vrot.slane %v1057_v32, 5  ;;  %v8802_v21 = vld [vmem:[#allocation2 + $0x24] sm:$0xff]  ;;  %v1055_v54 = vrot.slane %v1054_v13, 4  ;;  %v7975_v15 = vrot.slane %v1742_v14, 9  ;;  %v1828_v32 = vrot.slane %v9767_v20, 5 }
  0xaf   : > { %v532_v43 = vsel %vm9409_vm8, %v524_v42, %v531_v41  ;;  %v778_v63 = vsel %vm9450_vm10, %v533_v58, %v777_v46  ;;  %v850_v38 = vld [vmem:[#allocation2 + $0x54] sm:$0xf]  ;;  %v1827_v40 = vrot.slane %v1825_v11, 4  ;;  %v535_v61 = vshrl.u32 %v9838_v22, 16  ;;  %3764 = vmatpush.bf16.msra.mxu2 %v8899_v28  ;;  %v1743_v28 = vld [vmem:[#allocation2 + $0x48] sm:$0xe] }
  0xb0   : > { %v1064_v47 = vor.u32 %v1063_v19, %v1059_v60  ;;  %776 = vst [vmem:[#allocation2 + $0x64] sm:$0xf] %v532_v43  ;;  %v9834_v18 = vld [vmem:[#allocation2 + $0x58] sm:$0xf]  ;;  %v1060_v25 = vsel %vm9272_vm2, %v1055_v54, %v1059_v60  ;;  %v1072_v27 = vshrl.u32 %v850_v38, 16  ;;  %v1075_v30 = vshll.u32 %v850_v38, 16 }
  0xb1   : > { %779 = vst [vmem:[#allocation2 + $0x68] sm:$0x1] %v778_v63  ;;  %v1081_v37 = vshll.u32 %v9834_v18, 16  ;;  %v1085_v39 = vshrl.u32 %v9834_v18, 16  ;;  %v537_v55 = vrot.slane %v535_v61, 7  ;;  %v543_v29 = vshrl.u32 %v9841_v23, 16 }
  0xb2   : > { %2051 = vmatmul.bf16.gmra.mxu2 %v1951_v52  ;;  %v773_v52 = vld [vmem:[#allocation2 + $0x60] sm:$0xf]  ;;  %v1065_v6 = vrot.slane %v1064_v47, 4  ;;  %v1826_v44 = vsel %vm9596_vm13, %v7975_v15, %v1825_v11  ;;  %v538_v45 = vshll.u32 %v9838_v22, 16  ;;  %v1315_v60 = vunpack.c.l.b16 %v1060_v25  ;;  %v9861_v48 = vld [vmem:[#allocation2 + $0x5c] sm:$0x1] }
  0xb3   : > { %v774_v16 = vsel %vm9436_vm9, %v523_v51, %v773_v52  ;;  %v1829_v1 = vsel %vm9596_vm13, %v1827_v40, %v1828_v32  ;;  %v1074_v51 = vrot.slane %v1072_v27, 4  ;;  %v1077_v42 = vrot.slane %v1075_v30, 5  ;;  %v784_v11 = vld [vmem:[#allocation2 + $0x74] sm:$0x1]  ;;  %v8907_v38 = vld [vmem:[%s12289_s1 + $0x1e0] sm:$0xff] }
  0xb4   : > { %775 = vst [vmem:[#allocation2 + $0x60] sm:$0xf] %v774_v16  ;;  %v1070_v20 = vsel %vm9272_vm2, %v1065_v6, %v1069_v7  ;;  %v9859_v52 = vrot.slane %v1081_v37, 5  ;;  %v1087_v53 = vrot.slane %v1085_v39, 4  ;;  %v540_v41 = vor.u32 %v538_v45, %v537_v55  ;;  %v8845_v25 = vld [vmem:[#allocation2 + $0x54] sm:$0xff]  ;;  %4445 = vmatpush.bf16.msrb.mxu3 %v8907_v38 }
  0xb5   : > { %v1316_v19 = vunpack.c.l.b16 %v1070_v20  ;;  %v541_v13 = vrot.slane %v537_v55, 4  ;;  %v545_v58 = vrot.slane %v543_v29, 7  ;;  %v1926_v47 = vunpack.c.l.b16 %v1826_v44  ;;  %v8875_v55 = vld [vmem:[%s12289_s1 + $0x160] sm:$0xff] }
  0xb6   : > { %v1927_v16 = vunpack.c.l.b16 %v1829_v1  ;;  %v1088_v54 = vor.u32 %v1087_v53, %v9859_v52  ;;  %v1091_v14 = vshll.u32 %v9861_v48, 16  ;;  %v5172_v6 = vunpack.c.l.bf16 %v9762_v4  ;;  %3450 = vmatpush.bf16.msra.mxu1 %v8875_v55  ;;  %v9892_v1 = vld [vmem:[%s9333_s9 + $0x48] sm:$0xf] }
  0xb7   : > { %v1341_v43 = vpack.c.b16 %v1316_v19, %v1315_v60  ;;  %v550_v63 = vrot.slane %v545_v58, 4  ;;  %v5173_v7 = vunpack.c.l.bf16 %v9765_v49  ;;  %v9877_v4 = vld [vmem:[#allocation2 + $0x64] sm:$0xf]  ;;  %v5174_v49 = vunpack.c.l.bf16 %v9811_v24 }
  0xb8   : > { %v1953_v27 = vpack.c.b16 %v1927_v16, %v1926_v47  ;;  %v5175_v61 = vunpack.c.l.bf16 %v9814_v36  ;;  %v1089_v30 = vrot.slane %v1088_v54, 4  ;;  %v1093_v37 = vrot.slane %v1091_v14, 5 }
  0xb9   : > { %v785_v32 = vsel %vm9450_vm10, %v550_v63, %v784_v11  ;;  %v1832_v39 = vrot.slane %v9791_v2, 5  ;;  %v9885_v45 = vadd.f32 %v5174_v49, %v5172_v6  ;;  %v7976_v36 = vrot.slane %v1743_v28, 9  ;;  %v9895_v2 = vld [vmem:[%s9333_s9 + $0x4c] sm:$0xf]  ;;  %v9910_v63 = vld [vmem:[#allocation2 + $0x68] sm:$0x1] }
  0xba   : > { %1448 = vmatmul.bf16.gmra.mxu0 %v1340_v56  ;;  %v780_v56 = vld [vmem:[#allocation2 + $0x6c] sm:$0xf]  ;;  %786 = vst [vmem:[#allocation2 + $0x74] sm:$0x1] %v785_v32  ;;  %v9887_v24 = vadd.f32 %v5175_v61, %v5173_v7  ;;  %v1105_v60 = vshll.u32 %v9877_v4, 16  ;;  %v1109_v19 = vshrl.u32 %v9877_v4, 16 }
  0xbb   : > { %v781_v3 = vsel %vm9436_vm9, %v540_v41, %v780_v56  ;;  %v852_v40 = vld [vmem:[#allocation2 + $0x60] sm:$0xf]  ;;  %12338 = vst [vmem:[#allocation14_spill] sm:$0xff] %v9885_v45  ;;  %v1834_v53 = vrot.slane %v1832_v39, 4  ;;  %v1835_v41 = vrot.slane %v9824_v50, 5  ;;  %v555_v14 = vshll.u32 %v9892_v1, 16 }
  0xbc   : > { %782 = vst [vmem:[#allocation2 + $0x6c] sm:$0xf] %v781_v3  ;;  %v1096_v29 = vshrl.u32 %v852_v40, 16  ;;  %v1099_v44 = vshll.u32 %v852_v40, 16  ;;  %v1107_v47 = vrot.slane %v1105_v60, 5  ;;  %v1111_v3 = vrot.slane %v1109_v19, 4 }
  0xbd   : > { %12339 = vst [vmem:[#allocation15_spill] sm:$0xff] %v9887_v24  ;;  %v1836_v50 = vsel %vm9596_vm13, %v1834_v53, %v1835_v41  ;;  %v1115_v6 = vshll.u32 %v9910_v63, 16  ;;  %v563_v38 = vshll.u32 %v9895_v2, 16  ;;  %v8804_v28 = vld [vmem:[#allocation2 + $0x3c] sm:$0xff]  ;;  %v1744_v41 = vld [vmem:[#allocation2 + $0x54] sm:$0xe] }
  0xbe   : > { %1671 = vmatmul.bf16.gmra.mxu1 %v8802_v21  ;;  %2374 = vmatmul.bf16.gmra.mxu3 %v8844_v8  ;;  %v546_v21 = vshll.u32 %v9841_v23, 16  ;;  %v8803_v8 = vld [vmem:[#allocation2 + $0x30] sm:$0xff]  ;;  %v1098_v56 = vrot.slane %v1096_v29, 4  ;;  %v1112_v11 = vor.u32 %v1111_v3, %v1107_v47  ;;  %v8846_v19 = vld [vmem:[#allocation2 + $0x60] sm:$0xff] }
  0xbf   : > { %v1117_v55 = vrot.slane %v1115_v6, 5 }
  0xc0   : > { %v548_v46 = vor.u32 %v546_v21, %v545_v58  ;;  %v552_v58 = vshrl.u32 %v9892_v1, 16  ;;  %v1833_v21 = vsel %vm9596_vm13, %v7976_v36, %v1832_v39  ;;  %v1113_v39 = vrot.slane %v1112_v11, 4 }
  0xc2   : > { %2056 = vmatmul.bf16.gmra.mxu2 %v1952_v0  ;;  %v1078_v0 = vor.u32 %v1077_v42, %v1074_v51  ;;  %v549_v15 = vsel %vm9409_vm8, %v541_v13, %v548_v46  ;;  %v1094_v42 = vsel %vm9272_vm2, %v1089_v30, %v1093_v37  ;;  %v1101_v13 = vrot.slane %v1099_v44, 5 }
  0xc3   : > { %783 = vst [vmem:[#allocation2 + $0x70] sm:$0xf] %v549_v15  ;;  %v1318_v46 = vunpack.c.l.b16 %v1094_v42  ;;  %v554_v54 = vrot.slane %v552_v58, 7  ;;  %v787_v15 = vld [vmem:[#allocation2 + $0x78] sm:$0xf]  ;;  %v1839_v42 = vrot.slane %v9834_v18, 5  ;;  %v1118_v58 = vsel %vm9272_vm2, %v1113_v39, %v1117_v55 }
  0xc4   : > { %v1079_v20 = vrot.slane %v1078_v0, 4  ;;  %v1102_v0 = vor.u32 %v1101_v13, %v1098_v56  ;;  %v854_v29 = vld [vmem:[#allocation2 + $0x6c] sm:$0xf]  ;;  %v9928_v13 = vpop.f32.mrf.mxu0  ;;  %v9938_v18 = vld [vmem:[%s9333_s9 + $0x54] sm:$0xf] }
  0xc5   : > { %v557_v40 = vor.u32 %v555_v14, %v554_v54  ;;  %v1120_v56 = vshrl.u32 %v854_v29, 16 }
  0xc6   : > { %v1084_v51 = vsel %vm9272_vm2, %v1079_v20, %v9859_v52  ;;  %v560_v52 = vshrl.u32 %v9895_v2, 16  ;;  %v791_v20 = vld [vmem:[#allocation2 + $0x80] sm:$0x1]  ;;  %v1103_v30 = vrot.slane %v1102_v0, 4  ;;  %v1320_v0 = vunpack.c.l.b16 %v1118_v58 }
  0xc7   : > { %v1317_v16 = vunpack.c.l.b16 %v1084_v51  ;;  %v788_v37 = vsel %vm9436_vm9, %v557_v40, %v787_v15  ;;  %v9948_v15 = vld [vmem:[#allocation2 + $0x74] sm:$0x1] }
  0xc8   : > { %v562_v7 = vrot.slane %v560_v52, 7  ;;  %789 = vst [vmem:[#allocation2 + $0x78] sm:$0xf] %v788_v37  ;;  %v1108_v53 = vsel %vm9272_vm2, %v1103_v30, %v1107_v47  ;;  %v9935_v52 = vld [vmem:[%s9333_s9 + $0x50] sm:$0xf] }
  0xc9   : > { %v1342_v32 = vpack.c.b16 %v1318_v46, %v1317_v16  ;;  %v569_v47 = vshrl.u32 %v9935_v52, 16  ;;  %v7977_v16 = vrot.slane %v1744_v41, 9  ;;  %v1841_v46 = vrot.slane %v1839_v42, 4  ;;  %v794_v30 = vld [vmem:[#allocation2 + $0x84] sm:$0xf] }
  0xca   : > { %1453 = vmatmul.bf16.gmra.mxu0 %v1341_v43  ;;  %v8865_v43 = vld [vmem:[%s12289_s1 + $0x110] sm:$0xff]  ;;  %v565_v49 = vor.u32 %v563_v38, %v562_v7  ;;  %v567_v61 = vrot.slane %v562_v7, 4  ;;  %v8898_v7 = vld [vmem:[%s12289_s1 + $0x198] sm:$0xff]  ;;  %v577_v38 = vshrl.u32 %v9938_v18, 16  ;;  %v5176_v41 = vunpack.c.l.bf16 %v9838_v22 }
  0xcb   : > { %3027 = vmatpush.bf16.msrb.mxu0 %v8865_v43  ;;  %v9923_v51 = vld [vmem:[#allocation2 + $0x70] sm:$0xf]  ;;  %3765 = vmatpush.bf16.msra.mxu2 %v8898_v7  ;;  %v8874_v7 = vld [vmem:[%s12289_s1 + $0x158] sm:$0xff] }
  0xcc   : > { %v792_v36 = vsel %vm9450_vm10, %v567_v61, %v791_v20  ;;  %v1129_v3 = vshll.u32 %v9923_v51, 16  ;;  %v1133_v43 = vshrl.u32 %v9923_v51, 16  ;;  %v1139_v61 = vshll.u32 %v9948_v15, 16  ;;  %3451 = vmatpush.bf16.msra.mxu1 %v8874_v7 }
  0xcd   : > { %793 = vst [vmem:[#allocation2 + $0x80] sm:$0x1] %v792_v36  ;;  %v579_v20 = vrot.slane %v577_v38, 7  ;;  %v9958_v36 = vpop.f32.mrf.mxu0  ;;  %v8864_v38 = vld [vmem:[%s12289_s1 + $0x108] sm:$0xff] }
  0xce   : > { %1676 = vmatmul.bf16.gmra.mxu1 %v8803_v8  ;;  %2379 = vmatmul.bf16.gmra.mxu3 %v8845_v25  ;;  %v1928_v8 = vunpack.c.l.b16 %v1833_v21  ;;  %v1929_v25 = vunpack.c.l.b16 %v1836_v50  ;;  %v1123_v21 = vshll.u32 %v854_v29, 16  ;;  %v1842_v50 = vrot.slane %v9861_v48, 5 }
  0xcf   : > { %v9942_v11 = vrot.slane %v1129_v3, 5  ;;  %v1135_v6 = vrot.slane %v1133_v43, 4  ;;  %v580_v29 = vshll.u32 %v9938_v18, 16  ;;  %3028 = vmatpush.bf16.msrb.mxu0 %v8864_v38 }
  0xd0   : > { %v1954_v60 = vpack.c.b16 %v1929_v25, %v1928_v8  ;;  %v1319_v8 = vunpack.c.l.b16 %v1108_v53  ;;  %v1125_v14 = vrot.slane %v1123_v21, 5  ;;  %v1840_v25 = vsel %vm9596_vm13, %v7977_v16, %v1839_v42  ;;  %v798_v42 = vld [vmem:[#allocation2 + $0x8c] sm:$0x1] }
  0xd1   : > { %v1843_v48 = vsel %vm9596_vm13, %v1841_v46, %v1842_v50  ;;  %v1930_v37 = vunpack.c.l.b16 %v1840_v25  ;;  %v582_v58 = vor.u32 %v580_v29, %v579_v20  ;;  %v8906_v46 = vld [vmem:[%s12289_s1 + $0x1d8] sm:$0xff] }
  0xd2   : > { %2061 = vmatmul.bf16.gmra.mxu2 %v1953_v27  ;;  %v558_v27 = vrot.slane %v554_v54, 4  ;;  %v1122_v54 = vrot.slane %v1120_v56, 4  ;;  %v1343_v40 = vpack.c.b16 %v1320_v0, %v1319_v8  ;;  %v1931_v39 = vunpack.c.l.b16 %v1843_v48  ;;  %v1745_v8 = vld [vmem:[#allocation2 + $0x60] sm:$0xe]  ;;  %4446 = vmatpush.bf16.msrb.mxu3 %v8906_v46 }
  0xd3   : > { %v5177_v56 = vunpack.c.l.bf16 %v9841_v23  ;;  %v8847_v23 = vld [vmem:[#allocation2 + $0x6c] sm:$0xff]  ;;  %v1846_v0 = vrot.slane %v9877_v4, 5 }
  0xd4   : > { %v566_v44 = vsel %vm9409_vm8, %v558_v27, %v565_v49  ;;  %v572_v27 = vshll.u32 %v9935_v52, 16  ;;  %v1136_v49 = vor.u32 %v1135_v6, %v9942_v11  ;;  %v1955_v22 = vpack.c.b16 %v1931_v39, %v1930_v37  ;;  %v856_v6 = vld [vmem:[#allocation2 + $0x78] sm:$0xf] }
  0xd5   : > { %790 = vst [vmem:[#allocation2 + $0x7c] sm:$0xf] %v566_v44  ;;  %v8805_v44 = vld [vmem:[#allocation2 + $0x48] sm:$0xff]  ;;  %v1849_v37 = vrot.slane %v9910_v63, 5 }
  0xd6   : > { %v1137_v43 = vrot.slane %v1136_v49, 4  ;;  %v1848_v49 = vrot.slane %v1846_v0, 4 }
  0xda   : > { %1458 = vmatmul.bf16.gmra.mxu0 %v1342_v32  ;;  %v571_v32 = vrot.slane %v569_v47, 7  ;;  %v1141_v47 = vrot.slane %v1139_v61, 5  ;;  %v1144_v61 = vshrl.u32 %v856_v6, 16 }
  0xdc   : > { %v574_v55 = vor.u32 %v572_v27, %v571_v32  ;;  %v1142_v48 = vsel %vm9272_vm2, %v1137_v43, %v1141_v47  ;;  %v9996_v27 = vld [vmem:[%s9333_s9 + $0x58] sm:$0xf] }
  0xde   : > { %1681 = vmatmul.bf16.gmra.mxu1 %v8804_v28  ;;  %2384 = vmatmul.bf16.gmra.mxu3 %v8846_v19  ;;  %v1126_v28 = vor.u32 %v1125_v14, %v1122_v54  ;;  %v584_v19 = vrot.slane %v579_v20, 4  ;;  %v795_v21 = vsel %vm9436_vm9, %v574_v55, %v794_v30  ;;  %v5178_v54 = vunpack.c.l.bf16 %v9892_v1  ;;  %v9984_v1 = vld [vmem:[#allocation2 + $0x7c] sm:$0xf] }
  0xdf   : > { %796 = vst [vmem:[#allocation2 + $0x84] sm:$0xf] %v795_v21  ;;  %v5179_v14 = vunpack.c.l.bf16 %v9895_v2  ;;  %v1147_v20 = vshll.u32 %v856_v6, 16  ;;  %v586_v30 = vshrl.u32 %v9996_v27, 16  ;;  %v1157_v39 = vshrl.u32 %v9984_v1, 16 }
  0xe0   : > { %v1127_v3 = vrot.slane %v1126_v28, 4  ;;  %v799_v50 = vsel %vm9450_vm10, %v584_v19, %v798_v42  ;;  %v9986_v2 = vadd.f32 %v5178_v54, %v5176_v41  ;;  %v9999_v28 = vld [vmem:[%s9333_s9 + $0x5c] sm:$0xf]  ;;  %v1322_v42 = vunpack.c.l.b16 %v1142_v48  ;;  %v8806_v48 = vld [vmem:[#allocation2 + $0x54] sm:$0xff] }
  0xe1   : > { %800 = vst [vmem:[#allocation2 + $0x8c] sm:$0x1] %v799_v50  ;;  %v594_v55 = vshrl.u32 %v9999_v28, 16  ;;  %v588_v41 = vrot.slane %v586_v30, 7  ;;  %v1149_v21 = vrot.slane %v1147_v20, 5  ;;  %v1159_v47 = vrot.slane %v1157_v39, 4 }
  0xe2   : > { %2066 = vmatmul.bf16.gmra.mxu2 %v1954_v60  ;;  %v575_v60 = vrot.slane %v571_v32, 4  ;;  %12340 = vst [vmem:[#allocation16_spill] sm:$0xff] %v9986_v2  ;;  %v9988_v32 = vadd.f32 %v5179_v14, %v5177_v56  ;;  %v1132_v25 = vsel %vm9272_vm2, %v1127_v3, %v9942_v11  ;;  %v1153_v11 = vshll.u32 %v9984_v1, 16  ;;  %v805_v20 = vld [vmem:[#allocation2 + $0x98] sm:$0x1] }
  0xe3   : > { %v1321_v19 = vunpack.c.l.b16 %v1132_v25  ;;  %v589_v56 = vshll.u32 %v9996_v27, 16  ;;  %v1850_v3 = vsel %vm9596_vm13, %v1848_v49, %v1849_v37  ;;  %v596_v50 = vrot.slane %v594_v55, 7  ;;  %v340_v2 = vld [vmem:[%s9333_s9 + $0x7c] sm:$0xf] }
  0xe4   : > { %v583_v4 = vsel %vm9409_vm8, %v575_v60, %v582_v58  ;;  %12341 = vst [vmem:[#allocation17_spill] sm:$0xff] %v9988_v32  ;;  %v1146_v58 = vrot.slane %v1144_v61, 4  ;;  %v1155_v43 = vrot.slane %v1153_v11, 5  ;;  %v592_v6 = vrot.slane %v588_v41, 4 }
  0xe5   : > { %797 = vst [vmem:[#allocation2 + $0x88] sm:$0xf] %v583_v4  ;;  %v1344_v54 = vpack.c.b16 %v1322_v42, %v1321_v19  ;;  %v597_v7 = vshll.u32 %v9999_v28, 16  ;;  %v601_v4 = vrot.slane %v596_v50, 4  ;;  %v662_v24 = vshrl.u32 %v340_v2, 16 }
  0xe6   : > { %v1150_v38 = vor.u32 %v1149_v21, %v1146_v58  ;;  %v1853_v21 = vrot.slane %v9923_v51, 5  ;;  %v665_v10 = vshll.u32 %v340_v2, 16 }
  0xe7   : > { %v599_v61 = vor.u32 %v597_v7, %v596_v50  ;;  %v806_v37 = vsel %vm9450_vm10, %v601_v4, %v805_v20  ;;  %v10222_v5 = vrot.slane %v662_v24, 7 }
  0xe8   : > { %807 = vst [vmem:[#allocation2 + $0x98] sm:$0x1] %v806_v37  ;;  %v1151_v42 = vrot.slane %v1150_v38, 4  ;;  %v1856_v38 = vrot.slane %v9948_v15, 5 }
  0xe9   : > { %v600_v55 = vsel %vm9409_vm8, %v592_v6, %v599_v61  ;;  %12351 = vst [vmem:[#allocation27_spill] sm:$0xff] %v10222_v5 }
  0xea   : > { %1463 = vmatmul.bf16.gmra.mxu0 %v1343_v40  ;;  %v7978_v40 = vrot.slane %v1745_v8, 9  ;;  %v591_v8 = vor.u32 %v589_v56, %v588_v41  ;;  %v8848_v41 = vld [vmem:[#allocation2 + $0x78] sm:$0xff]  ;;  %v858_v56 = vld [vmem:[#allocation2 + $0x84] sm:$0xf]  ;;  %804 = vst [vmem:[#allocation2 + $0x94] sm:$0xf] %v600_v55 }
  0xeb   : > { %v9960_v53 = vpop.f32.mrf.mxu1 }
  0xec   : > { %v9966_v16 = vpop.f32.mrf.mxu3  ;;  %v1847_v63 = vsel %vm9596_vm13, %v7978_v40, %v1846_v0  ;;  %v1933_v0 = vunpack.c.l.b16 %v1850_v3  ;;  %v1160_v40 = vor.u32 %v1159_v47, %v1155_v43  ;;  %v10036_v3 = vld [vmem:[#allocation2 + $0x88] sm:$0xf]  ;;  %v1746_v47 = vld [vmem:[#allocation2 + $0x6c] sm:$0xe] }
  0xed   : > { %v1932_v14 = vunpack.c.l.b16 %v1847_v63  ;;  %v1181_v6 = vshrl.u32 %v10036_v3, 16  ;;  %v7979_v51 = vrot.slane %v1746_v47, 9 }
  0xee   : > { %1686 = vmatmul.bf16.gmra.mxu1 %v8805_v44  ;;  %2389 = vmatmul.bf16.gmra.mxu3 %v8847_v23  ;;  %v10019_v23 = vld [vmem:[#allocation2 + $0x80] sm:$0x1]  ;;  %v1161_v63 = vrot.slane %v1160_v40, 4 }
  0xef   : > { %v1163_v49 = vshll.u32 %v10019_v23, 16  ;;  %v1956_v19 = vpack.c.b16 %v1933_v0, %v1932_v14  ;;  %v1177_v14 = vshll.u32 %v10036_v3, 16  ;;  %v1855_v0 = vrot.slane %v1853_v21, 4 }
  0xf0   : > { %v1183_v37 = vrot.slane %v1181_v6, 4  ;;  %v5180_v6 = vunpack.c.l.bf16 %v9935_v52  ;;  %v5182_v52 = vunpack.c.l.bf16 %v9996_v27 }
  0xf1   : > { %v1165_v58 = vrot.slane %v1163_v49, 5  ;;  %v1179_v20 = vrot.slane %v1177_v14, 5 }
  0xf2   : > { %2071 = vmatmul.bf16.gmra.mxu2 %v1955_v22  ;;  %v801_v22 = vld [vmem:[#allocation2 + $0x90] sm:$0xf] }
  0xf3   : > { %v10006_v29 = vpop.f32.mrf.mxu1  ;;  %v802_v25 = vsel %vm9436_vm9, %v591_v8, %v801_v22  ;;  %v1168_v22 = vshrl.u32 %v858_v56, 16  ;;  %v1171_v8 = vshll.u32 %v858_v56, 16  ;;  %v1166_v7 = vsel %vm9272_vm2, %v1161_v63, %v1165_v58 }
  0xf4   : > { %12342 = vst [vmem:[#allocation18_spill] sm:$0xff] %v10006_v29  ;;  %v10010_v60 = vpop.f32.mrf.mxu0  ;;  %v10017_v46 = vpop.f32.mrf.mxu3  ;;  %v1324_v61 = vunpack.c.l.b16 %v1166_v7  ;;  %v1184_v47 = vor.u32 %v1183_v37, %v1179_v20  ;;  %v5181_v7 = vunpack.c.l.bf16 %v9938_v18  ;;  %v8849_v37 = vld [vmem:[#allocation2 + $0x84] sm:$0xff]  ;;  %v5183_v18 = vunpack.c.l.bf16 %v9999_v28 }
  0xf5   : > { %v10008_v44 = vpop.f32.mrf.mxu2  ;;  %803 = vst [vmem:[#allocation2 + $0x90] sm:$0xf] %v802_v25  ;;  %v1173_v40 = vrot.slane %v1171_v8, 5 }
  0xf6   : > { %12343 = vst [vmem:[#allocation19_spill] sm:$0xff] %v10008_v44 }
  0xfa   : > { %1468 = vmatmul.bf16.gmra.mxu0 %v1344_v54  ;;  %v1156_v54 = vsel %vm9272_vm2, %v1151_v42, %v1155_v43  ;;  %v10049_v43 = vld [vmem:[#allocation2 + $0x8c] sm:$0x1]  ;;  %v1857_v42 = vsel %vm9596_vm13, %v1855_v0, %v1856_v38 }
  0xfb   : > { %v10025_v30 = vpop.f32.mrf.mxu1  ;;  %v1323_v49 = vunpack.c.l.b16 %v1156_v54  ;;  %v1935_v58 = vunpack.c.l.b16 %v1857_v42  ;;  %v8863_v54 = vld [vmem:[%s12289_s1 + $0x100] sm:$0xff] }
  0xfc   : > { %12344 = vst [vmem:[#allocation20_spill] sm:$0xff] %v10025_v30  ;;  %v10031_v39 = vpop.f32.mrf.mxu0  ;;  %v10038_v50 = vpop.f32.mrf.mxu3  ;;  %3029 = vmatpush.bf16.msrb.mxu0 %v8863_v54 }
  0xfd   : > { %v10029_v11 = vpop.f32.mrf.mxu2  ;;  %v1345_v56 = vpack.c.b16 %v1324_v61, %v1323_v49  ;;  %v1185_v61 = vrot.slane %v1184_v47, 4 }
  0xfe   : > { %12345 = vst [vmem:[#allocation21_spill] sm:$0xff] %v10029_v11  ;;  %1691 = vmatmul.bf16.gmra.mxu1 %v8806_v48  ;;  %2394 = vmatmul.bf16.gmra.mxu3 %v8848_v41  ;;  %v1170_v48 = vrot.slane %v1168_v22, 4  ;;  %v1187_v41 = vshll.u32 %v10049_v43, 16  ;;  %v8807_v22 = vld [vmem:[#allocation2 + $0x60] sm:$0xff] }
 0x100   : > { %v1174_v15 = vor.u32 %v1173_v40, %v1170_v48  ;;  %v1189_v48 = vrot.slane %v1187_v41, 5  ;;  %v8905_v40 = vld [vmem:[%s12289_s1 + $0x1d0] sm:$0xff] }
 0x101   : > { %4447 = vmatpush.bf16.msrb.mxu3 %v8905_v40  ;;  %v8873_v41 = vld [vmem:[%s12289_s1 + $0x150] sm:$0xff] }
 0x102   : > { %2076 = vmatmul.bf16.gmra.mxu2 %v1956_v19  ;;  %v1854_v19 = vsel %vm9596_vm13, %v7979_v51, %v1853_v21  ;;  %v8897_v21 = vld [vmem:[%s12289_s1 + $0x190] sm:$0xff]  ;;  %v1175_v38 = vrot.slane %v1174_v15, 4  ;;  %3452 = vmatpush.bf16.msra.mxu1 %v8873_v41 }
 0x103   : > { %v10047_v4 = vpop.f32.mrf.mxu1  ;;  %v1934_v63 = vunpack.c.l.b16 %v1854_v19  ;;  %3766 = vmatpush.bf16.msra.mxu2 %v8897_v21  ;;  %v860_v19 = vld [vmem:[#allocation2 + $0x90] sm:$0xf]  ;;  %v10075_v15 = vld [vmem:[#allocation2 + $0x94] sm:$0xf] }
 0x104   : > { %12346 = vst [vmem:[#allocation22_spill] sm:$0xff] %v10047_v4  ;;  %v10051_v55 = vpop.f32.mrf.mxu0  ;;  %v10058_v8 = vpop.f32.mrf.mxu3  ;;  %v1180_v27 = vsel %vm9272_vm2, %v1175_v38, %v1179_v20  ;;  %v1192_v28 = vshrl.u32 %v860_v19, 16  ;;  %v1205_v54 = vshrl.u32 %v10075_v15, 16 }
 0x105   : > { %v2037_v25 = vpop.f32.mrf.mxu2  ;;  %v1957_v49 = vpack.c.b16 %v1935_v58, %v1934_v63  ;;  %v10080_v63 = vadd.f32 %v5182_v52, %v5180_v6  ;;  %v10082_v58 = vadd.f32 %v5183_v18, %v5181_v7  ;;  %v1863_v7 = vrot.slane %v10019_v23, 5  ;;  %v10103_v23 = vld [vmem:[#allocation2 + $0x98] sm:$0x1] }
 0x106   : > { %v1207_v52 = vrot.slane %v1205_v54, 4 }
 0x107   : > { %12347 = vst [vmem:[#allocation23_spill] sm:$0xff] %v10080_v63 }
 0x108   : > { %12348 = vst [vmem:[#allocation24_spill] sm:$0xff] %v10082_v58 }
 0x10a   : > { %1473 = vmatmul.bf16.gmra.mxu0 %v1345_v56  ;;  %v1747_v56 = vld [vmem:[#allocation2 + $0x78] sm:$0xe] }
 0x10b   : > { %v1657_v14 = vpop.f32.mrf.mxu1 }
 0x10c   : > { %v1658_v51 = vadd.f32 %v1657_v14, %v9928_v13  ;;  %v1860_v13 = vrot.slane %v9984_v1, 5  ;;  %v10084_v47 = vpop.f32.mrf.mxu0  ;;  %v1190_v1 = vsel %vm9272_vm2, %v1185_v61, %v1189_v48  ;;  %v7980_v14 = vrot.slane %v1747_v56, 9 }
 0x10d   : > { %v2039_v0 = vpop.f32.mrf.mxu2  ;;  %v1326_v40 = vunpack.c.l.b16 %v1190_v1  ;;  %v1194_v48 = vrot.slane %v1192_v28, 4 }
 0x10e   : > { %v2117_v42 = vadd.f32 %v2037_v25, %v1658_v51  ;;  %1696 = vmatmul.bf16.gmra.mxu1 %v8807_v22  ;;  %v1195_v25 = vshll.u32 %v860_v19, 16  ;;  %2399 = vmatmul.bf16.gmra.mxu3 %v8849_v37  ;;  %v1201_v22 = vshll.u32 %v10075_v15, 16  ;;  %v1862_v6 = vrot.slane %v1860_v13, 4 }
 0x10f   : > { %v1325_v51 = vunpack.c.l.b16 %v1180_v27 }
 0x110   : > { %v10093_v21 = vadd.f32 %v9966_v16, %v2117_v42  ;;  %v1197_v61 = vrot.slane %v1195_v25, 5  ;;  %v1203_v37 = vrot.slane %v1201_v22, 5  ;;  %v1861_v16 = vsel %vm9596_vm13, %v7980_v14, %v1860_v13 }
 0x111   : > { %v10097_v19 = vpop.f32.mrf.mxu3  ;;  %v1864_v42 = vsel %vm9596_vm13, %v1862_v6, %v1863_v7  ;;  %v1346_v41 = vpack.c.b16 %v1326_v40, %v1325_v51  ;;  %v1936_v27 = vunpack.c.l.b16 %v1861_v16  ;;  %v1211_v25 = vshll.u32 %v10103_v23, 16  ;;  %v2462_v40 = vld [vmem:[#allocation2 + $0xc] sm:$0xf] }
 0x112   : > { %2081 = vmatmul.bf16.gmra.mxu2 %v1957_v49  ;;  %v1198_v56 = vor.u32 %v1197_v61, %v1194_v48  ;;  %v1937_v1 = vunpack.c.l.b16 %v1864_v42  ;;  %v1208_v28 = vor.u32 %v1207_v52, %v1203_v37  ;;  %v1867_v61 = vrot.slane %v10036_v3, 5  ;;  %v10115_v52 = vld [vmem:[#allocation2 + $0x10] sm:$0xf] }
 0x113   : > { %v1659_v20 = vpop.f32.mrf.mxu1  ;;  %v2511_v16 = vshrl.u32 %v2462_v40, 16  ;;  %v2514_v42 = vshll.u32 %v2462_v40, 16 }
 0x114   : > { %v1660_v38 = vadd.f32 %v1659_v20, %v9958_v36  ;;  %v1199_v6 = vrot.slane %v1198_v56, 4  ;;  %v1958_v20 = vpack.c.b16 %v1937_v1, %v1936_v27  ;;  %v1209_v51 = vrot.slane %v1208_v28, 4 }
 0x115   : > { %v2042_v49 = vpop.f32.mrf.mxu2  ;;  %v2520_v56 = vshll.u32 %v10115_v52, 16  ;;  %v1869_v28 = vrot.slane %v1867_v61, 4 }
 0x116   : > { %v2118_v18 = vadd.f32 %v2039_v0, %v1660_v38  ;;  %v8808_v0 = vld [vmem:[#allocation2 + $0x6c] sm:$0xff] }
 0x117   : > { %v10109_v22 = vpop.f32.mrf.mxu0  ;;  %v8850_v38 = vld [vmem:[#allocation2 + $0x90] sm:$0xff] }
 0x118   : > { %v10106_v36 = vadd.f32 %v10017_v46, %v2118_v18  ;;  %v1213_v46 = vrot.slane %v1211_v25, 5  ;;  %v1748_v18 = vld [vmem:[#allocation2 + $0x84] sm:$0xe] }
 0x119   : > { %v10112_v7 = vpop.f32.mrf.mxu3  ;;  %v7981_v1 = vrot.slane %v1748_v18, 9 }
 0x11a   : > { %1478 = vmatmul.bf16.gmra.mxu0 %v1346_v41  ;;  %v1214_v41 = vsel %vm9272_vm2, %v1209_v51, %v1213_v46  ;;  %v2513_v51 = vrot.slane %v2511_v16, 4  ;;  %v2516_v46 = vrot.slane %v2514_v42, 5 }
 0x11b   : > { %v1662_v54 = vpop.f32.mrf.mxu1 }
 0x11c   : > { %v1663_v13 = vadd.f32 %v1662_v54, %v10010_v60  ;;  %v1204_v60 = vsel %vm9272_vm2, %v1199_v6, %v1203_v37  ;;  %v1870_v37 = vrot.slane %v10049_v43, 5  ;;  %v1868_v43 = vsel %vm9596_vm13, %v7981_v1, %v1867_v61  ;;  %v8896_v61 = vld [vmem:[%s12289_s1 + $0x188] sm:$0xff] }
 0x11d   : > { %v2044_v14 = vpop.f32.mrf.mxu2  ;;  %v1938_v42 = vunpack.c.l.b16 %v1868_v43  ;;  %3767 = vmatpush.bf16.msra.mxu2 %v8896_v61  ;;  %v1874_v43 = vrot.slane %v10075_v15, 5 }
 0x11e   : > { %v2119_v48 = vadd.f32 %v2042_v49, %v1663_v13  ;;  %1701 = vmatmul.bf16.gmra.mxu1 %v8808_v0  ;;  %2404 = vmatmul.bf16.gmra.mxu3 %v8850_v38  ;;  %v2524_v49 = vshrl.u32 %v10115_v52, 16  ;;  %v1327_v0 = vunpack.c.l.b16 %v1204_v60  ;;  %v1328_v13 = vunpack.c.l.b16 %v1214_v41 }
 0x11f   : > { %v10126_v3 = vpop.f32.mrf.mxu0  ;;  %v2522_v38 = vrot.slane %v2520_v56, 5  ;;  %v1871_v18 = vsel %vm9596_vm13, %v1869_v28, %v1870_v37  ;;  %v2517_v41 = vor.u32 %v2516_v46, %v2513_v51 }
 0x120   : > { %v10124_v27 = vadd.f32 %v10038_v50, %v2119_v48  ;;  %v8918_v50 = vld [vmem:[%s12289_s1 + $0x238] sm:$0xff]  ;;  %v2526_v40 = vrot.slane %v2524_v49, 4  ;;  %v1347_v60 = vpack.c.b16 %v1328_v13, %v1327_v0 }
 0x121   : > { %4867 = vmatpush.bf16.msra.mxu0 %v8918_v50  ;;  %v8809_v49 = vld [vmem:[#allocation2 + $0x78] sm:$0xff]  ;;  %v2518_v0 = vrot.slane %v2517_v41, 4  ;;  %v1749_v41 = vld [vmem:[#allocation2 + $0x90] sm:$0xe] }
 0x122   : > { %2086 = vmatmul.bf16.gmra.mxu2 %v1958_v20  ;;  %v10130_v20 = vpop.f32.mrf.mxu3  ;;  %v2527_v34 = vor.u32 %v2526_v40, %v2522_v38  ;;  %v8851_v50 = vld [vmem:[#allocation2 + $0x9c] sm:$0xff]  ;;  %v2465_v40 = vld [vmem:[#allocation2 + $0x18] sm:$0xf]  ;;  %v7982_v61 = vrot.slane %v1749_v41, 9 }
 0x123   : > { %v1664_v25 = vpop.f32.mrf.mxu1 }
 0x124   : > { %v1665_v54 = vadd.f32 %v1664_v25, %v10031_v39  ;;  %v10139_v39 = vld [vmem:[#allocation2 + $0x14] sm:$0x1]  ;;  %v1939_v25 = vunpack.c.l.b16 %v1871_v18  ;;  %v2528_v51 = vrot.slane %v2527_v34, 4  ;;  %v8872_v18 = vld [vmem:[%s12289_s1 + $0x148] sm:$0xff]  ;;  %v2538_v34 = vshll.u32 %v2465_v40, 16 }
 0x125   : > { %v2047_v6 = vpop.f32.mrf.mxu2  ;;  %v2530_v56 = vshll.u32 %v10139_v39, 16  ;;  %3453 = vmatpush.bf16.msra.mxu1 %v8872_v18 }
 0x126   : > { %v2120_v48 = vadd.f32 %v2044_v14, %v1665_v54  ;;  %v1959_v13 = vpack.c.b16 %v1939_v25, %v1938_v42  ;;  %v2535_v42 = vshrl.u32 %v2465_v40, 16  ;;  %v2540_v40 = vrot.slane %v2538_v34, 5 }
 0x127   : > { %v10145_v14 = vpop.f32.mrf.mxu0  ;;  %v2532_v46 = vrot.slane %v2530_v56, 5 }
 0x128   : > { %v10142_v16 = vadd.f32 %v10058_v8, %v2120_v48  ;;  %v8904_v8 = vld [vmem:[%s12289_s1 + $0x1c8] sm:$0xff] }
 0x129   : > { %4448 = vmatpush.bf16.msrb.mxu3 %v8904_v8 }
 0x12a   : > { %v10151_v54 = vpop.f32.mrf.mxu3  ;;  %1483 = vmatmul.bf16.gmra.mxu0 %v1347_v60  ;;  %v2523_v60 = vsel %vm9272_vm2, %v2518_v0, %v2522_v38  ;;  %v1877_v38 = vrot.slane %v10103_v23, 5  ;;  %v10181_v23 = vld [vmem:[#allocation2 + $0x20] sm:$0x1] }
 0x12b   : > { %v1667_v1 = vpop.f32.mrf.mxu1  ;;  %v2910_v0 = vunpack.c.l.b16 %v2523_v60  ;;  %v2554_v34 = vshll.u32 %v10181_v23, 16 }
 0x12c   : > { %v1668_v28 = vadd.f32 %v1667_v1, %v10051_v55  ;;  %v10157_v55 = vld [vmem:[#allocation2 + $0x1c] sm:$0xf]  ;;  %v1876_v1 = vrot.slane %v1874_v43, 4 }
 0x12d   : > { %v2049_v37 = vpop.f32.mrf.mxu2  ;;  %v2544_v15 = vshll.u32 %v10157_v55, 16  ;;  %v2548_v25 = vshrl.u32 %v10157_v55, 16 }
 0x12e   : > { %v2121_v48 = vadd.f32 %v2047_v6, %v1668_v28  ;;  %1706 = vmatmul.bf16.gmra.mxu1 %v8809_v49  ;;  %v2533_v6 = vsel %vm9272_vm2, %v2528_v51, %v2532_v46  ;;  %2409 = vmatmul.bf16.gmra.mxu3 %v8851_v50  ;;  %v2537_v50 = vrot.slane %v2535_v42, 4  ;;  %v1878_v41 = vsel %vm9596_vm13, %v1876_v1, %v1877_v38  ;;  %v2468_v38 = vld [vmem:[#allocation2 + $0x24] sm:$0xf] }
 0x12f   : > { %v10171_v49 = vpop.f32.mrf.mxu0  ;;  %v2911_v51 = vunpack.c.l.b16 %v2533_v6  ;;  %v2546_v18 = vrot.slane %v2544_v15, 5  ;;  %v2550_v33 = vrot.slane %v2548_v25, 4  ;;  %v2559_v63 = vshrl.u32 %v2468_v38, 16 }
 0x130   : > { %v10169_v56 = vadd.f32 %v10097_v19, %v2121_v48  ;;  %v1875_v48 = vsel %vm9596_vm13, %v7982_v61, %v1874_v43  ;;  %v2541_v58 = vor.u32 %v2540_v40, %v2537_v50  ;;  %v2556_v50 = vrot.slane %v2554_v34, 5  ;;  %v9125_v34 = vld [vmem:[#allocation2 + $0xa4] sm:$0x1] }
 0x131   : > { %v2942_v60 = vpack.c.b16 %v2911_v51, %v2910_v0  ;;  %v1940_v6 = vunpack.c.l.b16 %v1875_v48  ;;  %v2551_v42 = vor.u32 %v2550_v33, %v2546_v18  ;;  %v10192_v0 = vld [vmem:[#allocation2 + $0x28] sm:$0xf]  ;;  %v2562_v32 = vshll.u32 %v2468_v38, 16 }
 0x132   : > { %2091 = vmatmul.bf16.gmra.mxu2 %v1959_v13  ;;  %v10175_v46 = vpop.f32.mrf.mxu3  ;;  %v8852_v33 = vld [vmem:[#allocation2 + $0xa8] sm:$0xff]  ;;  %v2561_v38 = vrot.slane %v2559_v63, 4 }
 0x133   : > { %v1669_v28 = vpop.f32.mrf.mxu1  ;;  %v2552_v51 = vrot.slane %v2551_v42, 4 }
 0x134   : > { %v1670_v8 = vadd.f32 %v1669_v28, %v10084_v47  ;;  %v1941_v28 = vunpack.c.l.b16 %v1878_v41  ;;  %v1750_v41 = vld [vmem:[#allocation2 + $0x9c] sm:$0xe] }
 0x135   : > { %v2052_v13 = vpop.f32.mrf.mxu2 }
 0x136   : > { %v2122_v19 = vadd.f32 %v2049_v37, %v1670_v8  ;;  %v8810_v37 = vld [vmem:[#allocation2 + $0x84] sm:$0xff]  ;;  %v2542_v8 = vrot.slane %v2541_v58, 4  ;;  %v2557_v58 = vsel %vm9272_vm2, %v2552_v51, %v2556_v50 }
 0x137   : > { %v10187_v15 = vpop.f32.mrf.mxu0  ;;  %v2913_v50 = vunpack.c.l.b16 %v2557_v58 }
 0x138   : > { %v10184_v47 = vadd.f32 %v10112_v7, %v2122_v19  ;;  %v1960_v7 = vpack.c.b16 %v1941_v28, %v1940_v6  ;;  %v9124_v19 = vld [vmem:[#allocation2 + $0xa0] sm:$0xf]  ;;  %v7983_v28 = vrot.slane %v1750_v41, 9  ;;  %v339_v41 = vld [vmem:[%s9333_s9 + $0x78] sm:$0xf] }
 0x139   : > { %v1881_v48 = vrot.slane %v9124_v19, 5  ;;  %v657_v58 = vshll.u32 %v339_v41, 16 }
 0x13a   : > { %12349 = vst [vmem:[#allocation25_spill] sm:$0xff] %v10184_v47  ;;  %v10190_v1 = vpop.f32.mrf.mxu3  ;;  %3030 = vmatmul.bf16.vlgmr.msrb.gmra.mxu0 %v2942_v60  ;;  %v2547_v60 = vsel %vm9272_vm2, %v2542_v8, %v2546_v18 }
 0x13b   : > { %v1672_v25 = vpop.f32.mrf.mxu1  ;;  %v1883_v42 = vrot.slane %v1881_v48, 4  ;;  %v2912_v51 = vunpack.c.l.b16 %v2547_v60 }
 0x13c   : > { %v1673_v43 = vadd.f32 %v1672_v25, %v10109_v22  ;;  %v2568_v22 = vshll.u32 %v10192_v0, 16  ;;  %v2572_v25 = vshrl.u32 %v10192_v0, 16 }
 0x13d   : > { %v2054_v61 = vpop.f32.mrf.mxu2 }
 0x13e   : > { %v2123_v40 = vadd.f32 %v2052_v13, %v1673_v43  ;;  %1711 = vmatmul.bf16.gmra.mxu1 %v8810_v37  ;;  %2414 = vmatmul.bf16.gmra.mxu3 %v8852_v33  ;;  %v1884_v37 = vrot.slane %v9125_v34, 5  ;;  %v10205_v19 = vrot.slane %v2568_v22, 5  ;;  %v2574_v33 = vrot.slane %v2572_v25, 4  ;;  %v10219_v22 = vld [vmem:[#allocation2 + $0x2c] sm:$0x1] }
 0x13f   : > { %v10203_v6 = vpop.f32.mrf.mxu0  ;;  %v654_v34 = vshrl.u32 %v339_v41, 16 }
 0x140   : > { %v10201_v13 = vadd.f32 %v10130_v20, %v2123_v40  ;;  %v8917_v40 = vld [vmem:[%s12289_s1 + $0x230] sm:$0xff]  ;;  %v2575_v45 = vor.u32 %v2574_v33, %v10205_v19 }
 0x141   : > { %4868 = vmatpush.bf16.msra.mxu0 %v8917_v40  ;;  %v656_v25 = vrot.slane %v654_v34, 7 }
 0x142   : > { %2096 = vmatmul.bf16.gmra.mxu2 %v1960_v7  ;;  %12350 = vst [vmem:[#allocation26_spill] sm:$0xff] %v10201_v13  ;;  %v2564_v7 = vrot.slane %v2562_v32, 5  ;;  %v10208_v20 = vpop.f32.mrf.mxu3  ;;  %v1882_v32 = vsel %vm9596_vm13, %v7983_v28, %v1881_v48  ;;  %v8811_v28 = vld [vmem:[#allocation2 + $0x90] sm:$0xff] }
 0x143   : > { %v1674_v43 = vpop.f32.mrf.mxu1  ;;  %v1942_v35 = vunpack.c.l.b16 %v1882_v32  ;;  %v660_v31 = vrot.slane %v656_v25, 4  ;;  %v9126_v32 = vld [vmem:[#allocation2 + $0xac] sm:$0xf] }
 0x144   : > { %v1675_v18 = vadd.f32 %v1674_v43, %v10126_v3  ;;  %v1885_v3 = vsel %vm9596_vm13, %v1883_v42, %v1884_v37  ;;  %v2565_v60 = vor.u32 %v2564_v7, %v2561_v38  ;;  %v2943_v43 = vpack.c.b16 %v2913_v50, %v2912_v51  ;;  %v8895_v37 = vld [vmem:[%s12289_s1 + $0x180] sm:$0xff]  ;;  %v2471_v50 = vld [vmem:[#allocation2 + $0x30] sm:$0xf] }
 0x145   : > { %v2057_v8 = vpop.f32.mrf.mxu2  ;;  %v2578_v42 = vshll.u32 %v10219_v22, 16  ;;  %v667_v38 = vor.u32 %v665_v10, %v10222_v5  ;;  %v829_v7 = vld [vmem:[#allocation2 + $0xc0] sm:$0xf]  ;;  %3768 = vmatpush.bf16.msra.mxu2 %v8895_v37  ;;  %v2583_v37 = vshrl.u32 %v2471_v50, 16 }
 0x146   : > { %v2124_v63 = vadd.f32 %v2054_v61, %v1675_v18  ;;  %v1943_v61 = vunpack.c.l.b16 %v1885_v3  ;;  %v659_v18 = vor.u32 %v657_v58, %v656_v25  ;;  %v2566_v51 = vrot.slane %v2565_v60, 4  ;;  %v8903_v10 = vld [vmem:[%s12289_s1 + $0x1c0] sm:$0xff]  ;;  %v1751_v58 = vld [vmem:[#allocation2 + $0xa8] sm:$0xe] }
 0x147   : > { %v10224_v48 = vpop.f32.mrf.mxu0  ;;  %v1888_v3 = vrot.slane %v9126_v32, 5  ;;  %v2576_v25 = vrot.slane %v2575_v45, 4  ;;  %4449 = vmatpush.bf16.msrb.mxu3 %v8903_v10  ;;  %v8871_v32 = vld [vmem:[%s12289_s1 + $0x140] sm:$0xff]  ;;  %v9127_v45 = vld [vmem:[#allocation2 + $0xb0] sm:$0x1] }
 0x148   : > { %v10232_v24 = vadd.f32 %v10151_v54, %v2124_v63  ;;  %v830_v33 = vsel %vm9436_vm9, %v659_v18, %v829_v7  ;;  %v10242_v54 = vld [vmem:[#allocation2 + $0x34] sm:$0xf]  ;;  %v668_v63 = vsel %vm9409_vm8, %v660_v31, %v667_v38  ;;  %v1961_v60 = vpack.c.b16 %v1943_v61, %v1942_v35  ;;  %3454 = vmatpush.bf16.msra.mxu1 %v8871_v32 }
 0x149   : > { %831 = vst [vmem:[#allocation2 + $0xc0] sm:$0xf] %v830_v33  ;;  %v2580_v7 = vrot.slane %v2578_v42, 5  ;;  %v2592_v62 = vshll.u32 %v10242_v54, 16  ;;  %v2596_v31 = vshrl.u32 %v10242_v54, 16  ;;  %v1890_v35 = vrot.slane %v1888_v3, 4 }
 0x14a   : > { %12352 = vst [vmem:[#allocation28_spill] sm:$0xff] %v10232_v24  ;;  %v10237_v34 = vpop.f32.mrf.mxu3  ;;  %3035 = vmatmul.bf16.gmra.mxu0 %v2943_v43  ;;  %v7984_v43 = vrot.slane %v1751_v58, 9  ;;  %v1891_v61 = vrot.slane %v9127_v45, 5  ;;  %v2571_v42 = vsel %vm9272_vm2, %v2566_v51, %v10205_v19  ;;  %v10270_v51 = vld [vmem:[#allocation2 + $0x38] sm:$0x1] }
 0x14b   : > { %v1677_v2 = vpop.f32.mrf.mxu1  ;;  %832 = vst [vmem:[#allocation2 + $0xc4] sm:$0xf] %v668_v63  ;;  %v2581_v38 = vsel %vm9272_vm2, %v2576_v25, %v2580_v7  ;;  %v10261_v10 = vrot.slane %v2592_v62, 5  ;;  %v2598_v63 = vrot.slane %v2596_v31, 4  ;;  %v2914_v25 = vunpack.c.l.b16 %v2571_v42  ;;  %v3882_v31 = vld [vmem:[#allocation2 + $0x18] sm:$0xf] }
 0x14c   : > { %v1678_v40 = vadd.f32 %v1677_v2, %v10145_v14  ;;  %v8853_v14 = vld [vmem:[#allocation2 + $0xb4] sm:$0xff]  ;;  %v2586_v2 = vshll.u32 %v2471_v50, 16  ;;  %v2585_v50 = vrot.slane %v2583_v37, 4  ;;  %v1889_v58 = vsel %vm9596_vm13, %v7984_v43, %v1888_v3  ;;  %v2474_v45 = vld [vmem:[#allocation2 + $0x3c] sm:$0xf] }
 0x14d   : > { %v2059_v41 = vpop.f32.mrf.mxu2  ;;  %v1892_v19 = vsel %vm9596_vm13, %v1890_v35, %v1891_v61  ;;  %v2599_v62 = vor.u32 %v2598_v63, %v10261_v10  ;;  %v3934_v12 = vshll.u32 %v3882_v31, 16  ;;  %v9128_v43 = vld [vmem:[#allocation2 + $0xb8] sm:$0xf]  ;;  %v3883_v35 = vld [vmem:[#allocation2 + $0x1c] sm:$0xf] }
 0x14e   : > { %v2125_v18 = vadd.f32 %v2057_v8, %v1678_v40  ;;  %1716 = vmatmul.bf16.gmra.mxu1 %v8811_v28  ;;  %2419 = vmatmul.bf16.gmra.mxu3 %v8853_v14  ;;  %v2588_v33 = vrot.slane %v2586_v2, 5  ;;  %v1944_v2 = vunpack.c.l.b16 %v1889_v58  ;;  %v1945_v32 = vunpack.c.l.b16 %v1892_v19  ;;  %v8812_v42 = vld [vmem:[#allocation2 + $0x9c] sm:$0xff] }
 0x14f   : > { %v10254_v28 = vpop.f32.mrf.mxu0  ;;  %v1895_v59 = vrot.slane %v9128_v43, 5  ;;  %v2600_v58 = vrot.slane %v2599_v62, 4  ;;  %v2607_v19 = vshrl.u32 %v2474_v45, 16  ;;  %v3936_v43 = vrot.slane %v3934_v12, 5 }
 0x150   : > { %v10252_v8 = vadd.f32 %v10175_v46, %v2125_v18  ;;  %v2915_v18 = vunpack.c.l.b16 %v2581_v38  ;;  %v2589_v37 = vor.u32 %v2588_v33, %v2585_v50  ;;  %v3940_v5 = vshll.u32 %v3883_v35, 16 }
 0x152   : > { %2101 = vmatmul.bf16.gmra.mxu2 %v1961_v60  ;;  %12353 = vst [vmem:[#allocation29_spill] sm:$0xff] %v10252_v8  ;;  %v10264_v46 = vpop.f32.mrf.mxu3  ;;  %v2944_v3 = vpack.c.b16 %v2915_v18, %v2914_v25  ;;  %v2590_v38 = vrot.slane %v2589_v37, 4  ;;  %v10279_v25 = vld [vmem:[#allocation2 + $0x40] sm:$0xf]  ;;  %v2610_v18 = vshll.u32 %v2474_v45, 16  ;;  %v3942_v4 = vrot.slane %v3940_v5, 5 }
 0x153   : > { %v1679_v40 = vpop.f32.mrf.mxu1  ;;  %v8854_v37 = vld [vmem:[#allocation2 + $0xc0] sm:$0xff]  ;;  %v9129_v8 = vld [vmem:[#allocation2 + $0xbc] sm:$0x1]  ;;  %v2616_v45 = vshll.u32 %v10279_v25, 16 }
 0x154   : > { %v1680_v60 = vadd.f32 %v1679_v40, %v10171_v49  ;;  %v2602_v49 = vshll.u32 %v10270_v51, 16  ;;  %v3931_v40 = vshrl.u32 %v3882_v31, 16  ;;  %v2595_v24 = vsel %vm9272_vm2, %v2590_v38, %v10261_v10 }
 0x155   : > { %v2062_v14 = vpop.f32.mrf.mxu2  ;;  %v2612_v5 = vrot.slane %v2610_v18, 5  ;;  %v8916_v18 = vld [vmem:[%s12289_s1 + $0x228] sm:$0xff] }
 0x156   : > { %v2126_v7 = vadd.f32 %v2059_v41, %v1680_v60  ;;  %v1752_v41 = vld [vmem:[#allocation2 + $0xb4] sm:$0xe]  ;;  %v3933_v50 = vrot.slane %v3931_v40, 4  ;;  %v1962_v60 = vpack.c.b16 %v1945_v32, %v1944_v2  ;;  %v2604_v63 = vrot.slane %v2602_v49, 5  ;;  %4869 = vmatpush.bf16.msra.mxu0 %v8916_v18 }
 0x157   : > { %v10274_v61 = vpop.f32.mrf.mxu0  ;;  %v7985_v44 = vrot.slane %v1752_v41, 9  ;;  %v1897_v40 = vrot.slane %v1895_v59, 4  ;;  %v1898_v2 = vrot.slane %v9129_v8, 5  ;;  %v3944_v32 = vshrl.u32 %v3883_v35, 16 }
 0x158   : > { %v3937_v49 = vor.u32 %v3936_v43, %v3933_v50  ;;  %v2605_v12 = vsel %vm9272_vm2, %v2600_v58, %v2604_v63  ;;  %v2609_v8 = vrot.slane %v2607_v19, 4  ;;  %v10295_v38 = vadd.f32 %v10190_v1, %v2126_v7  ;;  %v10305_v1 = vld [vmem:[#allocation2 + $0x44] sm:$0x1] }
 0x159   : > { %v1899_v10 = vsel %vm9596_vm13, %v1897_v40, %v1898_v2  ;;  %v2916_v63 = vunpack.c.l.b16 %v2595_v24  ;;  %v2917_v43 = vunpack.c.l.b16 %v2605_v12  ;;  %v2477_v12 = vld [vmem:[#allocation2 + $0x48] sm:$0xf] }
 0x15a   : > { %v10277_v31 = vpop.f32.mrf.mxu3  ;;  %3040 = vmatmul.bf16.gmra.mxu0 %v2944_v3  ;;  %v2620_v3 = vshrl.u32 %v10279_v25, 16  ;;  %v3938_v35 = vrot.slane %v3937_v49, 4  ;;  %12354 = vst [vmem:[#allocation30_spill] sm:$0xff] %v10295_v38  ;;  %v1947_v40 = vunpack.c.l.b16 %v1899_v10  ;;  %v2613_v2 = vor.u32 %v2612_v5, %v2609_v8  ;;  %v3885_v49 = vld [vmem:[#allocation2 + $0x24] sm:$0xf]  ;;  %v8930_v10 = vld [vmem:[%s12290_s2 + $0x38] sm:$0xff] }
 0x15b   : > { %v1682_v33 = vpop.f32.mrf.mxu1  ;;  %v3958_v8 = vshll.u32 %v3885_v49, 16  ;;  %6368 = vmatpush.bf16.msrb.mxu2 %v8930_v10 }
 0x15c   : > { %v1683_v17 = vadd.f32 %v1682_v33, %v10187_v15  ;;  %v3950_v15 = vshll.u32 %v3884_v57, 16  ;;  %v3946_v33 = vrot.slane %v3944_v32, 4  ;;  %v2622_v19 = vrot.slane %v2620_v3, 4 }
 0x15d   : > { %v2064_v11 = vpop.f32.mrf.mxu2  ;;  %v3943_v24 = vsel %vm9272_vm2, %v3938_v35, %v3942_v4  ;;  %v3955_v3 = vshrl.u32 %v3885_v49, 16  ;;  %v10321_v35 = vld [vmem:[#allocation2 + $0x4c] sm:$0xf]  ;;  %v3960_v18 = vrot.slane %v3958_v8, 5 }
 0x15e   : > { %v2127_v62 = vadd.f32 %v2062_v14, %v1683_v17  ;;  %1721 = vmatmul.bf16.gmra.mxu1 %v8812_v42  ;;  %2424 = vmatmul.bf16.gmra.mxu3 %v8854_v37  ;;  %v1896_v17 = vsel %vm9596_vm13, %v7985_v44, %v1895_v59  ;;  %v3947_v57 = vor.u32 %v3946_v33, %v3942_v4  ;;  %v3952_v42 = vrot.slane %v3950_v15, 5 }
 0x15f   : > { %v10290_v14 = vpop.f32.mrf.mxu0  ;;  %v10300_v44 = vrot.slane %v2616_v45, 5  ;;  %v1946_v37 = vunpack.c.l.b16 %v1896_v17  ;;  %v2626_v33 = vshll.u32 %v10305_v1, 16  ;;  %v3886_v45 = vld [vmem:[#allocation2 + $0x28] sm:$0xf]  ;;  %v2945_v17 = vpack.c.b16 %v2917_v43, %v2916_v63  ;;  %v3887_v63 = vld [vmem:[#allocation2 + $0x2c] sm:$0x1] }
 0x160   : > { %v3948_v50 = vrot.slane %v3947_v57, 4  ;;  %v10308_v7 = vadd.f32 %v10208_v20, %v2127_v62  ;;  %v8813_v20 = vld [vmem:[#allocation2 + $0xa8] sm:$0xff]  ;;  %v4330_v62 = vunpack.c.l.b16 %v3943_v24  ;;  %v2614_v57 = vrot.slane %v2613_v2, 4  ;;  %v8946_v2 = vld [vmem:[%s12290_s2 + $0xb8] sm:$0xff] }
 0x161   : > { %v2623_v15 = vor.u32 %v2622_v19, %v10300_v44  ;;  %v1963_v4 = vpack.c.b16 %v1947_v40, %v1946_v37  ;;  %v2634_v19 = vshll.u32 %v2477_v12, 16  ;;  %v3968_v43 = vshrl.u32 %v3886_v45, 16  ;;  %6533 = vmatpush.bf16.msra.mxu3 %v8946_v2 }
 0x162   : > { %2106 = vmatmul.bf16.gmra.mxu2 %v1962_v60  ;;  %v10298_v59 = vpop.f32.mrf.mxu3  ;;  %12355 = vst [vmem:[#allocation31_spill] sm:$0xff] %v10308_v7  ;;  %v3953_v32 = vsel %vm9272_vm2, %v3948_v50, %v3952_v42  ;;  %v3957_v42 = vrot.slane %v3955_v3, 4  ;;  %v2628_v37 = vrot.slane %v2626_v33, 5  ;;  %v8938_v33 = vld [vmem:[%s12290_s2 + $0x78] sm:$0xff]  ;;  %v3974_v10 = vshll.u32 %v3887_v63, 16 }
 0x163   : > { %v1684_v41 = vpop.f32.mrf.mxu1  ;;  %v2624_v49 = vrot.slane %v2623_v15, 4  ;;  %v3970_v38 = vrot.slane %v3968_v43, 4  ;;  %v2644_v15 = vshrl.u32 %v10321_v35, 16  ;;  %6267 = vmatpush.bf16.msrb.mxu1 %v8938_v33 }
 0x164   : > { %v1685_v60 = vadd.f32 %v1684_v41, %v10203_v6  ;;  %v3964_v41 = vshll.u32 %v3886_v45, 16  ;;  %v3961_v8 = vor.u32 %v3960_v18, %v3957_v42  ;;  %v10349_v42 = vld [vmem:[#allocation2 + $0x50] sm:$0x1] }
 0x165   : > { %v2067_v58 = vpop.f32.mrf.mxu2 }
 0x166   : > { %v2128_v6 = vadd.f32 %v2064_v11, %v1685_v60  ;;  %v4331_v11 = vunpack.c.l.b16 %v3953_v32  ;;  %v2631_v60 = vshrl.u32 %v2477_v12, 16  ;;  %v3966_v3 = vrot.slane %v3964_v41, 5 }
 0x167   : > { %v10316_v5 = vpop.f32.mrf.mxu0  ;;  %v2640_v12 = vshll.u32 %v10321_v35, 16 }
 0x168   : > { %v4362_v7 = vpack.c.b16 %v4331_v11, %v4330_v62  ;;  %v10331_v45 = vadd.f32 %v10237_v34, %v2128_v6  ;;  %v2633_v41 = vrot.slane %v2631_v60, 4  ;;  %v3971_v62 = vor.u32 %v3970_v38, %v3966_v3 }
 0x169   : > { %v2619_v34 = vsel %vm9272_vm2, %v2614_v57, %v10300_v44  ;;  %v10342_v6 = vrot.slane %v2640_v12, 5  ;;  %v2646_v38 = vrot.slane %v2644_v15, 4  ;;  %v3976_v60 = vrot.slane %v3974_v10, 5  ;;  %v3888_v15 = vld [vmem:[#allocation2 + $0x30] sm:$0xf] }
 0x16a   : > { %v10324_v40 = vpop.f32.mrf.mxu3  ;;  %3045 = vmatmul.bf16.gmra.mxu0 %v2945_v17  ;;  %12356 = vst [vmem:[#allocation32_spill] sm:$0xff] %v10331_v45  ;;  %v2636_v17 = vrot.slane %v2634_v19, 5  ;;  %v2918_v18 = vunpack.c.l.b16 %v2619_v34  ;;  %v3212_v12 = vrot.slane %v10139_v39, 5  ;;  %v2480_v10 = vld [vmem:[#allocation2 + $0x54] sm:$0xf] }
 0x16b   : > { %v1687_v50 = vpop.f32.mrf.mxu1 }
 0x16c   : > { %v1688_v24 = vadd.f32 %v1687_v50, %v10224_v48  ;;  %v3962_v50 = vrot.slane %v3961_v8, 4  ;;  %v2637_v63 = vor.u32 %v2636_v17, %v2633_v41  ;;  %v3209_v8 = vrot.slane %v10115_v52, 5  ;;  %v3889_v41 = vld [vmem:[#allocation2 + $0x34] sm:$0xf]  ;;  %v3890_v52 = vld [vmem:[#allocation2 + $0x38] sm:$0x1] }
 0x16d   : > { %v2069_v32 = vpop.f32.mrf.mxu2  ;;  %v3979_v17 = vshrl.u32 %v3888_v15, 16 }
 0x16e   : > { %v2129_v48 = vadd.f32 %v2067_v58, %v1688_v24  ;;  %1726 = vmatmul.bf16.gmra.mxu1 %v8813_v20  ;;  %v2629_v58 = vsel %vm9272_vm2, %v2624_v49, %v2628_v37  ;;  %4450 = vmatmul.bf16.vlgmr.msrb.gmra.mxu3 %v4362_v7  ;;  %v2647_v49 = vor.u32 %v2646_v38, %v10342_v6 }
 0x16f   : > { %v10347_v11 = vpop.f32.mrf.mxu0  ;;  %v2919_v7 = vunpack.c.l.b16 %v2629_v58  ;;  %v3967_v37 = vsel %vm9272_vm2, %v3962_v50, %v3966_v3  ;;  %v10362_v58 = vld [vmem:[#allocation2 + $0x58] sm:$0xf]  ;;  %v3982_v3 = vshll.u32 %v3888_v15, 16 }
 0x170   : > { %v10345_v20 = vadd.f32 %v10264_v46, %v2129_v48  ;;  %v2650_v46 = vshll.u32 %v10349_v42, 16  ;;  %v2638_v48 = vrot.slane %v2637_v63, 4  ;;  %v8814_v50 = vld [vmem:[#allocation2 + $0xb4] sm:$0xff]  ;;  %v2664_v15 = vshll.u32 %v10362_v58, 16 }
 0x171   : > { %v2946_v33 = vpack.c.b16 %v2919_v7, %v2918_v18  ;;  %v2658_v18 = vshll.u32 %v2480_v10, 16  ;;  %v3984_v7 = vrot.slane %v3982_v3, 5 }
 0x172   : > { %2111 = vmatmul.bf16.gmra.mxu2 %v1963_v4  ;;  %12357 = vst [vmem:[#allocation33_spill] sm:$0xff] %v10345_v20  ;;  %v3972_v4 = vrot.slane %v3971_v62, 4  ;;  %v10352_v43 = vpop.f32.mrf.mxu3  ;;  %v4332_v62 = vunpack.c.l.b16 %v3967_v37  ;;  %v3992_v20 = vshrl.u32 %v3889_v41, 16 }
 0x173   : > { %v1689_v19 = vpop.f32.mrf.mxu1  ;;  %v2660_v29 = vrot.slane %v2658_v18, 5 }
 0x174   : > { %v1690_v44 = vadd.f32 %v1689_v19, %v10254_v28  ;;  %v3977_v2 = vsel %vm9272_vm2, %v3972_v4, %v3976_v60  ;;  %v3143_v28 = vld [vmem:[#allocation2 + $0xc] sm:$0xe]  ;;  %v2648_v4 = vrot.slane %v2647_v49, 4  ;;  %v3981_v60 = vrot.slane %v3979_v17, 4  ;;  %v8879_v49 = vld [vmem:[#allocation2 + $0x18] sm:$0xff] }
 0x175   : > { %v2072_v57 = vpop.f32.mrf.mxu2  ;;  %v4333_v34 = vunpack.c.l.b16 %v3977_v2  ;;  %v8146_v39 = vrot.slane %v3143_v28, 9  ;;  %v3988_v19 = vshll.u32 %v3889_v41, 16  ;;  %v3211_v2 = vrot.slane %v3209_v8, 4 }
 0x176   : > { %v2130_v24 = vadd.f32 %v2069_v32, %v1690_v44  ;;  %v2652_v32 = vrot.slane %v2650_v46, 5  ;;  %v2655_v44 = vshrl.u32 %v2480_v10, 16  ;;  %v2668_v17 = vshrl.u32 %v10362_v58, 16 }
 0x177   : > { %v10364_v38 = vpop.f32.mrf.mxu0  ;;  %v3990_v30 = vrot.slane %v3988_v19, 5  ;;  %v4363_v28 = vpack.c.b16 %v4333_v34, %v4332_v62  ;;  %v3994_v13 = vrot.slane %v3992_v20, 4  ;;  %v3985_v41 = vor.u32 %v3984_v7, %v3981_v60  ;;  %v10381_v62 = vld [vmem:[#allocation2 + $0x5c] sm:$0x1] }
 0x178   : > { %v10372_v10 = vadd.f32 %v10277_v31, %v2130_v24  ;;  %v2643_v19 = vsel %vm9272_vm2, %v2638_v48, %v10342_v6  ;;  %v3210_v20 = vsel %vm9596_vm13, %v8146_v39, %v3209_v8  ;;  %v3213_v31 = vsel %vm9596_vm13, %v3211_v2, %v3212_v12 }
 0x179   : > { %v3995_v47 = vor.u32 %v3994_v13, %v3990_v30  ;;  %v2670_v13 = vrot.slane %v2668_v17, 4  ;;  %v3986_v48 = vrot.slane %v3985_v41, 4  ;;  %v2920_v8 = vunpack.c.l.b16 %v2643_v19 }
 0x17a   : > { %v10367_v45 = vpop.f32.mrf.mxu3  ;;  %3050 = vmatmul.bf16.gmra.mxu0 %v2946_v33  ;;  %12358 = vst [vmem:[#allocation34_spill] sm:$0xff] %v10372_v10  ;;  %v2653_v33 = vsel %vm9272_vm2, %v2648_v4, %v2652_v32  ;;  %v2674_v39 = vshll.u32 %v10381_v62, 16  ;;  %v3335_v18 = vunpack.c.l.b16 %v3210_v20  ;;  %v3216_v41 = vrot.slane %v10157_v55, 5  ;;  %v10409_v20 = vld [vmem:[#allocation2 + $0x64] sm:$0xf] }
 0x17b   : > { %v1692_v63 = vpop.f32.mrf.mxu1  ;;  %v3996_v32 = vrot.slane %v3995_v47, 4 }
 0x17c   : > { %v1693_v46 = vadd.f32 %v1692_v63, %v10274_v61  ;;  %v3998_v61 = vshll.u32 %v3890_v52, 16  ;;  %v2657_v63 = vrot.slane %v2655_v44, 4  ;;  %v2921_v44 = vunpack.c.l.b16 %v2653_v33 }
 0x17d   : > { %v2074_v37 = vpop.f32.mrf.mxu2  ;;  %v3336_v52 = vunpack.c.l.b16 %v3213_v31 }
 0x17e   : > { %v2131_v3 = vadd.f32 %v2072_v57, %v1693_v46  ;;  %1731 = vmatmul.bf16.gmra.mxu1 %v8814_v50  ;;  %4455 = vmatmul.bf16.gmra.mxu3 %v4363_v28  ;;  %v10385_v57 = vrot.slane %v2664_v15, 5  ;;  %v4000_v34 = vrot.slane %v3998_v61, 5  ;;  %v2661_v4 = vor.u32 %v2660_v29, %v2657_v63  ;;  %v3891_v28 = vld [vmem:[#allocation2 + $0x3c] sm:$0xf]  ;;  %v2483_v61 = vld [vmem:[#allocation2 + $0x60] sm:$0xf] }
 0x17f   : > { %v10390_v6 = vpop.f32.mrf.mxu0  ;;  %v3991_v29 = vsel %vm9272_vm2, %v3986_v48, %v3990_v30  ;;  %v10406_v15 = vrot.slane %v2674_v39, 5  ;;  %v2947_v17 = vpack.c.b16 %v2921_v44, %v2920_v8  ;;  %v3892_v63 = vld [vmem:[#allocation2 + $0x40] sm:$0xf]  ;;  %v4006_v31 = vshll.u32 %v3891_v28, 16 }
 0x180   : > { %v10388_v24 = vadd.f32 %v10298_v59, %v2131_v3  ;;  %v8915_v59 = vld [vmem:[%s12289_s1 + $0x220] sm:$0xff]  ;;  %v2671_v47 = vor.u32 %v2670_v13, %v10385_v57  ;;  %v4001_v2 = vsel %vm9272_vm2, %v3996_v32, %v4000_v34  ;;  %v3367_v3 = vpack.c.b16 %v3336_v52, %v3335_v18  ;;  %v8929_v34 = vld [vmem:[%s12290_s2 + $0x30] sm:$0xff] }
 0x181   : > { %4870 = vmatpush.bf16.msra.mxu0 %v8915_v59  ;;  %v4334_v33 = vunpack.c.l.b16 %v3991_v29  ;;  %v4335_v30 = vunpack.c.l.b16 %v4001_v2  ;;  %v3219_v32 = vrot.slane %v10181_v23, 5  ;;  %v4012_v55 = vshll.u32 %v3892_v63, 16  ;;  %6369 = vmatpush.bf16.msrb.mxu2 %v8929_v34  ;;  %v8945_v23 = vld [vmem:[%s12290_s2 + $0xb0] sm:$0xff] }
 0x182   : > { %3769 = vmatmul.bf16.vlgmr.msra.gmra.mxu2 %v8879_v49  ;;  %12359 = vst [vmem:[#allocation35_spill] sm:$0xff] %v10388_v24  ;;  %v10394_v7 = vpop.f32.mrf.mxu3  ;;  %v3144_v49 = vld [vmem:[#allocation2 + $0x18] sm:$0xe]  ;;  %v2672_v19 = vrot.slane %v2671_v47, 4  ;;  %v2682_v39 = vshll.u32 %v2483_v61, 16  ;;  %v4008_v44 = vrot.slane %v4006_v31, 5  ;;  %6534 = vmatpush.bf16.msra.mxu3 %v8945_v23 }
 0x183   : > { %v1694_v50 = vpop.f32.mrf.mxu1  ;;  %v8147_v48 = vrot.slane %v3144_v49, 9  ;;  %v4016_v18 = vshrl.u32 %v3892_v63, 16  ;;  %v3218_v47 = vrot.slane %v3216_v41, 4  ;;  %v2688_v2 = vshll.u32 %v10409_v20, 16  ;;  %v8937_v34 = vld [vmem:[%s12290_s2 + $0x70] sm:$0xff] }
 0x184   : > { %v1695_v60 = vadd.f32 %v1694_v50, %v10290_v14  ;;  %v10404_v14 = vrot.slane %v2661_v4, 4  ;;  %v2679_v4 = vshrl.u32 %v2483_v61, 16  ;;  %v4014_v49 = vrot.slane %v4012_v55, 5  ;;  %6268 = vmatpush.bf16.msrb.mxu1 %v8937_v34 }
 0x185   : > { %v2077_v12 = vpop.f32.mrf.mxu2  ;;  %v4364_v61 = vpack.c.b16 %v4335_v30, %v4334_v33  ;;  %v4018_v63 = vrot.slane %v4016_v18, 4  ;;  %v2684_v55 = vrot.slane %v2682_v39, 5  ;;  %v10444_v30 = vrot.slane %v2688_v2, 5 }
 0x186   : > { %v2132_v46 = vadd.f32 %v2074_v37, %v1695_v60  ;;  %v4003_v37 = vshrl.u32 %v3891_v28, 16  ;;  %v3893_v60 = vld [vmem:[#allocation2 + $0x44] sm:$0x1]  ;;  %v2681_v10 = vrot.slane %v2679_v4, 4  ;;  %v2667_v33 = vsel %vm9272_vm2, %v10404_v14, %v10385_v57 }
 0x187   : > { %v10411_v13 = vpop.f32.mrf.mxu0  ;;  %v8880_v28 = vld [vmem:[#allocation2 + $0x24] sm:$0xff]  ;;  %v4022_v24 = vshll.u32 %v3893_v60, 16 }
 0x188   : > { %v4005_v50 = vrot.slane %v4003_v37, 4  ;;  %v2692_v37 = vshrl.u32 %v10409_v20, 16  ;;  %v2685_v60 = vor.u32 %v2684_v55, %v2681_v10  ;;  %v3145_v10 = vld [vmem:[#allocation2 + $0x24] sm:$0xe]  ;;  %v3895_v55 = vld [vmem:[#allocation2 + $0x4c] sm:$0xf] }
 0x189   : > { %v4024_v4 = vrot.slane %v4022_v24, 5 }
 0x18a   : > { %v10418_v29 = vpop.f32.mrf.mxu3  ;;  %3055 = vmatmul.bf16.gmra.mxu0 %v2947_v17  ;;  %v4019_v17 = vor.u32 %v4018_v63, %v4014_v49 }
 0x18b   : > { %v1697_v8 = vpop.f32.mrf.mxu1 }
 0x18c   : > { %v1698_v52 = vadd.f32 %v1697_v8, %v10316_v5  ;;  %v10426_v5 = vadd.f32 %v10324_v40, %v2132_v46  ;;  %v4009_v8 = vor.u32 %v4008_v44, %v4005_v50  ;;  %v2677_v40 = vsel %vm9272_vm2, %v2672_v19, %v10406_v15 }
 0x18d   : > { %v2079_v59 = vpop.f32.mrf.mxu2  ;;  %v3220_v46 = vsel %vm9596_vm13, %v3218_v47, %v3219_v32  ;;  %v2694_v50 = vrot.slane %v2692_v37, 4  ;;  %v4020_v19 = vrot.slane %v4019_v17, 4  ;;  %v2923_v39 = vunpack.c.l.b16 %v2677_v40  ;;  %v3894_v37 = vld [vmem:[#allocation2 + $0x48] sm:$0xf] }
 0x18e   : > { %v2133_v31 = vadd.f32 %v2077_v12, %v1698_v52  ;;  %3455 = vmatmul.bf16.vlgmr.msra.gmra.mxu1 %v3367_v3  ;;  %v3217_v12 = vsel %vm9596_vm13, %v8147_v48, %v3216_v41  ;;  %4460 = vmatmul.bf16.gmra.mxu3 %v4364_v61  ;;  %v10442_v3 = vld [vmem:[#allocation2 + $0x68] sm:$0x1]  ;;  %v4010_v15 = vrot.slane %v4009_v8, 4  ;;  %v2922_v48 = vunpack.c.l.b16 %v2667_v33  ;;  %v2486_v8 = vld [vmem:[#allocation2 + $0x6c] sm:$0xf] }
 0x18f   : > { %v10449_v14 = vpop.f32.mrf.mxu0  ;;  %v3337_v18 = vunpack.c.l.b16 %v3217_v12  ;;  %v3338_v52 = vunpack.c.l.b16 %v3220_v46  ;;  %v2698_v23 = vshll.u32 %v10442_v3, 16  ;;  %v4025_v24 = vsel %vm9272_vm2, %v4020_v19, %v4024_v4  ;;  %v10461_v12 = vld [vmem:[#allocation2 + $0x70] sm:$0xf] }
 0x190   : > { %v10447_v57 = vadd.f32 %v10352_v43, %v2133_v31  ;;  %v2695_v43 = vor.u32 %v2694_v50, %v10444_v30  ;;  %v2686_v61 = vrot.slane %v2685_v60, 4  ;;  %v2948_v63 = vpack.c.b16 %v2923_v39, %v2922_v48  ;;  %v3896_v39 = vld [vmem:[#allocation2 + $0x50] sm:$0x1] }
 0x191   : > { %v3368_v31 = vpack.c.b16 %v3338_v52, %v3337_v18  ;;  %v2700_v34 = vrot.slane %v2698_v23, 5  ;;  %v4027_v17 = vshrl.u32 %v3894_v37, 16  ;;  %v8148_v50 = vrot.slane %v3145_v10, 9  ;;  %v8881_v10 = vld [vmem:[#allocation2 + $0x30] sm:$0xff] }
 0x192   : > { %3774 = vmatmul.bf16.gmra.mxu2 %v8880_v28  ;;  %12360 = vst [vmem:[#allocation36_spill] sm:$0xff] %v10447_v57  ;;  %v10452_v47 = vpop.f32.mrf.mxu3  ;;  %v4015_v28 = vsel %vm9272_vm2, %v4010_v15, %v4014_v49  ;;  %v2696_v33 = vrot.slane %v2695_v43, 4  ;;  %v4030_v49 = vshll.u32 %v3894_v37, 16  ;;  %v3226_v15 = vrot.slane %v10219_v22, 5 }
 0x193   : > { %v1699_v41 = vpop.f32.mrf.mxu1  ;;  %v4336_v40 = vunpack.c.l.b16 %v4015_v28  ;;  %v4029_v19 = vrot.slane %v4027_v17, 4  ;;  %v2703_v48 = vshrl.u32 %v2486_v8, 16  ;;  %v2706_v43 = vshll.u32 %v2486_v8, 16 }
 0x194   : > { %v1700_v32 = vadd.f32 %v1699_v41, %v10347_v11  ;;  %v3223_v11 = vrot.slane %v10192_v0, 5  ;;  %v4036_v0 = vshll.u32 %v3895_v55, 16  ;;  %v4032_v60 = vrot.slane %v4030_v49, 5 }
 0x195   : > { %v2082_v44 = vpop.f32.mrf.mxu2  ;;  %v2712_v28 = vshll.u32 %v10461_v12, 16  ;;  %v2716_v37 = vshrl.u32 %v10461_v12, 16  ;;  %v2691_v8 = vsel %vm9272_vm2, %v2686_v61, %v10444_v30 }
 0x196   : > { %v2134_v2 = vadd.f32 %v2079_v59, %v1700_v32  ;;  %v4337_v59 = vunpack.c.l.b16 %v4025_v24  ;;  %v3225_v41 = vrot.slane %v3223_v11, 4  ;;  %v4040_v32 = vshrl.u32 %v3895_v55, 16 }
 0x197   : > { %v10463_v46 = vpop.f32.mrf.mxu0  ;;  %v4038_v24 = vrot.slane %v4036_v0, 5  ;;  %v4033_v55 = vor.u32 %v4032_v60, %v4029_v19  ;;  %v2708_v0 = vrot.slane %v2706_v43, 5  ;;  %v2924_v19 = vunpack.c.l.b16 %v2691_v8 }
 0x198   : > { %v4365_v22 = vpack.c.b16 %v4337_v59, %v4336_v40  ;;  %v4042_v17 = vrot.slane %v4040_v32, 4  ;;  %v10472_v57 = vadd.f32 %v10367_v45, %v2134_v2  ;;  %v3224_v40 = vsel %vm9596_vm13, %v8148_v50, %v3223_v11 }
 0x199   : > { %v2705_v59 = vrot.slane %v2703_v48, 4  ;;  %v3227_v45 = vsel %vm9596_vm13, %v3225_v41, %v3226_v15  ;;  %v10485_v2 = vrot.slane %v2712_v28, 5 }
 0x19a   : > { %v10467_v23 = vpop.f32.mrf.mxu3  ;;  %3060 = vmatmul.bf16.gmra.mxu0 %v2948_v63  ;;  %v2701_v63 = vsel %vm9272_vm2, %v2696_v33, %v2700_v34  ;;  %v4034_v34 = vrot.slane %v4033_v55, 4  ;;  %v3340_v60 = vunpack.c.l.b16 %v3227_v45  ;;  %v3897_v55 = vld [vmem:[#allocation2 + $0x54] sm:$0xf]  ;;  %v2489_v45 = vld [vmem:[#allocation2 + $0x78] sm:$0xf] }
 0x19b   : > { %v1702_v4 = vpop.f32.mrf.mxu1  ;;  %v2925_v48 = vunpack.c.l.b16 %v2701_v63  ;;  %v2709_v32 = vor.u32 %v2708_v0, %v2705_v59  ;;  %v3898_v63 = vld [vmem:[#allocation2 + $0x58] sm:$0xf] }
 0x19c   : > { %v1703_v18 = vadd.f32 %v1702_v4, %v10364_v38  ;;  %v4046_v38 = vshll.u32 %v3896_v39, 16  ;;  %v4043_v4 = vor.u32 %v4042_v17, %v4038_v24  ;;  %v3339_v39 = vunpack.c.l.b16 %v3224_v40  ;;  %v3146_v17 = vld [vmem:[#allocation2 + $0x30] sm:$0xe] }
 0x19d   : > { %v2084_v52 = vpop.f32.mrf.mxu2  ;;  %v2710_v8 = vrot.slane %v2709_v32, 4  ;;  %v4051_v40 = vshrl.u32 %v3897_v55, 16  ;;  %v4064_v32 = vshrl.u32 %v3898_v63, 16 }
 0x19e   : > { %v2135_v49 = vadd.f32 %v2082_v44, %v1703_v18  ;;  %3460 = vmatmul.bf16.gmra.mxu1 %v3368_v31  ;;  %4465 = vmatmul.bf16.gmra.mxu3 %v4365_v22  ;;  %v10483_v44 = vld [vmem:[#allocation2 + $0x74] sm:$0x1]  ;;  %v2718_v31 = vrot.slane %v2716_v37, 4  ;;  %v4044_v33 = vrot.slane %v4043_v4, 4  ;;  %v4048_v11 = vrot.slane %v4046_v38, 5 }
 0x19f   : > { %v10490_v61 = vpop.f32.mrf.mxu0  ;;  %v2722_v18 = vshll.u32 %v10483_v44, 16  ;;  %v4039_v22 = vsel %vm9272_vm2, %v4034_v34, %v4038_v24  ;;  %v2949_v37 = vpack.c.b16 %v2925_v48, %v2924_v19  ;;  %v3369_v38 = vpack.c.b16 %v3340_v60, %v3339_v39  ;;  %v8928_v39 = vld [vmem:[%s12290_s2 + $0x28] sm:$0xff] }
 0x1a0   : > { %v10488_v30 = vadd.f32 %v10394_v7, %v2135_v49  ;;  %v8914_v7 = vld [vmem:[%s12289_s1 + $0x218] sm:$0xff]  ;;  %v2719_v43 = vor.u32 %v2718_v31, %v10485_v2  ;;  %v3230_v49 = vrot.slane %v10242_v54, 5  ;;  %v4338_v59 = vunpack.c.l.b16 %v4039_v22  ;;  %6370 = vmatpush.bf16.msrb.mxu2 %v8928_v39 }
 0x1a1   : > { %4871 = vmatpush.bf16.msra.mxu0 %v8914_v7  ;;  %v2724_v4 = vrot.slane %v2722_v18, 5  ;;  %v4054_v31 = vshll.u32 %v3897_v55, 16  ;;  %v8149_v34 = vrot.slane %v3146_v17, 9  ;;  %v4060_v54 = vshll.u32 %v3898_v63, 16  ;;  %v8882_v17 = vld [vmem:[#allocation2 + $0x3c] sm:$0xff] }
 0x1a2   : > { %3779 = vmatmul.bf16.gmra.mxu2 %v8881_v10  ;;  %12361 = vst [vmem:[#allocation37_spill] sm:$0xff] %v10488_v30  ;;  %v10498_v10 = vpop.f32.mrf.mxu3  ;;  %v3232_v48 = vrot.slane %v3230_v49, 4  ;;  %v2730_v22 = vshll.u32 %v2489_v45, 16  ;;  %v4066_v30 = vrot.slane %v4064_v32, 4 }
 0x1a3   : > { %v1704_v50 = vpop.f32.mrf.mxu1  ;;  %v4056_v60 = vrot.slane %v4054_v31, 5 }
 0x1a4   : > { %v1705_v15 = vadd.f32 %v1704_v50, %v10390_v6  ;;  %v4049_v6 = vsel %vm9272_vm2, %v4044_v33, %v4048_v11  ;;  %v3233_v33 = vrot.slane %v10270_v51, 5  ;;  %v10508_v11 = vld [vmem:[#allocation2 + $0x7c] sm:$0xf]  ;;  %v4053_v50 = vrot.slane %v4051_v40, 4  ;;  %v8944_v51 = vld [vmem:[%s12290_s2 + $0xa8] sm:$0xff] }
 0x1a5   : > { %v2087_v41 = vpop.f32.mrf.mxu2  ;;  %v4339_v0 = vunpack.c.l.b16 %v4049_v6  ;;  %v4062_v6 = vrot.slane %v4060_v54, 5  ;;  %v2736_v40 = vshll.u32 %v10508_v11, 16  ;;  %6535 = vmatpush.bf16.msra.mxu3 %v8944_v51 }
 0x1a6   : > { %v2136_v28 = vadd.f32 %v2084_v52, %v1705_v15  ;;  %v2720_v52 = vrot.slane %v2719_v43, 4  ;;  %v3899_v15 = vld [vmem:[#allocation2 + $0x5c] sm:$0x1]  ;;  %v2727_v43 = vshrl.u32 %v2489_v45, 16  ;;  %v8936_v45 = vld [vmem:[%s12290_s2 + $0x68] sm:$0xff]  ;;  %v4057_v54 = vor.u32 %v4056_v60, %v4053_v50 }
 0x1a7   : > { %v10505_v24 = vpop.f32.mrf.mxu0  ;;  %v4366_v55 = vpack.c.b16 %v4339_v0, %v4338_v59  ;;  %v2715_v59 = vsel %vm9272_vm2, %v2710_v8, %v10485_v2  ;;  %6269 = vmatpush.bf16.msrb.mxu1 %v8936_v45  ;;  %v3231_v0 = vsel %vm9596_vm13, %v8149_v34, %v3230_v49  ;;  %v3234_v50 = vsel %vm9596_vm13, %v3232_v48, %v3233_v33  ;;  %v3900_v45 = vld [vmem:[#allocation2 + $0x60] sm:$0xf] }
 0x1a8   : > { %v10519_v31 = vadd.f32 %v10418_v29, %v2136_v28  ;;  %v2725_v29 = vsel %vm9272_vm2, %v2720_v52, %v2724_v4  ;;  %v10543_v4 = vld [vmem:[#allocation2 + $0x80] sm:$0x1]  ;;  %v4058_v39 = vrot.slane %v4057_v54, 4  ;;  %v3341_v48 = vunpack.c.l.b16 %v3231_v0  ;;  %v10553_v0 = vld [vmem:[#allocation2 + $0x88] sm:$0xf] }
 0x1a9   : > { %v2927_v49 = vunpack.c.l.b16 %v2725_v29  ;;  %v3342_v51 = vunpack.c.l.b16 %v3234_v50  ;;  %v4078_v50 = vshll.u32 %v3900_v45, 16 }
 0x1aa   : > { %3065 = vmatmul.bf16.gmra.mxu0 %v2949_v37  ;;  %12362 = vst [vmem:[#allocation38_spill] sm:$0xff] %v10519_v31  ;;  %v4070_v37 = vshll.u32 %v3899_v15, 16  ;;  %v10530_v28 = vpop.f32.mrf.mxu3 }
 0x1ab   : > { %v1707_v19 = vpop.f32.mrf.mxu1  ;;  %v3370_v54 = vpack.c.b16 %v3342_v51, %v3341_v48  ;;  %v3902_v48 = vld [vmem:[#allocation2 + $0x68] sm:$0x1]  ;;  %v4080_v51 = vrot.slane %v4078_v50, 5 }
 0x1ac   : > { %v1708_v18 = vadd.f32 %v1707_v19, %v10411_v13  ;;  %v2740_v13 = vshrl.u32 %v10508_v11, 16  ;;  %v4067_v19 = vor.u32 %v4066_v30, %v4062_v6  ;;  %v10536_v30 = vrot.slane %v2736_v40, 5 }
 0x1ad   : > { %v2089_v7 = vpop.f32.mrf.mxu2  ;;  %v4072_v60 = vrot.slane %v4070_v37, 5  ;;  %v4094_v31 = vshll.u32 %v3902_v48, 16 }
 0x1ae   : > { %v2137_v63 = vadd.f32 %v2087_v41, %v1708_v18  ;;  %3465 = vmatmul.bf16.gmra.mxu1 %v3369_v38  ;;  %v2729_v41 = vrot.slane %v2727_v43, 4  ;;  %v2732_v38 = vrot.slane %v2730_v22, 5  ;;  %4470 = vmatmul.bf16.gmra.mxu3 %v4366_v55  ;;  %v2742_v52 = vrot.slane %v2740_v13, 4 }
 0x1af   : > { %v10541_v8 = vpop.f32.mrf.mxu0  ;;  %v4068_v15 = vrot.slane %v4067_v19, 4  ;;  %v2926_v18 = vunpack.c.l.b16 %v2715_v59  ;;  %v4063_v55 = vsel %vm9272_vm2, %v4058_v39, %v4062_v6  ;;  %v3237_v13 = vrot.slane %v10279_v25, 5  ;;  %v3901_v19 = vld [vmem:[#allocation2 + $0x64] sm:$0xf] }
 0x1b0   : > { %v10539_v2 = vadd.f32 %v10452_v47, %v2137_v63  ;;  %v2733_v43 = vor.u32 %v2732_v38, %v2729_v41  ;;  %v2746_v47 = vshll.u32 %v10543_v4, 16  ;;  %v3147_v63 = vld [vmem:[#allocation2 + $0x3c] sm:$0xe]  ;;  %v4075_v59 = vshrl.u32 %v3900_v45, 16  ;;  %v2492_v38 = vld [vmem:[#allocation2 + $0x84] sm:$0xf] }
 0x1b1   : > { %v4073_v40 = vsel %vm9272_vm2, %v4068_v15, %v4072_v60  ;;  %v4340_v41 = vunpack.c.l.b16 %v4063_v55  ;;  %v8150_v15 = vrot.slane %v3147_v63, 9  ;;  %v4084_v25 = vshll.u32 %v3901_v19, 16 }
 0x1b2   : > { %3784 = vmatmul.bf16.gmra.mxu2 %v8882_v17  ;;  %12363 = vst [vmem:[#allocation39_spill] sm:$0xff] %v10539_v2  ;;  %v2743_v17 = vor.u32 %v2742_v52, %v10536_v30  ;;  %v2734_v37 = vrot.slane %v2733_v43, 4  ;;  %v2748_v29 = vrot.slane %v2746_v47, 5  ;;  %v10555_v52 = vpop.f32.mrf.mxu3  ;;  %v4077_v60 = vrot.slane %v4075_v59, 4 }
 0x1b3   : > { %v1709_v32 = vpop.f32.mrf.mxu1  ;;  %v2751_v55 = vshrl.u32 %v2492_v38, 16  ;;  %v2760_v45 = vshll.u32 %v10553_v0, 16  ;;  %v4086_v59 = vrot.slane %v4084_v25, 5  ;;  %v4088_v2 = vshrl.u32 %v3901_v19, 16 }
 0x1b4   : > { %v1710_v34 = vadd.f32 %v1709_v32, %v10449_v14  ;;  %v2950_v14 = vpack.c.b16 %v2927_v49, %v2926_v18  ;;  %v2744_v39 = vrot.slane %v2743_v17, 4  ;;  %v3239_v49 = vrot.slane %v3237_v13, 4  ;;  %v8883_v17 = vld [vmem:[#allocation2 + $0x48] sm:$0xff] }
 0x1b5   : > { %v2092_v33 = vpop.f32.mrf.mxu2  ;;  %v4081_v50 = vor.u32 %v4080_v51, %v4077_v60 }
 0x1b6   : > { %v2138_v22 = vadd.f32 %v2089_v7, %v1710_v34  ;;  %v4341_v7 = vunpack.c.l.b16 %v4073_v40  ;;  %v3240_v34 = vrot.slane %v10305_v1, 5  ;;  %v2754_v40 = vshll.u32 %v2492_v38, 16 }
 0x1b7   : > { %v3031_v6 = vpop.f32.mrf.mxu0  ;;  %v2764_v1 = vshrl.u32 %v10553_v0, 16  ;;  %v4090_v38 = vrot.slane %v4088_v2, 4  ;;  %v10581_v2 = vrot.slane %v2760_v45, 5 }
 0x1b8   : > { %v10558_v32 = vadd.f32 %v3031_v6, %v10093_v21  ;;  %v4367_v63 = vpack.c.b16 %v4341_v7, %v4340_v41  ;;  %v10564_v21 = vadd.f32 %v10467_v23, %v2138_v22  ;;  %v2753_v41 = vrot.slane %v2751_v55, 4  ;;  %v8913_v55 = vld [vmem:[%s12289_s1 + $0x210] sm:$0xff] }
 0x1b9   : > { %v2756_v7 = vrot.slane %v2754_v40, 5  ;;  %v3238_v23 = vsel %vm9596_vm13, %v8150_v15, %v3237_v13  ;;  %v4091_v22 = vor.u32 %v4090_v38, %v4086_v59  ;;  %4872 = vmatpush.bf16.msra.mxu0 %v8913_v55 }
 0x1ba   : > { %3070 = vmatmul.bf16.gmra.mxu0 %v2950_v14  ;;  %12364 = vst [vmem:[#allocation40_spill] sm:$0xff] %v10564_v21  ;;  %v2749_v14 = vsel %vm9272_vm2, %v2744_v39, %v2748_v29  ;;  %v4082_v29 = vrot.slane %v4081_v50, 4  ;;  %v4096_v39 = vrot.slane %v4094_v31, 5  ;;  %v10587_v51 = vpop.f32.mrf.mxu3  ;;  %v3903_v50 = vld [vmem:[#allocation2 + $0x6c] sm:$0xf] }
 0x1bb   : > { %v1712_v18 = vpop.f32.mrf.mxu1  ;;  %v4092_v13 = vrot.slane %v4091_v22, 4  ;;  %v4102_v22 = vshll.u32 %v3903_v50, 16 }
 0x1bc   : > { %v1713_v43 = vadd.f32 %v1712_v18, %v10463_v46  ;;  %v2739_v46 = vsel %vm9272_vm2, %v2734_v37, %v10536_v30  ;;  %v10579_v30 = vld [vmem:[#allocation2 + $0x8c] sm:$0x1]  ;;  %v2766_v37 = vrot.slane %v2764_v1, 4  ;;  %v2929_v18 = vunpack.c.l.b16 %v2749_v14  ;;  %v3148_v1 = vld [vmem:[#allocation2 + $0x48] sm:$0xe] }
 0x1bd   : > { %v2094_v47 = vpop.f32.mrf.mxu2  ;;  %v2928_v25 = vunpack.c.l.b16 %v2739_v46  ;;  %v2770_v31 = vshll.u32 %v10579_v30, 16  ;;  %v4087_v45 = vsel %vm9272_vm2, %v4082_v29, %v4086_v59  ;;  %v3244_v59 = vrot.slane %v10321_v35, 5  ;;  %v8943_v35 = vld [vmem:[%s12290_s2 + $0xa0] sm:$0xff] }
 0x1be   : > { %v2139_v6 = vadd.f32 %v2092_v33, %v1713_v43  ;;  %3470 = vmatmul.bf16.gmra.mxu1 %v3370_v54  ;;  %v3241_v33 = vsel %vm9596_vm13, %v3239_v49, %v3240_v34  ;;  %4475 = vmatmul.bf16.gmra.mxu3 %v4367_v63  ;;  %v3343_v34 = vunpack.c.l.b16 %v3238_v23  ;;  %v2757_v43 = vor.u32 %v2756_v7, %v2753_v41  ;;  %v3904_v41 = vld [vmem:[#allocation2 + $0x70] sm:$0xf] }
 0x1bf   : > { %v3033_v54 = vpop.f32.mrf.mxu0  ;;  %v3344_v48 = vunpack.c.l.b16 %v3241_v33  ;;  %v2767_v40 = vor.u32 %v2766_v37, %v10581_v2  ;;  %v10600_v46 = vrot.slane %v2770_v31, 5  ;;  %v4342_v38 = vunpack.c.l.b16 %v4087_v45  ;;  %6536 = vmatpush.bf16.msra.mxu3 %v8943_v35 }
 0x1c0   : > { %v10573_v19 = vadd.f32 %v10498_v10, %v2139_v6  ;;  %v10584_v10 = vadd.f32 %v3033_v54, %v10106_v36  ;;  %v10598_v6 = vrot.slane %v2757_v43, 4  ;;  %v4099_v7 = vshrl.u32 %v3903_v50, 16  ;;  %v3905_v43 = vld [vmem:[#allocation2 + $0x74] sm:$0x1] }
 0x1c1   : > { %v3371_v63 = vpack.c.b16 %v3344_v48, %v3343_v34  ;;  %v2768_v33 = vrot.slane %v2767_v40, 4  ;;  %v4108_v54 = vshll.u32 %v3904_v41, 16  ;;  %v4104_v55 = vrot.slane %v4102_v22, 5 }
 0x1c2   : > { %12365 = vst [vmem:[#allocation41_spill] sm:$0xff] %v10573_v19  ;;  %3789 = vmatmul.bf16.gmra.mxu2 %v8883_v17  ;;  %v2951_v17 = vpack.c.b16 %v2929_v18, %v2928_v25  ;;  %v8927_v25 = vld [vmem:[%s12290_s2 + $0x20] sm:$0xff]  ;;  %v10610_v18 = vld [vmem:[#allocation2 + $0x94] sm:$0xf]  ;;  %v4112_v45 = vshrl.u32 %v3904_v41, 16  ;;  %v3246_v50 = vrot.slane %v3244_v59, 4 }
 0x1c3   : > { %v1714_v60 = vpop.f32.mrf.mxu1  ;;  %6371 = vmatpush.bf16.msrb.mxu2 %v8927_v25  ;;  %v4110_v40 = vrot.slane %v4108_v54, 5 }
 0x1c4   : > { %v1715_v15 = vadd.f32 %v1714_v60, %v10490_v61  ;;  %v4097_v61 = vsel %vm9272_vm2, %v4092_v13, %v4096_v39  ;;  %v8151_v39 = vrot.slane %v3148_v1, 9  ;;  %v3247_v60 = vrot.slane %v10349_v42, 5  ;;  %v8884_v42 = vld [vmem:[#allocation2 + $0x54] sm:$0xff] }
 0x1c5   : > { %v2097_v49 = vpop.f32.mrf.mxu2  ;;  %v4343_v14 = vunpack.c.l.b16 %v4097_v61  ;;  %v4101_v13 = vrot.slane %v4099_v7, 4  ;;  %v4114_v41 = vrot.slane %v4112_v45, 4 }
 0x1c6   : > { %v2140_v36 = vadd.f32 %v2094_v47, %v1715_v15  ;;  %v2495_v47 = vld [vmem:[#allocation2 + $0x90] sm:$0xf] }
 0x1c7   : > { %v3036_v23 = vpop.f32.mrf.mxu0  ;;  %v2778_v48 = vshll.u32 %v2495_v47, 16  ;;  %v4368_v31 = vpack.c.b16 %v4343_v14, %v4342_v38  ;;  %v4105_v7 = vor.u32 %v4104_v55, %v4101_v13  ;;  %v2784_v38 = vshll.u32 %v10610_v18, 16 }
 0x1c8   : > { %v10604_v37 = vadd.f32 %v3036_v23, %v10124_v27  ;;  %v2775_v27 = vshrl.u32 %v2495_v47, 16  ;;  %v10617_v61 = vadd.f32 %v10530_v28, %v2140_v36  ;;  %v8935_v47 = vld [vmem:[%s12290_s2 + $0x60] sm:$0xff]  ;;  %v2788_v14 = vshrl.u32 %v10610_v18, 16 }
 0x1c9   : > { %v2763_v28 = vsel %vm9272_vm2, %v10598_v6, %v10581_v2  ;;  %6270 = vmatpush.bf16.msrb.mxu1 %v8935_v47  ;;  %v2773_v36 = vsel %vm9272_vm2, %v2768_v33, %v10600_v46  ;;  %v2780_v23 = vrot.slane %v2778_v48, 5  ;;  %v4115_v22 = vor.u32 %v4114_v41, %v4110_v40  ;;  %v10644_v48 = vld [vmem:[#allocation2 + $0x98] sm:$0x1] }
 0x1ca   : > { %3075 = vmatmul.bf16.gmra.mxu0 %v2951_v17  ;;  %12366 = vst [vmem:[#allocation42_spill] sm:$0xff] %v10617_v61  ;;  %v4118_v17 = vshll.u32 %v3905_v43, 16  ;;  %v3248_v2 = vsel %vm9596_vm13, %v3246_v50, %v3247_v60  ;;  %v4106_v6 = vrot.slane %v4105_v7, 4  ;;  %v2790_v35 = vrot.slane %v2788_v14, 4 }
 0x1cb   : > { %v1717_v29 = vpop.f32.mrf.mxu1  ;;  %v4116_v46 = vrot.slane %v4115_v22, 4  ;;  %v2930_v43 = vunpack.c.l.b16 %v2763_v28  ;;  %v2931_v55 = vunpack.c.l.b16 %v2773_v36  ;;  %v3346_v60 = vunpack.c.l.b16 %v3248_v2  ;;  %v2498_v28 = vld [vmem:[#allocation2 + $0x9c] sm:$0xf] }
 0x1cc   : > { %v1718_v15 = vadd.f32 %v1717_v29, %v10505_v24  ;;  %v10619_v24 = vpop.f32.mrf.mxu3  ;;  %v3245_v29 = vsel %vm9596_vm13, %v8151_v39, %v3244_v59  ;;  %v4120_v25 = vrot.slane %v4118_v17, 5 }
 0x1cd   : > { %v2099_v34 = vpop.f32.mrf.mxu2  ;;  %v3345_v59 = vunpack.c.l.b16 %v3245_v29  ;;  %v2952_v7 = vpack.c.b16 %v2931_v55, %v2930_v43 }
 0x1ce   : > { %v2141_v1 = vadd.f32 %v2097_v49, %v1718_v15  ;;  %3475 = vmatmul.bf16.gmra.mxu1 %v3371_v63  ;;  %4480 = vmatmul.bf16.gmra.mxu3 %v4368_v31  ;;  %v2777_v63 = vrot.slane %v2775_v27, 4  ;;  %v2786_v15 = vrot.slane %v2784_v38, 5  ;;  %v4111_v31 = vsel %vm9272_vm2, %v4106_v6, %v4110_v40 }
 0x1cf   : > { %v3038_v54 = vpop.f32.mrf.mxu0  ;;  %v4344_v38 = vunpack.c.l.b16 %v4111_v31  ;;  %v3372_v40 = vpack.c.b16 %v3346_v60, %v3345_v59  ;;  %v3254_v6 = vrot.slane %v10381_v62, 5 }
 0x1d0   : > { %v10631_v49 = vadd.f32 %v10555_v52, %v2141_v1  ;;  %v10641_v52 = vadd.f32 %v3038_v54, %v10142_v16  ;;  %v2781_v39 = vor.u32 %v2780_v23, %v2777_v63  ;;  %v4121_v16 = vsel %vm9272_vm2, %v4116_v46, %v4120_v25  ;;  %v10660_v54 = vld [vmem:[#allocation2 + $0xa0] sm:$0xf] }
 0x1d1   : > { %v2791_v45 = vor.u32 %v2790_v35, %v2786_v15  ;;  %v2794_v1 = vshll.u32 %v10644_v48, 16  ;;  %v4345_v14 = vunpack.c.l.b16 %v4121_v16  ;;  %v8885_v25 = vld [vmem:[#allocation2 + $0x60] sm:$0xff]  ;;  %v2808_v43 = vshll.u32 %v10660_v54, 16 }
 0x1d2   : > { %12367 = vst [vmem:[#allocation43_spill] sm:$0xff] %v10631_v49  ;;  %3794 = vmatmul.bf16.gmra.mxu2 %v8884_v42  ;;  %v2782_v17 = vrot.slane %v2781_v39, 4  ;;  %v2812_v55 = vshrl.u32 %v10660_v54, 16  ;;  %v3906_v39 = vld [vmem:[#allocation2 + $0x78] sm:$0xf] }
 0x1d3   : > { %v1719_v13 = vpop.f32.mrf.mxu1  ;;  %v2792_v23 = vrot.slane %v2791_v45, 4  ;;  %v2796_v22 = vrot.slane %v2794_v1, 5  ;;  %v4369_v35 = vpack.c.b16 %v4345_v14, %v4344_v38  ;;  %v4123_v60 = vshrl.u32 %v3906_v39, 16 }
 0x1d4   : > { %v1720_v33 = vadd.f32 %v1719_v13, %v10541_v8  ;;  %v10651_v50 = vpop.f32.mrf.mxu3  ;;  %v3251_v8 = vrot.slane %v10362_v58, 5  ;;  %v2787_v13 = vsel %vm9272_vm2, %v2782_v17, %v2786_v15  ;;  %v4126_v31 = vshll.u32 %v3906_v39, 16  ;;  %v10681_v17 = vld [vmem:[#allocation2 + $0xa4] sm:$0x1] }
 0x1d5   : > { %v2102_v27 = vpop.f32.mrf.mxu2  ;;  %v10670_v59 = vunpack.c.l.b16 %v2787_v13  ;;  %v10683_v38 = vrot.slane %v2808_v43, 5  ;;  %v2814_v14 = vrot.slane %v2812_v55, 4 }
 0x1d6   : > { %v2142_v42 = vadd.f32 %v2099_v34, %v1720_v33  ;;  %v3149_v34 = vld [vmem:[#allocation2 + $0x54] sm:$0xe]  ;;  %v3253_v2 = vrot.slane %v3251_v8, 4  ;;  %v2802_v33 = vshll.u32 %v2498_v28, 16 }
 0x1d7   : > { %v3041_v41 = vpop.f32.mrf.mxu0  ;;  %v8152_v29 = vrot.slane %v3149_v34, 9 }
 0x1d8   : > { %v10655_v47 = vadd.f32 %v10587_v51, %v2142_v42  ;;  %v10658_v36 = vadd.f32 %v3041_v41, %v10169_v56  ;;  %v2799_v56 = vshrl.u32 %v2498_v28, 16  ;;  %v3255_v15 = vsel %vm9596_vm13, %v3253_v2, %v3254_v6  ;;  %v3907_v42 = vld [vmem:[#allocation2 + $0x7c] sm:$0xf]  ;;  %v12370_v41 = vld [vmem:[#allocation25_spill] sm:$0xff] }
 0x1d9   : > { %v3252_v62 = vsel %vm9596_vm13, %v8152_v29, %v3251_v8  ;;  %v4132_v16 = vshll.u32 %v3907_v42, 16  ;;  %v4136_v45 = vshrl.u32 %v3907_v42, 16  ;;  %v2804_v34 = vrot.slane %v2802_v33, 5 }
 0x1da   : > { %12368 = vst [vmem:[#allocation44_spill] sm:$0xff] %v10655_v47  ;;  %3080 = vmatmul.bf16.gmra.mxu0 %v2952_v7  ;;  %v2801_v8 = vrot.slane %v2799_v56, 4  ;;  %v4125_v28 = vrot.slane %v4123_v60, 4  ;;  %v3347_v6 = vunpack.c.l.b16 %v3252_v62  ;;  %v3348_v56 = vunpack.c.l.b16 %v3255_v15 }
 0x1db   : > { %v1722_v63 = vpop.f32.mrf.mxu1  ;;  %v4138_v13 = vrot.slane %v4136_v45, 4  ;;  %v2815_v42 = vor.u32 %v2814_v14, %v10683_v38 }
 0x1dc   : > { %v1723_v58 = vadd.f32 %v1722_v63, %v9960_v53  ;;  %v2797_v53 = vsel %vm9272_vm2, %v2792_v23, %v2796_v22  ;;  %v10679_v7 = vpop.f32.mrf.mxu3  ;;  %v4128_v63 = vrot.slane %v4126_v31, 5  ;;  %v4134_v23 = vrot.slane %v4132_v16, 5  ;;  %v12371_v22 = vld [vmem:[#allocation18_spill] sm:$0xff]  ;;  %v3150_v16 = vld [vmem:[#allocation2 + $0x60] sm:$0xe] }
 0x1dd   : > { %v2104_v51 = vpop.f32.mrf.mxu2  ;;  %v2933_v2 = vunpack.c.l.b16 %v2797_v53  ;;  %v2805_v39 = vor.u32 %v2804_v34, %v2801_v8  ;;  %v3258_v53 = vrot.slane %v10409_v20, 5  ;;  %v2501_v8 = vld [vmem:[#allocation2 + $0xa8] sm:$0xf] }
 0x1de   : > { %v2143_v46 = vadd.f32 %v2102_v27, %v1723_v58  ;;  %3480 = vmatmul.bf16.gmra.mxu1 %v3372_v40  ;;  %4485 = vmatmul.bf16.gmra.mxu3 %v4369_v35  ;;  %v8912_v35 = vld [vmem:[%s12289_s1 + $0x208] sm:$0xff]  ;;  %v4129_v33 = vor.u32 %v4128_v63, %v4125_v28  ;;  %v4139_v60 = vor.u32 %v4138_v13, %v4134_v23  ;;  %v2816_v28 = vrot.slane %v2815_v42, 4 }
 0x1df   : > { %v3043_v1 = vpop.f32.mrf.mxu0  ;;  %4873 = vmatpush.bf16.msra.mxu0 %v8912_v35  ;;  %v2953_v15 = vpack.c.b16 %v2933_v2, %v10670_v59  ;;  %v2806_v14 = vrot.slane %v2805_v39, 4  ;;  %v8153_v59 = vrot.slane %v3150_v16, 9  ;;  %v3260_v2 = vrot.slane %v3258_v53, 4  ;;  %v12374_v13 = vld [vmem:[#allocation20_spill] sm:$0xff] }
 0x1e0   : > { %v10677_v27 = vadd.f32 %v10619_v24, %v2143_v46  ;;  %v10686_v40 = vadd.f32 %v3043_v1, %v12370_v41  ;;  %v2818_v46 = vshll.u32 %v10681_v17, 16  ;;  %v4130_v62 = vrot.slane %v4129_v33, 4  ;;  %v8886_v42 = vld [vmem:[#allocation2 + $0x6c] sm:$0xff] }
 0x1e1   : > { %v4140_v45 = vrot.slane %v4139_v60, 4  ;;  %v3373_v41 = vpack.c.b16 %v3348_v56, %v3347_v6  ;;  %v3261_v33 = vrot.slane %v10442_v3, 5  ;;  %v2826_v39 = vshll.u32 %v2501_v8, 16  ;;  %v8934_v3 = vld [vmem:[%s12290_s2 + $0x58] sm:$0xff] }
 0x1e2   : > { %12369 = vst [vmem:[#allocation45_spill] sm:$0xff] %v10677_v27  ;;  %3799 = vmatmul.bf16.gmra.mxu2 %v8885_v25  ;;  %v3908_v25 = vld [vmem:[#allocation2 + $0x80] sm:$0x1]  ;;  %6271 = vmatpush.bf16.msrb.mxu1 %v8934_v3 }
 0x1e3   : > { %v1724_v24 = vpop.f32.mrf.mxu1  ;;  %v4142_v43 = vshll.u32 %v3908_v25, 16 }
 0x1e4   : > { %v1725_v58 = vadd.f32 %v1724_v24, %v12371_v22  ;;  %v2820_v24 = vrot.slane %v2818_v46, 5  ;;  %v10703_v22 = vld [vmem:[#allocation2 + $0xac] sm:$0xf]  ;;  %v2422_v56 = vpop.f32.mrf.mxu3 }
 0x1e5   : > { %v2107_v29 = vpop.f32.mrf.mxu2  ;;  %v4144_v31 = vrot.slane %v4142_v43, 5  ;;  %v8942_v43 = vld [vmem:[%s12290_s2 + $0x98] sm:$0xff] }
 0x1e6   : > { %v2144_v55 = vadd.f32 %v2104_v51, %v1725_v58  ;;  %v4135_v51 = vsel %vm9272_vm2, %v4130_v62, %v4134_v23  ;;  %v12373_v58 = vld [vmem:[#allocation26_spill] sm:$0xff]  ;;  %v2832_v62 = vshll.u32 %v10703_v22, 16  ;;  %6537 = vmatpush.bf16.msra.mxu3 %v8942_v43 }
 0x1e7   : > { %v3046_v34 = vpop.f32.mrf.mxu0  ;;  %v4145_v20 = vsel %vm9272_vm2, %v4140_v45, %v4144_v31  ;;  %v4346_v63 = vunpack.c.l.b16 %v4135_v51  ;;  %v8926_v23 = vld [vmem:[%s12290_s2 + $0x18] sm:$0xff]  ;;  %v2836_v31 = vshrl.u32 %v10703_v22, 16  ;;  %v2811_v45 = vsel %vm9272_vm2, %v2806_v14, %v10683_v38  ;;  %v3910_v14 = vld [vmem:[#allocation2 + $0x88] sm:$0xf] }
 0x1e8   : > { %v10696_v1 = vadd.f32 %v10651_v50, %v2144_v55  ;;  %v10706_v50 = vadd.f32 %v3046_v34, %v12373_v58  ;;  %v4347_v6 = vunpack.c.l.b16 %v4145_v20  ;;  %v2823_v55 = vshrl.u32 %v2501_v8, 16  ;;  %6372 = vmatpush.bf16.msrb.mxu2 %v8926_v23  ;;  %v3909_v34 = vld [vmem:[#allocation2 + $0x84] sm:$0xf] }
 0x1e9   : > { %v3259_v51 = vsel %vm9596_vm13, %v8153_v59, %v3258_v53  ;;  %v3262_v8 = vsel %vm9596_vm13, %v3260_v2, %v3261_v33  ;;  %v2838_v38 = vrot.slane %v2836_v31, 4  ;;  %v2934_v53 = vunpack.c.l.b16 %v2811_v45  ;;  %v10735_v59 = vld [vmem:[#allocation2 + $0xb0] sm:$0x1]  ;;  %v12376_v2 = vld [vmem:[#allocation28_spill] sm:$0xff]  ;;  %v12377_v33 = vld [vmem:[#allocation22_spill] sm:$0xff] }
 0x1ea   : > { %12372 = vst [vmem:[#allocation25_spill] sm:$0xff] %v10696_v1  ;;  %3085 = vmatmul.bf16.gmra.mxu0 %v2953_v15  ;;  %v4370_v60 = vpack.c.b16 %v4347_v6, %v4346_v63  ;;  %v2821_v15 = vsel %vm9272_vm2, %v2816_v28, %v2820_v24  ;;  %v10733_v63 = vrot.slane %v2832_v62, 5  ;;  %v4147_v24 = vshrl.u32 %v3909_v34, 16  ;;  %v2504_v1 = vld [vmem:[#allocation2 + $0xb4] sm:$0xf] }
 0x1eb   : > { %v1727_v25 = vpop.f32.mrf.mxu1  ;;  %v4150_v28 = vshll.u32 %v3909_v34, 16  ;;  %v4160_v62 = vshrl.u32 %v3910_v14, 16  ;;  %v2842_v3 = vshll.u32 %v10735_v59, 16 }
 0x1ec   : > { %v1728_v35 = vadd.f32 %v1727_v25, %v12374_v13  ;;  %v2935_v25 = vunpack.c.l.b16 %v2821_v15  ;;  %v3349_v13 = vunpack.c.l.b16 %v3259_v51  ;;  %v10743_v34 = vpop.f32.mrf.mxu3 }
 0x1ed   : > { %v2109_v46 = vpop.f32.mrf.mxu2  ;;  %v2844_v47 = vrot.slane %v2842_v3, 5  ;;  %v8887_v3 = vld [vmem:[#allocation2 + $0x78] sm:$0xff] }
 0x1ee   : > { %v2145_v16 = vadd.f32 %v2107_v29, %v1728_v35  ;;  %3485 = vmatmul.bf16.gmra.mxu1 %v3373_v41  ;;  %v2825_v29 = vrot.slane %v2823_v55, 4  ;;  %v2828_v41 = vrot.slane %v2826_v39, 5  ;;  %4490 = vmatmul.bf16.gmra.mxu3 %v4370_v60  ;;  %v4149_v35 = vrot.slane %v4147_v24, 4  ;;  %v3911_v39 = vld [vmem:[#allocation2 + $0x8c] sm:$0x1] }
 0x1ef   : > { %v3048_v58 = vpop.f32.mrf.mxu0  ;;  %v4156_v60 = vshll.u32 %v3910_v14, 16  ;;  %v4166_v45 = vshll.u32 %v3911_v39, 16  ;;  %v3151_v24 = vld [vmem:[#allocation2 + $0x6c] sm:$0xe] }
 0x1f0   : > { %v10731_v20 = vadd.f32 %v10679_v7, %v2145_v16  ;;  %v10738_v6 = vadd.f32 %v3048_v58, %v12376_v2  ;;  %v3350_v7 = vunpack.c.l.b16 %v3262_v8  ;;  %v2829_v31 = vor.u32 %v2828_v41, %v2825_v29 }
 0x1f1   : > { %v2839_v16 = vor.u32 %v2838_v38, %v10733_v63  ;;  %v4158_v51 = vrot.slane %v4156_v60, 5  ;;  %v4162_v8 = vrot.slane %v4160_v62, 4  ;;  %v3265_v2 = vrot.slane %v10461_v12, 5  ;;  %v10750_v60 = vld [vmem:[#allocation2 + $0xb8] sm:$0xf]  ;;  %v12379_v12 = vld [vmem:[#allocation29_spill] sm:$0xff] }
 0x1f2   : > { %12375 = vst [vmem:[#allocation18_spill] sm:$0xff] %v10731_v20  ;;  %3804 = vmatmul.bf16.gmra.mxu2 %v8886_v42  ;;  %v4152_v42 = vrot.slane %v4150_v28, 5  ;;  %v4168_v28 = vrot.slane %v4166_v45, 5  ;;  %v2954_v29 = vpack.c.b16 %v2935_v25, %v2934_v53  ;;  %v3374_v41 = vpack.c.b16 %v3350_v7, %v3349_v13  ;;  %v12380_v53 = vld [vmem:[#allocation19_spill] sm:$0xff] }
 0x1f3   : > { %v1729_v23 = vpop.f32.mrf.mxu1  ;;  %v2830_v38 = vrot.slane %v2829_v31, 4  ;;  %v3267_v7 = vrot.slane %v3265_v2, 4  ;;  %v3268_v31 = vrot.slane %v10483_v44, 5 }
 0x1f4   : > { %v1730_v43 = vadd.f32 %v1729_v23, %v12377_v33  ;;  %v4153_v58 = vor.u32 %v4152_v42, %v4149_v35  ;;  %v4163_v33 = vor.u32 %v4162_v8, %v4158_v51  ;;  %v2856_v8 = vshll.u32 %v10750_v60, 16 }
 0x1f5   : > { %v2112_v55 = vpop.f32.mrf.mxu2 }
 0x1f6   : > { %v2146_v15 = vadd.f32 %v2109_v46, %v1730_v43  ;;  %v4154_v23 = vrot.slane %v4153_v58, 4  ;;  %v2840_v46 = vrot.slane %v2839_v16, 4  ;;  %v8154_v43 = vrot.slane %v3151_v24, 9 }
 0x1f7   : > { %v3051_v39 = vpop.f32.mrf.mxu0  ;;  %v4164_v42 = vrot.slane %v4163_v33, 4  ;;  %v2860_v24 = vshrl.u32 %v10750_v60, 16 }
 0x1f8   : > { %v10746_v14 = vadd.f32 %v2422_v56, %v2146_v15  ;;  %v4159_v35 = vsel %vm9272_vm2, %v4154_v23, %v4158_v51  ;;  %v10753_v62 = vadd.f32 %v3051_v39, %v12379_v12  ;;  %v2847_v56 = vshrl.u32 %v2504_v1, 16  ;;  %v10771_v12 = vpop.f32.mrf.mxu3 }
 0x1f9   : > { %v4348_v58 = vunpack.c.l.b16 %v4159_v35  ;;  %v2850_v15 = vshll.u32 %v2504_v1, 16  ;;  %v4169_v16 = vsel %vm9272_vm2, %v4164_v42, %v4168_v28  ;;  %v2835_v1 = vsel %vm9272_vm2, %v2830_v38, %v10733_v63  ;;  %v12381_v35 = vld [vmem:[#allocation27_spill] sm:$0xff] }
 0x1fa   : > { %12378 = vst [vmem:[#allocation26_spill] sm:$0xff] %v10746_v14  ;;  %3090 = vmatmul.bf16.gmra.mxu0 %v2954_v29  ;;  %v4349_v51 = vunpack.c.l.b16 %v4169_v16  ;;  %v3266_v44 = vsel %vm9596_vm13, %v8154_v43, %v3265_v2  ;;  %v2845_v33 = vsel %vm9272_vm2, %v2840_v46, %v2844_v47  ;;  %v2849_v29 = vrot.slane %v2847_v56, 4  ;;  %v3913_v2 = vld [vmem:[#allocation2 + $0x94] sm:$0xf] }
 0x1fb   : > { %v1732_v45 = vpop.f32.mrf.mxu1  ;;  %v2852_v39 = vrot.slane %v2850_v15, 5  ;;  %v669_v42 = vrot.slane %v12381_v35, 4  ;;  %v10775_v63 = vrot.slane %v2856_v8, 5  ;;  %v2862_v38 = vrot.slane %v2860_v24, 4  ;;  %v10777_v15 = vld [vmem:[#allocation2 + $0xbc] sm:$0x1] }
 0x1fc   : > { %v1733_v25 = vadd.f32 %v1732_v45, %v12380_v53  ;;  %v4371_v28 = vpack.c.b16 %v4349_v51, %v4348_v58  ;;  %v2936_v46 = vunpack.c.l.b16 %v2835_v1  ;;  %v2937_v58 = vunpack.c.l.b16 %v2845_v33  ;;  %v12382_v53 = vld [vmem:[#allocation30_spill] sm:$0xff]  ;;  %v833_v51 = vld [vmem:[#allocation2 + $0xc8] sm:$0x1]  ;;  %v12383_v8 = vld [vmem:[#allocation21_spill] sm:$0xff] }
 0x1fd   : > { %v2114_v13 = vpop.f32.mrf.mxu2  ;;  %v3351_v56 = vunpack.c.l.b16 %v3266_v44  ;;  %v3914_v35 = vld [vmem:[#allocation2 + $0x98] sm:$0x1]  ;;  %v4184_v61 = vshrl.u32 %v3913_v2, 16  ;;  %v8911_v1 = vld [vmem:[%s12289_s1 + $0x200] sm:$0xff]  ;;  %v2863_v44 = vor.u32 %v2862_v38, %v10775_v63  ;;  %v2866_v33 = vshll.u32 %v10777_v15, 16 }
 0x1fe   : > { %v10761_v23 = vadd.f32 %v2112_v55, %v1733_v25  ;;  %3490 = vmatmul.bf16.gmra.mxu1 %v3374_v41  ;;  %v3269_v55 = vsel %vm9596_vm13, %v3267_v7, %v3268_v31  ;;  %v3912_v41 = vld [vmem:[#allocation2 + $0x90] sm:$0xf]  ;;  %4495 = vmatmul.bf16.gmra.mxu3 %v4371_v28  ;;  %v2853_v31 = vor.u32 %v2852_v39, %v2849_v29 }
 0x1ff   : > { %v4171_v43 = vshrl.u32 %v3912_v41, 16  ;;  %v4174_v45 = vshll.u32 %v3912_v41, 16  ;;  %v3053_v47 = vpop.f32.mrf.mxu0  ;;  %v3352_v7 = vunpack.c.l.b16 %v3269_v55  ;;  %v4180_v41 = vshll.u32 %v3913_v2, 16  ;;  %4874 = vmatpush.bf16.msra.mxu0 %v8911_v1  ;;  %v3152_v2 = vld [vmem:[#allocation2 + $0x78] sm:$0xe] }
 0x200   : > { %v10780_v25 = vadd.f32 %v3053_v47, %v12382_v53  ;;  %v4190_v47 = vshll.u32 %v3914_v35, 16  ;;  %v834_v29 = vsel %vm9450_vm10, %v669_v42, %v833_v51  ;;  %v2955_v38 = vpack.c.b16 %v2937_v58, %v2936_v46  ;;  %v10793_v21 = vpop.f32.mrf.mxu3  ;;  %v8925_v58 = vld [vmem:[%s12290_s2 + $0x10] sm:$0xff] }
 0x201   : > { %v4176_v14 = vrot.slane %v4174_v45, 5  ;;  %v4182_v53 = vrot.slane %v4180_v41, 5  ;;  %835 = vst [vmem:[#allocation2 + $0xc8] sm:$0x1] %v834_v29  ;;  %v3272_v45 = vrot.slane %v10508_v11, 5  ;;  %v3375_v49 = vpack.c.b16 %v3352_v7, %v3351_v56  ;;  %6373 = vmatpush.bf16.msrb.mxu2 %v8925_v58 }
 0x202   : > { %3809 = vmatmul.bf16.gmra.mxu2 %v8887_v3  ;;  %v4173_v3 = vrot.slane %v4171_v43, 4  ;;  %v4192_v27 = vrot.slane %v4190_v47, 5  ;;  %v2854_v19 = vrot.slane %v2853_v31, 4  ;;  %v2868_v35 = vrot.slane %v2866_v33, 5  ;;  %v8888_v33 = vld [vmem:[#allocation2 + $0x84] sm:$0xff] }
 0x203   : > { %v1734_v16 = vpop.f32.mrf.mxu1  ;;  %v8155_v51 = vrot.slane %v3152_v2, 9  ;;  %v3274_v41 = vrot.slane %v3272_v45, 4  ;;  %v3275_v1 = vrot.slane %v10543_v4, 5 }
 0x204   : > { %v1735_v28 = vadd.f32 %v1734_v16, %v12383_v8  ;;  %v4177_v43 = vor.u32 %v4176_v14, %v4173_v3  ;;  %v4186_v16 = vrot.slane %v4184_v61, 4  ;;  %v12385_v3 = vld [vmem:[#allocation31_spill] sm:$0xff]  ;;  %v2859_v4 = vsel %vm9272_vm2, %v2854_v19, %v10775_v63 }
 0x205   : > { %v3770_v24 = vpop.f32.mrf.mxu2  ;;  %v3276_v19 = vsel %vm9596_vm13, %v3274_v41, %v3275_v1 }
 0x206   : > { %v10790_v39 = vadd.f32 %v2114_v13, %v1735_v28  ;;  %v4178_v8 = vrot.slane %v4177_v43, 4  ;;  %v4187_v20 = vor.u32 %v4186_v16, %v4182_v53  ;;  %v2864_v13 = vrot.slane %v2863_v44, 4  ;;  %v2507_v44 = vld [vmem:[#allocation2 + $0xc0] sm:$0xf]  ;;  %v10819_v43 = vld [vmem:[#allocation2 + $0xc4] sm:$0xf] }
 0x207   : > { %v3056_v42 = vpop.f32.mrf.mxu0  ;;  %v2874_v16 = vshll.u32 %v2507_v44, 16  ;;  %v2880_v2 = vshll.u32 %v10819_v43, 16 }
 0x208   : > { %v4183_v61 = vsel %vm9272_vm2, %v4178_v8, %v4182_v53  ;;  %v4188_v14 = vrot.slane %v4187_v20, 4  ;;  %v10798_v28 = vadd.f32 %v3056_v42, %v12385_v3  ;;  %v8941_v20 = vld [vmem:[%s12290_s2 + $0x90] sm:$0xff]  ;;  %v3916_v8 = vld [vmem:[#allocation2 + $0xa0] sm:$0xf]  ;;  %v12386_v3 = vld [vmem:[#allocation32_spill] sm:$0xff] }
 0x209   : > { %v4350_v46 = vunpack.c.l.b16 %v4183_v61  ;;  %6538 = vmatpush.bf16.msra.mxu3 %v8941_v20  ;;  %v8933_v53 = vld [vmem:[%s12290_s2 + $0x50] sm:$0xff] }
 0x20a   : > { %v4193_v31 = vsel %vm9272_vm2, %v4188_v14, %v4192_v27  ;;  %3095 = vmatmul.bf16.gmra.mxu0 %v2955_v38  ;;  %v3273_v27 = vsel %vm9596_vm13, %v8155_v51, %v3272_v45  ;;  %6272 = vmatpush.bf16.msrb.mxu1 %v8933_v53  ;;  %v2884_v45 = vshrl.u32 %v10819_v43, 16  ;;  %v3354_v14 = vunpack.c.l.b16 %v3276_v19 }
 0x20b   : > { %v3456_v11 = vpop.f32.mrf.mxu1  ;;  %v4351_v47 = vunpack.c.l.b16 %v4193_v31  ;;  %v3353_v61 = vunpack.c.l.b16 %v3273_v27  ;;  %v4208_v53 = vshrl.u32 %v3916_v8, 16  ;;  %v10836_v19 = vadd.f32 %v10743_v34, %v10761_v23 }
 0x20c   : > { %v3536_v56 = vadd.f32 %v3456_v11, %v10558_v32  ;;  %v2869_v32 = vsel %vm9272_vm2, %v2864_v13, %v2868_v35  ;;  %v2938_v13 = vunpack.c.l.b16 %v2859_v4  ;;  %v2882_v4 = vrot.slane %v2880_v2, 5 }
 0x20d   : > { %v3772_v7 = vpop.f32.mrf.mxu2  ;;  %v4372_v63 = vpack.c.b16 %v4351_v47, %v4350_v46  ;;  %v2939_v51 = vunpack.c.l.b16 %v2869_v32  ;;  %v2876_v46 = vrot.slane %v2874_v16, 5  ;;  %v4204_v47 = vshll.u32 %v3916_v8, 16 }
 0x20e   : > { %v10813_v29 = vadd.f32 %v3770_v24, %v3536_v56  ;;  %3495 = vmatmul.bf16.gmra.mxu1 %v3375_v49  ;;  %v2871_v24 = vshrl.u32 %v2507_v44, 16  ;;  %v3915_v49 = vld [vmem:[#allocation2 + $0x9c] sm:$0xf]  ;;  %v10831_v56 = vpop.f32.mrf.mxu3  ;;  %v3917_v44 = vld [vmem:[#allocation2 + $0xa4] sm:$0x1]  ;;  %v2886_v32 = vrot.slane %v2884_v45, 4 }
 0x20f   : > { %4500 = vmatmul.bf16.gmra.mxu3 %v4372_v63  ;;  %v4195_v38 = vshrl.u32 %v3915_v49, 16  ;;  %v4198_v35 = vshll.u32 %v3915_v49, 16  ;;  %v3058_v42 = vpop.f32.mrf.mxu0  ;;  %v4214_v27 = vshll.u32 %v3917_v44, 16  ;;  %v4206_v16 = vrot.slane %v4204_v47, 5 }
 0x210   : > { %v10829_v11 = vadd.f32 %v3058_v42, %v12386_v3  ;;  %v2873_v1 = vrot.slane %v2871_v24, 4  ;;  %v4210_v49 = vrot.slane %v4208_v53, 4  ;;  %v2887_v45 = vor.u32 %v2886_v32, %v2882_v4 }
 0x211   : > { %v4197_v58 = vrot.slane %v4195_v38, 4  ;;  %v10840_v38 = vld [vmem:[#allocation2 + $0xc8] sm:$0x1]  ;;  %v4216_v3 = vrot.slane %v4214_v27, 5  ;;  %v3279_v47 = vrot.slane %v10553_v0, 5 }
 0x212   : > { %3814 = vmatmul.bf16.gmra.mxu2 %v8888_v33  ;;  %12387 = vst [vmem:[#allocation20_spill] sm:$0xff] %v10829_v11  ;;  %v4200_v33 = vrot.slane %v4198_v35, 5  ;;  %v4211_v42 = vor.u32 %v4210_v49, %v4206_v16  ;;  %v2956_v35 = vpack.c.b16 %v2939_v51, %v2938_v13  ;;  %v2877_v8 = vor.u32 %v2876_v46, %v2873_v1  ;;  %v8889_v1 = vld [vmem:[#allocation2 + $0x90] sm:$0xff] }
 0x213   : > { %v3458_v41 = vpop.f32.mrf.mxu1  ;;  %v2890_v44 = vshll.u32 %v10840_v38, 16  ;;  %v10851_v13 = vadd.f32 %v10771_v12, %v10790_v39  ;;  %v2888_v0 = vrot.slane %v2887_v45, 4  ;;  %v3281_v12 = vrot.slane %v3279_v47, 4 }
 0x214   : > { %v3537_v31 = vadd.f32 %v3458_v41, %v10584_v10  ;;  %v4201_v24 = vor.u32 %v4200_v33, %v4197_v58  ;;  %v3376_v41 = vpack.c.b16 %v3354_v14, %v3353_v61  ;;  %v4212_v23 = vrot.slane %v4211_v42, 4  ;;  %v3153_v33 = vld [vmem:[#allocation2 + $0x84] sm:$0xe] }
 0x215   : > { %v3775_v20 = vpop.f32.mrf.mxu2  ;;  %12389 = vst [vmem:[#allocation28_spill] sm:$0xff] %v10851_v13  ;;  %v2878_v46 = vrot.slane %v2877_v8, 4  ;;  %v8156_v49 = vrot.slane %v3153_v33, 9  ;;  %v3282_v39 = vrot.slane %v10579_v30, 5  ;;  %v3920_v33 = vld [vmem:[#allocation2 + $0xb0] sm:$0x1] }
 0x216   : > { %v10838_v63 = vadd.f32 %v3772_v7, %v3537_v31  ;;  %v4202_v10 = vrot.slane %v4201_v24, 4  ;;  %v12388_v7 = vld [vmem:[#allocation33_spill] sm:$0xff]  ;;  %v4217_v14 = vsel %vm9272_vm2, %v4212_v23, %v4216_v3  ;;  %v10856_v27 = vpop.f32.mrf.mxu3  ;;  %v3919_v3 = vld [vmem:[#allocation2 + $0xac] sm:$0xf]  ;;  %v3155_v13 = vld [vmem:[#allocation2 + $0x9c] sm:$0xe] }
 0x217   : > { %v3061_v2 = vpop.f32.mrf.mxu0  ;;  %v4353_v32 = vunpack.c.l.b16 %v4217_v14  ;;  %v2883_v42 = vsel %vm9272_vm2, %v2878_v46, %v2882_v4  ;;  %v8158_v11 = vrot.slane %v3155_v13, 9 }
 0x218   : > { %v4207_v34 = vsel %vm9272_vm2, %v4202_v10, %v4206_v16  ;;  %v10846_v58 = vadd.f32 %v3061_v2, %v12388_v7  ;;  %v2892_v16 = vrot.slane %v2890_v44, 5  ;;  %v3918_v10 = vld [vmem:[#allocation2 + $0xa8] sm:$0xf]  ;;  %v12390_v2 = vld [vmem:[#allocation34_spill] sm:$0xff]  ;;  %v3283_v44 = vsel %vm9596_vm13, %v3281_v12, %v3282_v39 }
 0x219   : > { %v4352_v53 = vunpack.c.l.b16 %v4207_v34  ;;  %v4222_v23 = vshll.u32 %v3918_v10, 16  ;;  %v2940_v7 = vunpack.c.l.b16 %v2883_v42  ;;  %v4563_v42 = vld [vmem:[#allocation2 + $0x18] sm:$0xe] }
 0x21a   : > { %3100 = vmatmul.bf16.gmra.mxu0 %v2956_v35  ;;  %v4219_v35 = vshrl.u32 %v3918_v10, 16 }
 0x21b   : > { %v3461_v31 = vpop.f32.mrf.mxu1  ;;  %v4224_v46 = vrot.slane %v4222_v23, 5 }
 0x21c   : > { %v3538_v51 = vadd.f32 %v3461_v31, %v10604_v37  ;;  %v4373_v37 = vpack.c.b16 %v4353_v32, %v4352_v53  ;;  %v4221_v34 = vrot.slane %v4219_v35, 4  ;;  %v4228_v53 = vshll.u32 %v3919_v3, 16  ;;  %v9130_v35 = vld [vmem:[#allocation2 + $0x1c] sm:$0xf] }
 0x21d   : > { %v3777_v61 = vpop.f32.mrf.mxu2 }
 0x21e   : > { %v10858_v24 = vadd.f32 %v3775_v20, %v3538_v51  ;;  %3500 = vmatmul.bf16.gmra.mxu1 %v3376_v41  ;;  %v2893_v20 = vsel %vm9272_vm2, %v2888_v0, %v2892_v16  ;;  %v3280_v41 = vsel %vm9596_vm13, %v8156_v49, %v3279_v47  ;;  %v4232_v51 = vshrl.u32 %v3919_v3, 16  ;;  %v10875_v12 = vpop.f32.mrf.mxu3 }
 0x21f   : > { %4505 = vmatmul.bf16.gmra.mxu3 %v4373_v37  ;;  %v3063_v8 = vpop.f32.mrf.mxu0  ;;  %v2941_v14 = vunpack.c.l.b16 %v2893_v20  ;;  %v4238_v47 = vshll.u32 %v3920_v33, 16  ;;  %v3356_v0 = vunpack.c.l.b16 %v3283_v44  ;;  %v4230_v16 = vrot.slane %v4228_v53, 5 }
 0x220   : > { %v10868_v45 = vadd.f32 %v3063_v8, %v12390_v2  ;;  %v4234_v49 = vrot.slane %v4232_v51, 4  ;;  %v4225_v37 = vor.u32 %v4224_v46, %v4221_v34  ;;  %v4629_v8 = vrot.slane %v9130_v35, 5  ;;  %v9131_v46 = vld [vmem:[#allocation2 + $0x20] sm:$0x1]  ;;  %v8932_v35 = vld [vmem:[%s12290_s2 + $0x48] sm:$0xff] }
 0x221   : > { %v4240_v10 = vrot.slane %v4238_v47, 5  ;;  %v8322_v51 = vrot.slane %v4563_v42, 9  ;;  %v4632_v47 = vrot.slane %v9131_v46, 5  ;;  %v3289_v42 = vrot.slane %v10644_v48, 5  ;;  %6273 = vmatpush.bf16.msrb.mxu1 %v8932_v35 }
 0x222   : > { %3819 = vmatmul.bf16.gmra.mxu2 %v8889_v1  ;;  %12391 = vst [vmem:[#allocation22_spill] sm:$0xff] %v10868_v45  ;;  %v3355_v1 = vunpack.c.l.b16 %v3280_v41  ;;  %v4235_v39 = vor.u32 %v4234_v49, %v4230_v16  ;;  %v4226_v2 = vrot.slane %v4225_v37, 4  ;;  %v3286_v41 = vrot.slane %v10610_v18, 5 }
 0x223   : > { %v3463_v30 = vpop.f32.mrf.mxu1 }
 0x224   : > { %v3539_v4 = vadd.f32 %v3463_v30, %v10641_v52  ;;  %v2957_v52 = vpack.c.b16 %v2941_v14, %v2940_v7  ;;  %v3377_v20 = vpack.c.b16 %v3356_v0, %v3355_v1  ;;  %v4236_v30 = vrot.slane %v4235_v39, 4  ;;  %v8924_v7 = vld [vmem:[%s12290_s2 + $0x8] sm:$0xff]  ;;  %v8890_v0 = vld [vmem:[#allocation2 + $0x9c] sm:$0xff] }
 0x225   : > { %v3780_v31 = vpop.f32.mrf.mxu2  ;;  %v4231_v34 = vsel %vm9272_vm2, %v4226_v2, %v4230_v16  ;;  %v8940_v1 = vld [vmem:[%s12290_s2 + $0x88] sm:$0xff]  ;;  %v4631_v16 = vrot.slane %v4629_v8, 4  ;;  %6374 = vmatpush.bf16.msrb.mxu2 %v8924_v7  ;;  %v3288_v39 = vrot.slane %v3286_v41, 4  ;;  %v3921_v2 = vld [vmem:[#allocation2 + $0xb4] sm:$0xf] }
 0x226   : > { %v10873_v32 = vadd.f32 %v3777_v61, %v3539_v4  ;;  %v12392_v61 = vld [vmem:[#allocation35_spill] sm:$0xff]  ;;  %v3154_v4 = vld [vmem:[#allocation2 + $0x90] sm:$0xe]  ;;  %v4241_v18 = vsel %vm9272_vm2, %v4236_v30, %v4240_v10  ;;  %v4354_v14 = vunpack.c.l.b16 %v4231_v34  ;;  %6539 = vmatpush.bf16.msra.mxu3 %v8940_v1  ;;  %v12393_v30 = vld [vmem:[#allocation8_spill] sm:$0xff] }
 0x227   : > { %v3066_v3 = vpop.f32.mrf.mxu0  ;;  %v4355_v49 = vunpack.c.l.b16 %v4241_v18 }
 0x228   : > { %v10879_v23 = vadd.f32 %v3066_v3, %v12392_v61  ;;  %v3922_v3 = vld [vmem:[#allocation2 + $0xb8] sm:$0xf]  ;;  %v5224_v61 = vrot.slane %v12393_v30, 2 }
 0x229   : > { %v4374_v10 = vpack.c.b16 %v4355_v49, %v4354_v14  ;;  %v4246_v14 = vshll.u32 %v3921_v2, 16  ;;  %v4256_v49 = vshrl.u32 %v3922_v3, 16 }
 0x22a   : > { %3105 = vmatmul.bf16.gmra.mxu0 %v2957_v52  ;;  %v4630_v52 = vsel %vm9596_vm13, %v8322_v51, %v4629_v8  ;;  %v3290_v8 = vsel %vm9596_vm13, %v3288_v39, %v3289_v42  ;;  %v9132_v42 = vld [vmem:[#allocation2 + $0x28] sm:$0xf] }
 0x22b   : > { %v3466_v44 = vpop.f32.mrf.mxu1  ;;  %v4755_v51 = vunpack.c.l.b16 %v4630_v52  ;;  %v8370_v52 = vrot.slane %v12393_v30, 9 }
 0x22c   : > { %v3540_v33 = vadd.f32 %v3466_v44, %v10658_v36  ;;  %v8157_v36 = vrot.slane %v3154_v4, 9  ;;  %v10904_v44 = vpop.f32.mrf.mxu3 }
 0x22d   : > { %v3782_v53 = vpop.f32.mrf.mxu2 }
 0x22e   : > { %v10892_v37 = vadd.f32 %v3780_v31, %v3540_v33  ;;  %3505 = vmatmul.bf16.gmra.mxu1 %v3377_v20  ;;  %v4633_v31 = vsel %vm9596_vm13, %v4631_v16, %v4632_v47  ;;  %v4243_v20 = vshrl.u32 %v3921_v2, 16  ;;  %v3287_v34 = vsel %vm9596_vm13, %v8157_v36, %v3286_v41  ;;  %v4564_v2 = vld [vmem:[#allocation2 + $0x24] sm:$0xe] }
 0x22f   : > { %4510 = vmatmul.bf16.gmra.mxu3 %v4374_v10  ;;  %v3068_v4 = vpop.f32.mrf.mxu0  ;;  %v4756_v47 = vunpack.c.l.b16 %v4633_v31  ;;  %v4252_v16 = vshll.u32 %v3922_v3, 16  ;;  %v3357_v10 = vunpack.c.l.b16 %v3287_v34  ;;  %v3358_v41 = vunpack.c.l.b16 %v3290_v8 }
 0x230   : > { %v10911_v7 = vadd.f32 %v3068_v4, %v10426_v5  ;;  %v4245_v18 = vrot.slane %v4243_v20, 4  ;;  %v4248_v36 = vrot.slane %v4246_v14, 5  ;;  %v4636_v5 = vrot.slane %v9132_v42, 5 }
 0x231   : > { %v4254_v35 = vrot.slane %v4252_v16, 5  ;;  %v4258_v4 = vrot.slane %v4256_v49, 4  ;;  %v12396_v31 = vrot.slane %v12393_v30, 4  ;;  %v4787_v8 = vpack.c.b16 %v4756_v47, %v4755_v51  ;;  %v9133_v49 = vld [vmem:[#allocation2 + $0x2c] sm:$0x1] }
 0x232   : > { %3824 = vmatmul.bf16.gmra.mxu2 %v8890_v0  ;;  %12394 = vst [vmem:[#allocation29_spill] sm:$0xff] %v10911_v7  ;;  %v3923_v0 = vld [vmem:[#allocation2 + $0xbc] sm:$0x1]  ;;  %v4249_v20 = vor.u32 %v4248_v36, %v4245_v18  ;;  %v3378_v14 = vpack.c.b16 %v3358_v41, %v3357_v10  ;;  %v8323_v42 = vrot.slane %v4564_v2, 9  ;;  %v4638_v16 = vrot.slane %v4636_v5, 4  ;;  %v12397_v36 = vld [vmem:[#allocation36_spill] sm:$0xff] }
 0x233   : > { %v3468_v33 = vpop.f32.mrf.mxu1  ;;  %v4262_v48 = vshll.u32 %v3923_v0, 16  ;;  %v4259_v3 = vor.u32 %v4258_v4, %v4254_v35  ;;  %v4639_v7 = vrot.slane %v9133_v49, 5  ;;  %v5512_v18 = vadd.f32 %v8370_v52, %v12393_v30  ;;  %v8891_v52 = vld [vmem:[#allocation2 + $0xa8] sm:$0xff] }
 0x234   : > { %v3541_v1 = vadd.f32 %v3468_v33, %v10686_v40  ;;  %v8371_v40 = vrot.slane %v5224_v61, 9  ;;  %v8372_v33 = vrot.slane %v12396_v31, 9  ;;  %v10926_v47 = vpop.f32.mrf.mxu3  ;;  %v4637_v13 = vsel %vm9596_vm13, %v8323_v42, %v4636_v5 }
 0x235   : > { %v3785_v46 = vpop.f32.mrf.mxu2  ;;  %v4264_v34 = vrot.slane %v4262_v48, 5  ;;  %v4260_v45 = vrot.slane %v4259_v3, 4 }
 0x236   : > { %v10914_v39 = vadd.f32 %v3782_v53, %v3541_v1  ;;  %v3293_v53 = vrot.slane %v10660_v54, 5  ;;  %v4250_v1 = vrot.slane %v4249_v20, 4  ;;  %v5513_v51 = vadd.f32 %v8371_v40, %v5224_v61  ;;  %v4565_v40 = vld [vmem:[#allocation2 + $0x30] sm:$0xe] }
 0x237   : > { %v3071_v0 = vpop.f32.mrf.mxu0  ;;  %v4265_v41 = vsel %vm9272_vm2, %v4260_v45, %v4264_v34  ;;  %v4640_v61 = vsel %vm9596_vm13, %v4638_v16, %v4639_v7  ;;  %v9134_v34 = vld [vmem:[#allocation2 + $0x34] sm:$0xf]  ;;  %v3924_v7 = vld [vmem:[#allocation2 + $0xc0] sm:$0xf]  ;;  %v3925_v16 = vld [vmem:[#allocation2 + $0xc4] sm:$0xf] }
 0x238   : > { %12395 = vst [vmem:[#allocation19_spill] sm:$0xff] %v10914_v39  ;;  %v10922_v39 = vadd.f32 %v3071_v0, %v12397_v36  ;;  %v4255_v48 = vsel %vm9272_vm2, %v4250_v1, %v4254_v35  ;;  %v3295_v2 = vrot.slane %v3293_v53, 4  ;;  %v4357_v20 = vunpack.c.l.b16 %v4265_v41 }
 0x239   : > { %v4356_v4 = vunpack.c.l.b16 %v4255_v48  ;;  %v3294_v35 = vsel %vm9596_vm13, %v8158_v11, %v3293_v53  ;;  %v10945_v0 = vmul.f32 0.25, %v5512_v18  ;;  %v10947_v5 = vmul.f32 0.25, %v5513_v51  ;;  %v3156_v11 = vld [vmem:[#allocation2 + $0xa8] sm:$0xe]  ;;  %v9135_v18 = vld [vmem:[#allocation2 + $0x38] sm:$0x1] }
 0x23a   : > { %4875 = vmatmul.bf16.vlgmr.msra.gmra.mxu0 %v4787_v8  ;;  %v4643_v8 = vrot.slane %v9134_v34, 5  ;;  %v4758_v42 = vunpack.c.l.b16 %v4640_v61  ;;  %v3300_v53 = vrot.slane %v10703_v22, 5  ;;  %v4267_v49 = vshrl.u32 %v3924_v7, 16 }
 0x23b   : > { %v3471_v31 = vpop.f32.mrf.mxu1  ;;  %v4375_v45 = vpack.c.b16 %v4357_v20, %v4356_v4  ;;  %v8324_v48 = vrot.slane %v4565_v40, 9  ;;  %v4270_v20 = vshll.u32 %v3924_v7, 16  ;;  %v8159_v61 = vrot.slane %v3156_v11, 9 }
 0x23c   : > { %v3542_v54 = vadd.f32 %v3471_v31, %v10706_v50  ;;  %v3296_v50 = vrot.slane %v10681_v17, 5  ;;  %v4757_v17 = vunpack.c.l.b16 %v4637_v13  ;;  %v4645_v4 = vrot.slane %v4643_v8, 4  ;;  %v10957_v40 = vpop.f32.mrf.mxu3 }
 0x23d   : > { %v3787_v10 = vpop.f32.mrf.mxu2  ;;  %v4276_v34 = vshll.u32 %v3925_v16, 16  ;;  %v3302_v1 = vrot.slane %v3300_v53, 4  ;;  %12401 = vst [vmem:[#allocation21_spill] sm:$0xff] %v10957_v40  ;;  %v5661_v11 = vpack.c.bf16 %v10947_v5, %v10947_v5  ;;  %v9137_v5 = vld [vmem:[%s9333_s9 + $0x78] sm:$0xf] }
 0x23e   : > { %v10931_v3 = vadd.f32 %v3785_v46, %v3542_v54  ;;  %3510 = vmatmul.bf16.gmra.mxu1 %v3378_v14  ;;  %v12399_v46 = vrot.slane %v12393_v30, 4  ;;  %v3297_v31 = vsel %vm9596_vm13, %v3295_v2, %v3296_v50  ;;  %v4646_v54 = vrot.slane %v9135_v18, 5 }
 0x23f   : > { %4515 = vmatmul.bf16.gmra.mxu3 %v4375_v45  ;;  %v3073_v36 = vpop.f32.mrf.mxu0  ;;  %v3926_v45 = vld [vmem:[#allocation2 + $0xc8] sm:$0x1]  ;;  %v3303_v2 = vrot.slane %v10735_v59, 5  ;;  %v4272_v50 = vrot.slane %v4270_v20, 5  ;;  %v4278_v7 = vrot.slane %v4276_v34, 5  ;;  %v4644_v59 = vsel %vm9596_vm13, %v8324_v48, %v4643_v8 }
 0x240   : > { %12398 = vst [vmem:[#allocation27_spill] sm:$0xff] %v10931_v3  ;;  %v10943_v14 = vadd.f32 %v8372_v33, %v12399_v46  ;;  %v3359_v33 = vunpack.c.l.b16 %v3294_v35  ;;  %v10953_v51 = vadd.f32 %v3073_v36, %v10472_v57  ;;  %v4280_v46 = vshrl.u32 %v3925_v16, 16  ;;  %v9136_v20 = vld [vmem:[%s9333_s9 + $0x70] sm:$0xf] }
 0x241   : > { %v4286_v35 = vshll.u32 %v3926_v45, 16  ;;  %v3360_v36 = vunpack.c.l.b16 %v3297_v31  ;;  %v4647_v18 = vsel %vm9596_vm13, %v4645_v4, %v4646_v54  ;;  %v4788_v45 = vpack.c.b16 %v4758_v42, %v4757_v17 }
 0x242   : > { %3829 = vmatmul.bf16.gmra.mxu2 %v8891_v52  ;;  %12400 = vst [vmem:[#allocation30_spill] sm:$0xff] %v10953_v51  ;;  %v4269_v52 = vrot.slane %v4267_v49, 4  ;;  %v4282_v49 = vrot.slane %v4280_v46, 4  ;;  %v5190_v46 = vunpack.c.l.bf16 %v9137_v5  ;;  %v4759_v48 = vunpack.c.l.b16 %v4644_v59 }
 0x243   : > { %v3473_v41 = vpop.f32.mrf.mxu1  ;;  %v3379_v8 = vpack.c.b16 %v3360_v36, %v3359_v33 }
 0x244   : > { %v3543_v13 = vadd.f32 %v3473_v41, %v10738_v6  ;;  %v5660_v6 = vpack.c.bf16 %v10945_v0, %v10945_v0  ;;  %v4273_v16 = vor.u32 %v4272_v50, %v4269_v52  ;;  %v4283_v31 = vor.u32 %v4282_v49, %v4278_v7  ;;  %v12403_v50 = vld [vmem:[#allocation37_spill] sm:$0xff] }
 0x245   : > { %v3790_v22 = vpop.f32.mrf.mxu2  ;;  %v4288_v41 = vrot.slane %v4286_v35, 5  ;;  %v3304_v0 = vsel %vm9596_vm13, %v3302_v1, %v3303_v2  ;;  %v8923_v1 = vld [vmem:[%s12290_s2] sm:$0xff]  ;;  %v12404_v49 = vld [vmem:[#allocation9_spill] sm:$0xff] }
 0x246   : > { %v10959_v57 = vadd.f32 %v3787_v10, %v3543_v13  ;;  %v3301_v10 = vsel %vm9596_vm13, %v8159_v61, %v3300_v53  ;;  %v5188_v13 = vunpack.c.l.bf16 %v9136_v20  ;;  %v4274_v34 = vrot.slane %v4273_v16, 4  ;;  %6375 = vmatpush.bf16.msrb.mxu2 %v8923_v1  ;;  %v9139_v1 = vld [vmem:[#allocation2 + $0x44] sm:$0x1] }
 0x247   : > { %v3076_v51 = vpop.f32.mrf.mxu0  ;;  %v4284_v52 = vrot.slane %v4283_v31, 4  ;;  %v4760_v53 = vunpack.c.l.b16 %v4647_v18  ;;  %v3361_v61 = vunpack.c.l.b16 %v3301_v10  ;;  %v3362_v2 = vunpack.c.l.b16 %v3304_v0  ;;  %v4566_v31 = vld [vmem:[#allocation2 + $0x3c] sm:$0xe] }
 0x248   : > { %12402 = vst [vmem:[#allocation5_spill] sm:$0xff] %v10959_v57  ;;  %v10976_v54 = vadd.f32 %v3076_v51, %v12403_v50  ;;  %v4279_v35 = vsel %vm9272_vm2, %v4274_v34, %v4278_v7  ;;  %v8939_v51 = vld [vmem:[%s12290_s2 + $0x80] sm:$0xff]  ;;  %v8374_v59 = vrot.slane %v12404_v49, 9  ;;  %v8892_v7 = vld [vmem:[#allocation2 + $0xb4] sm:$0xff]  ;;  %v12405_v18 = vrot.slane %v12393_v30, 6 }
 0x249   : > { %v4289_v33 = vsel %vm9272_vm2, %v4284_v52, %v4288_v41  ;;  %v4358_v36 = vunpack.c.l.b16 %v4279_v35  ;;  %6540 = vmatpush.bf16.msra.mxu3 %v8939_v51  ;;  %v9138_v41 = vld [vmem:[#allocation2 + $0x40] sm:$0xf]  ;;  %v3307_v0 = vrot.slane %v10750_v60, 5  ;;  %v10996_v34 = vmul.f32 0.25, %v10943_v14  ;;  %v3157_v50 = vld [vmem:[#allocation2 + $0xb4] sm:$0xe] }
 0x24a   : > { %4880 = vmatmul.bf16.gmra.mxu0 %v4788_v45  ;;  %v4359_v16 = vunpack.c.l.b16 %v4289_v33  ;;  %v8373_v10 = vrot.slane %v12405_v18, 9  ;;  %v4650_v20 = vrot.slane %v9138_v41, 5  ;;  %v10998_v5 = vunpack.c.l.b16 %v5660_v6  ;;  %v3927_v14 = vld [vmem:[#allocation2 + $0xcc] sm:$0xf]  ;;  %v3928_v33 = vld [vmem:[#allocation2 + $0xd0] sm:$0xf] }
 0x24b   : > { %v3476_v4 = vpop.f32.mrf.mxu1  ;;  %v11000_v45 = vunpack.c.l.b16 %v5661_v11  ;;  %v11009_v35 = vpack.c.b16 %v4760_v53, %v4759_v48  ;;  %v11011_v60 = vpack.c.b16 %v3362_v2, %v3361_v61  ;;  %v5227_v6 = vrot.slane %v12404_v49, 2  ;;  %v12409_v61 = vld [vmem:[#allocation38_spill] sm:$0xff] }
 0x24c   : > { %v3544_v17 = vadd.f32 %v3476_v4, %v10753_v62  ;;  %v4376_v52 = vpack.c.b16 %v4359_v16, %v4358_v36  ;;  %v11007_v4 = vpop.f32.mrf.mxu3  ;;  %v8325_v11 = vrot.slane %v4566_v31, 9  ;;  %v4291_v36 = vshrl.u32 %v3927_v14, 16 }
 0x24d   : > { %v3792_v42 = vpop.f32.mrf.mxu2  ;;  %12407 = vst [vmem:[#allocation32_spill] sm:$0xff] %v11007_v4  ;;  %v5228_v51 = vrot.slane %v12404_v49, 4  ;;  %v8160_v16 = vrot.slane %v3157_v50, 9  ;;  %v3309_v18 = vrot.slane %v3307_v0, 4  ;;  %v12408_v48 = vrot.slane %v12393_v30, 6 }
 0x24e   : > { %v10992_v62 = vadd.f32 %v3790_v22, %v3544_v17  ;;  %3515 = vmatmul.bf16.gmra.mxu1 %v3379_v8  ;;  %v8931_v22 = vld [vmem:[%s12290_s2 + $0x40] sm:$0xff]  ;;  %v11005_v8 = vadd.f32 %v5190_v46, %v5188_v13  ;;  %v4653_v17 = vrot.slane %v9139_v1, 5  ;;  %v4652_v46 = vrot.slane %v4650_v20, 4  ;;  %v3929_v4 = vld [vmem:[#allocation2 + $0xd4] sm:$0x1] }
 0x24f   : > { %4520 = vmatmul.bf16.gmra.mxu3 %v4376_v52  ;;  %v3078_v13 = vpop.f32.mrf.mxu0  ;;  %6274 = vmatpush.bf16.msrb.mxu1 %v8931_v22  ;;  %v5515_v53 = vadd.f32 %v8373_v10, %v12408_v48  ;;  %v3310_v31 = vrot.slane %v10777_v15, 5  ;;  %v4293_v41 = vrot.slane %v4291_v36, 4  ;;  %v4294_v52 = vshll.u32 %v3927_v14, 16 }
 0x250   : > { %12406 = vst [vmem:[#allocation31_spill] sm:$0xff] %v10992_v62  ;;  %v11018_v2 = vadd.f32 %v3078_v13, %v12409_v61  ;;  %v4300_v57 = vshll.u32 %v3928_v33, 16  ;;  %v4304_v40 = vshrl.u32 %v3928_v33, 16  ;;  %v5516_v50 = vadd.f32 %v8374_v59, %v12404_v49 }
 0x251   : > { %v4651_v30 = vsel %vm9596_vm13, %v8325_v11, %v4650_v20  ;;  %v4296_v10 = vrot.slane %v4294_v52, 5  ;;  %v4310_v22 = vshll.u32 %v3929_v4, 16  ;;  %v5229_v13 = vrot.slane %v12404_v49, 6 }
 0x252   : > { %3834 = vmatmul.bf16.gmra.mxu2 %v8892_v7  ;;  %12410 = vst [vmem:[#allocation33_spill] sm:$0xff] %v11018_v2  ;;  %v4302_v15 = vrot.slane %v4300_v57, 5  ;;  %v4306_v36 = vrot.slane %v4304_v40, 4  ;;  %v8375_v14 = vrot.slane %v5227_v6, 9  ;;  %v11032_v59 = vsel %vm9596_vm13, %v8160_v16, %v3307_v0 }
 0x253   : > { %v3478_v7 = vpop.f32.mrf.mxu1  ;;  %v4297_v61 = vor.u32 %v4296_v10, %v4293_v41  ;;  %v8377_v33 = vrot.slane %v5229_v13, 9  ;;  %v4312_v11 = vrot.slane %v4310_v22, 5  ;;  %v4761_v2 = vunpack.c.l.b16 %v4651_v30  ;;  %v12412_v41 = vld [vmem:[#allocation39_spill] sm:$0xff] }
 0x254   : > { %v3545_v1 = vadd.f32 %v3478_v7, %v10780_v25  ;;  %v4654_v25 = vsel %vm9596_vm13, %v4652_v46, %v4653_v17  ;;  %v8376_v7 = vrot.slane %v5228_v51, 9  ;;  %v4307_v20 = vor.u32 %v4306_v36, %v4302_v15  ;;  %v11034_v57 = vpop.f32.mrf.mxu3 }
 0x255   : > { %v3795_v62 = vpop.f32.mrf.mxu2  ;;  %v5517_v4 = vadd.f32 %v8375_v14, %v5227_v6  ;;  %v4298_v52 = vrot.slane %v4297_v61, 4  ;;  %v5580_v46 = vmul.f32 0.25, %v5516_v50  ;;  %v8893_v50 = vld [vmem:[#allocation2 + $0xc0] sm:$0xff]  ;;  %v3311_v36 = vsel %vm9596_vm13, %v3309_v18, %v3310_v31  ;;  %v4567_v61 = vld [vmem:[#allocation2 + $0x48] sm:$0xe] }
 0x256   : > { %v11026_v48 = vadd.f32 %v3792_v42, %v3545_v1  ;;  %v5518_v49 = vadd.f32 %v8376_v7, %v5228_v51  ;;  %v5519_v42 = vadd.f32 %v8377_v33, %v5229_v13  ;;  %v5579_v1 = vmul.f32 0.25, %v5515_v53  ;;  %v9140_v7 = vld [vmem:[#allocation2 + $0x4c] sm:$0xf] }
 0x257   : > { %v3081_v40 = vpop.f32.mrf.mxu0  ;;  %v4308_v17 = vrot.slane %v4307_v20, 4  ;;  %v4303_v0 = vsel %vm9272_vm2, %v4298_v52, %v4302_v15  ;;  %v5581_v16 = vmul.f32 0.25, %v5517_v4  ;;  %v5662_v15 = vpack.c.bf16 %v10996_v34, %v10996_v34  ;;  %v3158_v4 = vld [vmem:[#allocation2 + $0xc0] sm:$0xe] }
 0x258   : > { %12411 = vst [vmem:[#allocation34_spill] sm:$0xff] %v11026_v48  ;;  %v4762_v48 = vunpack.c.l.b16 %v4654_v25  ;;  %v11037_v10 = vadd.f32 %v3081_v40, %v12412_v41  ;;  %v5582_v6 = vmul.f32 0.25, %v5518_v49  ;;  %v4360_v30 = vunpack.c.l.b16 %v4303_v0 }
 0x259   : > { %v4313_v53 = vsel %vm9272_vm2, %v4308_v17, %v4312_v11  ;;  %v5583_v13 = vmul.f32 0.25, %v5519_v42  ;;  %v5663_v25 = vpack.c.bf16 %v5579_v1, %v5579_v1  ;;  %v4657_v33 = vrot.slane %v9140_v7, 5 }
 0x25a   : > { %4885 = vmatmul.bf16.gmra.mxu0 %v11009_v35  ;;  %v4361_v14 = vunpack.c.l.b16 %v4313_v53  ;;  %v5664_v20 = vpack.c.bf16 %v5580_v46, %v5580_v46  ;;  %v3314_v18 = vrot.slane %v10819_v43, 5  ;;  %v5665_v31 = vpack.c.bf16 %v5581_v16, %v5581_v16  ;;  %v9141_v46 = vld [vmem:[#allocation2 + $0x50] sm:$0x1]  ;;  %v12415_v43 = vld [vmem:[#allocation40_spill] sm:$0xff] }
 0x25b   : > { %v3481_v3 = vpop.f32.mrf.mxu1  ;;  %v3363_v34 = vunpack.c.l.b16 %v11032_v59  ;;  %v3364_v52 = vunpack.c.l.b16 %v3311_v36  ;;  %v5666_v49 = vpack.c.bf16 %v5582_v6, %v5582_v6  ;;  %v5790_v42 = vunpack.c.l.b16 %v5662_v15 }
 0x25c   : > { %v3546_v51 = vadd.f32 %v3481_v3, %v10798_v28  ;;  %v5852_v28 = vrot.slane %v10998_v5, 7  ;;  %v4377_v11 = vpack.c.b16 %v4361_v14, %v4360_v30  ;;  %v5667_v5 = vpack.c.bf16 %v5583_v13, %v5583_v13 }
 0x25d   : > { %v11042_v22 = vpop.f32.mrf.mxu2  ;;  %v5791_v1 = vunpack.c.l.b16 %v5663_v25  ;;  %v4659_v17 = vrot.slane %v4657_v33, 4  ;;  %v4660_v41 = vrot.slane %v9141_v46, 5  ;;  %v8161_v0 = vrot.slane %v3158_v4, 9 }
 0x25e   : > { %12413 = vst [vmem:[#allocation35_spill] sm:$0xff] %v11042_v22  ;;  %v11052_v3 = vadd.f32 %v3795_v62, %v3546_v51  ;;  %3520 = vmatmul.bf16.gmra.mxu1 %v11011_v60  ;;  %v11058_v62 = vpack.c.b16 %v4762_v48, %v4761_v2  ;;  %v8326_v60 = vrot.slane %v4567_v61, 9  ;;  %v5792_v51 = vunpack.c.l.b16 %v5664_v20  ;;  %v11066_v48 = vpop.f32.mrf.mxu3 }
 0x25f   : > { %4525 = vmatmul.bf16.gmra.mxu3 %v4377_v11  ;;  %v3083_v40 = vpop.f32.mrf.mxu0  ;;  %v3316_v6 = vrot.slane %v3314_v18, 4  ;;  %v3317_v53 = vrot.slane %v10840_v38, 5  ;;  %v5793_v2 = vunpack.c.l.b16 %v5665_v31  ;;  %12417 = vst [vmem:[#allocation37_spill] sm:$0xff] %v11066_v48  ;;  %v5794_v13 = vunpack.c.l.b16 %v5666_v49  ;;  %v5998_v11 = vld [vmem:[#allocation3 + $0xc] sm:$0x1] }
 0x260   : > { %12414 = vst [vmem:[#allocation8_spill] sm:$0xff] %v11052_v3  ;;  %v11061_v16 = vadd.f32 %v3083_v40, %v12415_v43  ;;  %v5853_v36 = vrot.slane %v11000_v45, 6  ;;  %v11071_v14 = vsel %vm9596_vm13, %v8326_v60, %v4657_v33  ;;  %v5856_v15 = vrot.slane %v5790_v42, 5  ;;  %v6397_v49 = vld [vmem:[#allocation3] sm:$0xe]  ;;  %v12418_v43 = vld [vmem:[#allocation41_spill] sm:$0xff] }
 0x261   : > { %v5859_v25 = vrot.slane %v5791_v1, 4  ;;  %v11075_v61 = vsel %vm9596_vm13, %v4659_v17, %v4660_v41  ;;  %v5862_v7 = vrot.slane %v5792_v51, 3  ;;  %v5865_v45 = vrot.slane %v5793_v2, 2  ;;  %v6067_v1 = vld [vmem:[#allocation3 + $0x4] sm:$0x1] }
 0x262   : > { %3839 = vmatmul.bf16.gmra.mxu2 %v8893_v50  ;;  %12416 = vst [vmem:[#allocation36_spill] sm:$0xff] %v11061_v16  ;;  %v5795_v50 = vunpack.c.l.b16 %v5667_v5  ;;  %v5855_v38 = vsel %vm5854_vm14, %v5853_v36, %v5852_v28  ;;  %v5868_v4 = vrot.slane %v5794_v13, 1  ;;  %v3381_v5 = vpack.c.b16 %v3364_v52, %v3363_v34  ;;  %v5995_v51 = vld [vmem:[#allocation3 + $0x8] sm:$0xf]  ;;  %v6043_v52 = vld [vmem:[#allocation3] sm:$0xf] }
 0x263   : > { %v11063_v59 = vpop.f32.mrf.mxu1  ;;  %v5858_v20 = vsel %vm5857_vm15, %v5856_v15, %v5855_v38  ;;  %v4763_v60 = vunpack.c.l.b16 %v11071_v14  ;;  %v11083_v28 = vsel %vm9596_vm13, %v8161_v0, %v3314_v18  ;;  %v4764_v17 = vunpack.c.l.b16 %v11075_v61  ;;  %v8974_v38 = vld [vmem:[%s12290_s2 + $0x178] sm:$0xff] }
 0x264   : > { %v5861_v33 = vsel %vm5860_vm0, %v5859_v25, %v5858_v20  ;;  %v5963_v31 = vpack.c.b16 %v5795_v50, %v5795_v50  ;;  %v11089_v46 = vsel %vm9596_vm13, %v3316_v6, %v3317_v53  ;;  %v8514_v13 = vrot.slane %v6397_v49, 9  ;;  %v8966_v6 = vld [vmem:[%s12290_s2 + $0x138] sm:$0xff]  ;;  %v8894_v20 = vld [vmem:[#allocation2 + $0xcc] sm:$0xff]  ;;  %7084 = vmatpush.bf16.msrb.mxu3 %v8974_v38  ;;  %v12424_v38 = vld [vmem:[#allocation11_spill] sm:$0xff] }
 0x265   : > { %v3800_v30 = vpop.f32.mrf.mxu2  ;;  %v5864_v42 = vsel %vm5863_vm1, %v5862_v7, %v5861_v33  ;;  %v6076_v53 = vshrl.u32 %v6043_v52, 16  ;;  %v6423_v25 = vrot.slane %v6067_v1, 5  ;;  %v6079_v7 = vshll.u32 %v6043_v52, 16  ;;  %6911 = vmatpush.bf16.msra.mxu2 %v8966_v6  ;;  %v9142_v33 = vld [vmem:[#allocation2 + $0x58] sm:$0xf] }
 0x266   : > { %v5867_v41 = vsel %vm5866_vm3, %v5865_v45, %v5864_v42  ;;  %v5999_v34 = vsel %vm9450_vm10, %v5963_v31, %v5998_v11  ;;  %v3365_v45 = vunpack.c.l.b16 %v11083_v28  ;;  %v3366_v11 = vunpack.c.l.b16 %v11089_v46  ;;  %v11110_v31 = vpop.f32.mrf.mxu3  ;;  %v8958_v28 = vld [vmem:[%s12290_s2 + $0xf8] sm:$0xff] }
 0x267   : > { %v3086_v40 = vpop.f32.mrf.mxu0  ;;  %v5870_v2 = vsel %vm5869_vm4, %v5868_v4, %v5867_v41  ;;  %6000 = vst [vmem:[#allocation3 + $0xc] sm:$0x1] %v5999_v34  ;;  %v4664_v4 = vrot.slane %v9142_v33, 5  ;;  %v4568_v41 = vld [vmem:[#allocation2 + $0x54] sm:$0xe]  ;;  %v6081_v52 = vrot.slane %v6079_v7, 5  ;;  %6666 = vmatpush.bf16.msra.mxu1 %v8958_v28 }
 0x268   : > { %v11095_v18 = vadd.f32 %v3086_v40, %v12418_v43  ;;  %v5962_v15 = vpack.c.b16 %v5870_v2, %v5870_v2  ;;  %12420 = vst [vmem:[#allocation38_spill] sm:$0xff] %v11110_v31  ;;  %v8327_v46 = vrot.slane %v4568_v41, 9  ;;  %v12423_v2 = vld [vmem:[#allocation10_spill] sm:$0xff]  ;;  %v12434_v16 = vrot.slane %v12424_v38, 4 }
 0x269   : > { %v4666_v43 = vrot.slane %v4664_v4, 4  ;;  %v8378_v35 = vrot.slane %v12423_v2, 9  ;;  %v8468_v7 = vld [vmem:[#allocation3] sm:$0xf]  ;;  %v12430_v14 = vrot.slane %v12423_v2, 2 }
 0x26a   : > { %4890 = vmatmul.bf16.gmra.mxu0 %v11058_v62  ;;  %v5996_v40 = vsel %vm9436_vm9, %v5962_v15, %v5995_v51  ;;  %v9143_v62 = vld [vmem:[#allocation2 + $0x5c] sm:$0x1] }
 0x26b   : > { %v3486_v0 = vpop.f32.mrf.mxu1  ;;  %v4667_v34 = vrot.slane %v9143_v62, 5  ;;  %5997 = vst [vmem:[#allocation3 + $0x8] sm:$0xf] %v5996_v40  ;;  %v8379_v61 = vrot.slane %v12430_v14, 9 }
 0x26c   : > { %v3548_v50 = vadd.f32 %v3486_v0, %v10846_v58  ;;  %v6078_v58 = vrot.slane %v6076_v53, 4  ;;  %v6085_v0 = vshll.u32 %v6067_v1, 16 }
 0x26d   : > { %v11102_v36 = vpop.f32.mrf.mxu2  ;;  %v4668_v15 = vsel %vm9596_vm13, %v4666_v43, %v4667_v34 }
 0x26e   : > { %12419 = vst [vmem:[#allocation9_spill] sm:$0xff] %v11102_v36  ;;  %v11112_v49 = vadd.f32 %v3800_v30, %v3548_v50  ;;  %3525 = vmatmul.bf16.gmra.mxu1 %v3381_v5  ;;  %v11122_v5 = vsel %vm9596_vm13, %v8514_v13, %v6423_v25  ;;  %v6082_v51 = vor.u32 %v6081_v52, %v6078_v58  ;;  %v6087_v1 = vrot.slane %v6085_v0, 5  ;;  %v6068_v13 = vld [vmem:[#allocation3 + $0xc] sm:$0x1]  ;;  %v12427_v52 = vld [vmem:[#allocation12_spill] sm:$0xff]  ;;  %v11158_v34 = vpop.f32.mrf.mxu3 }
 0x26f   : > { %v4665_v50 = vsel %vm9596_vm13, %v8327_v46, %v4664_v4  ;;  %v11131_v33 = vpop.f32.mrf.mxu0  ;;  %v4766_v58 = vunpack.c.l.b16 %v4668_v15  ;;  %v8965_v4 = vld [vmem:[%s12290_s2 + $0x130] sm:$0xff]  ;;  %v6427_v41 = vrot.slane %v6068_v13, 5  ;;  %v4791_v46 = vpack.c.b16 %v4764_v17, %v4763_v60  ;;  %12429 = vst [vmem:[#allocation4_spill] sm:$0xff] %v11158_v34  ;;  %v12435_v36 = vld [vmem:[#allocation43_spill] sm:$0xff] }
 0x270   : > { %12421 = vst [vmem:[#allocation39_spill] sm:$0xff] %v11112_v49  ;;  %v4765_v25 = vunpack.c.l.b16 %v4665_v50  ;;  %v6083_v40 = vrot.slane %v6082_v51, 4  ;;  %v12428_v50 = vld [vmem:[#allocation13_spill] sm:$0xff]  ;;  %6912 = vmatpush.bf16.msra.mxu2 %v8965_v4  ;;  %v6469_v51 = vunpack.c.l.b16 %v11122_v5  ;;  %v12431_v60 = vrot.slane %v12423_v2, 4 }
 0x271   : > { %12425 = vst [vmem:[#allocation40_spill] sm:$0xff] %v11131_v33 }
 0x272   : > { %3844 = vmatmul.bf16.gmra.mxu2 %v8894_v20  ;;  %v6099_v20 = vshll.u32 %v6068_v13, 16  ;;  %v6088_v0 = vsel %vm9272_vm2, %v6083_v40, %v6087_v1  ;;  %v3382_v1 = vpack.c.b16 %v3366_v11, %v3365_v45  ;;  %v6398_v40 = vld [vmem:[#allocation3 + $0x8] sm:$0xe]  ;;  %v11154_v6 = vpack.c.b16 %v4766_v58, %v4765_v25 }
 0x273   : > { %v11134_v62 = vpop.f32.mrf.mxu1  ;;  %v8919_v15 = vld [vmem:[#allocation3 + $0x4] sm:$0xf0]  ;;  %v8515_v30 = vrot.slane %v6398_v40, 9  ;;  %v11156_v33 = vunpack.c.l.b16 %v6088_v0  ;;  %v8380_v17 = vrot.slane %v12431_v60, 9  ;;  %v5520_v45 = vadd.f32 %v8378_v35, %v12423_v2 }
 0x274   : > { %12426 = vst [vmem:[#allocation41_spill] sm:$0xff] %v11134_v62  ;;  %v6101_v53 = vrot.slane %v6099_v20, 5  ;;  %v6044_v13 = vld [vmem:[#allocation3 + $0x8] sm:$0xf]  ;;  %v8469_v28 = vor.u32 %v8919_v15, %v8468_v7  ;;  %v12432_v58 = vrot.slane %v12423_v2, 6  ;;  %v8382_v7 = vrot.slane %v12424_v38, 9 }
 0x275   : > { %v3805_v43 = vpop.f32.mrf.mxu2  ;;  %v6090_v20 = vshrl.u32 %v6044_v13, 16  ;;  %v6093_v4 = vshll.u32 %v6044_v13, 16  ;;  %v6428_v11 = vsel %vm9596_vm13, %v8515_v30, %v6427_v41  ;;  %v12433_v15 = vrot.slane %v12424_v38, 2 }
 0x276   : > { %v8381_v0 = vrot.slane %v12432_v58, 9  ;;  %v6470_v13 = vunpack.c.l.b16 %v6428_v11  ;;  %v8384_v60 = vrot.slane %v12434_v16, 9  ;;  %v12436_v41 = vrot.slane %v12424_v38, 6 }
 0x277   : > { %v6092_v5 = vrot.slane %v6090_v20, 4  ;;  %v6095_v25 = vrot.slane %v6093_v4, 5  ;;  %v3091_v40 = vpop.f32.mrf.mxu0  ;;  %v8383_v14 = vrot.slane %v12433_v15, 9  ;;  %v8386_v4 = vrot.slane %v12427_v52, 9 }
 0x278   : > { %v11175_v35 = vadd.f32 %v3091_v40, %v12435_v36  ;;  %v8385_v20 = vrot.slane %v12436_v41, 9  ;;  %v6477_v58 = vpack.c.b16 %v6470_v13, %v6469_v51  ;;  %v12437_v62 = vrot.slane %v12427_v52, 2 }
 0x279   : > { %v6096_v30 = vor.u32 %v6095_v25, %v6092_v5  ;;  %v12438_v15 = vrot.slane %v12427_v52, 4  ;;  %v12440_v5 = vrot.slane %v12427_v52, 6  ;;  %v8390_v40 = vrot.slane %v12428_v50, 9 }
 0x27a   : > { %v8387_v34 = vrot.slane %v12437_v62, 9  ;;  %4895 = vmatmul.bf16.gmra.mxu0 %v4791_v46  ;;  %v12441_v41 = vrot.slane %v12428_v50, 2  ;;  %6541 = vmatmul.bf16.vlgmr.msra.gmra.mxu3 %v6477_v58  ;;  %v12444_v46 = vrot.slane %v12428_v50, 6  ;;  %v12445_v13 = vrot.slane %v12423_v2, 2 }
 0x27b   : > { %v3491_v49 = vpop.f32.mrf.mxu1  ;;  %v8388_v31 = vrot.slane %v12438_v15, 9  ;;  %v6097_v36 = vrot.slane %v6096_v30, 4  ;;  %v8389_v25 = vrot.slane %v12440_v5, 9  ;;  %v12446_v5 = vrot.slane %v12423_v2, 4 }
 0x27c   : > { %v3550_v11 = vadd.f32 %v3491_v49, %v10879_v23  ;;  %v8391_v3 = vrot.slane %v12441_v41, 9  ;;  %v12443_v49 = vrot.slane %v12428_v50, 4  ;;  %v8393_v51 = vrot.slane %v12444_v46, 9 }
 0x27d   : > { %v11185_v16 = vpop.f32.mrf.mxu2  ;;  %v5521_v30 = vadd.f32 %v8379_v61, %v12445_v13  ;;  %v6102_v15 = vsel %vm9272_vm2, %v6097_v36, %v6101_v53  ;;  %v12448_v41 = vrot.slane %v12424_v38, 2  ;;  %v12449_v46 = vrot.slane %v12424_v38, 4 }
 0x27e   : > { %12439 = vst [vmem:[#allocation10_spill] sm:$0xff] %v11185_v16  ;;  %v11192_v23 = vadd.f32 %v3805_v43, %v3550_v11  ;;  %3530 = vmatmul.bf16.gmra.mxu1 %v3382_v1  ;;  %v8392_v62 = vrot.slane %v12443_v49, 9  ;;  %v5522_v16 = vadd.f32 %v8380_v17, %v12446_v5  ;;  %v12447_v43 = vrot.slane %v12423_v2, 6 }
 0x27f   : > { %v5524_v1 = vadd.f32 %v8382_v7, %v12424_v38  ;;  %v11207_v58 = vunpack.c.l.b16 %v6102_v15  ;;  %v5525_v49 = vadd.f32 %v8383_v14, %v12448_v41  ;;  %v5584_v61 = vmul.f32 0.25, %v5520_v45  ;;  %v11220_v15 = vpop.f32.mrf.mxu3  ;;  %v11222_v5 = vpop.f32.mrf.mxu0 }
 0x280   : > { %12442 = vst [vmem:[#allocation11_spill] sm:$0xff] %v11192_v23  ;;  %v5523_v11 = vadd.f32 %v8381_v0, %v12447_v43  ;;  %v5526_v23 = vadd.f32 %v8384_v60, %v12449_v46  ;;  %v12450_v53 = vrot.slane %v12424_v38, 6  ;;  %v5528_v17 = vadd.f32 %v8386_v4, %v12427_v52 }
 0x281   : > { %v12451_v2 = vrot.slane %v12427_v52, 2  ;;  %v12452_v7 = vrot.slane %v12427_v52, 4  ;;  %12453 = vst [vmem:[#allocation12_spill] sm:$0xff] %v11220_v15  ;;  %v12455_v14 = vrot.slane %v12427_v52, 6  ;;  %v12456_v38 = vrot.slane %v12428_v50, 2 }
 0x282   : > { %6376 = vmatmul.bf16.vlgmr.msrb.gmra.mxu2 %v8469_v28  ;;  %v5527_v36 = vadd.f32 %v8385_v20, %v12450_v53  ;;  %12454 = vst [vmem:[#allocation13_spill] sm:$0xff] %v11222_v5  ;;  %v5532_v28 = vadd.f32 %v8390_v40, %v12428_v50  ;;  %v12457_v20 = vrot.slane %v12428_v50, 4  ;;  %v5585_v46 = vmul.f32 0.25, %v5521_v30 }
 0x283   : > { %v5529_v0 = vadd.f32 %v8387_v34, %v12451_v2  ;;  %v5530_v13 = vadd.f32 %v8388_v31, %v12452_v7  ;;  %v5531_v60 = vadd.f32 %v8389_v25, %v12455_v14  ;;  %v5533_v45 = vadd.f32 %v8391_v3, %v12456_v38  ;;  %v11231_v43 = vpop.f32.mrf.mxu1 }
 0x284   : > { %v5534_v4 = vadd.f32 %v8392_v62, %v12457_v20  ;;  %12458 = vst [vmem:[#allocation43_spill] sm:$0xff] %v11231_v43  ;;  %v6211_v31 = vpack.c.b16 %v11207_v58, %v11156_v33  ;;  %v12459_v34 = vrot.slane %v12428_v50, 6  ;;  %v5586_v53 = vmul.f32 0.25, %v5522_v16 }
 0x285   : > { %v5587_v52 = vmul.f32 0.25, %v5523_v11  ;;  %v5588_v25 = vmul.f32 0.25, %v5524_v1  ;;  %v5589_v2 = vmul.f32 0.25, %v5525_v49  ;;  %v5590_v40 = vmul.f32 0.25, %v5526_v23  ;;  %v3810_v15 = vpop.f32.mrf.mxu2 }
 0x286   : > { %v5535_v41 = vadd.f32 %v8393_v51, %v12459_v34  ;;  %v5591_v7 = vmul.f32 0.25, %v5527_v36  ;;  %v5592_v14 = vmul.f32 0.25, %v5528_v17  ;;  %v5593_v3 = vmul.f32 0.25, %v5529_v0 }
 0x287   : > { %v5594_v38 = vmul.f32 0.25, %v5530_v13  ;;  %v5595_v5 = vmul.f32 0.25, %v5531_v60  ;;  %v5596_v62 = vmul.f32 0.25, %v5532_v28  ;;  %v5597_v20 = vmul.f32 0.25, %v5533_v45  ;;  %v3096_v17 = vpop.f32.mrf.mxu0  ;;  %v12460_v45 = vld [vmem:[#allocation45_spill] sm:$0xff] }
 0x288   : > { %v5598_v43 = vmul.f32 0.25, %v5534_v4  ;;  %v5599_v22 = vmul.f32 0.25, %v5535_v41  ;;  %v5668_v33 = vpack.c.bf16 %v5584_v61, %v5584_v61  ;;  %v5669_v58 = vpack.c.bf16 %v5585_v46, %v5585_v46 }
 0x289   : > { %v5670_v50 = vpack.c.bf16 %v5586_v53, %v5586_v53  ;;  %v5671_v51 = vpack.c.bf16 %v5587_v52, %v5587_v52  ;;  %v5672_v30 = vpack.c.bf16 %v5588_v25, %v5588_v25  ;;  %v5673_v16 = vpack.c.bf16 %v5589_v2, %v5589_v2  ;;  %v8973_v53 = vld [vmem:[%s12290_s2 + $0x170] sm:$0xff] }
 0x28a   : > { %v5674_v11 = vpack.c.bf16 %v5590_v40, %v5590_v40  ;;  %v5675_v1 = vpack.c.bf16 %v5591_v7, %v5591_v7  ;;  %v5676_v49 = vpack.c.bf16 %v5592_v14, %v5592_v14  ;;  %v5677_v23 = vpack.c.bf16 %v5593_v3, %v5593_v3  ;;  %v8957_v52 = vld [vmem:[%s12290_s2 + $0xf0] sm:$0xff]  ;;  %4900 = vmatmul.bf16.gmra.mxu0 %v11154_v6 }
 0x28b   : > { %v5678_v36 = vpack.c.bf16 %v5594_v38, %v5594_v38  ;;  %v5679_v0 = vpack.c.bf16 %v5595_v5, %v5595_v5  ;;  %v5680_v13 = vpack.c.bf16 %v5596_v62, %v5596_v62  ;;  %v5681_v60 = vpack.c.bf16 %v5597_v20, %v5597_v20  ;;  %v3496_v34 = vpop.f32.mrf.mxu1  ;;  %v8964_v5 = vld [vmem:[%s12290_s2 + $0x128] sm:$0xff]  ;;  %7085 = vmatpush.bf16.msrb.mxu3 %v8973_v53 }
 0x28c   : > { %v5682_v28 = vpack.c.bf16 %v5598_v43, %v5598_v43  ;;  %v11238_v4 = vadd.f32 %v3096_v17, %v12460_v45  ;;  %v5683_v61 = vpack.c.bf16 %v5599_v22, %v5599_v22  ;;  %v5796_v41 = vunpack.c.l.b16 %v5668_v33  ;;  %v11249_v43 = vpop.f32.mrf.mxu3  ;;  %v8972_v62 = vld [vmem:[%s12290_s2 + $0x168] sm:$0xff]  ;;  %6913 = vmatpush.bf16.msra.mxu2 %v8964_v5  ;;  %6667 = vmatpush.bf16.msra.mxu1 %v8957_v52 }
 0x28d   : > { %v5797_v46 = vunpack.c.l.b16 %v5669_v58  ;;  %12461 = vst [vmem:[#allocation45_spill] sm:$0xff] %v11249_v43  ;;  %v3552_v25 = vadd.f32 %v3496_v34, %v10922_v39  ;;  %v5798_v2 = vunpack.c.l.b16 %v5670_v50  ;;  %v5799_v22 = vunpack.c.l.b16 %v5671_v51 }
 0x28e   : > { %v5800_v40 = vunpack.c.l.b16 %v5672_v30  ;;  %v5801_v7 = vunpack.c.l.b16 %v5673_v16  ;;  %v5802_v14 = vunpack.c.l.b16 %v5674_v11  ;;  %v5804_v3 = vunpack.c.l.b16 %v5676_v49  ;;  %6275 = vmatmul.bf16.vlgmr.msrb.gmra.mxu1 %v6211_v31 }
 0x28f   : > { %v5805_v38 = vunpack.c.l.b16 %v5677_v23  ;;  %v11256_v20 = vadd.f32 %v3810_v15, %v3552_v25  ;;  %v5806_v33 = vunpack.c.l.b16 %v5678_v36  ;;  %v5807_v58 = vunpack.c.l.b16 %v5679_v0  ;;  %v11258_v15 = vpop.f32.mrf.mxu2  ;;  %7086 = vmatpush.bf16.msrb.mxu3 %v8972_v62  ;;  %v11260_v31 = vpop.f32.mrf.mxu0  ;;  %v4569_v25 = vld [vmem:[#allocation2 + $0x60] sm:$0xe] }
 0x290   : > { %v5808_v39 = vunpack.c.l.b16 %v5680_v13  ;;  %v5803_v50 = vunpack.c.l.b16 %v5675_v1  ;;  %v5809_v51 = vunpack.c.l.b16 %v5681_v60  ;;  %v5810_v30 = vunpack.c.l.b16 %v5682_v28  ;;  %12463 = vst [vmem:[#allocation47_spill] sm:$0xff] %v11258_v15  ;;  %v8956_v60 = vld [vmem:[%s12290_s2 + $0xe8] sm:$0xff]  ;;  %v8963_v28 = vld [vmem:[%s12290_s2 + $0x120] sm:$0xff] }
 0x291   : > { %12462 = vst [vmem:[#allocation46_spill] sm:$0xff] %v11256_v20  ;;  %v5871_v6 = vrot.slane %v5796_v41, 7  ;;  %v5811_v16 = vunpack.c.l.b16 %v5683_v61  ;;  %v5872_v11 = vrot.slane %v5797_v46, 6  ;;  %v5874_v49 = vrot.slane %v5798_v2, 5  ;;  %6668 = vmatpush.bf16.msra.mxu1 %v8956_v60  ;;  %6914 = vmatpush.bf16.msra.mxu2 %v8963_v28  ;;  %v12467_v28 = vld [vmem:[#allocation14_spill] sm:$0xff] }
 0x292   : > { %v5876_v23 = vrot.slane %v5799_v22, 4  ;;  %v5878_v17 = vrot.slane %v5800_v40, 3  ;;  %v5880_v45 = vrot.slane %v5801_v7, 2  ;;  %v5884_v34 = vrot.slane %v5804_v3, 7  ;;  %12464 = vst [vmem:[#allocation48_spill] sm:$0xff] %v11260_v31 }
 0x293   : > { %v5885_v53 = vrot.slane %v5805_v38, 6  ;;  %v5873_v36 = vsel %vm5854_vm14, %v5872_v11, %v5871_v6  ;;  %v5887_v1 = vrot.slane %v5806_v33, 5  ;;  %v5889_v0 = vrot.slane %v5807_v58, 4  ;;  %v11269_v61 = vpop.f32.mrf.mxu1  ;;  %v6004_v3 = vld [vmem:[#allocation3 + $0x14] sm:$0x1] }
 0x294   : > { %v5891_v13 = vrot.slane %v5808_v39, 3  ;;  %12465 = vst [vmem:[#allocation49_spill] sm:$0xff] %v11269_v61  ;;  %v5875_v41 = vsel %vm5857_vm15, %v5874_v49, %v5873_v36  ;;  %v5882_v46 = vrot.slane %v5802_v14, 1  ;;  %v5893_v5 = vrot.slane %v5809_v51, 2  ;;  %v6010_v38 = vld [vmem:[#allocation3 + $0x1c] sm:$0x1]  ;;  %v11279_v51 = vpop.f32.mrf.mxu3 }
 0x295   : > { %v5886_v52 = vsel %vm5854_vm14, %v5885_v53, %v5884_v34  ;;  %v5877_v22 = vsel %vm5860_vm0, %v5876_v23, %v5875_v41  ;;  %v5895_v7 = vrot.slane %v5810_v30, 1  ;;  %v5965_v14 = vpack.c.b16 %v5803_v50, %v5803_v50  ;;  %12466 = vst [vmem:[#allocation50_spill] sm:$0xff] %v11279_v51  ;;  %v6001_v34 = vld [vmem:[#allocation3 + $0x10] sm:$0xf]  ;;  %v6007_v36 = vld [vmem:[#allocation3 + $0x18] sm:$0xf] }
 0x296   : > { %v5888_v40 = vsel %vm5857_vm15, %v5887_v1, %v5886_v52  ;;  %v5879_v62 = vsel %vm5863_vm1, %v5878_v17, %v5877_v22  ;;  %v5967_v58 = vpack.c.b16 %v5811_v16, %v5811_v16  ;;  %v8426_v39 = vrot.slane %v11005_v8, 9 }
 0x297   : > { %v5890_v33 = vsel %vm5860_vm0, %v5889_v0, %v5888_v40  ;;  %v5881_v6 = vsel %vm5866_vm3, %v5880_v45, %v5879_v62  ;;  %v8328_v49 = vrot.slane %v4569_v25, 9  ;;  %v6005_v17 = vsel %vm9450_vm10, %v5965_v14, %v6004_v3  ;;  %v9144_v45 = vld [vmem:[#allocation2 + $0x64] sm:$0xf]  ;;  %v9145_v0 = vld [vmem:[#allocation2 + $0x68] sm:$0x1]  ;;  %v3101_v25 = vpop.f32.mrf.mxu0  ;;  %v12469_v62 = vld [vmem:[#allocation18_spill] sm:$0xff] }
 0x298   : > { %v5892_v11 = vsel %vm5863_vm1, %v5891_v13, %v5890_v33  ;;  %v5883_v30 = vsel %vm5869_vm4, %v5882_v46, %v5881_v6  ;;  %v6011_v50 = vsel %vm9450_vm10, %v5967_v58, %v6010_v38  ;;  %6006 = vst [vmem:[#allocation3 + $0x14] sm:$0x1] %v6005_v17  ;;  %v4671_v1 = vrot.slane %v9144_v45, 5  ;;  %v3815_v58 = vpop.f32.mrf.mxu2 }
 0x299   : > { %v5894_v23 = vsel %vm5866_vm3, %v5893_v5, %v5892_v11  ;;  %v5964_v53 = vpack.c.b16 %v5883_v30, %v5883_v30  ;;  %v4674_v13 = vrot.slane %v9145_v0, 5  ;;  %6012 = vst [vmem:[#allocation3 + $0x1c] sm:$0x1] %v6011_v50  ;;  %v5242_v41 = vrot.slane %v12467_v28, 2 }
 0x29a   : > { %v5896_v16 = vsel %vm5869_vm4, %v5895_v7, %v5894_v23  ;;  %v5243_v46 = vrot.slane %v12467_v28, 4  ;;  %v5244_v52 = vrot.slane %v12467_v28, 6  ;;  %v4672_v22 = vsel %vm9596_vm13, %v8328_v49, %v4671_v1  ;;  %v12468_v7 = vld [vmem:[#allocation15_spill] sm:$0xff] }
 0x29b   : > { %v5966_v60 = vpack.c.b16 %v5896_v16, %v5896_v16  ;;  %v6002_v5 = vsel %vm9436_vm9, %v5964_v53, %v6001_v34  ;;  %v4673_v40 = vrot.slane %v4671_v1, 4  ;;  %v12315_v3 = vrot.slane %v12468_v7, 2  ;;  %v3501_v14 = vpop.f32.mrf.mxu1  ;;  %v12470_v34 = vld [vmem:[#allocation16_spill] sm:$0xff] }
 0x29c   : > { %6003 = vst [vmem:[#allocation3 + $0x10] sm:$0xf] %v6002_v5  ;;  %v11301_v33 = vadd.f32 %v3101_v25, %v12469_v62  ;;  %v4767_v6 = vunpack.c.l.b16 %v4672_v22  ;;  %v12316_v11 = vrot.slane %v12468_v7, 4  ;;  %v3554_v30 = vadd.f32 %v3501_v14, %v10976_v54 }
 0x29d   : > { %v6008_v38 = vsel %vm9436_vm9, %v5966_v60, %v6007_v36  ;;  %v4675_v49 = vsel %vm9596_vm13, %v4673_v40, %v4674_v13  ;;  %v12317_v23 = vrot.slane %v12468_v7, 6  ;;  %v12471_v36 = vld [vmem:[#allocation17_spill] sm:$0xff]  ;;  %v8394_v60 = vrot.slane %v12467_v28, 9 }
 0x29e   : > { %6009 = vst [vmem:[#allocation3 + $0x18] sm:$0xf] %v6008_v38  ;;  %v4768_v50 = vunpack.c.l.b16 %v4675_v49  ;;  %v11312_v1 = vadd.f32 %v3815_v58, %v3554_v30  ;;  %v8395_v25 = vrot.slane %v5242_v41, 9  ;;  %v8396_v22 = vrot.slane %v5243_v46, 9  ;;  %v11317_v38 = vpop.f32.mrf.mxu3 }
 0x29f   : > { %v6069_v13 = vld [vmem:[#allocation3 + $0x14] sm:$0x1]  ;;  %v8397_v40 = vrot.slane %v5244_v52, 9  ;;  %12473 = vst [vmem:[#allocation15_spill] sm:$0xff] %v11317_v38  ;;  %v8398_v58 = vrot.slane %v12468_v7, 9  ;;  %v8399_v30 = vrot.slane %v12315_v3, 9 }
 0x2a0   : > { %12472 = vst [vmem:[#allocation14_spill] sm:$0xff] %v11312_v1  ;;  %v4793_v5 = vpack.c.b16 %v4768_v50, %v4767_v6  ;;  %v6070_v62 = vld [vmem:[#allocation3 + $0x1c] sm:$0x1]  ;;  %v6431_v14 = vrot.slane %v6069_v13, 5  ;;  %v6113_v49 = vshll.u32 %v6069_v13, 16  ;;  %v8400_v0 = vrot.slane %v12316_v11, 9 }
 0x2a1   : > { %v6435_v2 = vrot.slane %v6070_v62, 5  ;;  %v6127_v54 = vshll.u32 %v6070_v62, 16  ;;  %v8401_v6 = vrot.slane %v12317_v23, 9  ;;  %v11327_v50 = vld [vmem:[%s9333_s9 + $0x74] sm:$0xf]  ;;  %v11333_v13 = vadd.f32 %v8426_v39, %v11005_v8 }
 0x2a2   : > { %4905 = vmatmul.bf16.gmra.mxu0 %v4793_v5  ;;  %v5536_v5 = vadd.f32 %v8394_v60, %v12467_v28  ;;  %v5537_v1 = vadd.f32 %v8395_v25, %v5242_v41  ;;  %v5538_v23 = vadd.f32 %v8396_v22, %v5243_v46  ;;  %v5539_v38 = vadd.f32 %v8397_v40, %v5244_v52 }
 0x2a3   : > { %v6399_v53 = vld [vmem:[#allocation3 + $0x10] sm:$0xe]  ;;  %v5540_v41 = vadd.f32 %v8398_v58, %v12468_v7  ;;  %v6115_v25 = vrot.slane %v6113_v49, 5  ;;  %v6129_v52 = vrot.slane %v6127_v54, 5  ;;  %v8402_v22 = vrot.slane %v12470_v34, 9 }
 0x2a4   : > { %v8472_v3 = vld [vmem:[#allocation3 + $0x10] sm:$0xf]  ;;  %v8516_v17 = vrot.slane %v6399_v53, 9  ;;  %v12479_v54 = vrot.slane %v12471_v36, 4 }
 0x2a5   : > { %v6045_v16 = vld [vmem:[#allocation3 + $0x10] sm:$0xf]  ;;  %v6400_v62 = vld [vmem:[#allocation3 + $0x18] sm:$0xe] }
 0x2a6   : > { %v8920_v11 = vld [vmem:[#allocation3 + $0x14] sm:$0xf0]  ;;  %v6104_v31 = vshrl.u32 %v6045_v16, 16  ;;  %v8517_v15 = vrot.slane %v6400_v62, 9  ;;  %v6107_v45 = vshll.u32 %v6045_v16, 16  ;;  %v6432_v39 = vsel %vm9596_vm13, %v8516_v17, %v6431_v14  ;;  %v11348_v14 = vpop.f32.mrf.mxu3 }
 0x2a7   : > { %v8473_v20 = vor.u32 %v8920_v11, %v8472_v3  ;;  %v6046_v61 = vld [vmem:[#allocation3 + $0x18] sm:$0xf]  ;;  %v6471_v60 = vunpack.c.l.b16 %v6432_v39  ;;  %12477 = vst [vmem:[#allocation18_spill] sm:$0xff] %v11348_v14  ;;  %v8408_v58 = vrot.slane %v12479_v54, 9  ;;  %v12480_v39 = vrot.slane %v12471_v36, 6 }
 0x2a8   : > { %v6106_v51 = vrot.slane %v6104_v31, 4  ;;  %v6118_v43 = vshrl.u32 %v6046_v61, 16  ;;  %v6121_v48 = vshll.u32 %v6046_v61, 16  ;;  %v6436_v28 = vsel %vm9596_vm13, %v8517_v15, %v6435_v2 }
 0x2a9   : > { %6381 = vmatmul.bf16.gmra.mxu2 %v8473_v20  ;;  %v6109_v53 = vrot.slane %v6107_v45, 5  ;;  %v6472_v46 = vunpack.c.l.b16 %v6436_v28  ;;  %v12474_v31 = vrot.slane %v12470_v34, 2  ;;  %v12475_v15 = vrot.slane %v12470_v34, 4 }
 0x2aa   : > { %v6120_v3 = vrot.slane %v6118_v43, 4  ;;  %v6123_v11 = vrot.slane %v6121_v48, 5  ;;  %v12476_v20 = vrot.slane %v12470_v34, 6  ;;  %v8406_v48 = vrot.slane %v12471_v36, 9 }
 0x2ab   : > { %v6110_v16 = vor.u32 %v6109_v53, %v6106_v51  ;;  %v8403_v17 = vrot.slane %v12474_v31, 9  ;;  %v6478_v61 = vpack.c.b16 %v6472_v46, %v6471_v60  ;;  %v8404_v2 = vrot.slane %v12475_v15, 9 }
 0x2ac   : > { %v6124_v40 = vor.u32 %v6123_v11, %v6120_v3  ;;  %v8405_v45 = vrot.slane %v12476_v20, 9  ;;  %v12478_v43 = vrot.slane %v12471_v36, 2  ;;  %v8409_v28 = vrot.slane %v12480_v39, 9 }
 0x2ad   : > { %v6111_v49 = vrot.slane %v6110_v16, 4  ;;  %6546 = vmatmul.bf16.gmra.mxu3 %v6478_v61  ;;  %v12481_v60 = vrot.slane %v12468_v7, 2  ;;  %v12482_v46 = vrot.slane %v12468_v7, 4  ;;  %v12483_v16 = vrot.slane %v12468_v7, 6 }
 0x2ae   : > { %v8407_v51 = vrot.slane %v12478_v43, 9  ;;  %v6125_v62 = vrot.slane %v6124_v40, 4  ;;  %v5544_v15 = vadd.f32 %v8402_v22, %v12470_v34  ;;  %v12484_v61 = vrot.slane %v12470_v34, 2 }
 0x2af   : > { %v5541_v53 = vadd.f32 %v8399_v30, %v12481_v60  ;;  %v5542_v3 = vadd.f32 %v8400_v0, %v12482_v46  ;;  %v6116_v11 = vsel %vm9272_vm2, %v6111_v49, %v6115_v25  ;;  %v5543_v31 = vadd.f32 %v8401_v6, %v12483_v16 }
 0x2b0   : > { %v5545_v40 = vadd.f32 %v8403_v17, %v12484_v61  ;;  %v6130_v20 = vsel %vm9272_vm2, %v6125_v62, %v6129_v52  ;;  %v6205_v43 = vunpack.c.l.b16 %v6116_v11  ;;  %v12485_v30 = vrot.slane %v12470_v34, 4 }
 0x2b1   : > { %v12486_v0 = vrot.slane %v12470_v34, 6  ;;  %v6206_v60 = vunpack.c.l.b16 %v6130_v20  ;;  %v5548_v25 = vadd.f32 %v8406_v48, %v12471_v36  ;;  %v12487_v7 = vrot.slane %v12471_v36, 2 }
 0x2b2   : > { %v5546_v54 = vadd.f32 %v8404_v2, %v12485_v30  ;;  %v12488_v22 = vrot.slane %v12471_v36, 4  ;;  %v12489_v17 = vrot.slane %v12471_v36, 6  ;;  %v5600_v52 = vmul.f32 0.25, %v5536_v5  ;;  %v11381_v5 = vpop.f32.mrf.mxu3 }
 0x2b3   : > { %v5547_v39 = vadd.f32 %v8405_v45, %v12486_v0  ;;  %v5549_v6 = vadd.f32 %v8407_v51, %v12487_v7  ;;  %v5601_v62 = vmul.f32 0.25, %v5537_v1  ;;  %v5602_v11 = vmul.f32 0.25, %v5538_v23  ;;  %v11383_v23 = vpop.f32.mrf.mxu0 }
 0x2b4   : > { %v5550_v49 = vadd.f32 %v8408_v58, %v12488_v22  ;;  %v5551_v46 = vadd.f32 %v8409_v28, %v12489_v17  ;;  %v6212_v16 = vpack.c.b16 %v6206_v60, %v6205_v43  ;;  %v5603_v2 = vmul.f32 0.25, %v5539_v38  ;;  %12490 = vst [vmem:[#allocation16_spill] sm:$0xff] %v11383_v23  ;;  %v6016_v23 = vld [vmem:[#allocation3 + $0x24] sm:$0x1] }
 0x2b5   : > { %v5604_v61 = vmul.f32 0.25, %v5540_v41  ;;  %v5605_v34 = vmul.f32 0.25, %v5541_v53  ;;  %v5606_v45 = vmul.f32 0.25, %v5542_v3  ;;  %v5608_v20 = vmul.f32 0.25, %v5544_v15  ;;  %v11385_v3 = vpop.f32.mrf.mxu1 }
 0x2b6   : > { %v5609_v30 = vmul.f32 0.25, %v5545_v40  ;;  %v5610_v48 = vmul.f32 0.25, %v5546_v54  ;;  %6280 = vmatmul.bf16.gmra.mxu1 %v6212_v16  ;;  %v5607_v0 = vmul.f32 0.25, %v5543_v31  ;;  %v5611_v51 = vmul.f32 0.25, %v5547_v39  ;;  %v8962_v16 = vld [vmem:[%s12290_s2 + $0x118] sm:$0xff] }
 0x2b7   : > { %v5612_v7 = vmul.f32 0.25, %v5548_v25  ;;  %v5613_v14 = vmul.f32 0.25, %v5549_v6  ;;  %v5614_v58 = vmul.f32 0.25, %v5550_v49  ;;  %v5684_v22 = vpack.c.bf16 %v5600_v52, %v5600_v52  ;;  %6915 = vmatpush.bf16.msra.mxu2 %v8962_v16 }
 0x2b8   : > { %v5685_v36 = vpack.c.bf16 %v5601_v62, %v5601_v62  ;;  %v5686_v28 = vpack.c.bf16 %v5602_v11, %v5602_v11  ;;  %v5615_v1 = vmul.f32 0.25, %v5551_v46  ;;  %v5687_v38 = vpack.c.bf16 %v5603_v2, %v5603_v2  ;;  %v8971_v46 = vld [vmem:[%s12290_s2 + $0x160] sm:$0xff]  ;;  %v11390_v62 = vpop.f32.mrf.mxu2 }
 0x2b9   : > { %v5688_v41 = vpack.c.bf16 %v5604_v61, %v5604_v61  ;;  %v5689_v53 = vpack.c.bf16 %v5605_v34, %v5605_v34  ;;  %v5690_v15 = vpack.c.bf16 %v5606_v45, %v5606_v45  ;;  %v5692_v40 = vpack.c.bf16 %v5608_v20, %v5608_v20  ;;  %12491 = vst [vmem:[#allocation17_spill] sm:$0xff] %v11390_v62  ;;  %v8955_v11 = vld [vmem:[%s12290_s2 + $0xe0] sm:$0xff] }
 0x2ba   : > { %v5693_v31 = vpack.c.bf16 %v5609_v30, %v5609_v30  ;;  %v5694_v43 = vpack.c.bf16 %v5610_v48, %v5610_v48  ;;  %v5691_v54 = vpack.c.bf16 %v5607_v0, %v5607_v0  ;;  %v5695_v39 = vpack.c.bf16 %v5611_v51, %v5611_v51  ;;  %7087 = vmatpush.bf16.msrb.mxu3 %v8971_v46  ;;  %v8970_v0 = vld [vmem:[%s12290_s2 + $0x158] sm:$0xff] }
 0x2bb   : > { %v5696_v60 = vpack.c.bf16 %v5612_v7, %v5612_v7  ;;  %v5697_v25 = vpack.c.bf16 %v5613_v14, %v5613_v14  ;;  %v5698_v6 = vpack.c.bf16 %v5614_v58, %v5614_v58  ;;  %v5812_v49 = vunpack.c.l.b16 %v5684_v22  ;;  %6669 = vmatpush.bf16.msra.mxu1 %v8955_v11 }
 0x2bc   : > { %v5813_v17 = vunpack.c.l.b16 %v5685_v36  ;;  %v5814_v52 = vunpack.c.l.b16 %v5686_v28  ;;  %v5699_v2 = vpack.c.bf16 %v5615_v1, %v5615_v1  ;;  %v5815_v14 = vunpack.c.l.b16 %v5687_v38 }
 0x2bd   : > { %v5816_v61 = vunpack.c.l.b16 %v5688_v41  ;;  %v5817_v34 = vunpack.c.l.b16 %v5689_v53  ;;  %v5818_v45 = vunpack.c.l.b16 %v5690_v15  ;;  %v5820_v20 = vunpack.c.l.b16 %v5692_v40 }
 0x2be   : > { %v5821_v30 = vunpack.c.l.b16 %v5693_v31  ;;  %v5822_v48 = vunpack.c.l.b16 %v5694_v43  ;;  %v5819_v51 = vunpack.c.l.b16 %v5691_v54  ;;  %v5823_v7 = vunpack.c.l.b16 %v5695_v39  ;;  %7088 = vmatpush.bf16.msrb.mxu3 %v8970_v0  ;;  %v11402_v54 = vpop.f32.mrf.mxu3 }
 0x2bf   : > { %v5824_v58 = vunpack.c.l.b16 %v5696_v60  ;;  %v5825_v22 = vunpack.c.l.b16 %v5697_v25  ;;  %v5826_v36 = vunpack.c.l.b16 %v5698_v6  ;;  %v5897_v28 = vrot.slane %v5812_v49, 7  ;;  %12492 = vst [vmem:[#allocation51_spill] sm:$0xff] %v11402_v54  ;;  %v3106_v49 = vpop.f32.mrf.mxu0 }
 0x2c0   : > { %v5898_v1 = vrot.slane %v5813_v17, 6  ;;  %v5900_v38 = vrot.slane %v5814_v52, 5  ;;  %v5827_v41 = vunpack.c.l.b16 %v5699_v2  ;;  %v5902_v53 = vrot.slane %v5815_v14, 4  ;;  %v8954_v17 = vld [vmem:[%s12290_s2 + $0xd8] sm:$0xff]  ;;  %v8961_v52 = vld [vmem:[%s12290_s2 + $0x110] sm:$0xff] }
 0x2c1   : > { %v5904_v15 = vrot.slane %v5816_v61, 3  ;;  %v5906_v40 = vrot.slane %v5817_v34, 2  ;;  %v5910_v43 = vrot.slane %v5820_v20, 7  ;;  %v5911_v46 = vrot.slane %v5821_v30, 6  ;;  %v6022_v34 = vld [vmem:[#allocation3 + $0x2c] sm:$0x1]  ;;  %v3506_v20 = vpop.f32.mrf.mxu1  ;;  %6670 = vmatpush.bf16.msra.mxu1 %v8954_v17  ;;  %6916 = vmatpush.bf16.msra.mxu2 %v8961_v52 }
 0x2c2   : > { %v5899_v31 = vsel %vm5854_vm14, %v5898_v1, %v5897_v28  ;;  %v5913_v11 = vrot.slane %v5822_v48, 5  ;;  %v5908_v60 = vrot.slane %v5818_v45, 1  ;;  %v5915_v25 = vrot.slane %v5823_v7, 4  ;;  %v4570_v7 = vld [vmem:[#allocation2 + $0x6c] sm:$0xe] }
 0x2c3   : > { %v5901_v39 = vsel %vm5857_vm15, %v5900_v38, %v5899_v31  ;;  %v5917_v6 = vrot.slane %v5824_v58, 3  ;;  %v5912_v2 = vsel %vm5854_vm14, %v5911_v46, %v5910_v43  ;;  %v5919_v14 = vrot.slane %v5825_v22, 2 }
 0x2c4   : > { %v5903_v16 = vsel %vm5860_vm0, %v5902_v53, %v5901_v39  ;;  %v5969_v61 = vpack.c.b16 %v5819_v51, %v5819_v51  ;;  %v5914_v30 = vsel %vm5857_vm15, %v5913_v11, %v5912_v2  ;;  %v5921_v48 = vrot.slane %v5826_v36, 1  ;;  %v3820_v51 = vpop.f32.mrf.mxu2  ;;  %v6013_v36 = vld [vmem:[#allocation3 + $0x20] sm:$0xf] }
 0x2c5   : > { %v5905_v45 = vsel %vm5863_vm1, %v5904_v15, %v5903_v16  ;;  %v5971_v0 = vpack.c.b16 %v5827_v41, %v5827_v41  ;;  %v5916_v28 = vsel %vm5860_vm0, %v5915_v25, %v5914_v30  ;;  %v11420_v22 = vadd.f32 %v3106_v49, %v10836_v19  ;;  %v9147_v19 = vld [vmem:[#allocation2 + $0x70] sm:$0xf] }
 0x2c6   : > { %v5907_v58 = vsel %vm5866_vm3, %v5906_v40, %v5905_v45  ;;  %v6017_v1 = vsel %vm9450_vm10, %v5969_v61, %v6016_v23  ;;  %v5918_v53 = vsel %vm5863_vm1, %v5917_v6, %v5916_v28  ;;  %v3556_v15 = vadd.f32 %v3506_v20, %v11037_v10  ;;  %v9148_v6 = vld [vmem:[#allocation2 + $0x74] sm:$0x1]  ;;  %v12495_v61 = vld [vmem:[#allocation23_spill] sm:$0xff] }
 0x2c7   : > { %v5909_v38 = vsel %vm5869_vm4, %v5908_v60, %v5907_v58  ;;  %6018 = vst [vmem:[#allocation3 + $0x24] sm:$0x1] %v6017_v1  ;;  %v6023_v41 = vsel %vm9450_vm10, %v5971_v0, %v6022_v34  ;;  %v5920_v40 = vsel %vm5866_vm3, %v5919_v14, %v5918_v53  ;;  %v8329_v23 = vrot.slane %v4570_v7, 9  ;;  %v6019_v60 = vld [vmem:[#allocation3 + $0x28] sm:$0xf]  ;;  %v12496_v0 = vld [vmem:[#allocation24_spill] sm:$0xff]  ;;  %v11448_v58 = vpop.f32.mrf.mxu3 }
 0x2c8   : > { %v5968_v31 = vpack.c.b16 %v5909_v38, %v5909_v38  ;;  %6024 = vst [vmem:[#allocation3 + $0x2c] sm:$0x1] %v6023_v41  ;;  %v4678_v43 = vrot.slane %v9147_v19, 5  ;;  %v12493_v46 = vrot.slane %v11005_v8, 2  ;;  %v5922_v39 = vsel %vm5869_vm4, %v5921_v48, %v5920_v40 }
 0x2c9   : > { %v11431_v25 = vadd.f32 %v3820_v51, %v3556_v15  ;;  %v4681_v49 = vrot.slane %v9148_v6, 5  ;;  %v5970_v17 = vpack.c.b16 %v5922_v39, %v5922_v39  ;;  %v11438_v2 = vmul.f32 0.25, %v11333_v13  ;;  %12497 = vst [vmem:[#allocation23_spill] sm:$0xff] %v11448_v58  ;;  %v12498_v51 = vld [vmem:[#allocation6_spill] sm:$0xff]  ;;  %v12499_v15 = vld [vmem:[#allocation7_spill] sm:$0xff] }
 0x2ca   : > { %v8427_v11 = vrot.slane %v12493_v46, 9  ;;  %v6014_v10 = vsel %vm9436_vm9, %v5968_v31, %v6013_v36  ;;  %v4679_v52 = vsel %vm9596_vm13, %v8329_v23, %v4678_v43  ;;  %v4680_v16 = vrot.slane %v4678_v43, 4 }
 0x2cb   : > { %12494 = vst [vmem:[#allocation52_spill] sm:$0xff] %v11431_v25  ;;  %v4769_v14 = vunpack.c.l.b16 %v4679_v52  ;;  %v5254_v34 = vrot.slane %v12495_v61, 2  ;;  %v5255_v20 = vrot.slane %v12495_v61, 4  ;;  %v6020_v45 = vsel %vm9436_vm9, %v5970_v17, %v6019_v60 }
 0x2cc   : > { %6015 = vst [vmem:[#allocation3 + $0x20] sm:$0xf] %v6014_v10  ;;  %v4682_v30 = vsel %vm9596_vm13, %v4680_v16, %v4681_v49  ;;  %v5256_v48 = vrot.slane %v12495_v61, 6  ;;  %v8410_v49 = vrot.slane %v12495_v61, 9  ;;  %v11470_v40 = vadd.f32 %v10793_v21, %v10813_v29 }
 0x2cd   : > { %6021 = vst [vmem:[#allocation3 + $0x28] sm:$0xf] %v6020_v45  ;;  %v4770_v13 = vunpack.c.l.b16 %v4682_v30  ;;  %v8411_v17 = vrot.slane %v5254_v34, 9  ;;  %v8412_v52 = vrot.slane %v5255_v20, 9  ;;  %v8414_v45 = vrot.slane %v12496_v0, 9 }
 0x2ce   : > { %v6071_v53 = vld [vmem:[#allocation3 + $0x24] sm:$0x1]  ;;  %v8413_v16 = vrot.slane %v5256_v48, 9 }
 0x2cf   : > { %v6072_v23 = vld [vmem:[#allocation3 + $0x2c] sm:$0x1]  ;;  %v6439_v19 = vrot.slane %v6071_v53, 5  ;;  %v4794_v43 = vpack.c.b16 %v4770_v13, %v4769_v14  ;;  %v6141_v46 = vshll.u32 %v6071_v53, 16  ;;  %v11461_v30 = vld [vmem:[%s9333_s9 + $0x7c] sm:$0xf]  ;;  %v5554_v7 = vadd.f32 %v8412_v52, %v5255_v20 }
 0x2d0   : > { %v6443_v60 = vrot.slane %v6072_v23, 5  ;;  %v6155_v6 = vshll.u32 %v6072_v23, 16  ;;  %v12500_v14 = vrot.slane %v11005_v8, 2  ;;  %v5555_v25 = vadd.f32 %v8413_v16, %v5256_v48 }
 0x2d1   : > { %4910 = vmatmul.bf16.gmra.mxu0 %v4794_v43  ;;  %v6143_v10 = vrot.slane %v6141_v46, 5  ;;  %v11474_v43 = vadd.f32 %v10831_v56, %v10838_v63  ;;  %v12503_v20 = vrot.slane %v12496_v0, 4  ;;  %v12507_v52 = vrot.slane %v12498_v51, 6 }
 0x2d2   : > { %v11466_v13 = vadd.f32 %v8427_v11, %v12500_v14  ;;  %v6157_v38 = vrot.slane %v6155_v6, 5  ;;  %v5552_v11 = vadd.f32 %v8410_v49, %v12495_v61  ;;  %v5553_v14 = vadd.f32 %v8411_v17, %v5254_v34 }
 0x2d3   : > { %v6401_v53 = vld [vmem:[#allocation3 + $0x20] sm:$0xe]  ;;  %v12502_v61 = vrot.slane %v12496_v0, 2  ;;  %v8416_v48 = vrot.slane %v12503_v20, 9  ;;  %v8421_v16 = vrot.slane %v12507_v52, 9  ;;  %v12513_v52 = vrot.slane %v12496_v0, 6 }
 0x2d4   : > { %v8476_v39 = vld [vmem:[#allocation3 + $0x20] sm:$0xf]  ;;  %v8518_v46 = vrot.slane %v6401_v53, 9  ;;  %v6402_v31 = vld [vmem:[#allocation3 + $0x28] sm:$0xe] }
 0x2d5   : > { %v6047_v23 = vld [vmem:[#allocation3 + $0x20] sm:$0xf]  ;;  %v8921_v1 = vld [vmem:[#allocation3 + $0x24] sm:$0xf0]  ;;  %v8519_v29 = vrot.slane %v6402_v31, 9  ;;  %v8415_v34 = vrot.slane %v12502_v61, 9 }
 0x2d6   : > { %v6132_v41 = vshrl.u32 %v6047_v23, 16  ;;  %v6135_v36 = vshll.u32 %v6047_v23, 16  ;;  %v6048_v28 = vld [vmem:[#allocation3 + $0x28] sm:$0xf]  ;;  %v6440_v21 = vsel %vm9596_vm13, %v8518_v46, %v6439_v19  ;;  %v8477_v58 = vor.u32 %v8921_v1, %v8476_v39  ;;  %v11481_v23 = vpop.f32.mrf.mxu3 }
 0x2d7   : > { %v6473_v56 = vunpack.c.l.b16 %v6440_v21  ;;  %v6146_v53 = vshrl.u32 %v6048_v28, 16  ;;  %v6149_v54 = vshll.u32 %v6048_v28, 16  ;;  %v6444_v6 = vsel %vm9596_vm13, %v8519_v29, %v6443_v60  ;;  %12501 = vst [vmem:[#allocation24_spill] sm:$0xff] %v11481_v23 }
 0x2d8   : > { %v6134_v62 = vrot.slane %v6132_v41, 4  ;;  %v6137_v63 = vrot.slane %v6135_v36, 5  ;;  %6386 = vmatmul.bf16.gmra.mxu2 %v8477_v58  ;;  %v12504_v31 = vrot.slane %v12496_v0, 6  ;;  %v6474_v41 = vunpack.c.l.b16 %v6444_v6 }
 0x2d9   : > { %v6148_v36 = vrot.slane %v6146_v53, 4  ;;  %v6151_v39 = vrot.slane %v6149_v54, 5  ;;  %v8418_v28 = vrot.slane %v12498_v51, 9  ;;  %v12505_v60 = vrot.slane %v12498_v51, 2 }
 0x2da   : > { %v8417_v1 = vrot.slane %v12504_v31, 9  ;;  %v6138_v19 = vor.u32 %v6137_v63, %v6134_v62  ;;  %v12506_v58 = vrot.slane %v12498_v51, 4  ;;  %v6479_v46 = vpack.c.b16 %v6474_v41, %v6473_v56 }
 0x2db   : > { %v8419_v49 = vrot.slane %v12505_v60, 9  ;;  %v6152_v29 = vor.u32 %v6151_v39, %v6148_v36  ;;  %v8422_v61 = vrot.slane %v12499_v15, 9  ;;  %v12508_v62 = vrot.slane %v12499_v15, 2 }
 0x2dc   : > { %v8420_v17 = vrot.slane %v12506_v58, 9  ;;  %v6139_v21 = vrot.slane %v6138_v19, 4  ;;  %v12509_v54 = vrot.slane %v12499_v15, 4  ;;  %v12510_v6 = vrot.slane %v12499_v15, 6  ;;  %6551 = vmatmul.bf16.gmra.mxu3 %v6479_v46 }
 0x2dd   : > { %v8423_v63 = vrot.slane %v12508_v62, 9  ;;  %v5556_v31 = vadd.f32 %v8414_v45, %v12496_v0  ;;  %v6153_v56 = vrot.slane %v6152_v29, 4  ;;  %v12511_v41 = vrot.slane %v12496_v0, 2 }
 0x2de   : > { %v8424_v53 = vrot.slane %v12509_v54, 9  ;;  %v8425_v20 = vrot.slane %v12510_v6, 9  ;;  %v6144_v60 = vsel %vm9272_vm2, %v6139_v21, %v6143_v10  ;;  %v12512_v36 = vrot.slane %v12496_v0, 4  ;;  %v11524_v0 = vpop.f32.mrf.mxu1 }
 0x2df   : > { %v5557_v19 = vadd.f32 %v8415_v34, %v12511_v41  ;;  %v6207_v58 = vunpack.c.l.b16 %v6144_v60  ;;  %v5559_v62 = vadd.f32 %v8417_v1, %v12513_v52  ;;  %v5560_v54 = vadd.f32 %v8418_v28, %v12498_v51  ;;  %v11522_v41 = vpop.f32.mrf.mxu0  ;;  %12518 = vst [vmem:[#allocation7_spill] sm:$0xff] %v11524_v0 }
 0x2e0   : > { %v5558_v39 = vadd.f32 %v8416_v48, %v12512_v36  ;;  %v12514_v6 = vrot.slane %v12498_v51, 2  ;;  %v6158_v46 = vsel %vm9272_vm2, %v6153_v56, %v6157_v38  ;;  %v12515_v10 = vrot.slane %v12498_v51, 4  ;;  %12517 = vst [vmem:[#allocation6_spill] sm:$0xff] %v11522_v41 }
 0x2e1   : > { %v12516_v34 = vrot.slane %v12498_v51, 6  ;;  %v5564_v48 = vadd.f32 %v8422_v61, %v12499_v15  ;;  %v6208_v60 = vunpack.c.l.b16 %v6158_v46  ;;  %v12519_v1 = vrot.slane %v12499_v15, 2  ;;  %v11532_v61 = vpop.f32.mrf.mxu3 }
 0x2e2   : > { %v5561_v45 = vadd.f32 %v8419_v49, %v12514_v6  ;;  %v5562_v21 = vadd.f32 %v8420_v17, %v12515_v10  ;;  %v12520_v49 = vrot.slane %v12499_v15, 4  ;;  %v12521_v38 = vrot.slane %v12499_v15, 6  ;;  %12522 = vst [vmem:[#allocation53_spill] sm:$0xff] %v11532_v61 }
 0x2e3   : > { %v5563_v29 = vadd.f32 %v8421_v16, %v12516_v34  ;;  %v5565_v28 = vadd.f32 %v8423_v63, %v12519_v1  ;;  %v5616_v17 = vmul.f32 0.25, %v5552_v11  ;;  %v5617_v52 = vmul.f32 0.25, %v5553_v14 }
 0x2e4   : > { %v5566_v36 = vadd.f32 %v8424_v53, %v12520_v49  ;;  %v5567_v56 = vadd.f32 %v8425_v20, %v12521_v38  ;;  %v5618_v51 = vmul.f32 0.25, %v5554_v7  ;;  %v5619_v16 = vmul.f32 0.25, %v5555_v25 }
 0x2e5   : > { %v6213_v6 = vpack.c.b16 %v6208_v60, %v6207_v58  ;;  %v5620_v46 = vmul.f32 0.25, %v5556_v31  ;;  %v5621_v10 = vmul.f32 0.25, %v5557_v19  ;;  %v5622_v34 = vmul.f32 0.25, %v5558_v39 }
 0x2e6   : > { %v5624_v41 = vmul.f32 0.25, %v5560_v54  ;;  %v5625_v23 = vmul.f32 0.25, %v5561_v45  ;;  %v5626_v0 = vmul.f32 0.25, %v5562_v21  ;;  %v5627_v63 = vmul.f32 0.25, %v5563_v29 }
 0x2e7   : > { %6285 = vmatmul.bf16.gmra.mxu1 %v6213_v6  ;;  %v5623_v1 = vmul.f32 0.25, %v5559_v62  ;;  %v5628_v53 = vmul.f32 0.25, %v5564_v48  ;;  %v5629_v49 = vmul.f32 0.25, %v5565_v28  ;;  %v5631_v15 = vmul.f32 0.25, %v5567_v56 }
 0x2e8   : > { %v5700_v20 = vpack.c.bf16 %v5616_v17, %v5616_v17  ;;  %v5701_v11 = vpack.c.bf16 %v5617_v52, %v5617_v52  ;;  %v5702_v14 = vpack.c.bf16 %v5618_v51, %v5618_v51  ;;  %v5703_v7 = vpack.c.bf16 %v5619_v16, %v5619_v16  ;;  %v8969_v17 = vld [vmem:[%s12290_s2 + $0x150] sm:$0xff] }
 0x2e9   : > { %v5630_v25 = vmul.f32 0.25, %v5566_v36  ;;  %v5704_v58 = vpack.c.bf16 %v5620_v46, %v5620_v46  ;;  %v5705_v60 = vpack.c.bf16 %v5621_v10, %v5621_v10  ;;  %v5706_v38 = vpack.c.bf16 %v5622_v34, %v5622_v34  ;;  %v11537_v36 = vpop.f32.mrf.mxu2  ;;  %v4876_v46 = vpop.f32.mrf.mxu0  ;;  %7089 = vmatpush.bf16.msrb.mxu3 %v8969_v17  ;;  %v6028_v17 = vld [vmem:[#allocation3 + $0x34] sm:$0x1] }
 0x2ea   : > { %v5708_v31 = vpack.c.bf16 %v5624_v41, %v5624_v41  ;;  %v5709_v19 = vpack.c.bf16 %v5625_v23, %v5625_v23  ;;  %v5710_v39 = vpack.c.bf16 %v5626_v0, %v5626_v0  ;;  %v5711_v54 = vpack.c.bf16 %v5627_v63, %v5627_v63  ;;  %12523 = vst [vmem:[#allocation54_spill] sm:$0xff] %v11537_v36  ;;  %v8953_v23 = vld [vmem:[%s12290_s2 + $0xd0] sm:$0xff]  ;;  %v8960_v41 = vld [vmem:[%s12290_s2 + $0x108] sm:$0xff]  ;;  %v3511_v10 = vpop.f32.mrf.mxu1 }
 0x2eb   : > { %v5707_v45 = vpack.c.bf16 %v5623_v1, %v5623_v1  ;;  %v5712_v21 = vpack.c.bf16 %v5628_v53, %v5628_v53  ;;  %v5713_v29 = vpack.c.bf16 %v5629_v49, %v5629_v49  ;;  %v5715_v6 = vpack.c.bf16 %v5631_v15, %v5631_v15  ;;  %6671 = vmatpush.bf16.msra.mxu1 %v8953_v23  ;;  %v8968_v49 = vld [vmem:[%s12290_s2 + $0x148] sm:$0xff] }
 0x2ec   : > { %v5828_v62 = vunpack.c.l.b16 %v5700_v20  ;;  %v5829_v48 = vunpack.c.l.b16 %v5701_v11  ;;  %v5830_v28 = vunpack.c.l.b16 %v5702_v14  ;;  %v5831_v56 = vunpack.c.l.b16 %v5703_v7  ;;  %v11548_v7 = vpop.f32.mrf.mxu3  ;;  %6917 = vmatpush.bf16.msra.mxu2 %v8960_v41 }
 0x2ed   : > { %v5714_v0 = vpack.c.bf16 %v5630_v25, %v5630_v25  ;;  %v5832_v52 = vunpack.c.l.b16 %v5704_v58  ;;  %v5833_v51 = vunpack.c.l.b16 %v5705_v60  ;;  %v5834_v16 = vunpack.c.l.b16 %v5706_v38  ;;  %7090 = vmatpush.bf16.msrb.mxu3 %v8968_v49 }
 0x2ee   : > { %v5836_v34 = vunpack.c.l.b16 %v5708_v31  ;;  %v5837_v63 = vunpack.c.l.b16 %v5709_v19  ;;  %v5838_v1 = vunpack.c.l.b16 %v5710_v39  ;;  %v5839_v53 = vunpack.c.l.b16 %v5711_v54 }
 0x2ef   : > { %v5835_v15 = vunpack.c.l.b16 %v5707_v45  ;;  %v5840_v20 = vunpack.c.l.b16 %v5712_v21  ;;  %v5841_v11 = vunpack.c.l.b16 %v5713_v29  ;;  %v5843_v14 = vunpack.c.l.b16 %v5715_v6  ;;  %v6034_v21 = vld [vmem:[#allocation3 + $0x3c] sm:$0x1] }
 0x2f0   : > { %v5923_v25 = vrot.slane %v5828_v62, 7  ;;  %v5924_v58 = vrot.slane %v5829_v48, 6  ;;  %v5926_v60 = vrot.slane %v5830_v28, 5  ;;  %v5928_v38 = vrot.slane %v5831_v56, 4  ;;  %v8952_v48 = vld [vmem:[%s12290_s2 + $0xc8] sm:$0xff]  ;;  %v8967_v28 = vld [vmem:[%s12290_s2 + $0x140] sm:$0xff] }
 0x2f1   : > { %v5842_v31 = vunpack.c.l.b16 %v5714_v0  ;;  %v5930_v19 = vrot.slane %v5832_v52, 3  ;;  %v5932_v39 = vrot.slane %v5833_v51, 2  ;;  %v5936_v54 = vrot.slane %v5836_v34, 7  ;;  %v3825_v34 = vpop.f32.mrf.mxu2  ;;  %6672 = vmatpush.bf16.msra.mxu1 %v8952_v48  ;;  %7091 = vmatpush.bf16.msrb.mxu3 %v8967_v28 }
 0x2f2   : > { %v5925_v23 = vsel %vm5854_vm14, %v5924_v58, %v5923_v25  ;;  %v5937_v61 = vrot.slane %v5837_v63, 6  ;;  %v5939_v36 = vrot.slane %v5838_v1, 5  ;;  %v5941_v45 = vrot.slane %v5839_v53, 4  ;;  %v11568_v25 = vpop.f32.mrf.mxu1 }
 0x2f3   : > { %v5927_v29 = vsel %vm5857_vm15, %v5926_v60, %v5925_v23  ;;  %v5934_v6 = vrot.slane %v5834_v16, 1  ;;  %v5943_v41 = vrot.slane %v5840_v20, 3  ;;  %v5945_v62 = vrot.slane %v5841_v11, 2  ;;  %v8959_v16 = vld [vmem:[%s12290_s2 + $0x100] sm:$0xff]  ;;  %v4571_v20 = vld [vmem:[#allocation2 + $0x78] sm:$0xe]  ;;  %v4878_v11 = vpop.f32.mrf.mxu0 }
 0x2f4   : > { %v5929_v56 = vsel %vm5860_vm0, %v5928_v38, %v5927_v29  ;;  %v5938_v0 = vsel %vm5854_vm14, %v5937_v61, %v5936_v54  ;;  %v5973_v52 = vpack.c.b16 %v5835_v15, %v5835_v15  ;;  %v5975_v51 = vpack.c.b16 %v5843_v14, %v5843_v14  ;;  %v9150_v54 = vld [vmem:[#allocation2 + $0x7c] sm:$0xf]  ;;  %6918 = vmatpush.bf16.msra.mxu2 %v8959_v16  ;;  %v9151_v29 = vld [vmem:[#allocation2 + $0x80] sm:$0x1]  ;;  %v11603_v16 = vld [vmem:[#allocation3 + $0x14] sm:$0x1] }
 0x2f5   : > { %v5931_v63 = vsel %vm5863_vm1, %v5930_v19, %v5929_v56  ;;  %v5940_v1 = vsel %vm5857_vm15, %v5939_v36, %v5938_v0  ;;  %v5947_v53 = vrot.slane %v5842_v31, 1  ;;  %v11566_v49 = vadd.f32 %v4876_v46, %v11470_v40  ;;  %v6025_v46 = vld [vmem:[#allocation3 + $0x30] sm:$0xf]  ;;  %v11592_v0 = vld [vmem:[#allocation3 + $0xc] sm:$0x1] }
 0x2f6   : > { %v5933_v61 = vsel %vm5866_vm3, %v5932_v39, %v5931_v63  ;;  %v5942_v15 = vsel %vm5860_vm0, %v5941_v45, %v5940_v1  ;;  %v6029_v14 = vsel %vm9450_vm10, %v5973_v52, %v6028_v17  ;;  %v6035_v58 = vsel %vm9450_vm10, %v5975_v51, %v6034_v21  ;;  %v6031_v45 = vld [vmem:[#allocation3 + $0x38] sm:$0xf]  ;;  %v6949_v63 = vld [vmem:[#allocation3 + $0x10] sm:$0xe] }
 0x2f7   : > { %v5935_v36 = vsel %vm5869_vm4, %v5934_v6, %v5933_v61  ;;  %v5944_v40 = vsel %vm5863_vm1, %v5943_v41, %v5942_v15  ;;  %6030 = vst [vmem:[#allocation3 + $0x34] sm:$0x1] %v6029_v14  ;;  %v5090_v60 = vmul.f32 %v11566_v49, %v11566_v49  ;;  %v3558_v38 = vadd.f32 %v3511_v10, %v11095_v18  ;;  %v11585_v41 = vpop.f32.mrf.mxu3  ;;  %v6948_v10 = vld [vmem:[#allocation3 + $0x8] sm:$0xe]  ;;  %v8994_v15 = vld [vmem:[%s12290_s2 + $0x1f8] sm:$0xff] }
 0x2f8   : > { %v5946_v31 = vsel %vm5866_vm3, %v5945_v62, %v5944_v40  ;;  %v5972_v19 = vpack.c.b16 %v5935_v36, %v5935_v36  ;;  %6036 = vst [vmem:[#allocation3 + $0x3c] sm:$0x1] %v6035_v58  ;;  %v8330_v39 = vrot.slane %v4571_v20, 9  ;;  %v4685_v17 = vrot.slane %v9150_v54, 5  ;;  %v8951_v61 = vld [vmem:[%s12290_s2 + $0xc0] sm:$0xff]  ;;  %v9002_v14 = vld [vmem:[%s12290_s2 + $0x238] sm:$0xff]  ;;  %7463 = vmatpush.bf16.msrb.mxu2 %v8994_v15 }
 0x2f9   : > { %v5948_v23 = vsel %vm5869_vm4, %v5947_v53, %v5946_v31  ;;  %v11583_v21 = vadd.f32 %v3825_v34, %v3558_v38  ;;  %v4688_v6 = vrot.slane %v9151_v29, 5  ;;  %v4957_v18 = vadd.f32 %v4878_v11, %v11474_v43  ;;  %v11609_v11 = vpop.f32.mrf.mxu2  ;;  %v11624_v31 = vld [vmem:[#allocation3 + $0x8] sm:$0xf]  ;;  %6673 = vmatpush.bf16.msra.mxu1 %v8951_v61  ;;  %7636 = vmatpush.bf16.msra.mxu3 %v9002_v14  ;;  %v4572_v58 = vld [vmem:[#allocation2 + $0x84] sm:$0xe] }
 0x2fa   : > { %v5974_v62 = vpack.c.b16 %v5948_v23, %v5948_v23  ;;  %v6026_v48 = vsel %vm9436_vm9, %v5972_v19, %v6025_v46  ;;  %v4686_v28 = vsel %vm9596_vm13, %v8330_v39, %v4685_v17  ;;  %v4687_v56 = vrot.slane %v4685_v17, 4  ;;  %v3516_v19 = vpop.f32.mrf.mxu1 }
 0x2fb   : > { %6027 = vst [vmem:[#allocation3 + $0x30] sm:$0xf] %v6026_v48  ;;  %v4771_v52 = vunpack.c.l.b16 %v4686_v28  ;;  %v9006_v43 = vpack.c.bf16 %v4957_v18, %v11566_v49  ;;  %v5052_v51 = vadd.f32 %v4957_v18, %v11566_v49  ;;  %v5091_v34 = vmul.f32 %v4957_v18, %v4957_v18  ;;  %v4881_v38 = vpop.f32.mrf.mxu0 }
 0x2fc   : > { %v6032_v1 = vsel %vm9436_vm9, %v5974_v62, %v6031_v45  ;;  %v4689_v53 = vsel %vm9596_vm13, %v4687_v56, %v4688_v6  ;;  %v8634_v20 = vrot.slane %v6948_v10, 9  ;;  %v4533_v49 = vadd.f32 %v10856_v27, %v10858_v24 }
 0x2fd   : > { %6033 = vst [vmem:[#allocation3 + $0x38] sm:$0xf] %v6032_v1  ;;  %v4772_v36 = vunpack.c.l.b16 %v4689_v53  ;;  %v5122_v40 = vadd.f32 %v5091_v34, %v5090_v60  ;;  %v6974_v46 = vrot.slane %v11592_v0, 5  ;;  %v12524_v27 = vrot.slane %v11005_v8, 4 }
 0x2fe   : > { %v11631_v39 = vmul.f32 0.25, %v11466_v13  ;;  %v5716_v54 = vpack.c.bf16 %v11438_v2, %v11438_v2  ;;  %v6073_v17 = vld [vmem:[#allocation3 + $0x34] sm:$0x1]  ;;  %9007 = vst [vmem:[%s11599_s16] sm:$0xff] %v9006_v43   ;;  %v11636_v60 = vadd.f32 %v4881_v38, %v4533_v49  ;;  %v8635_v6 = vrot.slane %v6949_v63, 9  ;;  %v8993_v38 = vld [vmem:[%s12290_s2 + $0x1f0] sm:$0xff] }
 0x2ff   : > { %v11628_v24 = vrot.slane %v12524_v27, 9  ;;  %v6074_v23 = vld [vmem:[#allocation3 + $0x3c] sm:$0x1]  ;;  %v4795_v45 = vpack.c.b16 %v4772_v36, %v4771_v52  ;;  %v6169_v29 = vshll.u32 %v6073_v17, 16  ;;  %v6978_v18 = vrot.slane %v11603_v16, 5  ;;  %7464 = vmatpush.bf16.msrb.mxu2 %v8993_v38 }
 0x300   : > { %v6447_v10 = vrot.slane %v6073_v17, 5  ;;  %v6183_v62 = vshll.u32 %v6074_v23, 16  ;;  %v11641_v13 = vsel %vm9596_vm13, %v8634_v20, %v6974_v46  ;;  %v6720_v2 = vshrl.u32 %v11624_v31, 16 }
 0x301   : > { %v6451_v48 = vrot.slane %v6074_v23, 5  ;;  %4915 = vmatmul.bf16.gmra.mxu0 %v4795_v45  ;;  %v11644_v28 = vrot.slane %v6169_v29, 5  ;;  %v11647_v56 = vadd.f32 %v5052_v51, %v11636_v60  ;;  %v5092_v52 = vmul.f32 %v11636_v60, %v11636_v60  ;;  %v3830_v17 = vpop.f32.mrf.mxu2 }
 0x302   : > { %v12525_v43 = vunpack.c.l.bf16 %v11327_v50  ;;  %v12526_v34 = vunpack.c.l.bf16 %v11461_v30  ;;  %v11657_v1 = vunpack.c.l.b16 %v5716_v54  ;;  %v6403_v53 = vld [vmem:[#allocation3 + $0x30] sm:$0xe]  ;;  %v3560_v49 = vadd.f32 %v3516_v19, %v11175_v35  ;;  %v11666_v50 = vpop.f32.mrf.mxu3  ;;  %v8986_v30 = vld [vmem:[%s12290_s2 + $0x1b8] sm:$0xff] }
 0x303   : > { %v8480_v20 = vld [vmem:[#allocation3 + $0x30] sm:$0xf]  ;;  %v11662_v51 = vadd.f32 %v10875_v12, %v10873_v32  ;;  %v8520_v15 = vrot.slane %v6403_v53, 9  ;;  %v11664_v46 = vrot.slane %v6183_v62, 5  ;;  %12527 = vst [vmem:[#allocation55_spill] sm:$0xff] %v11666_v50  ;;  %v11676_v32 = vsel %vm9596_vm13, %v8635_v6, %v6978_v18  ;;  %7218 = vmatpush.bf16.msrb.mxu1 %v8986_v30  ;;  %v11687_v6 = vpop.f32.mrf.mxu1 }
 0x304   : > { %v11655_v63 = vadd.f32 %v12526_v34, %v12525_v43  ;;  %v6049_v61 = vld [vmem:[#allocation3 + $0x30] sm:$0xf]  ;;  %v6404_v35 = vld [vmem:[#allocation3 + $0x38] sm:$0xe]  ;;  %v11679_v54 = vadd.f32 %v5122_v40, %v5092_v52  ;;  %v11683_v23 = vadd.f32 %v10904_v44, %v10892_v37  ;;  %v4883_v34 = vpop.f32.mrf.mxu0  ;;  %v6722_v44 = vrot.slane %v6720_v2, 4 }
 0x305   : > { %v6160_v14 = vshrl.u32 %v6049_v61, 16  ;;  %v6163_v36 = vshll.u32 %v6049_v61, 16  ;;  %v8922_v19 = vld [vmem:[#allocation3 + $0x34] sm:$0xf0]  ;;  %v6448_v45 = vsel %vm9596_vm13, %v8520_v15, %v6447_v10  ;;  %v8521_v29 = vrot.slane %v6404_v35, 9 }
 0x306   : > { %v6050_v27 = vld [vmem:[#allocation3 + $0x38] sm:$0xf]  ;;  %v8481_v62 = vor.u32 %v8922_v19, %v8480_v20  ;;  %v6475_v18 = vunpack.c.l.b16 %v6448_v45  ;;  %v6705_v61 = vld [vmem:[#allocation3 + $0x10] sm:$0xf]  ;;  %v6723_v10 = vshll.u32 %v11624_v31, 16  ;;  %v6729_v20 = vshll.u32 %v11592_v0, 16 }
 0x307   : > { %v6162_v43 = vrot.slane %v6160_v14, 4  ;;  %v6165_v53 = vrot.slane %v6163_v36, 5  ;;  %v6174_v40 = vshrl.u32 %v6050_v27, 16  ;;  %v6177_v52 = vshll.u32 %v6050_v27, 16 }
 0x308   : > { %v6452_v37 = vsel %vm9596_vm13, %v8521_v29, %v6451_v48  ;;  %6391 = vmatmul.bf16.gmra.mxu2 %v8481_v62  ;;  %v6725_v35 = vrot.slane %v6723_v10, 5  ;;  %v6731_v19 = vrot.slane %v6729_v20, 5  ;;  %v6734_v45 = vshrl.u32 %v6705_v61, 16  ;;  %v9153_v20 = vld [vmem:[#allocation2 + $0x8c] sm:$0x1] }
 0x309   : > { %v6476_v15 = vunpack.c.l.b16 %v6452_v37  ;;  %v6166_v14 = vor.u32 %v6165_v53, %v6162_v43  ;;  %v6176_v30 = vrot.slane %v6174_v40, 4  ;;  %v6179_v38 = vrot.slane %v6177_v52, 5  ;;  %v11702_v52 = vpop.f32.mrf.mxu2 }
 0x30a   : > { %v6737_v36 = vshll.u32 %v6705_v61, 16  ;;  %v6743_v48 = vshll.u32 %v11603_v16, 16  ;;  %v6726_v29 = vor.u32 %v6725_v35, %v6722_v44  ;;  %v6736_v2 = vrot.slane %v6734_v45, 4  ;;  %v8985_v16 = vld [vmem:[%s12290_s2 + $0x1b0] sm:$0xff] }
 0x30b   : > { %v6480_v27 = vpack.c.b16 %v6476_v15, %v6475_v18  ;;  %v6167_v12 = vrot.slane %v6166_v14, 4  ;;  %v6180_v50 = vor.u32 %v6179_v38, %v6176_v30  ;;  %v11694_v31 = vadd.f32 %v3830_v17, %v3560_v49  ;;  %v9001_v18 = vld [vmem:[%s12290_s2 + $0x230] sm:$0xff]  ;;  %v8992_v49 = vld [vmem:[%s12290_s2 + $0x1e8] sm:$0xff]  ;;  %7219 = vmatpush.bf16.msrb.mxu1 %v8985_v16  ;;  %v11717_v30 = vpop.f32.mrf.mxu1 }
 0x30c   : > { %v6739_v62 = vrot.slane %v6737_v36, 5  ;;  %v6745_v53 = vrot.slane %v6743_v48, 5  ;;  %v8331_v40 = vrot.slane %v4572_v58, 9  ;;  %v6727_v61 = vrot.slane %v6726_v29, 4  ;;  %v11710_v58 = vpop.f32.mrf.mxu3  ;;  %v4886_v37 = vpop.f32.mrf.mxu0  ;;  %7637 = vmatpush.bf16.msra.mxu3 %v9001_v18  ;;  %v9000_v38 = vld [vmem:[%s12290_s2 + $0x228] sm:$0xff]  ;;  %7465 = vmatpush.bf16.msrb.mxu2 %v8992_v49 }
 0x30d   : > { %6556 = vmatmul.bf16.gmra.mxu3 %v6480_v27  ;;  %v6172_v0 = vsel %vm9272_vm2, %v6167_v12, %v11644_v28  ;;  %v6181_v43 = vrot.slane %v6180_v50, 4  ;;  %v9152_v50 = vld [vmem:[#allocation2 + $0x88] sm:$0xf]  ;;  %v7021_v10 = vunpack.c.l.b16 %v11676_v32  ;;  %v4695_v15 = vrot.slane %v9153_v20, 5  ;;  %v11726_v32 = vld [vmem:[#allocation3 + $0x1c] sm:$0x1] }
 0x30e   : > { %v6209_v17 = vunpack.c.l.b16 %v6172_v0  ;;  %v6740_v28 = vor.u32 %v6739_v62, %v6736_v2  ;;  %v4692_v12 = vrot.slane %v9152_v50, 5  ;;  %v4959_v14 = vadd.f32 %v4883_v34, %v11662_v51  ;;  %v6950_v51 = vld [vmem:[#allocation3 + $0x18] sm:$0xe]  ;;  %v6710_v2 = vld [vmem:[#allocation3 + $0x24] sm:$0x1] }
 0x30f   : > { %v6186_v44 = vsel %vm9272_vm2, %v6181_v43, %v11664_v46  ;;  %v6732_v45 = vsel %vm9272_vm2, %v6727_v61, %v6731_v19  ;;  %v6951_v62 = vld [vmem:[#allocation3 + $0x20] sm:$0xe]  ;;  %v8636_v49 = vrot.slane %v6950_v51, 9  ;;  %v6982_v61 = vrot.slane %v11726_v32, 5 }
 0x310   : > { %v6210_v35 = vunpack.c.l.b16 %v6186_v44  ;;  %v6741_v36 = vrot.slane %v6740_v28, 4  ;;  %v4693_v46 = vsel %vm9596_vm13, %v8331_v40, %v4692_v12  ;;  %v6847_v34 = vunpack.c.l.b16 %v6732_v45  ;;  %v6707_v28 = vld [vmem:[#allocation3 + $0x18] sm:$0xf]  ;;  %7638 = vmatpush.bf16.msra.mxu3 %v9000_v38  ;;  %v12528_v44 = vld [vmem:[#allocation20_spill] sm:$0xff]  ;;  %v6709_v38 = vld [vmem:[#allocation3 + $0x20] sm:$0xf] }
 0x311   : > { %v4694_v27 = vrot.slane %v4692_v12, 4  ;;  %v4773_v48 = vunpack.c.l.b16 %v4693_v46  ;;  %v9011_v29 = vpack.c.bf16 %v4959_v14, %v11636_v60  ;;  %v5054_v43 = vadd.f32 %v11647_v56, %v4959_v14  ;;  %v8984_v56 = vld [vmem:[%s12290_s2 + $0x1a8] sm:$0xff] }
 0x312   : > { %v6214_v0 = vpack.c.b16 %v6210_v35, %v6209_v17  ;;  %v6746_v19 = vsel %vm9272_vm2, %v6741_v36, %v6745_v53  ;;  %v5093_v18 = vmul.f32 %v4959_v14, %v4959_v14  ;;  %v8637_v50 = vrot.slane %v6951_v62, 9  ;;  %v8991_v53 = vld [vmem:[%s12290_s2 + $0x1e0] sm:$0xff]  ;;  %7220 = vmatpush.bf16.msrb.mxu1 %v8984_v56 }
 0x313   : > { %v6848_v40 = vunpack.c.l.b16 %v6746_v19  ;;  %v4696_v16 = vsel %vm9596_vm13, %v4694_v27, %v4695_v15  ;;  %9083 = vst [vmem:[%s11599_s16 + $0x8] sm:$0xff] %v9011_v29   ;;  %v6986_v12 = vrot.slane %v6710_v2, 5  ;;  %v11745_v20 = vadd.f32 %v11063_v59, %v12528_v44  ;;  %v12529_v35 = vld [vmem:[#allocation19_spill] sm:$0xff]  ;;  %7466 = vmatpush.bf16.msrb.mxu2 %v8991_v53  ;;  %v4573_v19 = vld [vmem:[#allocation2 + $0x90] sm:$0xe] }
 0x314   : > { %6290 = vmatmul.bf16.gmra.mxu1 %v6214_v0  ;;  %v4774_v60 = vunpack.c.l.b16 %v4696_v16  ;;  %v5124_v17 = vadd.f32 %v11679_v54, %v5093_v18  ;;  %v11748_v14 = vadd.f32 %v4886_v37, %v11683_v23  ;;  %v3835_v54 = vpop.f32.mrf.mxu2  ;;  %v4536_v45 = vadd.f32 %v10926_v47, %v12529_v35  ;;  %v4888_v59 = vpop.f32.mrf.mxu0 }
 0x315   : > { %v6855_v15 = vpack.c.b16 %v6848_v40, %v6847_v34  ;;  %v12530_v36 = vunpack.c.l.b16 %v11641_v13  ;;  %v11756_v27 = vsel %vm9596_vm13, %v8636_v49, %v6982_v61  ;;  %v6748_v29 = vshrl.u32 %v6707_v28, 16  ;;  %v11771_v61 = vld [vmem:[#allocation3 + $0x8] sm:$0xf] }
 0x316   : > { %v4796_v51 = vpack.c.b16 %v4774_v60, %v4773_v48  ;;  %v11760_v23 = vsel %vm9596_vm13, %v8637_v50, %v6986_v12  ;;  %v5055_v37 = vadd.f32 %v5054_v43, %v11748_v14  ;;  %v5094_v47 = vmul.f32 %v11748_v14, %v11748_v14  ;;  %v11769_v43 = vpop.f32.mrf.mxu1 }
 0x317   : > { %v7028_v46 = vpack.c.b16 %v7021_v10, %v12530_v36  ;;  %v6751_v13 = vshll.u32 %v6707_v28, 16  ;;  %v11765_v10 = vpop.f32.mrf.mxu3  ;;  %v6750_v34 = vrot.slane %v6748_v29, 4  ;;  %v6757_v48 = vshll.u32 %v11726_v32, 16  ;;  %v8947_v32 = vld [vmem:[#allocation3 + $0xc] sm:$0xf0] }
 0x318   : > { %6919 = vmatmul.bf16.vlgmr.msra.gmra.mxu2 %v6855_v15  ;;  %4920 = vmatmul.bf16.gmra.mxu0 %v4796_v51  ;;  %v6762_v62 = vshrl.u32 %v6709_v38, 16  ;;  %v6765_v0 = vshll.u32 %v6709_v38, 16  ;;  %v7022_v18 = vunpack.c.l.b16 %v11756_v27  ;;  %v5125_v40 = vadd.f32 %v5124_v17, %v5094_v47  ;;  %v9154_v15 = vld [vmem:[#allocation2 + $0x94] sm:$0xf]  ;;  %v9155_v36 = vld [vmem:[#allocation2 + $0x98] sm:$0x1] }
 0x319   : > { %v6753_v16 = vrot.slane %v6751_v13, 5  ;;  %v6771_v49 = vshll.u32 %v6710_v2, 16  ;;  %v7023_v28 = vunpack.c.l.b16 %v11760_v23  ;;  %v3562_v12 = vadd.f32 %v11717_v30, %v11238_v4  ;;  %v8999_v4 = vld [vmem:[%s12290_s2 + $0x220] sm:$0xff] }
 0x31a   : > { %v6764_v60 = vrot.slane %v6762_v62, 4  ;;  %v6767_v50 = vrot.slane %v6765_v0, 5  ;;  %v6759_v53 = vrot.slane %v6757_v48, 5  ;;  %v8332_v44 = vrot.slane %v4573_v19, 9  ;;  %v11789_v48 = vld [vmem:[#allocation3 + $0x18] sm:$0xf]  ;;  %7639 = vmatpush.bf16.msra.mxu3 %v8999_v4 }
 0x31b   : > { %v6754_v56 = vor.u32 %v6753_v16, %v6750_v34  ;;  %v4699_v38 = vrot.slane %v9154_v15, 5  ;;  %v6773_v35 = vrot.slane %v6771_v49, 5  ;;  %v11776_v2 = vadd.f32 %v3835_v54, %v3562_v12  ;;  %v8983_v54 = vld [vmem:[%s12290_s2 + $0x1a0] sm:$0xff]  ;;  %v11791_v62 = vld [vmem:[#allocation3 + $0x1c] sm:$0xf0] }
 0x31c   : > { %v6768_v17 = vor.u32 %v6767_v50, %v6764_v60  ;;  %v4702_v51 = vrot.slane %v9155_v36, 5  ;;  %v4961_v47 = vadd.f32 %v4888_v59, %v4536_v45  ;;  %v11783_v30 = vpop.f32.mrf.mxu2  ;;  %v8557_v13 = vor.u32 %v8947_v32, %v11771_v61  ;;  %v12531_v0 = vld [vmem:[#allocation27_spill] sm:$0xff]  ;;  %v12532_v45 = vld [vmem:[#allocation21_spill] sm:$0xff]  ;;  %v4891_v19 = vpop.f32.mrf.mxu0  ;;  %v8990_v16 = vld [vmem:[%s12290_s2 + $0x1d8] sm:$0xff]  ;;  %7221 = vmatpush.bf16.msrb.mxu1 %v8983_v54 }
 0x31d   : > { %7092 = vmatmul.bf16.vlgmr.msrb.gmra.mxu3 %v7028_v46  ;;  %v6755_v27 = vrot.slane %v6754_v56, 4  ;;  %v4700_v29 = vsel %vm9596_vm13, %v8332_v44, %v4699_v38  ;;  %v4701_v23 = vrot.slane %v4699_v38, 4  ;;  %v4537_v59 = vadd.f32 %v12532_v45, %v12531_v0  ;;  %v6712_v12 = vld [vmem:[#allocation3 + $0x2c] sm:$0x1]  ;;  %v6952_v32 = vld [vmem:[#allocation3 + $0x28] sm:$0xe]  ;;  %7467 = vmatpush.bf16.msrb.mxu2 %v8990_v16 }
 0x31e   : > { %v6769_v34 = vrot.slane %v6768_v17, 4  ;;  %v4775_v46 = vunpack.c.l.b16 %v4700_v29  ;;  %v9016_v60 = vpack.c.bf16 %v4961_v47, %v11748_v14  ;;  %v5056_v50 = vadd.f32 %v5055_v37, %v4961_v47  ;;  %v8998_v56 = vld [vmem:[%s12290_s2 + $0x218] sm:$0xff]  ;;  %v6714_v17 = vld [vmem:[#allocation3 + $0x34] sm:$0x1]  ;;  %v6953_v36 = vld [vmem:[#allocation3 + $0x30] sm:$0xe] }
 0x31f   : > { %v6760_v49 = vsel %vm9272_vm2, %v6755_v27, %v6759_v53  ;;  %v4703_v61 = vsel %vm9596_vm13, %v4701_v23, %v4702_v51  ;;  %v5095_v53 = vmul.f32 %v4961_v47, %v4961_v47  ;;  %v6711_v51 = vld [vmem:[#allocation3 + $0x28] sm:$0xf]  ;;  %v11808_v14 = vpack.c.b16 %v7023_v28, %v7022_v18  ;;  %v12533_v27 = vld [vmem:[#allocation5_spill] sm:$0xff]  ;;  %v12534_v29 = vld [vmem:[#allocation32_spill] sm:$0xff]  ;;  %7640 = vmatpush.bf16.msra.mxu3 %v8998_v56 }
 0x320   : > { %v6774_v44 = vsel %vm9272_vm2, %v6769_v34, %v6773_v35  ;;  %v6849_v15 = vunpack.c.l.b16 %v6760_v49  ;;  %v4776_v38 = vunpack.c.l.b16 %v4703_v61  ;;  %9084 = vst [vmem:[%s11599_s16 + $0x10] sm:$0xff] %v9016_v60   ;;  %v4538_v23 = vadd.f32 %v12534_v29, %v12533_v27  ;;  %v12535_v4 = vld [vmem:[#allocation31_spill] sm:$0xff]  ;;  %v11817_v35 = vpop.f32.mrf.mxu3  ;;  %v6713_v54 = vld [vmem:[#allocation3 + $0x30] sm:$0xf]  ;;  %v3526_v60 = vpop.f32.mrf.mxu1 }
 0x321   : > { %v6850_v37 = vunpack.c.l.b16 %v6774_v44  ;;  %v11815_v0 = vadd.f32 %v11034_v57, %v12535_v4  ;;  %12536 = vst [vmem:[#allocation20_spill] sm:$0xff] %v11817_v35  ;;  %v5126_v34 = vadd.f32 %v5125_v40, %v5095_v53  ;;  %v8638_v47 = vrot.slane %v6952_v32, 9 }
 0x322   : > { %v6990_v45 = vrot.slane %v6712_v12, 5  ;;  %v11819_v49 = vadd.f32 %v4891_v19, %v4537_v59  ;;  %v8639_v28 = vrot.slane %v6953_v36, 9  ;;  %v6994_v16 = vrot.slane %v6714_v17, 5  ;;  %v8982_v59 = vld [vmem:[%s12290_s2 + $0x198] sm:$0xff]  ;;  %v8989_v19 = vld [vmem:[%s12290_s2 + $0x1d0] sm:$0xff] }
 0x323   : > { %v6776_v61 = vshrl.u32 %v6711_v51, 16  ;;  %v6856_v44 = vpack.c.b16 %v6850_v37, %v6849_v15  ;;  %v4797_v57 = vpack.c.b16 %v4776_v38, %v4775_v46  ;;  %v6779_v53 = vshll.u32 %v6711_v51, 16  ;;  %7222 = vmatpush.bf16.msrb.mxu1 %v8982_v59  ;;  %7468 = vmatpush.bf16.msrb.mxu2 %v8989_v19  ;;  %v9157_v19 = vld [vmem:[#allocation2 + $0xa4] sm:$0x1] }
 0x324   : > { %6674 = vmatmul.bf16.vlgmr.msra.gmra.mxu1 %v8557_v13  ;;  %v5057_v27 = vadd.f32 %v5056_v50, %v11819_v49  ;;  %v5096_v40 = vmul.f32 %v11819_v49, %v11819_v49  ;;  %v6785_v36 = vshll.u32 %v6712_v12, 16  ;;  %v6790_v56 = vshrl.u32 %v6713_v54, 16  ;;  %v4574_v13 = vld [vmem:[#allocation2 + $0x9c] sm:$0xe]  ;;  %v3840_v37 = vpop.f32.mrf.mxu2  ;;  %v4893_v51 = vpop.f32.mrf.mxu0 }
 0x325   : > { %v6778_v32 = vrot.slane %v6776_v61, 4  ;;  %v11834_v46 = vsel %vm9596_vm13, %v8638_v47, %v6990_v45  ;;  %v6793_v15 = vshll.u32 %v6713_v54, 16  ;;  %v6799_v38 = vshll.u32 %v6714_v17, 16 }
 0x326   : > { %v5127_v50 = vadd.f32 %v5126_v34, %v5096_v40  ;;  %v11838_v29 = vsel %vm9596_vm13, %v8639_v28, %v6994_v16  ;;  %v6781_v4 = vrot.slane %v6779_v53, 5  ;;  %v6792_v61 = vrot.slane %v6790_v56, 4  ;;  %v9156_v34 = vld [vmem:[#allocation2 + $0xa0] sm:$0xf] }
 0x327   : > { %v3564_v12 = vadd.f32 %v3526_v60, %v11301_v33  ;;  %v6787_v18 = vrot.slane %v6785_v36, 5  ;;  %v6795_v47 = vrot.slane %v6793_v15, 5  ;;  %v8333_v45 = vrot.slane %v4574_v13, 9 }
 0x328   : > { %6924 = vmatmul.bf16.gmra.mxu2 %v6856_v44  ;;  %4925 = vmatmul.bf16.gmra.mxu0 %v4797_v57  ;;  %v4706_v54 = vrot.slane %v9156_v34, 5  ;;  %v6782_v17 = vor.u32 %v6781_v4, %v6778_v32  ;;  %v6801_v40 = vrot.slane %v6799_v38, 5  ;;  %v4709_v35 = vrot.slane %v9157_v19, 5  ;;  %v11847_v56 = vpop.f32.mrf.mxu3 }
 0x329   : > { %v11841_v59 = vadd.f32 %v3840_v37, %v3564_v12  ;;  %v6796_v28 = vor.u32 %v6795_v47, %v6792_v61  ;;  %v4963_v33 = vadd.f32 %v4893_v51, %v4538_v23  ;;  %v7024_v60 = vunpack.c.l.b16 %v11834_v46  ;;  %v11857_v61 = vpop.f32.mrf.mxu1  ;;  %v8995_v46 = vld [vmem:[%s12290_s2 + $0x200] sm:$0xff] }
 0x32a   : > { %v4707_v16 = vsel %vm9596_vm13, %v8333_v45, %v4706_v54  ;;  %v4708_v53 = vrot.slane %v4706_v54, 4  ;;  %v6783_v44 = vrot.slane %v6782_v17, 4  ;;  %v5269_v36 = vrot.slane %v11655_v63, 2 }
 0x32b   : > { %v4777_v57 = vunpack.c.l.b16 %v4707_v16  ;;  %v6797_v32 = vrot.slane %v6796_v28, 4  ;;  %v9021_v15 = vpack.c.bf16 %v4963_v33, %v11819_v49  ;;  %v11852_v38 = vadd.f32 %v5057_v27, %v4963_v33 }
 0x32c   : > { %v4710_v13 = vsel %vm9596_vm13, %v4708_v53, %v4709_v35  ;;  %v6788_v23 = vsel %vm9272_vm2, %v6783_v44, %v6787_v18  ;;  %v5097_v4 = vmul.f32 %v4963_v33, %v4963_v33  ;;  %v5270_v12 = vrot.slane %v11655_v63, 4 }
 0x32d   : > { %7097 = vmatmul.bf16.gmra.mxu3 %v11808_v14  ;;  %v4778_v37 = vunpack.c.l.b16 %v4710_v13  ;;  %v6802_v51 = vsel %vm9272_vm2, %v6797_v32, %v6801_v40  ;;  %v6851_v47 = vunpack.c.l.b16 %v6788_v23  ;;  %9085 = vst [vmem:[%s11599_s16 + $0x18] sm:$0xff] %v9021_v15   ;;  %v5271_v35 = vrot.slane %v11655_v63, 6  ;;  %v11880_v32 = vpop.f32.mrf.mxu2  ;;  %v8981_v13 = vld [vmem:[%s12290_s2 + $0x190] sm:$0xff] }
 0x32e   : > { %v12537_v49 = vrot.slane %v11005_v8, 6  ;;  %v6852_v14 = vunpack.c.l.b16 %v6802_v51  ;;  %v11866_v34 = vadd.f32 %v5127_v50, %v5097_v4  ;;  %v8430_v18 = vrot.slane %v11655_v63, 9  ;;  %v8997_v50 = vld [vmem:[%s12290_s2 + $0x210] sm:$0xff]  ;;  %12540 = vst [vmem:[#allocation19_spill] sm:$0xff] %v11880_v32  ;;  %7223 = vmatpush.bf16.msrb.mxu1 %v8981_v13  ;;  %v12543_v13 = vld [vmem:[#allocation34_spill] sm:$0xff] }
 0x32f   : > { %v4798_v45 = vpack.c.b16 %v4778_v37, %v4777_v57  ;;  %v8431_v54 = vrot.slane %v5269_v36, 9  ;;  %v8432_v17 = vrot.slane %v5270_v12, 9  ;;  %v8433_v19 = vrot.slane %v5271_v35, 9  ;;  %v4896_v37 = vpop.f32.mrf.mxu0  ;;  %7641 = vmatpush.bf16.msra.mxu3 %v8997_v50  ;;  %v8996_v50 = vld [vmem:[%s12290_s2 + $0x208] sm:$0xff] }
 0x330   : > { %v8429_v27 = vrot.slane %v12537_v49, 9  ;;  %v12538_v28 = vrot.slane %v11005_v8, 4  ;;  %v6857_v16 = vpack.c.b16 %v6852_v14, %v6851_v47  ;;  %v12539_v53 = vmov %v12537_v49 }
 0x331   : > { %v5572_v44 = vadd.f32 %v8430_v18, %v11655_v63  ;;  %v5717_v57 = vpack.c.bf16 %v11631_v39, %v11631_v39  ;;  %v5574_v15 = vadd.f32 %v8432_v17, %v5270_v12  ;;  %v5575_v23 = vadd.f32 %v8433_v19, %v5271_v35  ;;  %v11890_v17 = vld [vmem:[#allocation3 + $0x28] sm:$0xf]  ;;  %v11892_v19 = vld [vmem:[#allocation3 + $0x2c] sm:$0xf0] }
 0x332   : > { %v5570_v40 = vadd.f32 %v11628_v24, %v12538_v28  ;;  %v5571_v33 = vadd.f32 %v8429_v27, %v12539_v53  ;;  %v5573_v24 = vadd.f32 %v8431_v54, %v5269_v36  ;;  %v5949_v39 = vrot.slane %v11657_v1, 7  ;;  %v11894_v1 = vpop.f32.mrf.mxu3 }
 0x333   : > { %v5636_v63 = vmul.f32 0.25, %v5572_v44  ;;  %v5845_v51 = vunpack.c.l.b16 %v5717_v57  ;;  %v12541_v47 = vor.u32 %v11791_v62, %v11789_v48  ;;  %v5638_v27 = vmul.f32 0.25, %v5574_v15  ;;  %12542 = vst [vmem:[#allocation27_spill] sm:$0xff] %v11894_v1  ;;  %v3531_v57 = vpop.f32.mrf.mxu1  ;;  %7642 = vmatpush.bf16.msra.mxu3 %v8996_v50  ;;  %v9161_v1 = vld [vmem:[#allocation2 + $0xbc] sm:$0x1] }
 0x334   : > { %v5634_v8 = vmul.f32 0.25, %v5570_v40  ;;  %v5635_v4 = vmul.f32 0.25, %v5571_v33  ;;  %v5637_v49 = vmul.f32 0.25, %v5573_v24  ;;  %v5639_v14 = vmul.f32 0.25, %v5575_v23  ;;  %v12544_v24 = vld [vmem:[#allocation37_spill] sm:$0xff] }
 0x335   : > { %6679 = vmatmul.bf16.gmra.mxu1 %v12541_v47  ;;  %v7025_v36 = vunpack.c.l.b16 %v11838_v29  ;;  %v5720_v35 = vpack.c.bf16 %v5636_v63, %v5636_v63  ;;  %v5950_v54 = vrot.slane %v5845_v51, 6  ;;  %v5722_v40 = vpack.c.bf16 %v5638_v27, %v5638_v27  ;;  %v8988_v29 = vld [vmem:[%s12290_s2 + $0x1c8] sm:$0xff]  ;;  %v11905_v51 = vld [vmem:[#allocation3 + $0x38] sm:$0xe] }
 0x336   : > { %v5718_v18 = vpack.c.bf16 %v5634_v8, %v5634_v8  ;;  %v5719_v12 = vpack.c.bf16 %v5635_v4, %v5635_v4  ;;  %v5721_v28 = vpack.c.bf16 %v5637_v49, %v5637_v49  ;;  %v5723_v53 = vpack.c.bf16 %v5639_v14, %v5639_v14  ;;  %v8980_v47 = vld [vmem:[%s12290_s2 + $0x188] sm:$0xff]  ;;  %7469 = vmatpush.bf16.msrb.mxu2 %v8988_v29 }
 0x337   : > { %v5848_v33 = vunpack.c.l.b16 %v5720_v35  ;;  %v5951_v44 = vsel %vm5854_vm14, %v5950_v54, %v5949_v39  ;;  %v4540_v15 = vadd.f32 %v12544_v24, %v12543_v13  ;;  %v5850_v8 = vunpack.c.l.b16 %v5722_v40  ;;  %v6715_v39 = vld [vmem:[#allocation3 + $0x38] sm:$0xf]  ;;  %7224 = vmatpush.bf16.msrb.mxu1 %v8980_v47  ;;  %v4575_v24 = vld [vmem:[#allocation2 + $0xa8] sm:$0xe]  ;;  %7643 = vmatpush.bf16.msra.mxu3 %v8995_v46 }
 0x338   : > { %v5846_v48 = vunpack.c.l.b16 %v5718_v18  ;;  %v5847_v62 = vunpack.c.l.b16 %v5719_v12  ;;  %6929 = vmatmul.bf16.gmra.mxu2 %v6857_v16  ;;  %4930 = vmatmul.bf16.gmra.mxu0 %v4798_v45  ;;  %v5849_v23 = vunpack.c.l.b16 %v5721_v28  ;;  %v5851_v4 = vunpack.c.l.b16 %v5723_v53  ;;  %v6040_v45 = vld [vmem:[#allocation3 + $0x44] sm:$0x1]  ;;  %v11914_v18 = vld [vmem:[#allocation3 + $0x3c] sm:$0x1]  ;;  %v3845_v12 = vpop.f32.mrf.mxu2 }
 0x339   : > { %v7030_v49 = vpack.c.b16 %v7025_v36, %v7024_v60  ;;  %v8565_v27 = vor.u32 %v11892_v19, %v11890_v17  ;;  %v5956_v16 = vrot.slane %v5848_v33, 3  ;;  %v5960_v28 = vrot.slane %v5850_v8, 1  ;;  %v4898_v60 = vpop.f32.mrf.mxu0  ;;  %v8987_v36 = vld [vmem:[%s12290_s2 + $0x1c0] sm:$0xff]  ;;  %v11969_v19 = vld [vmem:[#allocation3 + $0x1c] sm:$0x1] }
 0x33a   : > { %v5952_v63 = vrot.slane %v5846_v48, 5  ;;  %v5954_v14 = vrot.slane %v5847_v62, 4  ;;  %v5958_v54 = vrot.slane %v5849_v23, 2  ;;  %v5977_v40 = vpack.c.b16 %v5851_v4, %v5851_v4  ;;  %7470 = vmatpush.bf16.msrb.mxu2 %v8987_v36  ;;  %v8979_v36 = vld [vmem:[%s12290_s2 + $0x180] sm:$0xff] }
 0x33b   : > { %v8640_v48 = vrot.slane %v11905_v51, 9  ;;  %v4964_v62 = vadd.f32 %v4896_v37, %v11815_v0  ;;  %v6804_v33 = vshrl.u32 %v6715_v39, 16  ;;  %v6998_v50 = vrot.slane %v11914_v18, 5  ;;  %v6037_v37 = vld [vmem:[#allocation3 + $0x40] sm:$0xf]  ;;  %7225 = vmatpush.bf16.msrb.mxu1 %v8979_v36 }
 0x33c   : > { %v5953_v35 = vsel %vm5857_vm15, %v5952_v63, %v5951_v44  ;;  %v6041_v29 = vsel %vm9450_vm10, %v5977_v40, %v6040_v45  ;;  %v6807_v13 = vshll.u32 %v6715_v39, 16  ;;  %v6813_v47 = vshll.u32 %v11914_v18, 16  ;;  %v9159_v40 = vld [vmem:[#allocation2 + $0xb0] sm:$0x1] }
 0x33d   : > { %v5955_v53 = vsel %vm5860_vm0, %v5954_v14, %v5953_v35  ;;  %7102 = vmatmul.bf16.gmra.mxu3 %v7030_v49  ;;  %6042 = vst [vmem:[#allocation3 + $0x44] sm:$0x1] %v6041_v29  ;;  %v5059_v8 = vadd.f32 %v11852_v38, %v4964_v62  ;;  %v5098_v4 = vmul.f32 %v4964_v62, %v4964_v62  ;;  %v6806_v63 = vrot.slane %v6804_v33, 4  ;;  %v11936_v35 = vpop.f32.mrf.mxu1  ;;  %v11938_v38 = vpop.f32.mrf.mxu3  ;;  %v12549_v33 = vld [vmem:[#allocation35_spill] sm:$0xff] }
 0x33e   : > { %v5957_v44 = vsel %vm5863_vm1, %v5956_v16, %v5955_v53  ;;  %v6809_v51 = vrot.slane %v6807_v13, 5  ;;  %v3566_v55 = vadd.f32 %v3531_v57, %v11420_v22  ;;  %v8334_v14 = vrot.slane %v4575_v24, 9  ;;  %v9158_v16 = vld [vmem:[#allocation2 + $0xac] sm:$0xf]  ;;  %12545 = vst [vmem:[#allocation21_spill] sm:$0xff] %v11936_v35 }
 0x33f   : > { %v5959_v23 = vsel %vm5866_vm3, %v5958_v54, %v5957_v44  ;;  %v5129_v49 = vadd.f32 %v11866_v34, %v5098_v4  ;;  %v4713_v45 = vrot.slane %v9158_v16, 5  ;;  %12546 = vst [vmem:[#allocation5_spill] sm:$0xff] %v11938_v38  ;;  %v4716_v53 = vrot.slane %v9159_v40, 5  ;;  %v7257_v16 = vld [vmem:[#allocation3 + $0x18] sm:$0xf] }
 0x340   : > { %v5961_v0 = vsel %vm5869_vm4, %v5960_v28, %v5959_v23  ;;  %v6810_v54 = vor.u32 %v6809_v51, %v6806_v63  ;;  %v11940_v28 = vadd.f32 %v3845_v12, %v3566_v55  ;;  %v4965_v18 = vadd.f32 %v4898_v60, %v4540_v15  ;;  %v11946_v46 = vpop.f32.mrf.mxu2  ;;  %v11959_v23 = vld [vmem:[#allocation3 + $0x14] sm:$0x1]  ;;  %v7255_v55 = vld [vmem:[#allocation3 + $0x10] sm:$0xf] }
 0x341   : > { %v5976_v39 = vpack.c.b16 %v5961_v0, %v5961_v0  ;;  %v4714_v57 = vsel %vm9596_vm13, %v8334_v14, %v4713_v45  ;;  %v4715_v34 = vrot.slane %v4713_v45, 4  ;;  %12548 = vst [vmem:[#allocation31_spill] sm:$0xff] %v11946_v46  ;;  %v3861_v12 = vadd.f32 %v12549_v33, %v11745_v20  ;;  %v4901_v42 = vpop.f32.mrf.mxu0  ;;  %v12552_v45 = vld [vmem:[#allocation4_spill] sm:$0xff] }
 0x342   : > { %12547 = vst [vmem:[#allocation32_spill] sm:$0xff] %v11940_v28  ;;  %v4779_v44 = vunpack.c.l.b16 %v4714_v57  ;;  %v9026_v15 = vpack.c.bf16 %v4965_v18, %v4964_v62  ;;  %v5060_v60 = vadd.f32 %v5059_v8, %v4965_v18  ;;  %v11955_v29 = vsel %vm9596_vm13, %v8640_v48, %v6998_v50  ;;  %v7500_v8 = vld [vmem:[#allocation3 + $0x10] sm:$0xe]  ;;  %v7501_v48 = vld [vmem:[#allocation3 + $0x18] sm:$0xe] }
 0x343   : > { %v6038_v22 = vsel %vm9436_vm9, %v5976_v39, %v6037_v37  ;;  %v4717_v13 = vsel %vm9596_vm13, %v4715_v34, %v4716_v53  ;;  %v5099_v24 = vmul.f32 %v4965_v18, %v4965_v18  ;;  %v6811_v20 = vrot.slane %v6810_v54, 4  ;;  %v12550_v50 = vld [vmem:[#allocation8_spill] sm:$0xff]  ;;  %v12551_v37 = vld [vmem:[#allocation38_spill] sm:$0xff] }
 0x344   : > { %6039 = vst [vmem:[#allocation3 + $0x40] sm:$0xf] %v6038_v22  ;;  %v6815_v4 = vrot.slane %v6813_v47, 5  ;;  %v4780_v62 = vunpack.c.l.b16 %v4717_v13  ;;  %v6718_v63 = vld [vmem:[#allocation3 + $0x44] sm:$0x1]  ;;  %v4541_v51 = vadd.f32 %v12551_v37, %v12550_v50  ;;  %v7026_v39 = vunpack.c.l.b16 %v11955_v29 }
 0x345   : > { %6684 = vmatmul.bf16.gmra.mxu1 %v8565_v27  ;;  %9086 = vst [vmem:[%s11599_s16 + $0x20] sm:$0xff] %v9026_v15   ;;  %v5130_v0 = vadd.f32 %v5129_v49, %v5099_v24  ;;  %v4542_v40 = vadd.f32 %v12552_v45, %v3861_v12  ;;  %v6827_v17 = vshll.u32 %v6718_v63, 16  ;;  %v8754_v27 = vrot.slane %v7500_v8, 9  ;;  %v6276_v49 = vpop.f32.mrf.mxu1  ;;  %v4576_v37 = vld [vmem:[#allocation2 + $0xb4] sm:$0xe] }
 0x346   : > { %v4799_v14 = vpack.c.b16 %v4780_v62, %v4779_v44  ;;  %v7526_v47 = vrot.slane %v11959_v23, 5  ;;  %v11972_v54 = vadd.f32 %v4901_v42, %v4541_v51  ;;  %v7002_v53 = vrot.slane %v6718_v63, 5  ;;  %v11979_v62 = vpop.f32.mrf.mxu3  ;;  %v9160_v28 = vld [vmem:[#allocation2 + $0xb8] sm:$0xf] }
 0x347   : > { %v6816_v18 = vsel %vm9272_vm2, %v6811_v20, %v6815_v4  ;;  %v8755_v22 = vrot.slane %v7501_v48, 9  ;;  %v7272_v57 = vshrl.u32 %v7255_v55, 16  ;;  %v7275_v44 = vshll.u32 %v7255_v55, 16  ;;  %12553 = vst [vmem:[#allocation34_spill] sm:$0xff] %v11979_v62  ;;  %v8568_v48 = vld [vmem:[#allocation3 + $0x38] sm:$0xf] }
 0x348   : > { %4935 = vmatmul.bf16.gmra.mxu0 %v4799_v14  ;;  %v5061_v33 = vadd.f32 %v5060_v60, %v11972_v54  ;;  %v5100_v12 = vmul.f32 %v11972_v54, %v11972_v54  ;;  %v7286_v15 = vshrl.u32 %v7257_v16, 16  ;;  %v6377_v29 = vpop.f32.mrf.mxu2  ;;  %v7530_v20 = vrot.slane %v11969_v19, 5 }
 0x349   : > { %v4903_v4 = vpop.f32.mrf.mxu0  ;;  %v6829_v8 = vrot.slane %v6827_v17, 5  ;;  %v6853_v63 = vunpack.c.l.b16 %v6816_v18  ;;  %v11984_v60 = vsel %vm9596_vm13, %v8754_v27, %v7526_v47  ;;  %v7277_v62 = vrot.slane %v7275_v44, 5 }
 0x34a   : > { %v5131_v50 = vadd.f32 %v5130_v0, %v5100_v12  ;;  %v7288_v46 = vrot.slane %v7286_v15, 4  ;;  %v7289_v38 = vshll.u32 %v7257_v16, 16  ;;  %v8335_v18 = vrot.slane %v4576_v37, 9 }
 0x34b   : > { %v6955_v34 = vld [vmem:[#allocation3 + $0x40] sm:$0xe]  ;;  %v4720_v35 = vrot.slane %v9160_v28, 5  ;;  %v4723_v27 = vrot.slane %v9161_v1, 5  ;;  %v7531_v12 = vsel %vm9596_vm13, %v8755_v22, %v7530_v20  ;;  %v11992_v15 = vadd.f32 %v6377_v29, %v6276_v49  ;;  %v12555_v29 = vld [vmem:[#allocation41_spill] sm:$0xff] }
 0x34c   : > { %v6717_v36 = vld [vmem:[#allocation3 + $0x40] sm:$0xf]  ;;  %v8641_v42 = vrot.slane %v6955_v34, 9  ;;  %v7274_v34 = vrot.slane %v7272_v57, 4  ;;  %v7281_v28 = vshll.u32 %v11959_v23, 16  ;;  %v4967_v1 = vadd.f32 %v4903_v4, %v4542_v40 }
 0x34d   : > { %v6818_v13 = vshrl.u32 %v6717_v36, 16  ;;  %v6821_v24 = vshll.u32 %v6717_v36, 16  ;;  %v8950_v45 = vld [vmem:[#allocation3 + $0x3c] sm:$0xf0]  ;;  %v4721_v57 = vsel %vm9596_vm13, %v8335_v18, %v4720_v35  ;;  %v4722_v44 = vrot.slane %v4720_v35, 4 }
 0x34e   : > { %v7003_v51 = vsel %vm9596_vm13, %v8641_v42, %v7002_v53  ;;  %v8569_v0 = vor.u32 %v8950_v45, %v8568_v48  ;;  %v7291_v53 = vrot.slane %v7289_v38, 5  ;;  %v6278_v42 = vpop.f32.mrf.mxu1  ;;  %v7278_v16 = vor.u32 %v7277_v62, %v7274_v34  ;;  %v12554_v49 = vld [vmem:[#allocation22_spill] sm:$0xff] }
 0x34f   : > { %v6820_v55 = vrot.slane %v6818_v13, 4  ;;  %v6823_v14 = vrot.slane %v6821_v24, 5  ;;  %v7027_v36 = vunpack.c.l.b16 %v7003_v51  ;;  %v4781_v24 = vunpack.c.l.b16 %v4721_v57 }
 0x350   : > { %v7292_v22 = vor.u32 %v7291_v53, %v7288_v46  ;;  %v7295_v38 = vshll.u32 %v11969_v19, 16  ;;  %v4724_v20 = vsel %vm9596_vm13, %v4722_v44, %v4723_v27  ;;  %v3549_v37 = vadd.f32 %v12555_v29, %v12554_v49  ;;  %v8676_v53 = vld [vmem:[#allocation3 + $0x10] sm:$0xf]  ;;  %v8975_v44 = vld [vmem:[#allocation3 + $0x14] sm:$0xf0] }
 0x351   : > { %v6824_v17 = vor.u32 %v6823_v14, %v6820_v55  ;;  %v7031_v47 = vpack.c.b16 %v7027_v36, %v7026_v39  ;;  %v6379_v39 = vpop.f32.mrf.mxu2  ;;  %v4906_v35 = vpop.f32.mrf.mxu0  ;;  %v4782_v51 = vunpack.c.l.b16 %v4724_v20  ;;  %v9031_v23 = vpack.c.bf16 %v4967_v1, %v11972_v54  ;;  %v7259_v36 = vld [vmem:[#allocation3 + $0x20] sm:$0xf]  ;;  %v12556_v54 = vld [vmem:[#allocation39_spill] sm:$0xff] }
 0x352   : > { %v7572_v40 = vunpack.c.l.b16 %v11984_v60  ;;  %v7573_v4 = vunpack.c.l.b16 %v7531_v12  ;;  %v5062_v46 = vadd.f32 %v5061_v33, %v4967_v1  ;;  %v5101_v19 = vmul.f32 %v4967_v1, %v4967_v1  ;;  %v7261_v33 = vld [vmem:[#allocation3 + $0x28] sm:$0xf] }
 0x353   : > { %v6825_v13 = vrot.slane %v6824_v17, 4  ;;  %7107 = vmatmul.bf16.gmra.mxu3 %v7031_v47  ;;  %v7279_v14 = vrot.slane %v7278_v16, 4  ;;  %v7283_v45 = vrot.slane %v7281_v28, 5  ;;  %v4800_v34 = vpack.c.b16 %v4782_v51, %v4781_v24  ;;  %9087 = vst [vmem:[%s11599_s16 + $0x28] sm:$0xff] %v9031_v23   ;;  %v4577_v24 = vld [vmem:[#allocation2 + $0xc0] sm:$0xe] }
 0x354   : > { %v7293_v17 = vrot.slane %v7292_v22, 4  ;;  %v7297_v18 = vrot.slane %v7295_v38, 5  ;;  %v5132_v27 = vadd.f32 %v5131_v50, %v5101_v19  ;;  %v12007_v47 = vadd.f32 %v6379_v39, %v6278_v42  ;;  %v12560_v50 = vld [vmem:[#allocation43_spill] sm:$0xff]  ;;  %v7502_v51 = vld [vmem:[#allocation3 + $0x20] sm:$0xe] }
 0x355   : > { %v6830_v48 = vsel %vm9272_vm2, %v6825_v13, %v6829_v8  ;;  %6689 = vmatmul.bf16.gmra.mxu1 %v8569_v0  ;;  %v12004_v8 = vpop.f32.mrf.mxu3  ;;  %v12557_v0 = vld [vmem:[#allocation12_spill] sm:$0xff]  ;;  %v7300_v13 = vshrl.u32 %v7259_v36, 16  ;;  %v7303_v28 = vshll.u32 %v7259_v36, 16  ;;  %v7580_v39 = vpack.c.b16 %v7573_v4, %v7572_v40  ;;  %v7260_v36 = vld [vmem:[#allocation3 + $0x24] sm:$0x1] }
 0x356   : > { %v6854_v62 = vunpack.c.l.b16 %v6830_v48  ;;  %v4543_v60 = vadd.f32 %v12557_v0, %v12556_v54  ;;  %v6281_v12 = vpop.f32.mrf.mxu1  ;;  %v12559_v48 = vld [vmem:[#allocation29_spill] sm:$0xff]  ;;  %v7284_v22 = vsel %vm9272_vm2, %v7279_v14, %v7283_v45  ;;  %v7298_v38 = vsel %vm9272_vm2, %v7293_v17, %v7297_v18  ;;  %v7503_v54 = vld [vmem:[#allocation3 + $0x28] sm:$0xe]  ;;  %v9163_v0 = vld [vmem:[#allocation2 + $0xc8] sm:$0x1] }
 0x357   : > { %v12014_v42 = vadd.f32 %v12560_v50, %v12559_v48  ;;  %v7302_v23 = vrot.slane %v7300_v13, 4  ;;  %v8336_v19 = vrot.slane %v4577_v24, 9  ;;  %v7305_v4 = vrot.slane %v7303_v28, 5  ;;  %v12561_v24 = vld [vmem:[#allocation45_spill] sm:$0xff] }
 0x358   : > { %v6858_v55 = vpack.c.b16 %v6854_v62, %v6853_v63  ;;  %4940 = vmatmul.bf16.gmra.mxu0 %v4800_v34  ;;  %v12558_v63 = vld [vmem:[#allocation9_spill] sm:$0xff]  ;;  %v4968_v16 = vadd.f32 %v4906_v35, %v4543_v60  ;;  %v7317_v62 = vshll.u32 %v7261_v33, 16  ;;  %v8677_v35 = vor.u32 %v8975_v44, %v8676_v53 }
 0x359   : > { %v3863_v57 = vadd.f32 %v12558_v63, %v3549_v37  ;;  %v6382_v1 = vpop.f32.mrf.mxu2  ;;  %v4908_v20 = vpop.f32.mrf.mxu0  ;;  %v7314_v37 = vshrl.u32 %v7261_v33, 16  ;;  %v4730_v14 = vrot.slane %v9163_v0, 5  ;;  %v7399_v17 = vunpack.c.l.b16 %v7284_v22  ;;  %v7262_v33 = vld [vmem:[#allocation3 + $0x2c] sm:$0x1] }
 0x35a   : > { %6934 = vmatmul.bf16.gmra.mxu2 %v6858_v55  ;;  %v5063_v49 = vadd.f32 %v5062_v46, %v4968_v16  ;;  %v5102_v29 = vmul.f32 %v4968_v16, %v4968_v16  ;;  %v9162_v55 = vld [vmem:[#allocation2 + $0xc4] sm:$0xf]  ;;  %v12020_v45 = vadd.f32 %v6382_v1, %v6281_v12  ;;  %v7400_v18 = vunpack.c.l.b16 %v7298_v38 }
 0x35b   : > { %v4727_v34 = vrot.slane %v9162_v55, 5  ;;  %v8756_v13 = vrot.slane %v7502_v51, 9  ;;  %v7316_v63 = vrot.slane %v7314_v37, 4  ;;  %v7319_v44 = vrot.slane %v7317_v62, 5 }
 0x35c   : > { %v5133_v40 = vadd.f32 %v5132_v27, %v5102_v29  ;;  %v4544_v48 = vadd.f32 %v12561_v24, %v3863_v57  ;;  %v7534_v28 = vrot.slane %v7260_v36, 5  ;;  %v8757_v50 = vrot.slane %v7503_v54, 9 }
 0x35d   : > { %v12022_v46 = vpop.f32.mrf.mxu3  ;;  %v4728_v60 = vsel %vm9596_vm13, %v8336_v19, %v4727_v34  ;;  %v4729_v53 = vrot.slane %v4727_v34, 4  ;;  %v7306_v22 = vor.u32 %v7305_v4, %v7302_v23  ;;  %v7309_v38 = vshll.u32 %v7260_v36, 16 }
 0x35e   : > { %v6283_v27 = vpop.f32.mrf.mxu1  ;;  %v4783_v1 = vunpack.c.l.b16 %v4728_v60  ;;  %v4969_v55 = vadd.f32 %v4908_v20, %v4544_v48  ;;  %v7407_v34 = vpack.c.b16 %v7400_v18, %v7399_v17  ;;  %v7538_v51 = vrot.slane %v7262_v33, 5  ;;  %v12562_v60 = vld [vmem:[#allocation11_spill] sm:$0xff]  ;;  %v4578_v48 = vld [vmem:[#allocation2 + $0xcc] sm:$0xe] }
 0x35f   : > { %v4731_v12 = vsel %vm9596_vm13, %v4729_v53, %v4730_v14  ;;  %v7323_v37 = vshll.u32 %v7262_v33, 16  ;;  %v7320_v0 = vor.u32 %v7319_v44, %v7316_v63  ;;  %v7535_v20 = vsel %vm9596_vm13, %v8756_v13, %v7534_v28  ;;  %v7263_v33 = vld [vmem:[#allocation3 + $0x30] sm:$0xf] }
 0x360   : > { %v4784_v29 = vunpack.c.l.b16 %v4731_v12  ;;  %v9036_v24 = vpack.c.bf16 %v4969_v55, %v4968_v16  ;;  %v5064_v54 = vadd.f32 %v5063_v49, %v4969_v55  ;;  %v5103_v32 = vmul.f32 %v4969_v55, %v4969_v55  ;;  %v12564_v16 = vld [vmem:[#allocation10_spill] sm:$0xff] }
 0x361   : > { %v6384_v19 = vpop.f32.mrf.mxu2  ;;  %v4911_v57 = vpop.f32.mrf.mxu0  ;;  %v7307_v36 = vrot.slane %v7306_v22, 4  ;;  %v7311_v4 = vrot.slane %v7309_v38, 5  ;;  %v7539_v18 = vsel %vm9596_vm13, %v8757_v50, %v7538_v51  ;;  %v3865_v49 = vadd.f32 %v12564_v16, %v12014_v42  ;;  %v8680_v42 = vld [vmem:[#allocation3 + $0x20] sm:$0xf]  ;;  %v9165_v51 = vld [vmem:[#allocation2 + $0xd4] sm:$0x1] }
 0x362   : > { %v12029_v62 = vadd.f32 %v6384_v19, %v6283_v27  ;;  %v4801_v14 = vpack.c.b16 %v4784_v29, %v4783_v1  ;;  %9088 = vst [vmem:[%s11599_s16 + $0x30] sm:$0xff] %v9036_v24   ;;  %v5134_v17 = vadd.f32 %v5133_v40, %v5103_v32  ;;  %v7325_v63 = vrot.slane %v7323_v37, 5  ;;  %v7265_v32 = vld [vmem:[#allocation3 + $0x38] sm:$0xf]  ;;  %v8976_v29 = vld [vmem:[#allocation3 + $0x24] sm:$0xf0] }
 0x363   : > { %7644 = vmatmul.bf16.vlgmr.msra.gmra.mxu3 %v7580_v39  ;;  %v12563_v39 = vld [vmem:[#allocation50_spill] sm:$0xff]  ;;  %v7574_v27 = vunpack.c.l.b16 %v7535_v20  ;;  %v7575_v40 = vunpack.c.l.b16 %v7539_v18  ;;  %v7312_v50 = vsel %vm9272_vm2, %v7307_v36, %v7311_v4  ;;  %v7328_v1 = vshrl.u32 %v7263_v33, 16  ;;  %v9164_v19 = vld [vmem:[#allocation2 + $0xd0] sm:$0xf] }
 0x364   : > { %v4545_v23 = vadd.f32 %v12563_v39, %v12562_v60  ;;  %v8337_v22 = vrot.slane %v4578_v48, 9  ;;  %v4737_v37 = vrot.slane %v9165_v51, 5  ;;  %v12565_v60 = vld [vmem:[#allocation15_spill] sm:$0xff]  ;;  %v8681_v4 = vor.u32 %v8976_v29, %v8680_v42 }
 0x365   : > { %7226 = vmatmul.bf16.vlgmr.msrb.gmra.mxu1 %v8677_v35  ;;  %v7321_v35 = vrot.slane %v7320_v0, 4  ;;  %v12040_v12 = vpop.f32.mrf.mxu3  ;;  %v4546_v39 = vadd.f32 %v12565_v60, %v3865_v49  ;;  %v7581_v36 = vpack.c.b16 %v7575_v40, %v7574_v27  ;;  %v7401_v16 = vunpack.c.l.b16 %v7312_v50 }
 0x366   : > { %v4970_v53 = vadd.f32 %v4911_v57, %v4545_v23  ;;  %v6286_v44 = vpop.f32.mrf.mxu1  ;;  %v7345_v23 = vshll.u32 %v7265_v32, 16 }
 0x367   : > { %v7326_v24 = vsel %vm9272_vm2, %v7321_v35, %v7325_v63  ;;  %v7266_v35 = vld [vmem:[#allocation3 + $0x3c] sm:$0x1]  ;;  %v7505_v63 = vld [vmem:[#allocation3 + $0x38] sm:$0xe] }
 0x368   : > { %4945 = vmatmul.bf16.gmra.mxu0 %v4801_v14  ;;  %v5065_v13 = vadd.f32 %v5064_v54, %v4970_v53  ;;  %v5104_v28 = vmul.f32 %v4970_v53, %v4970_v53  ;;  %v7331_v54 = vshll.u32 %v7263_v33, 16  ;;  %v7342_v14 = vshrl.u32 %v7265_v32, 16 }
 0x369   : > { %v6387_v38 = vpop.f32.mrf.mxu2  ;;  %v4913_v0 = vpop.f32.mrf.mxu0  ;;  %v7402_v48 = vunpack.c.l.b16 %v7326_v24  ;;  %v7347_v42 = vrot.slane %v7345_v23, 5  ;;  %v7546_v24 = vrot.slane %v7266_v35, 5  ;;  %v7351_v23 = vshll.u32 %v7266_v35, 16 }
 0x36a   : > { %7471 = vmatmul.bf16.vlgmr.msrb.gmra.mxu2 %v7407_v34  ;;  %v5135_v55 = vadd.f32 %v5134_v17, %v5104_v28  ;;  %v4734_v34 = vrot.slane %v9164_v19, 5  ;;  %v12044_v57 = vadd.f32 %v6387_v38, %v6286_v44  ;;  %v4971_v18 = vadd.f32 %v4913_v0, %v4546_v39  ;;  %v7264_v44 = vld [vmem:[#allocation3 + $0x34] sm:$0x1]  ;;  %v7504_v28 = vld [vmem:[#allocation3 + $0x30] sm:$0xe] }
 0x36b   : > { %v7330_v38 = vrot.slane %v7328_v1, 4  ;;  %v7333_v49 = vrot.slane %v7331_v54, 5  ;;  %v7344_v32 = vrot.slane %v7342_v14, 4  ;;  %v7542_v51 = vrot.slane %v7264_v44, 5 }
 0x36c   : > { %v4736_v20 = vrot.slane %v4734_v34, 4  ;;  %v4735_v17 = vsel %vm9596_vm13, %v8337_v22, %v4734_v34  ;;  %v9041_v19 = vpack.c.bf16 %v4971_v18, %v4970_v53  ;;  %v12053_v27 = vadd.f32 %v5065_v13, %v4971_v18 }
 0x36d   : > { %v4785_v22 = vunpack.c.l.b16 %v4735_v17  ;;  %v5105_v50 = vmul.f32 %v4971_v18, %v4971_v18  ;;  %v8758_v34 = vrot.slane %v7504_v28, 9  ;;  %v12056_v0 = vpop.f32.mrf.mxu3  ;;  %v7408_v53 = vpack.c.b16 %v7402_v48, %v7401_v16 }
 0x36e   : > { %v4738_v33 = vsel %vm9596_vm13, %v4736_v20, %v4737_v37  ;;  %v6288_v40 = vpop.f32.mrf.mxu1  ;;  %9089 = vst [vmem:[%s11599_s16 + $0x38] sm:$0xff] %v9041_v19   ;;  %v8759_v37 = vrot.slane %v7505_v63, 9  ;;  %v7337_v13 = vshll.u32 %v7264_v44, 16  ;;  %v7334_v14 = vor.u32 %v7333_v49, %v7330_v38  ;;  %v7267_v63 = vld [vmem:[#allocation3 + $0x40] sm:$0xf] }
 0x36f   : > { %v4786_v29 = vunpack.c.l.b16 %v4738_v33  ;;  %v5136_v60 = vadd.f32 %v5135_v55, %v5105_v50  ;;  %v7348_v39 = vor.u32 %v7347_v42, %v7344_v32  ;;  %v7353_v55 = vrot.slane %v7351_v23, 5  ;;  %v8684_v44 = vld [vmem:[#allocation3 + $0x30] sm:$0xf]  ;;  %v8977_v38 = vld [vmem:[#allocation3 + $0x34] sm:$0xf0] }
 0x370   : > { %v7547_v17 = vsel %vm9596_vm13, %v8759_v37, %v7546_v24  ;;  %v7335_v18 = vrot.slane %v7334_v14, 4  ;;  %v7339_v28 = vrot.slane %v7337_v13, 5  ;;  %v7356_v35 = vshrl.u32 %v7267_v63, 16  ;;  %v12567_v50 = vld [vmem:[#allocation49_spill] sm:$0xff]  ;;  %v7268_v37 = vld [vmem:[#allocation3 + $0x44] sm:$0x1] }
 0x371   : > { %v6389_v1 = vpop.f32.mrf.mxu2  ;;  %v4802_v20 = vpack.c.b16 %v4786_v29, %v4785_v22  ;;  %v7349_v33 = vrot.slane %v7348_v39, 4  ;;  %v7577_v48 = vunpack.c.l.b16 %v7547_v17  ;;  %v7359_v49 = vshll.u32 %v7267_v63, 16  ;;  %v12566_v29 = vld [vmem:[#allocation30_spill] sm:$0xff] }
 0x372   : > { %v12058_v54 = vadd.f32 %v6389_v1, %v6288_v40  ;;  %v7340_v19 = vsel %vm9272_vm2, %v7335_v18, %v7339_v28  ;;  %v8685_v1 = vor.u32 %v8977_v38, %v8684_v44  ;;  %v7506_v24 = vld [vmem:[#allocation3 + $0x40] sm:$0xe]  ;;  %v7358_v18 = vrot.slane %v7356_v35, 4 }
 0x373   : > { %7649 = vmatmul.bf16.gmra.mxu3 %v7581_v36  ;;  %v7543_v36 = vsel %vm9596_vm13, %v8758_v34, %v7542_v51  ;;  %v7354_v40 = vsel %vm9272_vm2, %v7349_v33, %v7353_v55  ;;  %v3553_v34 = vadd.f32 %v12567_v50, %v12566_v29  ;;  %v12569_v13 = vld [vmem:[#allocation18_spill] sm:$0xff]  ;;  %v7403_v39 = vunpack.c.l.b16 %v7340_v19 }
 0x374   : > { %v7576_v16 = vunpack.c.l.b16 %v7543_v36  ;;  %v7404_v23 = vunpack.c.l.b16 %v7354_v40  ;;  %v7507_v36 = vld [vmem:[#allocation3 + $0x48] sm:$0xe]  ;;  %v7361_v28 = vrot.slane %v7359_v49, 5  ;;  %v8760_v44 = vrot.slane %v7506_v24, 9 }
 0x375   : > { %7231 = vmatmul.bf16.gmra.mxu1 %v8681_v4  ;;  %v7269_v4 = vld [vmem:[#allocation3 + $0x48] sm:$0xf]  ;;  %v12064_v32 = vpop.f32.mrf.mxu3  ;;  %v7550_v38 = vrot.slane %v7268_v37, 5  ;;  %v8761_v29 = vrot.slane %v7507_v36, 9  ;;  %v7365_v35 = vshll.u32 %v7268_v37, 16 }
 0x376   : > { %v7370_v42 = vshrl.u32 %v7269_v4, 16  ;;  %v7373_v22 = vshll.u32 %v7269_v4, 16  ;;  %v7582_v51 = vpack.c.b16 %v7577_v48, %v7576_v16  ;;  %v12076_v4 = vadd.f32 %v12004_v8, %v11992_v15  ;;  %v12570_v16 = vld [vmem:[#allocation47_spill] sm:$0xff] }
 0x377   : > { %v3867_v48 = vadd.f32 %v12570_v16, %v3553_v34  ;;  %v7551_v15 = vsel %vm9596_vm13, %v8760_v44, %v7550_v38  ;;  %v8688_v16 = vld [vmem:[#allocation3 + $0x40] sm:$0xf] }
 0x378   : > { %4950 = vmatmul.bf16.gmra.mxu0 %v4802_v20  ;;  %v7270_v20 = vld [vmem:[#allocation3 + $0x4c] sm:$0x1]  ;;  %v7372_v55 = vrot.slane %v7370_v42, 4  ;;  %v7375_v63 = vrot.slane %v7373_v22, 5  ;;  %v7362_v22 = vor.u32 %v7361_v28, %v7358_v18 }
 0x379   : > { %v7554_v19 = vrot.slane %v7270_v20, 5  ;;  %v7379_v49 = vshll.u32 %v7270_v20, 16  ;;  %v4548_v34 = vadd.f32 %v11381_v5, %v3867_v48  ;;  %v8978_v48 = vld [vmem:[#allocation3 + $0x44] sm:$0xf0] }
 0x37a   : > { %7476 = vmatmul.bf16.gmra.mxu2 %v7408_v53  ;;  %v12568_v53 = vld [vmem:[#allocation46_spill] sm:$0xff]  ;;  %v7363_v24 = vrot.slane %v7362_v22, 4  ;;  %v8689_v38 = vor.u32 %v8978_v48, %v8688_v16  ;;  %v12578_v16 = vld [vmem:[#allocation52_spill] sm:$0xff] }
 0x37b   : > { %v4547_v14 = vadd.f32 %v12569_v13, %v12568_v53  ;;  %v7409_v53 = vpack.c.b16 %v7404_v23, %v7403_v39  ;;  %v7376_v13 = vor.u32 %v7375_v63, %v7372_v55  ;;  %v7555_v8 = vsel %vm9596_vm13, %v8761_v29, %v7554_v19  ;;  %v12579_v48 = vld [vmem:[#allocation24_spill] sm:$0xff] }
 0x37c   : > { %v12089_v39 = vadd.f32 %v12022_v46, %v12007_v47  ;;  %v7578_v23 = vunpack.c.l.b16 %v7551_v15  ;;  %v7579_v20 = vunpack.c.l.b16 %v7555_v8  ;;  %v12574_v15 = vld [vmem:[#allocation17_spill] sm:$0xff] }
 0x37e   : > { %v4916_v17 = vpop.f32.mrf.mxu0  ;;  %v7583_v63 = vpack.c.b16 %v7579_v20, %v7578_v23 }
 0x37f   : > { %v4972_v33 = vadd.f32 %v4916_v17, %v4547_v14  ;;  %v12080_v14 = vpop.f32.mrf.mxu3 }
 0x381   : > { %v5067_v40 = vadd.f32 %v12053_v27, %v4972_v33  ;;  %v5106_v50 = vmul.f32 %v4972_v33, %v4972_v33  ;;  %v7367_v27 = vrot.slane %v7365_v35, 5  ;;  %v12572_v35 = vld [vmem:[#allocation14_spill] sm:$0xff] }
 0x383   : > { %7654 = vmatmul.bf16.gmra.mxu3 %v7582_v51  ;;  %v5137_v42 = vadd.f32 %v5136_v60, %v5106_v50  ;;  %v7381_v51 = vrot.slane %v7379_v49, 5  ;;  %v7368_v5 = vsel %vm9272_vm2, %v7363_v24, %v7367_v27  ;;  %v12571_v50 = vld [vmem:[#allocation33_spill] sm:$0xff]  ;;  %v12573_v49 = vld [vmem:[#allocation51_spill] sm:$0xff]  ;;  %v12107_v27 = vadd.f32 %v12056_v0, %v12029_v62 }
 0x384   : > { %v7405_v44 = vunpack.c.l.b16 %v7368_v5  ;;  %v3555_v26 = vadd.f32 %v11385_v3, %v12571_v50  ;;  %v12575_v24 = vld [vmem:[#allocation23_spill] sm:$0xff]  ;;  %v12116_v5 = vadd.f32 %v12064_v32, %v12044_v57 }
 0x385   : > { %7236 = vmatmul.bf16.gmra.mxu1 %v8685_v1  ;;  %v7377_v1 = vrot.slane %v7376_v13, 4 }
 0x386   : > { %v4918_v37 = vpop.f32.mrf.mxu0  ;;  %v3869_v8 = vadd.f32 %v12574_v15, %v3555_v26 }
 0x387   : > { %v4973_v60 = vadd.f32 %v4918_v37, %v4548_v34  ;;  %v7382_v28 = vsel %vm9272_vm2, %v7377_v1, %v7381_v51 }
 0x388   : > { %v7406_v47 = vunpack.c.l.b16 %v7382_v28  ;;  %v4550_v1 = vadd.f32 %v12575_v24, %v3869_v8  ;;  %v12576_v28 = vld [vmem:[#allocation36_spill] sm:$0xff]  ;;  %v12582_v24 = vld [vmem:[#allocation42_spill] sm:$0xff] }
 0x389   : > { %v9046_v36 = vpack.c.bf16 %v4973_v60, %v4972_v33  ;;  %v5068_v17 = vadd.f32 %v5067_v40, %v4973_v60  ;;  %v5107_v9 = vmul.f32 %v4973_v60, %v4973_v60  ;;  %v12098_v33 = vadd.f32 %v12040_v12, %v12020_v45 }
 0x38a   : > { %7481 = vmatmul.bf16.gmra.mxu2 %v7409_v53  ;;  %v7410_v40 = vpack.c.b16 %v7406_v47, %v7405_v44  ;;  %v4551_v44 = vadd.f32 %v12579_v48, %v12578_v16 }
 0x38b   : > { %v6392_v18 = vpop.f32.mrf.mxu2  ;;  %9090 = vst [vmem:[%s11599_s16 + $0x40] sm:$0xff] %v9046_v36   ;;  %v5138_v55 = vadd.f32 %v5137_v42, %v5107_v9  ;;  %v4549_v42 = vadd.f32 %v12573_v49, %v12572_v35 }
 0x390   : > { %v6557_v46 = vpop.f32.mrf.mxu3 }
 0x391   : > { %v6291_v29 = vpop.f32.mrf.mxu1 }
 0x392   : > { %v6393_v19 = vadd.f32 %v6392_v18, %v6291_v29  ;;  %v12580_v29 = vld [vmem:[#allocation54_spill] sm:$0xff] }
 0x393   : > { %7659 = vmatmul.bf16.gmra.mxu3 %v7583_v63  ;;  %v6394_v53 = vpop.f32.mrf.mxu2 }
 0x395   : > { %7241 = vmatmul.bf16.gmra.mxu1 %v8689_v38  ;;  %v4921_v22 = vpop.f32.mrf.mxu0 }
 0x396   : > { %v4974_v13 = vadd.f32 %v4921_v22, %v4549_v42  ;;  %v12581_v42 = vld [vmem:[#allocation53_spill] sm:$0xff] }
 0x398   : > { %v6559_v34 = vpop.f32.mrf.mxu3  ;;  %v5069_v45 = vadd.f32 %v5068_v17, %v4974_v13  ;;  %v5108_v12 = vmul.f32 %v4974_v13, %v4974_v13 }
 0x399   : > { %v6293_v51 = vpop.f32.mrf.mxu1 }
 0x39a   : > { %7486 = vmatmul.bf16.gmra.mxu2 %v7410_v40  ;;  %v6395_v3 = vadd.f32 %v6394_v53, %v6293_v51  ;;  %v5139_v37 = vadd.f32 %v5138_v55, %v5108_v12  ;;  %v12577_v55 = vld [vmem:[#allocation7_spill] sm:$0xff]  ;;  %v12132_v53 = vadd.f32 %v12080_v14, %v12058_v54 }
 0x39b   : > { %v12110_v23 = vpop.f32.mrf.mxu2  ;;  %v3557_v63 = vadd.f32 %v12577_v55, %v12576_v28 }
 0x39d   : > { %v4923_v60 = vpop.f32.mrf.mxu0  ;;  %v3871_v40 = vadd.f32 %v12580_v29, %v3557_v63 }
 0x39e   : > { %v4975_v20 = vadd.f32 %v4923_v60, %v4550_v1  ;;  %v12583_v1 = vld [vmem:[#allocation40_spill] sm:$0xff] }
 0x39f   : > { %v4552_v22 = vadd.f32 %v12581_v42, %v3871_v40  ;;  %v3134_v60 = vadd.f32 %v12583_v1, %v12582_v24 }
 0x3a0   : > { %v12112_v36 = vpop.f32.mrf.mxu3  ;;  %v9051_v9 = vpack.c.bf16 %v4975_v20, %v4974_v13  ;;  %v5070_v18 = vadd.f32 %v5069_v45, %v4975_v20  ;;  %v5109_v17 = vmul.f32 %v4975_v20, %v4975_v20 }
 0x3a1   : > { %v12118_v62 = vpop.f32.mrf.mxu1  ;;  %v3559_v14 = vadd.f32 %v11568_v25, %v3134_v60 }
 0x3a2   : > { %9091 = vst [vmem:[%s11599_s16 + $0x48] sm:$0xff] %v9051_v9   ;;  %v5140_v0 = vadd.f32 %v5139_v37, %v5109_v17  ;;  %v4553_v9 = vadd.f32 %v11548_v7, %v11583_v21 }
 0x3a3   : > { %v12128_v26 = vpop.f32.mrf.mxu2  ;;  %v3873_v28 = vadd.f32 %v11609_v11, %v3559_v14 }
 0x3a5   : > { %v4926_v47 = vpop.f32.mrf.mxu0  ;;  %v4554_v25 = vadd.f32 %v11585_v41, %v3873_v28  ;;  %v12586_v41 = vld [vmem:[#allocation55_spill] sm:$0xff] }
 0x3a6   : > { %v4976_v38 = vadd.f32 %v4926_v47, %v4551_v44 }
 0x3a8   : > { %v12126_v50 = vpop.f32.mrf.mxu3  ;;  %v5071_v57 = vadd.f32 %v5070_v18, %v4976_v38  ;;  %v5110_v32 = vmul.f32 %v4976_v38, %v4976_v38  ;;  %v12149_v18 = vadd.f32 %v6557_v46, %v6393_v19 }
 0x3a9   : > { %v12134_v35 = vpop.f32.mrf.mxu1 }
 0x3aa   : > { %v5141_v49 = vadd.f32 %v5140_v0, %v5110_v32  ;;  %v12585_v32 = vld [vmem:[#allocation13_spill] sm:$0xff] }
 0x3ab   : > { %v12143_v20 = vpop.f32.mrf.mxu2 }
 0x3ad   : > { %v4928_v13 = vpop.f32.mrf.mxu0 }
 0x3ae   : > { %v4977_v15 = vadd.f32 %v4928_v13, %v4552_v22 }
 0x3b0   : > { %v12137_v8 = vpop.f32.mrf.mxu3  ;;  %v9056_v45 = vpack.c.bf16 %v4977_v15, %v4976_v38  ;;  %v5072_v12 = vadd.f32 %v5071_v57, %v4977_v15  ;;  %v5111_v51 = vmul.f32 %v4977_v15, %v4977_v15  ;;  %v12159_v38 = vadd.f32 %v6559_v34, %v6395_v3  ;;  %v12584_v57 = vld [vmem:[#allocation44_spill] sm:$0xff] }
 0x3b1   : > { %v4555_v34 = vadd.f32 %v12586_v41, %v11694_v31 }
 0x3b2   : > { %v12139_v37 = vpop.f32.mrf.mxu1  ;;  %9092 = vst [vmem:[%s11599_s16 + $0x50] sm:$0xff] %v9056_v45   ;;  %v5142_v54 = vadd.f32 %v5141_v49, %v5111_v51  ;;  %v3136_v49 = vadd.f32 %v12585_v32, %v12584_v57 }
 0x3b3   : > { %v12156_v47 = vpop.f32.mrf.mxu2 }
 0x3b4   : > { %v3561_v22 = vadd.f32 %v11687_v6, %v3136_v49 }
 0x3b5   : > { %v4931_v17 = vpop.f32.mrf.mxu0 }
 0x3b6   : > { %v4978_v0 = vadd.f32 %v4931_v17, %v4553_v9  ;;  %v3875_v45 = vadd.f32 %v11702_v52, %v3561_v22  ;;  %v12588_v52 = vld [vmem:[#allocation48_spill] sm:$0xff] }
 0x3b8   : > { %v12152_v55 = vpop.f32.mrf.mxu3  ;;  %v5073_v63 = vadd.f32 %v5072_v12, %v4978_v0  ;;  %v5112_v16 = vmul.f32 %v4978_v0, %v4978_v0 }
 0x3ba   : > { %v12154_v48 = vpop.f32.mrf.mxu1  ;;  %v5143_v44 = vadd.f32 %v5142_v54, %v5112_v16  ;;  %v4556_v54 = vadd.f32 %v11710_v58, %v3875_v45  ;;  %v4557_v58 = vadd.f32 %v11765_v10, %v11776_v2 }
 0x3bb   : > { %v12171_v13 = vpop.f32.mrf.mxu2 }
 0x3bd   : > { %v4933_v7 = vpop.f32.mrf.mxu0 }
 0x3be   : > { %v4979_v21 = vadd.f32 %v4933_v7, %v4554_v25 }
 0x3c0   : > { %v12161_v46 = vpop.f32.mrf.mxu3  ;;  %v9061_v19 = vpack.c.bf16 %v4979_v21, %v4978_v0  ;;  %v5074_v11 = vadd.f32 %v5073_v63, %v4979_v21  ;;  %v5113_v29 = vmul.f32 %v4979_v21, %v4979_v21  ;;  %v12587_v63 = vld [vmem:[#allocation25_spill] sm:$0xff] }
 0x3c1   : > { %v3138_v16 = vadd.f32 %v12588_v52, %v12587_v63 }
 0x3c2   : > { %v12163_v40 = vpop.f32.mrf.mxu1  ;;  %9093 = vst [vmem:[%s11599_s16 + $0x58] sm:$0xff] %v9061_v19   ;;  %v5144_v42 = vadd.f32 %v5143_v44, %v5113_v29 }
 0x3c3   : > { %v12179_v9 = vpop.f32.mrf.mxu2  ;;  %v3563_v25 = vadd.f32 %v11769_v43, %v3138_v16  ;;  %v12589_v43 = vld [vmem:[#allocation20_spill] sm:$0xff]  ;;  %v12592_v16 = vld [vmem:[#allocation19_spill] sm:$0xff] }
 0x3c5   : > { %v4936_v3 = vpop.f32.mrf.mxu0 }
 0x3c6   : > { %v4980_v15 = vadd.f32 %v4936_v3, %v4555_v34  ;;  %v6695_v34 = vadd.f32 %v12118_v62, %v12076_v4  ;;  %v4559_v4 = vadd.f32 %v11847_v56, %v11841_v59  ;;  %v6696_v62 = vadd.f32 %v12134_v35, %v12089_v39  ;;  %v12219_v59 = vld [vmem:[%s12291_s3] ss:$0 sm:$0xff] }
 0x3c7   : > { %v12593_v39 = vld [vmem:[#allocation27_spill] sm:$0xff]  ;;  %v6697_v35 = vadd.f32 %v12139_v37, %v12098_v33 }
 0x3c8   : > { %v5075_v12 = vadd.f32 %v5074_v11, %v4980_v15  ;;  %v5114_v51 = vmul.f32 %v4980_v15, %v4980_v15  ;;  %v12176_v1 = vpop.f32.mrf.mxu3  ;;  %v3877_v11 = vadd.f32 %v11783_v30, %v3563_v25  ;;  %v6940_v45 = vadd.f32 %v12110_v23, %v6695_v34 }
 0x3c9   : > { %v6942_v33 = vadd.f32 %v12143_v20, %v6697_v35 }
 0x3ca   : > { %v12174_v24 = vpop.f32.mrf.mxu1  ;;  %v5145_v60 = vadd.f32 %v5144_v42, %v5114_v51  ;;  %v4558_v41 = vadd.f32 %v12589_v43, %v3877_v11  ;;  %v12590_v51 = vld [vmem:[#allocation26_spill] sm:$0xff]  ;;  %v7113_v23 = vadd.f32 %v12112_v36, %v6940_v45 }
 0x3cd   : > { %v4938_v6 = vpop.f32.mrf.mxu0 }
 0x3ce   : > { %v4981_v14 = vadd.f32 %v4938_v6, %v4556_v54 }
 0x3d0   : > { %v9066_v31 = vpack.c.bf16 %v4981_v14, %v4980_v15  ;;  %v5076_v17 = vadd.f32 %v5075_v12, %v4981_v14  ;;  %v5115_v0 = vmul.f32 %v4981_v14, %v4981_v14 }
 0x3d2   : > { %v12181_v28 = vpop.f32.mrf.mxu1  ;;  %9094 = vst [vmem:[%s11599_s16 + $0x60] sm:$0xff] %v9066_v31   ;;  %v5146_v44 = vadd.f32 %v5145_v60, %v5115_v0  ;;  %v12591_v60 = vld [vmem:[#allocation16_spill] sm:$0xff] }
 0x3d3   : > { %v3140_v54 = vadd.f32 %v12591_v60, %v12590_v51  ;;  %v12596_v60 = vld [vmem:[#allocation21_spill] sm:$0xff] }
 0x3d5   : > { %v4941_v21 = vpop.f32.mrf.mxu0  ;;  %v3565_v31 = vadd.f32 %v11857_v61, %v3140_v54 }
 0x3d6   : > { %v12187_v7 = vpop.f32.mrf.mxu3  ;;  %v4982_v19 = vadd.f32 %v4941_v21, %v4557_v58  ;;  %v6941_v21 = vadd.f32 %v12128_v26, %v6696_v62  ;;  %v6698_v62 = vadd.f32 %v12154_v48, %v12107_v27 }
 0x3d8   : > { %v5077_v29 = vadd.f32 %v5076_v17, %v4982_v19  ;;  %v5116_v57 = vmul.f32 %v4982_v19, %v4982_v19  ;;  %v7114_v26 = vadd.f32 %v12126_v50, %v6941_v21  ;;  %v12595_v50 = vld [vmem:[#allocation6_spill] sm:$0xff] }
 0x3da   : > { %v12192_v32 = vpop.f32.mrf.mxu1  ;;  %v5147_v42 = vadd.f32 %v5146_v44, %v5116_v57  ;;  %v3879_v44 = vadd.f32 %v12592_v16, %v3565_v31  ;;  %v12597_v31 = vld [vmem:[#allocation32_spill] sm:$0xff] }
 0x3dc   : > { %v4560_v36 = vadd.f32 %v12593_v39, %v3879_v44  ;;  %v12599_v44 = vld [vmem:[#allocation31_spill] sm:$0xff]  ;;  %v6699_v39 = vadd.f32 %v12163_v40, %v12116_v5 }
 0x3dd   : > { %v12194_v49 = vpop.f32.mrf.mxu2  ;;  %v4943_v10 = vpop.f32.mrf.mxu0 }
 0x3de   : > { %v12196_v22 = vpop.f32.mrf.mxu3  ;;  %v4983_v2 = vadd.f32 %v4943_v10, %v4558_v41 }
 0x3e0   : > { %v9071_v3 = vpack.c.bf16 %v4983_v2, %v4982_v19  ;;  %v5078_v15 = vadd.f32 %v5077_v29, %v4983_v2  ;;  %v5117_v30 = vmul.f32 %v4983_v2, %v4983_v2 }
 0x3e2   : > { %v7227_v12 = vpop.f32.mrf.mxu1  ;;  %9095 = vst [vmem:[%s11599_s16 + $0x68] sm:$0xff] %v9071_v3   ;;  %v5148_v14 = vadd.f32 %v5147_v42, %v5117_v30 }
 0x3e3   : > { %v7247_v52 = vadd.f32 %v7227_v12, %v7113_v23  ;;  %v7115_v23 = vadd.f32 %v12137_v8, %v6942_v33 }
 0x3e5   : > { %v12204_v6 = vpop.f32.mrf.mxu2  ;;  %v4946_v0 = vpop.f32.mrf.mxu0 }
 0x3e6   : > { %v7645_v17 = vpop.f32.mrf.mxu3  ;;  %v4984_v63 = vadd.f32 %v4946_v0, %v4559_v4 }
 0x3e8   : > { %v5079_v25 = vadd.f32 %v5078_v15, %v4984_v63  ;;  %v5118_v58 = vmul.f32 %v4984_v63, %v4984_v63  ;;  %v12594_v15 = vld [vmem:[#allocation28_spill] sm:$0xff] }
 0x3e9   : > { %v3142_v30 = vadd.f32 %v12595_v50, %v12594_v15  ;;  %v6700_v15 = vadd.f32 %v12174_v24, %v12132_v53 }
 0x3ea   : > { %v7229_v19 = vpop.f32.mrf.mxu1  ;;  %v5149_v11 = vadd.f32 %v5148_v14, %v5118_v58 }
 0x3eb   : > { %v7248_v34 = vadd.f32 %v7229_v19, %v7114_v26  ;;  %v3567_v54 = vadd.f32 %v12596_v60, %v3142_v30  ;;  %v6943_v19 = vadd.f32 %v12156_v47, %v6698_v62 }
 0x3ed   : > { %v7472_v61 = vpop.f32.mrf.mxu2  ;;  %v4948_v42 = vpop.f32.mrf.mxu0  ;;  %v7116_v35 = vadd.f32 %v12152_v55, %v6943_v19 }
 0x3ee   : > { %v7492_v29 = vadd.f32 %v7472_v61, %v7247_v52  ;;  %v7647_v56 = vpop.f32.mrf.mxu3  ;;  %v4985_v43 = vadd.f32 %v4948_v42, %v4560_v36 }
 0x3f0   : > { %v7665_v57 = vadd.f32 %v7645_v17, %v7492_v29  ;;  %v9076_v10 = vpack.c.bf16 %v4985_v43, %v4984_v63  ;;  %v5080_v2 = vadd.f32 %v5079_v25, %v4985_v43  ;;  %v5119_v3 = vmul.f32 %v4985_v43, %v4985_v43  ;;  %v12598_v17 = vld [vmem:[#allocation5_spill] sm:$0xff] }
 0x3f1   : > { %v4561_v4 = vadd.f32 %v12598_v17, %v12597_v31  ;;  %v3881_v25 = vadd.f32 %v12599_v44, %v3567_v54  ;;  %v6945_v31 = vadd.f32 %v12179_v9, %v6700_v15 }
 0x3f2   : > { %v7677_v41 = vadd.f32 %v12219_v59, %v7665_v57  ;;  %v7232_v37 = vpop.f32.mrf.mxu1  ;;  %9096 = vst [vmem:[%s11599_s16 + $0x70] sm:$0xff] %v9076_v10   ;;  %v5150_v12 = vadd.f32 %v5149_v11, %v5119_v3  ;;  %v6944_v10 = vadd.f32 %v12171_v13, %v6699_v39 }
 0x3f3   : > { %v7249_v16 = vadd.f32 %v7232_v37, %v7115_v23  ;;  %v6701_v23 = vadd.f32 %v12181_v28, %v12149_v18  ;;  %v7118_v9 = vadd.f32 %v12176_v1, %v6945_v31 }
 0x3f4   : > { %7685 = vst [vmem:[%s12228_s11] sm:$0xff] %v7677_v41  ;;  %v7117_v30 = vadd.f32 %v12161_v46, %v6944_v10 }
 0x3f5   : > { %v7474_v45 = vpop.f32.mrf.mxu2  ;;  %v4951_v0 = vpop.f32.mrf.mxu0 }
 0x3f6   : > { %v7493_v51 = vadd.f32 %v7474_v45, %v7248_v34  ;;  %v7650_v14 = vpop.f32.mrf.mxu3  ;;  %v4986_v63 = vadd.f32 %v4951_v0, %v4561_v4 }
 0x3f8   : > { %v7666_v20 = vadd.f32 %v7647_v56, %v7493_v51  ;;  %v5081_v58 = vadd.f32 %v5080_v2, %v4986_v63  ;;  %v5120_v21 = vmul.f32 %v4986_v63, %v4986_v63  ;;  %v12600_v56 = vld [vmem:[#allocation34_spill] sm:$0xff] }
 0x3f9   : > { %v4562_v8 = vadd.f32 %v12600_v56, %v3881_v25  ;;  %v6946_v25 = vadd.f32 %v12194_v49, %v6701_v23 }
 0x3fa   : > { %v7678_v52 = vadd.f32 %v12219_v59, %v7666_v20  ;;  %v7234_v61 = vpop.f32.mrf.mxu1  ;;  %v5151_v29 = vadd.f32 %v5150_v12, %v5120_v21  ;;  %v6702_v21 = vadd.f32 %v12192_v32, %v12159_v38 }
 0x3fb   : > { %v7250_v42 = vadd.f32 %v7234_v61, %v7116_v35  ;;  %v7119_v1 = vadd.f32 %v12187_v7, %v6946_v25 }
 0x3fc   : > { %7686 = vst [vmem:[%s12228_s11 + $0x8] sm:$0xff] %v7678_v52 }
 0x3fd   : > { %v7477_v11 = vpop.f32.mrf.mxu2  ;;  %v4953_v57 = vpop.f32.mrf.mxu0 }
 0x3fe   : > { %v7494_v27 = vadd.f32 %v7477_v11, %v7249_v16  ;;  %v7652_v48 = vpop.f32.mrf.mxu3  ;;  %v4987_v26 = vadd.f32 %v4953_v57, %v4562_v8 }
 0x400   : > { %v7667_v36 = vadd.f32 %v7650_v14, %v7494_v27  ;;  %v9081_v43 = vpack.c.bf16 %v4987_v26, %v4986_v63  ;;  %v5082_v41 = vadd.f32 %v5081_v58, %v4987_v26  ;;  %v5121_v34 = vmul.f32 %v4987_v26, %v4987_v26 }
 0x402   : > { %v7679_v47 = vadd.f32 %v12219_v59, %v7667_v36  ;;  %v7237_v2 = vpop.f32.mrf.mxu1  ;;  %9097 = vst [vmem:[%s11599_s16 + $0x78] sm:$0xff] %v9081_v43   ;;  %v5083_v33 = vrot.slane %v5082_v41, 4  ;;  %v5152_v5 = vadd.f32 %v5151_v29, %v5121_v34  ;;  %v6947_v29 = vadd.f32 %v12204_v6, %v6702_v21 }
 0x403   : > { %v7251_v60 = vadd.f32 %v7237_v2, %v7117_v30 }
 0x404   : > { %7687 = vst [vmem:[%s12228_s11 + $0x10] sm:$0xff] %v7679_v47  ;;  %v5084_v37 = vadd.f32 %v5083_v33, %v5082_v41  ;;  %v5153_v55 = vrot.slane %v5152_v5, 4  ;;  %v7120_v39 = vadd.f32 %v12196_v22, %v6947_v29 }
 0x405   : > { %v7479_v3 = vpop.f32.mrf.mxu2 }
 0x406   : > { %v7495_v40 = vadd.f32 %v7479_v3, %v7250_v42  ;;  %v7655_v45 = vpop.f32.mrf.mxu3  ;;  %v5085_v12 = vrot.slane %v5084_v37, 2  ;;  %v5154_v13 = vadd.f32 %v5153_v55, %v5152_v5 }
 0x408   : > { %v7668_v50 = vadd.f32 %v7652_v48, %v7495_v40  ;;  %v5086_v54 = vadd.f32 %v5085_v12, %v5084_v37  ;;  %v5155_v14 = vrot.slane %v5154_v13, 2 }
 0x40a   : > { %v7680_v51 = vadd.f32 %v12219_v59, %v7668_v50  ;;  %v7239_v17 = vpop.f32.mrf.mxu1  ;;  %v5087_v62 = vrot.slane %v5086_v54, 1  ;;  %v5156_v53 = vadd.f32 %v5155_v14, %v5154_v13 }
 0x40b   : > { %v7252_v16 = vadd.f32 %v7239_v17, %v7118_v9 }
 0x40c   : > { %7688 = vst [vmem:[%s12228_s11 + $0x18] sm:$0xff] %v7680_v51  ;;  %v5088_v46 = vadd.f32 %v5087_v62, %v5086_v54  ;;  %v5157_v20 = vrot.slane %v5156_v53, 1 }
 0x40d   : > { %v7482_v4 = vpop.f32.mrf.mxu2 }
 0x40e   : > { %v7496_v24 = vadd.f32 %v7482_v4, %v7251_v60  ;;  %5089 = vst [vmem:[%s299_s13] sm:$0x1] %v5088_v46  ;;  %v5158_v63 = vadd.f32 %v5157_v20, %v5156_v53  ;;  %v7657_v44 = vpop.f32.mrf.mxu3 }
 0x410   : > { %v7669_v0 = vadd.f32 %v7655_v45, %v7496_v24  ;;  %5159 = vst [vmem:[%s302_s17] sm:$0x1] %v5158_v63 }
 0x412   : > { %v7681_v52 = vadd.f32 %v12219_v59, %v7669_v0  ;;  %v7242_v18 = vpop.f32.mrf.mxu1 }
 0x413   : > { %v7253_v11 = vadd.f32 %v7242_v18, %v7119_v1 }
 0x414   : > { %7689 = vst [vmem:[%s12228_s11 + $0x20] sm:$0xff] %v7681_v52 }
 0x415   : > { %v7484_v58 = vpop.f32.mrf.mxu2 }
 0x416   : > { %v7497_v28 = vadd.f32 %v7484_v58, %v7252_v16  ;;  %v7660_v27 = vpop.f32.mrf.mxu3 }
 0x418   : > { %v7670_v19 = vadd.f32 %v7657_v44, %v7497_v28 }
 0x41a   : > { %v7682_v61 = vadd.f32 %v12219_v59, %v7670_v19  ;;  %v7244_v56 = vpop.f32.mrf.mxu1 }
 0x41b   : > { %v7254_v38 = vadd.f32 %v7244_v56, %v7120_v39 }
 0x41c   : > { %7690 = vst [vmem:[%s12228_s11 + $0x28] sm:$0xff] %v7682_v61 }
 0x41d   : > { %v7487_v49 = vpop.f32.mrf.mxu2 }
 0x41e   : > { %v7498_v48 = vadd.f32 %v7487_v49, %v7253_v11  ;;  %v7662_v35 = vpop.f32.mrf.mxu3 }
 0x420   : > { %v7671_v8 = vadd.f32 %v7660_v27, %v7498_v48 }
 0x422   : > { %v7683_v36 = vadd.f32 %v12219_v59, %v7671_v8 }
 0x424   : > { %7691 = vst [vmem:[%s12228_s11 + $0x30] sm:$0xff] %v7683_v36 }
 0x425   : > { %v7489_v32 = vpop.f32.mrf.mxu2 }
 0x426   : > { %v7499_v7 = vadd.f32 %v7489_v32, %v7254_v38 }
 0x428   : > { %v7672_v57 = vadd.f32 %v7662_v35, %v7499_v7 }
 0x42a   : > { %v7684_v26 = vadd.f32 %v12219_v59, %v7672_v57 }
 0x42c   : > { %7692 = vst [vmem:[%s12228_s11 + $0x38] sm:$0xff] %v7684_v26 }
 0x42d PF: > { %s18_s24 = sadd.s32 1, %s9172_s24  }
 0x42e   : > { %p15_p4 = scmp.ge.s32.totalorder %s18_s24, 4  }
 0x430   :  { %17 = sbr.rel (!%p15_p4) target bundleno = 1 (0x1), region = 106 }

</bundles_post_ra>
